<compile_context>
chip_gen: v7x
topology: tpu7x:2x2x1
jax: 0.10.0
libtpu: 0.0.40
codegen_flags: <defaults>
</compile_context>

<pallas_src>
import collections
import functools
import math

import jax
import jax.numpy as jnp
import numpy as np
from jax import lax
from jax.experimental import pallas as pl
from jax.experimental.pallas import tpu as pltpu

AXL = collections.namedtuple("AXL", ["A", "X", "L"])
F32 = jnp.float32


# ----------------------------------------------------------------------------
# small helpers
# ----------------------------------------------------------------------------
def _rup(x, m):
    return ((x + m - 1) // m) * m


def _pad_to(a, shape):
    pads = [(0, t - s) for s, t in zip(a.shape, shape)]
    return jnp.pad(a, pads)


def _silu(v):
    return v * jax.nn.sigmoid(v)


def _pick_vmem_limit():
    """Per-generation scoped-VMEM limit: ~3/4 of physical, capped at 96 MiB."""
    try:
        info = pltpu.get_tpu_info()
        cap = int(getattr(info, "vmem_capacity_bytes", 0) or 0)
        if cap > 0:
            return int(min((cap * 3) // 4, 96 * 1024 * 1024))
    except Exception:
        pass
    return 64 * 1024 * 1024


_EGCL_WEIGHT_ORDER = (
    "mw0s", "mw0t", "mw0r", "mb0", "mwh", "mbh",
    "cw0", "cb0", "cwh", "cbh", "cwf",
    "nw0h", "nw0m", "nb0", "nwh", "nbh", "nwf", "nbf",
)


# ----------------------------------------------------------------------------
# Pallas kernel (one E_GCL layer, edge-tiled, optional fused embedding / cls)
# ----------------------------------------------------------------------------
def _make_egcl_kernel(*, has_emb, has_cls, n_mh, n_nh, n_ch,
                      edge_block, node_pad, compute_dtype):
    cdt = compute_dtype

    def kernel(*refs):
        it = iter(refs)
        # --- inputs (all constant-spec, resident in VMEM) -------------------
        row_e_ref = next(it)      # (Epad, 1) int32  target node i of each edge
        col_e_ref = next(it)      # (Epad, 1) int32  source node j of each edge
        row_l_ref = next(it)      # (1, Epad) int32  target i, lane-oriented
        h_in_ref = next(it)       # (Npad, Hin) f32 node features (raw if has_emb)
        coord_ref = next(it)      # (Npad, Dpad) f32
        inv_ref = next(it)        # (Npad, 1) f32   1/max(in_degree, 1)
        if has_emb:
            emb_w_ref = next(it)
            emb_b_ref = next(it)
        mw0s_ref = next(it); mw0t_ref = next(it); mw0r_ref = next(it); mb0_ref = next(it)
        mwh_ref = next(it); mbh_ref = next(it)
        cw0_ref = next(it); cb0_ref = next(it); cwh_ref = next(it); cbh_ref = next(it)
        cwf_ref = next(it)
        nw0h_ref = next(it); nw0m_ref = next(it); nb0_ref = next(it)
        nwh_ref = next(it); nbh_ref = next(it); nwf_ref = next(it); nbf_ref = next(it)
        if has_cls:
            cls_w_ref = next(it)
            cls_b_ref = next(it)
        # --- outputs --------------------------------------------------------
        h_out_ref = next(it)      # (Npad, HP) f32
        x_out_ref = next(it)      # (Npad, Dpad) f32
        if has_cls:
            logit_ref = next(it)  # (Npad, Cpad) f32
        # --- scratch (persists across edge blocks) --------------------------
        h_sc = next(it)           # (Npad, HP)  f32 : this layer's node features
        hs_sc = next(it)          # (Npad, HmP) cdt : h @ mw0s  (project-then-gather)
        ht_sc = next(it)          # (Npad, HmP) cdt : h @ mw0t
        msg_acc = next(it)        # (Npad, HmP) f32 : sum_j m_ij
        coord_acc = next(it)      # (Npad, Dpad) f32: sum_j (x_i - x_j) * phi_x(m_ij)

        k = pl.program_id(0)
        last = pl.num_programs(0) - 1

        # ---------- init: node-level projections + zero accumulators --------
        @pl.when(k == 0)
        def _init():
            if has_emb:
                h_sc[...] = (
                    jnp.dot(h_in_ref[...].astype(cdt), emb_w_ref[...],
                            preferred_element_type=F32) + emb_b_ref[...])
            else:
                h_sc[...] = h_in_ref[...]
            h_c = h_sc[...].astype(cdt)
            hs_sc[...] = jnp.dot(h_c, mw0s_ref[...],
                                 preferred_element_type=F32).astype(cdt)
            ht_sc[...] = jnp.dot(h_c, mw0t_ref[...],
                                 preferred_element_type=F32).astype(cdt)
            msg_acc[...] = jnp.zeros_like(msg_acc)
            coord_acc[...] = jnp.zeros_like(coord_acc)

        # ---------- per-edge-block work --------------------------------------
        # Slice this block's indices out of the resident full index arrays
        # (no per-step DMA; start is a known multiple of the lane-aligned tile).
        off = pl.multiple_of(k * edge_block, edge_block)
        row = row_e_ref[pl.ds(off, edge_block), :]        # (E_t, 1)
        col = col_e_ref[pl.ds(off, edge_block), :]        # (E_t, 1)
        row_l = row_l_ref[:, pl.ds(off, edge_block)]      # (1, E_t)

        # boolean one-hot masks built in-register; padded sentinel edges
        # (index == Npad, out of range) give all-zero rows/columns.
        node_ids = lax.broadcasted_iota(jnp.int32, (edge_block, node_pad), 1)
        row_mask = node_ids == row                        # (E_t, Npad) bool
        col_mask = node_ids == col
        node_ids_t = lax.broadcasted_iota(jnp.int32, (node_pad, edge_block), 0)
        rowT_mask = node_ids_t == row_l                   # (Npad, E_t) bool

        # one cast per consumer dtype (no f32 -> bf16 double casts)
        row_oh_c = row_mask.astype(cdt)
        col_oh_c = col_mask.astype(cdt)
        rowT_oh_c = rowT_mask.astype(cdt)
        if cdt == F32:
            diff_oh_f = row_oh_c - col_oh_c
            rowT_oh_f = rowT_oh_c
        else:
            diff_oh_f = row_mask.astype(F32) - col_mask.astype(F32)
            rowT_oh_f = rowT_mask.astype(F32)

        # fused coordinate gather+diff, kept entirely in f32 (equivariant path)
        coord_diff = jnp.dot(diff_oh_f, coord_ref[...],
                             preferred_element_type=F32)   # (E_t, Dpad)
        radial = jnp.sum(coord_diff * coord_diff, axis=-1, keepdims=True)

        # message MLP phi_e(h_i, h_j, ||x_i - x_j||^2): gather the projected
        # node features (lane-dense HmP-wide dots on the MXU).
        m = (jnp.dot(row_oh_c, hs_sc[...], preferred_element_type=F32)
             + jnp.dot(col_oh_c, ht_sc[...], preferred_element_type=F32)
             + radial * mw0r_ref[...]
             + mb0_ref[...])
        m = _silu(m)
        for i in range(n_mh):
            m = _silu(jnp.dot(m.astype(cdt), mwh_ref[i],
                              preferred_element_type=F32) + mbh_ref[i])

        # coordinate MLP phi_x(m)
        c = _silu(jnp.dot(m.astype(cdt), cw0_ref[...],
                          preferred_element_type=F32) + cb0_ref[...])
        for i in range(n_ch):
            c = _silu(jnp.dot(c.astype(cdt), cwh_ref[i],
                              preferred_element_type=F32) + cbh_ref[i])
        scale = jnp.sum(c * cwf_ref[...], axis=-1, keepdims=True)  # Linear(Hc,1,no bias)
        trans = coord_diff * scale                                  # f32 (E_t, Dpad)

        # scatter-add into node accumulators (padded sentinel edges have
        # all-zero mask columns and contribute 0)
        coord_acc[...] += jnp.dot(rowT_oh_f, trans, preferred_element_type=F32)
        msg_acc[...] += jnp.dot(rowT_oh_c, m.astype(cdt),
                                preferred_element_type=F32)

        # ---------- finalize: mean-aggregate, node MLP, residual --------------
        @pl.when(k == last)
        def _finalize():
            inv = inv_ref[...]
            h = h_sc[...]
            msg_mean = msg_acc[...] * inv          # message_agg='mean' (module default)
            n = (jnp.dot(h.astype(cdt), nw0h_ref[...], preferred_element_type=F32)
                 + jnp.dot(msg_mean.astype(cdt), nw0m_ref[...], preferred_element_type=F32)
                 + nb0_ref[...])
            n = _silu(n)
            for i in range(n_nh):
                n = _silu(jnp.dot(n.astype(cdt), nwh_ref[i],
                                  preferred_element_type=F32) + nbh_ref[i])
            n = jnp.dot(n.astype(cdt), nwf_ref[...],
                        preferred_element_type=F32) + nbf_ref[...]
            h_new = h + n                           # residual=True
            h_out_ref[...] = h_new
            x_out_ref[...] = coord_ref[...] + coord_acc[...] * inv   # coords_agg='mean'
            if has_cls:
                logit_ref[...] = (jnp.dot(h_new.astype(cdt), cls_w_ref[...],
                                          preferred_element_type=F32) + cls_b_ref[...])

    return kernel


# ----------------------------------------------------------------------------
# pallas_call plumbing for one layer
# ----------------------------------------------------------------------------
def _const_spec(shape):
    nd = len(shape)
    return pl.BlockSpec(shape, lambda k, _z=(0,) * nd: _z)


def _egcl_call(h, coord, row_e, col_e, row_l, inv_cnt, wp, *,
               emb=None, cls=None, edge_block, compute_dtype):
    Npad = h.shape[0]
    Dpad = coord.shape[1]
    Epad = row_e.shape[0]
    assert Epad % edge_block == 0
    grid = (Epad // edge_block,)

    HP = wp["mw0s"].shape[0]      # node feature width inside this layer
    HmP = wp["mw0s"].shape[1]
    HoP = wp["nwf"].shape[1]
    has_emb = emb is not None
    has_cls = cls is not None
    if has_emb:
        assert emb[0].shape[1] == HP
    else:
        assert h.shape[1] == HP

    inputs = [row_e, col_e, row_l, h, coord, inv_cnt]
    if has_emb:
        inputs += list(emb)
    inputs += [wp[k] for k in _EGCL_WEIGHT_ORDER]
    if has_cls:
        inputs += list(cls)

    # every input (indices, features, coords, weights) is a constant full-array
    # block: loaded to VMEM once, no per-grid-step DMAs.
    in_specs = [_const_spec(a.shape) for a in inputs]

    out_shape = [jax.ShapeDtypeStruct((Npad, HoP), F32),
                 jax.ShapeDtypeStruct((Npad, Dpad), F32)]
    if has_cls:
        out_shape.append(jax.ShapeDtypeStruct((Npad, cls[0].shape[1]), F32))
    out_specs = tuple(_const_spec(s.shape) for s in out_shape)

    scratch_shapes = [
        pltpu.VMEM((Npad, HP), F32),            # h_sc
        pltpu.VMEM((Npad, HmP), compute_dtype),  # hs_sc
        pltpu.VMEM((Npad, HmP), compute_dtype),  # ht_sc
        pltpu.VMEM((Npad, HmP), F32),            # msg_acc
        pltpu.VMEM((Npad, Dpad), F32),           # coord_acc
    ]

    kernel = _make_egcl_kernel(
        has_emb=has_emb, has_cls=has_cls,
        n_mh=wp["mwh"].shape[0], n_nh=wp["nwh"].shape[0], n_ch=wp["cwh"].shape[0],
        edge_block=edge_block, node_pad=Npad, compute_dtype=compute_dtype)

    return pl.pallas_call(
        kernel,
        grid=grid,
        in_specs=in_specs,
        out_specs=out_specs,
        out_shape=tuple(out_shape),
        scratch_shapes=scratch_shapes,
        compiler_params=pltpu.CompilerParams(
            # edge axis is a reduction into node accumulators -> arbitrary
            dimension_semantics=("arbitrary",),
            # per-generation budget: ~48 MiB on v7x, up to 96 MiB on v5e/v6e
            vmem_limit_bytes=_pick_vmem_limit(),
        ),
    )(*inputs)


# ----------------------------------------------------------------------------
# parameter padding / casting (zero padding preserves the math exactly)
# ----------------------------------------------------------------------------
def _prepare_params(params, use_bf16):
    cdt = jnp.bfloat16 if use_bf16 else F32
    in_p = _rup(params["emb_w"].shape[0], 128)
    hn_p = _rup(params["emb_w"].shape[1], 128)
    c_p = _rup(params["cls_w"].shape[1], 128)
    out = {
        "emb_w": _pad_to(params["emb_w"], (in_p, hn_p)).astype(cdt),
        "emb_b": _pad_to(params["emb_b"], (1, hn_p)).astype(F32),
        "cls_w": _pad_to(params["cls_w"], (hn_p, c_p)).astype(cdt),
        "cls_b": _pad_to(params["cls_b"], (1, c_p)).astype(F32),
        "layers": [],
    }
    for lp in params["layers"]:
        H, Hm = lp["mw0s"].shape
        Hc = lp["cw0"].shape[1]
        Hn = lp["nw0h"].shape[1]
        Ho = lp["nwf"].shape[1]
        HP, HmP, HcP, HnP, HoP = (_rup(v, 128) for v in (H, Hm, Hc, Hn, Ho))
        n_mh, n_ch, n_nh = lp["mwh"].shape[0], lp["cwh"].shape[0], lp["nwh"].shape[0]
        out["layers"].append({
            "mw0s": _pad_to(lp["mw0s"], (HP, HmP)).astype(cdt),
            "mw0t": _pad_to(lp["mw0t"], (HP, HmP)).astype(cdt),
            "mw0r": _pad_to(lp["mw0r"], (1, HmP)).astype(F32),
            "mb0": _pad_to(lp["mb0"], (1, HmP)).astype(F32),
            "mwh": _pad_to(lp["mwh"], (n_mh, HmP, HmP)).astype(cdt),
            "mbh": _pad_to(lp["mbh"], (n_mh, 1, HmP)).astype(F32),
            "cw0": _pad_to(lp["cw0"], (HmP, HcP)).astype(cdt),
            "cb0": _pad_to(lp["cb0"], (1, HcP)).astype(F32),
            "cwh": _pad_to(lp["cwh"], (n_ch, HcP, HcP)).astype(cdt),
            "cbh": _pad_to(lp["cbh"], (n_ch, 1, HcP)).astype(F32),
            "cwf": _pad_to(lp["cwf"], (1, HcP)).astype(F32),
            "nw0h": _pad_to(lp["nw0h"], (HP, HnP)).astype(cdt),
            "nw0m": _pad_to(lp["nw0m"], (HmP, HnP)).astype(cdt),
            "nb0": _pad_to(lp["nb0"], (1, HnP)).astype(F32),
            "nwh": _pad_to(lp["nwh"], (n_nh, HnP, HnP)).astype(cdt),
            "nbh": _pad_to(lp["nbh"], (n_nh, 1, HnP)).astype(F32),
            "nwf": _pad_to(lp["nwf"], (HnP, HoP)).astype(cdt),
            "nbf": _pad_to(lp["nbf"], (1, HoP)).astype(F32),
        })
    return out


# ----------------------------------------------------------------------------
# full EGNN forward
# ----------------------------------------------------------------------------
def egnn_forward(params, h, edges, x, *, use_bf16=True, edge_block=512):
    """EGNN forward.  h: (N, input_size), edges: (E, 2) int32 [target, source], x: (N, D)."""
    assert edge_block % 128 == 0, "edge tile must be lane-aligned (multiple of 128)"
    N, in_dim = h.shape
    D = x.shape[1]
    E = edges.shape[0]

    Npad = _rup(max(N, 8), 8)
    Dpad = max(D, 8)              # small lane pad only (not 128) — exact zero padding
    InP = _rup(in_dim, 128)
    Epad = _rup(max(E, edge_block), edge_block)

    # Padded-edge sentinel index == Npad must never be a legal node id.
    # Npad >= N always holds, so node ids (0..N-1) never reach the sentinel.
    assert Npad >= N

    cdt = jnp.bfloat16 if use_bf16 else F32
    pp = _prepare_params(params, use_bf16)

    row = edges[:, 0].astype(jnp.int32)
    col = edges[:, 1].astype(jnp.int32)
    # padded edges get an out-of-range sentinel -> all-zero one-hot rows in the
    # kernel -> they contribute nothing to any aggregation.
    row_p = jnp.full((Epad,), jnp.int32(Npad)).at[:E].set(row)
    col_p = jnp.full((Epad,), jnp.int32(Npad)).at[:E].set(col)
    row_e = row_p.reshape(Epad, 1)
    col_e = col_p.reshape(Epad, 1)
    row_l = row_p.reshape(1, Epad)

    # per-node in-degree is layer-invariant: computed once here, not in-kernel
    deg = jnp.zeros((Npad,), F32).at[row].add(1.0)
    inv_cnt = (1.0 / jnp.maximum(deg, 1.0)).reshape(Npad, 1)

    h_pad = _pad_to(h.astype(F32), (Npad, InP))
    x_pad = _pad_to(x.astype(F32), (Npad, Dpad))

    n_layers = len(pp["layers"])
    logits = None
    for li, wp in enumerate(pp["layers"]):
        has_emb = li == 0
        has_cls = li == n_layers - 1
        res = _egcl_call(
            h_pad, x_pad, row_e, col_e, row_l, inv_cnt, wp,
            emb=(pp["emb_w"], pp["emb_b"]) if has_emb else None,
            cls=(pp["cls_w"], pp["cls_b"]) if has_cls else None,
            edge_block=edge_block, compute_dtype=cdt)
        h_pad, x_pad = res[0], res[1]
        if has_cls:
            logits = res[2]

    num_classes = params["cls_w"].shape[1]
    A = logits[:N, :num_classes]
    X = x_pad[:N, :D]
    return AXL(A=A, X=X, L=jnp.zeros_like(X))


# ----------------------------------------------------------------------------
# Pure-JAX f32 reference (exact module math) for correctness checks
# ----------------------------------------------------------------------------
def _segment_mean(data, seg, num):
    s = jnp.zeros((num, data.shape[1]), data.dtype).at[seg].add(data)
    cnt = jnp.zeros((num, 1), data.dtype).at[seg].add(1.0)
    return s / jnp.maximum(cnt, 1.0)


def _egcl_ref(h, coord, row, col, p):
    h_row, h_col = h[row], h[col]
    coord_diff = coord[row] - coord[col]
    radial = jnp.sum(coord_diff ** 2, -1, keepdims=True)
    m = jax.nn.silu(h_row @ p["mw0s"] + h_col @ p["mw0t"] + radial * p["mw0r"] + p["mb0"])
    for k in range(p["mwh"].shape[0]):
        m = jax.nn.silu(m @ p["mwh"][k] + p["mbh"][k])
    c = jax.nn.silu(m @ p["cw0"] + p["cb0"])
    for k in range(p["cwh"].shape[0]):
        c = jax.nn.silu(c @ p["cwh"][k] + p["cbh"][k])
    scale = jnp.sum(c * p["cwf"], -1, keepdims=True)
    N = h.shape[0]
    coord_new = coord + _segment_mean(coord_diff * scale, row, N)
    msg_agg = _segment_mean(m, row, N)
    n = jax.nn.silu(h @ p["nw0h"] + msg_agg @ p["nw0m"] + p["nb0"])
    for k in range(p["nwh"].shape[0]):
        n = jax.nn.silu(n @ p["nwh"][k] + p["nbh"][k])
    return h + (n @ p["nwf"] + p["nbf"]), coord_new


def egnn_ref(params, h, edges, x):
    row, col = edges[:, 0], edges[:, 1]
    h = h @ params["emb_w"] + params["emb_b"]
    for lp in params["layers"]:
        h, x = _egcl_ref(h, x, row, col, lp)
    logits = h @ params["cls_w"] + params["cls_b"]
    return AXL(A=logits, X=x, L=jnp.zeros_like(x))


# ----------------------------------------------------------------------------
# deterministic synthetic parameter init (nn.Linear-style uniform bounds)
# ----------------------------------------------------------------------------
def _lin(key, fan_in, fan_out, bound_in=None, bias=True):
    bound = 1.0 / math.sqrt(bound_in if bound_in is not None else fan_in)
    kw, kb = jax.random.split(key)
    w = jax.random.uniform(kw, (fan_in, fan_out), F32, -bound, bound)
    if not bias:
        return w
    b = jax.random.uniform(kb, (1, fan_out), F32, -bound, bound)
    return w, b


def _stack(key, n, fan_in, fan_out):
    ws, bs = [], []
    for k in jax.random.split(key, n):
        w, b = _lin(k, fan_in, fan_out)
        ws.append(w)
        bs.append(b)
    return jnp.stack(ws), jnp.stack(bs)


def init_egcl_params(key, H, Hm, Hn, Hc, n_mh, n_nh, n_ch):
    ks = jax.random.split(key, 12)
    msg_in = 2 * H + 1
    mw0s = _lin(ks[0], H, Hm, bound_in=msg_in, bias=False)
    mw0t = _lin(ks[1], H, Hm, bound_in=msg_in, bias=False)
    mw0r, mb0 = _lin(ks[2], 1, Hm, bound_in=msg_in)
    mwh, mbh = _stack(ks[3], n_mh, Hm, Hm)
    cw0, cb0 = _lin(ks[4], Hm, Hc)
    cwh, cbh = _stack(ks[5], n_ch, Hc, Hc)
    cwf = _lin(ks[6], 1, Hc, bound_in=Hc, bias=False)   # final Linear(Hc, 1, bias=False)
    node_in = H + Hm
    nw0h = _lin(ks[7], H, Hn, bound_in=node_in, bias=False)
    nw0m, nb0 = _lin(ks[8], Hm, Hn, bound_in=node_in)
    nwh, nbh = _stack(ks[9], n_nh, Hn, Hn)
    nwf, nbf = _lin(ks[10], Hn, H)
    return dict(mw0s=mw0s, mw0t=mw0t, mw0r=mw0r, mb0=mb0, mwh=mwh, mbh=mbh,
                cw0=cw0, cb0=cb0, cwh=cwh, cbh=cbh, cwf=cwf,
                nw0h=nw0h, nw0m=nw0m, nb0=nb0, nwh=nwh, nbh=nbh, nwf=nwf, nbf=nbf)


def init_egnn_params(key, input_size, num_classes, Hm, Hn, Hc,
                     n_mh, n_nh, n_ch, n_layers):
    keys = jax.random.split(key, n_layers + 2)
    emb_w, emb_b = _lin(keys[0], input_size, Hn)
    layers = [init_egcl_params(keys[1 + i], Hn, Hm, Hn, Hc, n_mh, n_nh, n_ch)
              for i in range(n_layers)]
    cls_w, cls_b = _lin(keys[-1], Hn, num_classes)
    return dict(emb_w=emb_w, emb_b=emb_b, layers=layers, cls_w=cls_w, cls_b=cls_b)


# ----------------------------------------------------------------------------
if __name__ == "__main__":
    key = jax.random.PRNGKey(0)
    k_param, k_h, k_x = jax.random.split(key, 3)

    # small shapes consistent with the module
    N, D = 16, 3                 # nodes, spatial dimension
    input_size = 4               # node input features
    num_classes = 5              # atomic species + MASK
    Hm = Hn = Hc = 32            # MLP hidden sizes
    n_mh = n_nh = n_ch = 1       # hidden layers per MLP
    n_layers = 2                 # E_GCL layers

    # fully connected graph w/o self-loops: edges[:, 0]=target i, [:, 1]=source j
    edge_list = [(i, j) for i in range(N) for j in range(N) if i != j]
    edges = jnp.asarray(edge_list, dtype=jnp.int32)          # (E, 2), E = 240

    h0 = jax.random.normal(k_h, (N, input_size), F32)
    x0 = jax.random.normal(k_x, (N, D), F32)

    params = init_egnn_params(k_param, input_size, num_classes,
                              Hm, Hn, Hc, n_mh, n_nh, n_ch, n_layers)

    ref = egnn_ref(params, h0, edges, x0)

    # --- f32 mode, small edge tile: multi-block accumulation + tight numerics -
    fwd_f32 = jax.jit(functools.partial(egnn_forward, use_bf16=False, edge_block=128))
    out32 = fwd_f32(params, h0, edges, x0)
    jax.block_until_ready(out32.A)
    np.testing.assert_allclose(np.asarray(out32.A), np.asarray(ref.A), rtol=1e-3, atol=1e-3)
    np.testing.assert_allclose(np.asarray(out32.X), np.asarray(ref.X), rtol=1e-3, atol=1e-3)

    # --- bf16 fast path with the default (large) edge tile ---------------------
    fwd_bf16 = jax.jit(functools.partial(egnn_forward, use_bf16=True))   # edge_block=512
    out = fwd_bf16(params, h0, edges, x0)
    jax.block_until_ready(out.A)
    jax.block_until_ready(out.X)
    jax.block_until_ready(out.L)
    np.testing.assert_allclose(np.asarray(out.A), np.asarray(ref.A), rtol=5e-2, atol=5e-2)
    np.testing.assert_allclose(np.asarray(out.X), np.asarray(ref.X), rtol=5e-2, atol=5e-2)

    assert out.A.shape == (N, num_classes)
    assert out.X.shape == (N, D)
    assert out.L.shape == (N, D)

    print("KERNEL_OK")
</pallas_src>

<mosaic_0001>
module attributes {stable_mosaic.version = 11 : i64} {
  func.func private @main(%arg0: i32) attributes {dimension_semantics = [#tpu.dimension_semantics<core_parallel>], iteration_bounds = array<i64: 2>, tpu.core_type = #tpu.core_type<sc_scalar_subcore>, window_params = []} {
    return
  }
}

module attributes {stable_mosaic.version = 11 : i64} {
  func.func private @main(%arg0: i32) attributes {dimension_semantics = [#tpu.dimension_semantics<core_parallel>], iteration_bounds = array<i64: 2>, tpu.core_type = #tpu.core_type<sc_scalar_subcore>, window_params = []} {
    return
  }
}

module attributes {stable_mosaic.version = 11 : i64} {
  func.func @kernel(%arg0: i32, %arg1: memref<256x1xi32, #tpu.memory_space<vmem>>, %arg2: memref<256x1xi32, #tpu.memory_space<vmem>>, %arg3: memref<1x256xi32, #tpu.memory_space<vmem>>, %arg4: memref<16x128xf32, #tpu.memory_space<vmem>>, %arg5: memref<16x8xf32, #tpu.memory_space<vmem>>, %arg6: memref<16x1xf32, #tpu.memory_space<vmem>>, %arg7: memref<128x128xf32, #tpu.memory_space<vmem>>, %arg8: memref<1x128xf32, #tpu.memory_space<vmem>>, %arg9: memref<128x128xf32, #tpu.memory_space<vmem>>, %arg10: memref<128x128xf32, #tpu.memory_space<vmem>>, %arg11: memref<1x128xf32, #tpu.memory_space<vmem>>, %arg12: memref<1x128xf32, #tpu.memory_space<vmem>>, %arg13: memref<1x128x128xf32, #tpu.memory_space<vmem>>, %arg14: memref<1x1x128xf32, #tpu.memory_space<vmem>>, %arg15: memref<128x128xf32, #tpu.memory_space<vmem>>, %arg16: memref<1x128xf32, #tpu.memory_space<vmem>>, %arg17: memref<1x128x128xf32, #tpu.memory_space<vmem>>, %arg18: memref<1x1x128xf32, #tpu.memory_space<vmem>>, %arg19: memref<1x128xf32, #tpu.memory_space<vmem>>, %arg20: memref<128x128xf32, #tpu.memory_space<vmem>>, %arg21: memref<128x128xf32, #tpu.memory_space<vmem>>, %arg22: memref<1x128xf32, #tpu.memory_space<vmem>>, %arg23: memref<1x128x128xf32, #tpu.memory_space<vmem>>, %arg24: memref<1x1x128xf32, #tpu.memory_space<vmem>>, %arg25: memref<128x128xf32, #tpu.memory_space<vmem>>, %arg26: memref<1x128xf32, #tpu.memory_space<vmem>>, %arg27: memref<16x128xf32, #tpu.memory_space<vmem>>, %arg28: memref<16x8xf32, #tpu.memory_space<vmem>>, %arg29: memref<16x128xf32, #tpu.memory_space<vmem>>, %arg30: memref<16x128xf32, #tpu.memory_space<vmem>>, %arg31: memref<16x128xf32, #tpu.memory_space<vmem>>, %arg32: memref<16x128xf32, #tpu.memory_space<vmem>>, %arg33: memref<16x8xf32, #tpu.memory_space<vmem>>) attributes {dimension_semantics = [#tpu.dimension_semantics<arbitrary>], iteration_bounds = array<i64: 2>, scalar_prefetch = 0 : i64, scratch_operands = 5 : i64, tpu.core_type = #tpu.core_type<tc>, window_params = [{pipeline_mode = #tpu.pipeline_mode<synchronous>, transform_indices = @transform_0, window_bounds = array<i64: 256, 1>}, {pipeline_mode = #tpu.pipeline_mode<synchronous>, transform_indices = @transform_1, window_bounds = array<i64: 256, 1>}, {pipeline_mode = #tpu.pipeline_mode<synchronous>, transform_indices = @transform_2, window_bounds = array<i64: 1, 256>}, {pipeline_mode = #tpu.pipeline_mode<synchronous>, transform_indices = @transform_3, window_bounds = array<i64: 16, 128>}, {pipeline_mode = #tpu.pipeline_mode<synchronous>, transform_indices = @transform_4, window_bounds = array<i64: 16, 8>}, {pipeline_mode = #tpu.pipeline_mode<synchronous>, transform_indices = @transform_5, window_bounds = array<i64: 16, 1>}, {pipeline_mode = #tpu.pipeline_mode<synchronous>, transform_indices = @transform_6, window_bounds = array<i64: 128, 128>}, {pipeline_mode = #tpu.pipeline_mode<synchronous>, transform_indices = @transform_7, window_bounds = array<i64: 1, 128>}, {pipeline_mode = #tpu.pipeline_mode<synchronous>, transform_indices = @transform_8, window_bounds = array<i64: 128, 128>}, {pipeline_mode = #tpu.pipeline_mode<synchronous>, transform_indices = @transform_9, window_bounds = array<i64: 128, 128>}, {pipeline_mode = #tpu.pipeline_mode<synchronous>, transform_indices = @transform_10, window_bounds = array<i64: 1, 128>}, {pipeline_mode = #tpu.pipeline_mode<synchronous>, transform_indices = @transform_11, window_bounds = array<i64: 1, 128>}, {pipeline_mode = #tpu.pipeline_mode<synchronous>, transform_indices = @transform_12, window_bounds = array<i64: 1, 128, 128>}, {pipeline_mode = #tpu.pipeline_mode<synchronous>, transform_indices = @transform_13, window_bounds = array<i64: 1, 1, 128>}, {pipeline_mode = #tpu.pipeline_mode<synchronous>, transform_indices = @transform_14, window_bounds = array<i64: 128, 128>}, {pipeline_mode = #tpu.pipeline_mode<synchronous>, transform_indices = @transform_15, window_bounds = array<i64: 1, 128>}, {pipeline_mode = #tpu.pipeline_mode<synchronous>, transform_indices = @transform_16, window_bounds = array<i64: 1, 128, 128>}, {pipeline_mode = #tpu.pipeline_mode<synchronous>, transform_indices = @transform_17, window_bounds = array<i64: 1, 1, 128>}, {pipeline_mode = #tpu.pipeline_mode<synchronous>, transform_indices = @transform_18, window_bounds = array<i64: 1, 128>}, {pipeline_mode = #tpu.pipeline_mode<synchronous>, transform_indices = @transform_19, window_bounds = array<i64: 128, 128>}, {pipeline_mode = #tpu.pipeline_mode<synchronous>, transform_indices = @transform_20, window_bounds = array<i64: 128, 128>}, {pipeline_mode = #tpu.pipeline_mode<synchronous>, transform_indices = @transform_21, window_bounds = array<i64: 1, 128>}, {pipeline_mode = #tpu.pipeline_mode<synchronous>, transform_indices = @transform_22, window_bounds = array<i64: 1, 128, 128>}, {pipeline_mode = #tpu.pipeline_mode<synchronous>, transform_indices = @transform_23, window_bounds = array<i64: 1, 1, 128>}, {pipeline_mode = #tpu.pipeline_mode<synchronous>, transform_indices = @transform_24, window_bounds = array<i64: 128, 128>}, {pipeline_mode = #tpu.pipeline_mode<synchronous>, transform_indices = @transform_25, window_bounds = array<i64: 1, 128>}, {pipeline_mode = #tpu.pipeline_mode<synchronous>, transform_indices = @transform_26, window_bounds = array<i64: 16, 128>}, {pipeline_mode = #tpu.pipeline_mode<synchronous>, transform_indices = @transform_27, window_bounds = array<i64: 16, 8>}]} {
    %c0_i32 = arith.constant 0 : i32
    %0 = arith.cmpi eq, %arg0, %c0_i32 : i32
    %1 = arith.extui %0 : i1 to i32
    %c0_i32_0 = arith.constant 0 : i32
    %2 = arith.cmpi ne, %1, %c0_i32_0 : i32
    scf.if %2 {
      %c0_53 = arith.constant 0 : index
      %c0_54 = arith.constant 0 : index
      %105 = vector.load %arg4[%c0_53, %c0_54] : memref<16x128xf32, #tpu.memory_space<vmem>>, vector<16x128xf32>
      %c0_55 = arith.constant 0 : index
      %c0_56 = arith.constant 0 : index
      %106 = vector.load %arg7[%c0_55, %c0_56] : memref<128x128xf32, #tpu.memory_space<vmem>>, vector<128x128xf32>
      %cst_57 = arith.constant dense<0.000000e+00> : vector<16x128xf32>
      %107 = tpu.matmul %105, %106, %cst_57 {dimension_numbers = #tpu.dot_dimension_numbers<[1], [0], [0], [1], [0, 0, 1, 1], [], []>} : vector<16x128xf32>, vector<128x128xf32>, vector<16x128xf32> -> vector<16x128xf32>
      %c0_58 = arith.constant 0 : index
      %c0_59 = arith.constant 0 : index
      %108 = vector.load %arg8[%c0_58, %c0_59] : memref<1x128xf32, #tpu.memory_space<vmem>>, vector<1x128xf32>
      %109 = vector.broadcast %108 : vector<1x128xf32> to vector<16x128xf32>
      %110 = arith.addf %107, %109 : vector<16x128xf32>
      %c0_60 = arith.constant 0 : index
      %c0_61 = arith.constant 0 : index
      %111 = vector.load %arg29[%c0_60, %c0_61] : memref<16x128xf32, #tpu.memory_space<vmem>>, vector<16x128xf32>
      tpu.vector_store %arg29[%c0_60, %c0_61], %110 {strides = array<i32>} : memref<16x128xf32, #tpu.memory_space<vmem>>, vector<16x128xf32>,
      %c0_62 = arith.constant 0 : index
      %c0_63 = arith.constant 0 : index
      %112 = vector.load %arg29[%c0_62, %c0_63] : memref<16x128xf32, #tpu.memory_space<vmem>>, vector<16x128xf32>
      %c0_64 = arith.constant 0 : index
      %c0_65 = arith.constant 0 : index
      %113 = vector.load %arg9[%c0_64, %c0_65] : memref<128x128xf32, #tpu.memory_space<vmem>>, vector<128x128xf32>
      %cst_66 = arith.constant dense<0.000000e+00> : vector<16x128xf32>
      %114 = tpu.matmul %112, %113, %cst_66 {dimension_numbers = #tpu.dot_dimension_numbers<[1], [0], [0], [1], [0, 0, 1, 1], [], []>} : vector<16x128xf32>, vector<128x128xf32>, vector<16x128xf32> -> vector<16x128xf32>
      %c0_67 = arith.constant 0 : index
      %c0_68 = arith.constant 0 : index
      %115 = vector.load %arg30[%c0_67, %c0_68] : memref<16x128xf32, #tpu.memory_space<vmem>>, vector<16x128xf32>
      tpu.vector_store %arg30[%c0_67, %c0_68], %114 {strides = array<i32>} : memref<16x128xf32, #tpu.memory_space<vmem>>, vector<16x128xf32>,
      %c0_69 = arith.constant 0 : index
      %c0_70 = arith.constant 0 : index
      %116 = vector.load %arg10[%c0_69, %c0_70] : memref<128x128xf32, #tpu.memory_space<vmem>>, vector<128x128xf32>
      %cst_71 = arith.constant dense<0.000000e+00> : vector<16x128xf32>
      %117 = tpu.matmul %112, %116, %cst_71 {dimension_numbers = #tpu.dot_dimension_numbers<[1], [0], [0], [1], [0, 0, 1, 1], [], []>} : vector<16x128xf32>, vector<128x128xf32>, vector<16x128xf32> -> vector<16x128xf32>
      %c0_72 = arith.constant 0 : index
      %c0_73 = arith.constant 0 : index
      %118 = vector.load %arg31[%c0_72, %c0_73] : memref<16x128xf32, #tpu.memory_space<vmem>>, vector<16x128xf32>
      tpu.vector_store %arg31[%c0_72, %c0_73], %117 {strides = array<i32>} : memref<16x128xf32, #tpu.memory_space<vmem>>, vector<16x128xf32>,
      %cst_74 = arith.constant 0.000000e+00 : f32
      %119 = vector.broadcast %cst_74 : f32 to vector<16x128xf32>
      %c0_75 = arith.constant 0 : index
      %c0_76 = arith.constant 0 : index
      %120 = vector.load %arg32[%c0_75, %c0_76] : memref<16x128xf32, #tpu.memory_space<vmem>>, vector<16x128xf32>
      tpu.vector_store %arg32[%c0_75, %c0_76], %119 {strides = array<i32>} : memref<16x128xf32, #tpu.memory_space<vmem>>, vector<16x128xf32>,
      %cst_77 = arith.constant 0.000000e+00 : f32
      %121 = vector.broadcast %cst_77 : f32 to vector<16x8xf32>
      %c0_78 = arith.constant 0 : index
      %c0_79 = arith.constant 0 : index
      %122 = vector.load %arg33[%c0_78, %c0_79] : memref<16x8xf32, #tpu.memory_space<vmem>>, vector<16x8xf32>
      tpu.vector_store %arg33[%c0_78, %c0_79], %121 {strides = array<i32>} : memref<16x8xf32, #tpu.memory_space<vmem>>, vector<16x8xf32>,
    } else {
    }
    %c128_i32 = arith.constant 128 : i32
    %3 = arith.muli %arg0, %c128_i32 : i32
    %4 = tpu.assume_multiple %3, 128 : i32
    %5 = arith.index_cast %4 : i32 to index
    %c0 = arith.constant 0 : index
    %6 = vector.load %arg1[%5, %c0] : memref<256x1xi32, #tpu.memory_space<vmem>>, vector<128x1xi32>
    %7 = arith.index_cast %4 : i32 to index
    %c0_1 = arith.constant 0 : index
    %8 = vector.load %arg2[%7, %c0_1] : memref<256x1xi32, #tpu.memory_space<vmem>>, vector<128x1xi32>
    %c0_2 = arith.constant 0 : index
    %9 = arith.index_cast %4 : i32 to index
    %10 = vector.load %arg3[%c0_2, %9] : memref<1x256xi32, #tpu.memory_space<vmem>>, vector<1x128xi32>
    %11 = tpu.iota {dimensions = array<i32: 1>} : vector<128x16xi32>
    %12 = vector.broadcast %6 : vector<128x1xi32> to vector<128x16xi32>
    %13 = arith.cmpi eq, %11, %12 : vector<128x16xi32>
    %14 = vector.broadcast %8 : vector<128x1xi32> to vector<128x16xi32>
    %15 = arith.cmpi eq, %11, %14 : vector<128x16xi32>
    %16 = tpu.iota {dimensions = array<i32: 0>} : vector<16x128xi32>
    %17 = vector.broadcast %10 : vector<1x128xi32> to vector<16x128xi32>
    %18 = arith.cmpi eq, %16, %17 : vector<16x128xi32>
    %19 = arith.extui %13 : vector<128x16xi1> to vector<128x16xi32>
    %20 = arith.sitofp %19 : vector<128x16xi32> to vector<128x16xf32>
    %21 = arith.extui %15 : vector<128x16xi1> to vector<128x16xi32>
    %22 = arith.sitofp %21 : vector<128x16xi32> to vector<128x16xf32>
    %23 = arith.extui %18 : vector<16x128xi1> to vector<16x128xi32>
    %24 = arith.sitofp %23 : vector<16x128xi32> to vector<16x128xf32>
    %25 = arith.subf %20, %22 : vector<128x16xf32>
    %c0_3 = arith.constant 0 : index
    %c0_4 = arith.constant 0 : index
    %26 = vector.load %arg5[%c0_3, %c0_4] : memref<16x8xf32, #tpu.memory_space<vmem>>, vector<16x8xf32>
    %cst = arith.constant dense<0.000000e+00> : vector<128x8xf32>
    %27 = tpu.matmul %25, %26, %cst {dimension_numbers = #tpu.dot_dimension_numbers<[1], [0], [0], [1], [0, 0, 1, 1], [], []>} : vector<128x16xf32>, vector<16x8xf32>, vector<128x8xf32> -> vector<128x8xf32>
    %28 = arith.mulf %27, %27 : vector<128x8xf32>
    %cst_5 = arith.constant dense<0.000000e+00> : vector<128xf32>
    %29 = vector.multi_reduction <add>, %28, %cst_5 [1] : vector<128x8xf32> to vector<128xf32>
    %30 = vector.shape_cast %29 : vector<128xf32> to vector<128x1xf32>
    %c0_6 = arith.constant 0 : index
    %c0_7 = arith.constant 0 : index
    %31 = vector.load %arg30[%c0_6, %c0_7] : memref<16x128xf32, #tpu.memory_space<vmem>>, vector<16x128xf32>
    %cst_8 = arith.constant dense<0.000000e+00> : vector<128x128xf32>
    %32 = tpu.matmul %20, %31, %cst_8 {dimension_numbers = #tpu.dot_dimension_numbers<[1], [0], [0], [1], [0, 0, 1, 1], [], []>} : vector<128x16xf32>, vector<16x128xf32>, vector<128x128xf32> -> vector<128x128xf32>
    %c0_9 = arith.constant 0 : index
    %c0_10 = arith.constant 0 : index
    %33 = vector.load %arg31[%c0_9, %c0_10] : memref<16x128xf32, #tpu.memory_space<vmem>>, vector<16x128xf32>
    %cst_11 = arith.constant dense<0.000000e+00> : vector<128x128xf32>
    %34 = tpu.matmul %22, %33, %cst_11 {dimension_numbers = #tpu.dot_dimension_numbers<[1], [0], [0], [1], [0, 0, 1, 1], [], []>} : vector<128x16xf32>, vector<16x128xf32>, vector<128x128xf32> -> vector<128x128xf32>
    %35 = arith.addf %32, %34 : vector<128x128xf32>
    %c0_12 = arith.constant 0 : index
    %c0_13 = arith.constant 0 : index
    %36 = vector.load %arg11[%c0_12, %c0_13] : memref<1x128xf32, #tpu.memory_space<vmem>>, vector<1x128xf32>
    %37 = vector.broadcast %30 : vector<128x1xf32> to vector<128x128xf32>
    %38 = vector.broadcast %36 : vector<1x128xf32> to vector<128x128xf32>
    %39 = arith.mulf %37, %38 : vector<128x128xf32>
    %40 = arith.addf %35, %39 : vector<128x128xf32>
    %c0_14 = arith.constant 0 : index
    %c0_15 = arith.constant 0 : index
    %41 = vector.load %arg12[%c0_14, %c0_15] : memref<1x128xf32, #tpu.memory_space<vmem>>, vector<1x128xf32>
    %42 = vector.broadcast %41 : vector<1x128xf32> to vector<128x128xf32>
    %43 = arith.addf %40, %42 : vector<128x128xf32>
    %44 = arith.negf %43 : vector<128x128xf32>
    %45 = math.exp %44 : vector<128x128xf32>
    %cst_16 = arith.constant 1.000000e+00 : f32
    %46 = vector.broadcast %cst_16 : f32 to vector<128x128xf32>
    %47 = arith.addf %46, %45 : vector<128x128xf32>
    %48 = arith.divf %46, %47 : vector<128x128xf32>
    %49 = arith.mulf %43, %48 : vector<128x128xf32>
    %c0_17 = arith.constant 0 : index
    %c0_18 = arith.constant 0 : index
    %c0_19 = arith.constant 0 : index
    %50 = vector.load %arg13[%c0_17, %c0_18, %c0_19] : memref<1x128x128xf32, #tpu.memory_space<vmem>>, vector<1x128x128xf32>
    %51 = vector.shape_cast %50 : vector<1x128x128xf32> to vector<128x128xf32>
    %cst_20 = arith.constant dense<0.000000e+00> : vector<128x128xf32>
    %52 = tpu.matmul %49, %51, %cst_20 {dimension_numbers = #tpu.dot_dimension_numbers<[1], [0], [0], [1], [0, 0, 1, 1], [], []>} : vector<128x128xf32>, vector<128x128xf32>, vector<128x128xf32> -> vector<128x128xf32>
    %c0_21 = arith.constant 0 : index
    %c0_22 = arith.constant 0 : index
    %c0_23 = arith.constant 0 : index
    %53 = vector.load %arg14[%c0_21, %c0_22, %c0_23] : memref<1x1x128xf32, #tpu.memory_space<vmem>>, vector<1x1x128xf32>
    %54 = vector.shape_cast %53 : vector<1x1x128xf32> to vector<1x128xf32>
    %55 = vector.broadcast %54 : vector<1x128xf32> to vector<128x128xf32>
    %56 = arith.addf %52, %55 : vector<128x128xf32>
    %57 = arith.negf %56 : vector<128x128xf32>
    %58 = math.exp %57 : vector<128x128xf32>
    %cst_24 = arith.constant 1.000000e+00 : f32
    %59 = vector.broadcast %cst_24 : f32 to vector<128x128xf32>
    %60 = arith.addf %59, %58 : vector<128x128xf32>
    %61 = arith.divf %59, %60 : vector<128x128xf32>
    %62 = arith.mulf %56, %61 : vector<128x128xf32>
    %c0_25 = arith.constant 0 : index
    %c0_26 = arith.constant 0 : index
    %63 = vector.load %arg15[%c0_25, %c0_26] : memref<128x128xf32, #tpu.memory_space<vmem>>, vector<128x128xf32>
    %cst_27 = arith.constant dense<0.000000e+00> : vector<128x128xf32>
    %64 = tpu.matmul %62, %63, %cst_27 {dimension_numbers = #tpu.dot_dimension_numbers<[1], [0], [0], [1], [0, 0, 1, 1], [], []>} : vector<128x128xf32>, vector<128x128xf32>, vector<128x128xf32> -> vector<128x128xf32>
    %c0_28 = arith.constant 0 : index
    %c0_29 = arith.constant 0 : index
    %65 = vector.load %arg16[%c0_28, %c0_29] : memref<1x128xf32, #tpu.memory_space<vmem>>, vector<1x128xf32>
    %66 = vector.broadcast %65 : vector<1x128xf32> to vector<128x128xf32>
    %67 = arith.addf %64, %66 : vector<128x128xf32>
    %68 = arith.negf %67 : vector<128x128xf32>
    %69 = math.exp %68 : vector<128x128xf32>
    %cst_30 = arith.constant 1.000000e+00 : f32
    %70 = vector.broadcast %cst_30 : f32 to vector<128x128xf32>
    %71 = arith.addf %70, %69 : vector<128x128xf32>
    %72 = arith.divf %70, %71 : vector<128x128xf32>
    %73 = arith.mulf %67, %72 : vector<128x128xf32>
    %c0_31 = arith.constant 0 : index
    %c0_32 = arith.constant 0 : index
    %c0_33 = arith.constant 0 : index
    %74 = vector.load %arg17[%c0_31, %c0_32, %c0_33] : memref<1x128x128xf32, #tpu.memory_space<vmem>>, vector<1x128x128xf32>
    %75 = vector.shape_cast %74 : vector<1x128x128xf32> to vector<128x128xf32>
    %cst_34 = arith.constant dense<0.000000e+00> : vector<128x128xf32>
    %76 = tpu.matmul %73, %75, %cst_34 {dimension_numbers = #tpu.dot_dimension_numbers<[1], [0], [0], [1], [0, 0, 1, 1], [], []>} : vector<128x128xf32>, vector<128x128xf32>, vector<128x128xf32> -> vector<128x128xf32>
    %c0_35 = arith.constant 0 : index
    %c0_36 = arith.constant 0 : index
    %c0_37 = arith.constant 0 : index
    %77 = vector.load %arg18[%c0_35, %c0_36, %c0_37] : memref<1x1x128xf32, #tpu.memory_space<vmem>>, vector<1x1x128xf32>
    %78 = vector.shape_cast %77 : vector<1x1x128xf32> to vector<1x128xf32>
    %79 = vector.broadcast %78 : vector<1x128xf32> to vector<128x128xf32>
    %80 = arith.addf %76, %79 : vector<128x128xf32>
    %81 = arith.negf %80 : vector<128x128xf32>
    %82 = math.exp %81 : vector<128x128xf32>
    %cst_38 = arith.constant 1.000000e+00 : f32
    %83 = vector.broadcast %cst_38 : f32 to vector<128x128xf32>
    %84 = arith.addf %83, %82 : vector<128x128xf32>
    %85 = arith.divf %83, %84 : vector<128x128xf32>
    %86 = arith.mulf %80, %85 : vector<128x128xf32>
    %c0_39 = arith.constant 0 : index
    %c0_40 = arith.constant 0 : index
    %87 = vector.load %arg19[%c0_39, %c0_40] : memref<1x128xf32, #tpu.memory_space<vmem>>, vector<1x128xf32>
    %88 = vector.broadcast %87 : vector<1x128xf32> to vector<128x128xf32>
    %89 = arith.mulf %86, %88 : vector<128x128xf32>
    %cst_41 = arith.constant dense<0.000000e+00> : vector<128xf32>
    %90 = vector.multi_reduction <add>, %89, %cst_41 [1] : vector<128x128xf32> to vector<128xf32>
    %91 = vector.shape_cast %90 : vector<128xf32> to vector<128x1xf32>
    %92 = vector.broadcast %91 : vector<128x1xf32> to vector<128x8xf32>
    %93 = arith.mulf %27, %92 : vector<128x8xf32>
    %c0_42 = arith.constant 0 : index
    %c0_43 = arith.constant 0 : index
    %94 = vector.load %arg33[%c0_42, %c0_43] : memref<16x8xf32, #tpu.memory_space<vmem>>, vector<16x8xf32>
    %cst_44 = arith.constant dense<0.000000e+00> : vector<16x8xf32>
    %95 = tpu.matmul %24, %93, %cst_44 {dimension_numbers = #tpu.dot_dimension_numbers<[1], [0], [0], [1], [0, 0, 1, 1], [], []>} : vector<16x128xf32>, vector<128x8xf32>, vector<16x8xf32> -> vector<16x8xf32>
    %96 = arith.addf %94, %95 : vector<16x8xf32>
    %c0_45 = arith.constant 0 : index
    %c0_46 = arith.constant 0 : index
    %97 = vector.load %arg33[%c0_45, %c0_46] : memref<16x8xf32, #tpu.memory_space<vmem>>, vector<16x8xf32>
    tpu.vector_store %arg33[%c0_45, %c0_46], %96 {strides = array<i32>} : memref<16x8xf32, #tpu.memory_space<vmem>>, vector<16x8xf32>,
    %c0_47 = arith.constant 0 : index
    %c0_48 = arith.constant 0 : index
    %98 = vector.load %arg32[%c0_47, %c0_48] : memref<16x128xf32, #tpu.memory_space<vmem>>, vector<16x128xf32>
    %cst_49 = arith.constant dense<0.000000e+00> : vector<16x128xf32>
    %99 = tpu.matmul %24, %62, %cst_49 {dimension_numbers = #tpu.dot_dimension_numbers<[1], [0], [0], [1], [0, 0, 1, 1], [], []>} : vector<16x128xf32>, vector<128x128xf32>, vector<16x128xf32> -> vector<16x128xf32>
    %100 = arith.addf %98, %99 : vector<16x128xf32>
    %c0_50 = arith.constant 0 : index
    %c0_51 = arith.constant 0 : index
    %101 = vector.load %arg32[%c0_50, %c0_51] : memref<16x128xf32, #tpu.memory_space<vmem>>, vector<16x128xf32>
    tpu.vector_store %arg32[%c0_50, %c0_51], %100 {strides = array<i32>} : memref<16x128xf32, #tpu.memory_space<vmem>>, vector<16x128xf32>,
    %c1_i32 = arith.constant 1 : i32
    %102 = arith.cmpi eq, %arg0, %c1_i32 : i32
    %103 = arith.extui %102 : i1 to i32
    %c0_i32_52 = arith.constant 0 : i32
    %104 = arith.cmpi ne, %103, %c0_i32_52 : i32
    scf.if %104 {
      %c0_53 = arith.constant 0 : index
      %c0_54 = arith.constant 0 : index
      %105 = vector.load %arg6[%c0_53, %c0_54] : memref<16x1xf32, #tpu.memory_space<vmem>>, vector<16x1xf32>
      %c0_55 = arith.constant 0 : index
      %c0_56 = arith.constant 0 : index
      %106 = vector.load %arg29[%c0_55, %c0_56] : memref<16x128xf32, #tpu.memory_space<vmem>>, vector<16x128xf32>
      %c0_57 = arith.constant 0 : index
      %c0_58 = arith.constant 0 : index
      %107 = vector.load %arg32[%c0_57, %c0_58] : memref<16x128xf32, #tpu.memory_space<vmem>>, vector<16x128xf32>
      %108 = vector.broadcast %105 : vector<16x1xf32> to vector<16x128xf32>
      %109 = arith.mulf %107, %108 : vector<16x128xf32>
      %c0_59 = arith.constant 0 : index
      %c0_60 = arith.constant 0 : index
      %110 = vector.load %arg20[%c0_59, %c0_60] : memref<128x128xf32, #tpu.memory_space<vmem>>, vector<128x128xf32>
      %cst_61 = arith.constant dense<0.000000e+00> : vector<16x128xf32>
      %111 = tpu.matmul %106, %110, %cst_61 {dimension_numbers = #tpu.dot_dimension_numbers<[1], [0], [0], [1], [0, 0, 1, 1], [], []>} : vector<16x128xf32>, vector<128x128xf32>, vector<16x128xf32> -> vector<16x128xf32>
      %c0_62 = arith.constant 0 : index
      %c0_63 = arith.constant 0 : index
      %112 = vector.load %arg21[%c0_62, %c0_63] : memref<128x128xf32, #tpu.memory_space<vmem>>, vector<128x128xf32>
      %cst_64 = arith.constant dense<0.000000e+00> : vector<16x128xf32>
      %113 = tpu.matmul %109, %112, %cst_64 {dimension_numbers = #tpu.dot_dimension_numbers<[1], [0], [0], [1], [0, 0, 1, 1], [], []>} : vector<16x128xf32>, vector<128x128xf32>, vector<16x128xf32> -> vector<16x128xf32>
      %114 = arith.addf %111, %113 : vector<16x128xf32>
      %c0_65 = arith.constant 0 : index
      %c0_66 = arith.constant 0 : index
      %115 = vector.load %arg22[%c0_65, %c0_66] : memref<1x128xf32, #tpu.memory_space<vmem>>, vector<1x128xf32>
      %116 = vector.broadcast %115 : vector<1x128xf32> to vector<16x128xf32>
      %117 = arith.addf %114, %116 : vector<16x128xf32>
      %118 = arith.negf %117 : vector<16x128xf32>
      %119 = math.exp %118 : vector<16x128xf32>
      %cst_67 = arith.constant 1.000000e+00 : f32
      %120 = vector.broadcast %cst_67 : f32 to vector<16x128xf32>
      %121 = arith.addf %120, %119 : vector<16x128xf32>
      %122 = arith.divf %120, %121 : vector<16x128xf32>
      %123 = arith.mulf %117, %122 : vector<16x128xf32>
      %c0_68 = arith.constant 0 : index
      %c0_69 = arith.constant 0 : index
      %c0_70 = arith.constant 0 : index
      %124 = vector.load %arg23[%c0_68, %c0_69, %c0_70] : memref<1x128x128xf32, #tpu.memory_space<vmem>>, vector<1x128x128xf32>
      %125 = vector.shape_cast %124 : vector<1x128x128xf32> to vector<128x128xf32>
      %cst_71 = arith.constant dense<0.000000e+00> : vector<16x128xf32>
      %126 = tpu.matmul %123, %125, %cst_71 {dimension_numbers = #tpu.dot_dimension_numbers<[1], [0], [0], [1], [0, 0, 1, 1], [], []>} : vector<16x128xf32>, vector<128x128xf32>, vector<16x128xf32> -> vector<16x128xf32>
      %c0_72 = arith.constant 0 : index
      %c0_73 = arith.constant 0 : index
      %c0_74 = arith.constant 0 : index
      %127 = vector.load %arg24[%c0_72, %c0_73, %c0_74] : memref<1x1x128xf32, #tpu.memory_space<vmem>>, vector<1x1x128xf32>
      %128 = vector.shape_cast %127 : vector<1x1x128xf32> to vector<1x128xf32>
      %129 = vector.broadcast %128 : vector<1x128xf32> to vector<16x128xf32>
      %130 = arith.addf %126, %129 : vector<16x128xf32>
      %131 = arith.negf %130 : vector<16x128xf32>
      %132 = math.exp %131 : vector<16x128xf32>
      %cst_75 = arith.constant 1.000000e+00 : f32
      %133 = vector.broadcast %cst_75 : f32 to vector<16x128xf32>
      %134 = arith.addf %133, %132 : vector<16x128xf32>
      %135 = arith.divf %133, %134 : vector<16x128xf32>
      %136 = arith.mulf %130, %135 : vector<16x128xf32>
      %c0_76 = arith.constant 0 : index
      %c0_77 = arith.constant 0 : index
      %137 = vector.load %arg25[%c0_76, %c0_77] : memref<128x128xf32, #tpu.memory_space<vmem>>, vector<128x128xf32>
      %cst_78 = arith.constant dense<0.000000e+00> : vector<16x128xf32>
      %138 = tpu.matmul %136, %137, %cst_78 {dimension_numbers = #tpu.dot_dimension_numbers<[1], [0], [0], [1], [0, 0, 1, 1], [], []>} : vector<16x128xf32>, vector<128x128xf32>, vector<16x128xf32> -> vector<16x128xf32>
      %c0_79 = arith.constant 0 : index
      %c0_80 = arith.constant 0 : index
      %139 = vector.load %arg26[%c0_79, %c0_80] : memref<1x128xf32, #tpu.memory_space<vmem>>, vector<1x128xf32>
      %140 = vector.broadcast %139 : vector<1x128xf32> to vector<16x128xf32>
      %141 = arith.addf %138, %140 : vector<16x128xf32>
      %142 = arith.addf %106, %141 : vector<16x128xf32>
      %c0_81 = arith.constant 0 : index
      %c0_82 = arith.constant 0 : index
      %143 = vector.load %arg27[%c0_81, %c0_82] : memref<16x128xf32, #tpu.memory_space<vmem>>, vector<16x128xf32>
      tpu.vector_store %arg27[%c0_81, %c0_82], %142 {strides = array<i32>} : memref<16x128xf32, #tpu.memory_space<vmem>>, vector<16x128xf32>,
      %c0_83 = arith.constant 0 : index
      %c0_84 = arith.constant 0 : index
      %144 = vector.load %arg5[%c0_83, %c0_84] : memref<16x8xf32, #tpu.memory_space<vmem>>, vector<16x8xf32>
      %c0_85 = arith.constant 0 : index
      %c0_86 = arith.constant 0 : index
      %145 = vector.load %arg33[%c0_85, %c0_86] : memref<16x8xf32, #tpu.memory_space<vmem>>, vector<16x8xf32>
      %146 = vector.broadcast %105 : vector<16x1xf32> to vector<16x8xf32>
      %147 = arith.mulf %145, %146 : vector<16x8xf32>
      %148 = arith.addf %144, %147 : vector<16x8xf32>
      %c0_87 = arith.constant 0 : index
      %c0_88 = arith.constant 0 : index
      %149 = vector.load %arg28[%c0_87, %c0_88] : memref<16x8xf32, #tpu.memory_space<vmem>>, vector<16x8xf32>
      tpu.vector_store %arg28[%c0_87, %c0_88], %148 {strides = array<i32>} : memref<16x8xf32, #tpu.memory_space<vmem>>, vector<16x8xf32>,
    } else {
    }
    return
  }
  func.func @transform_0(%arg0: i32) -> (i32, i32) {
    %c0_i32 = arith.constant 0 : i32
    %c0_i32_0 = arith.constant 0 : i32
    %c0_i32_1 = arith.constant 0 : i32
    return %c0_i32, %c0_i32_0 : i32, i32
  }
  func.func @transform_1(%arg0: i32) -> (i32, i32) {
    %c0_i32 = arith.constant 0 : i32
    %c0_i32_0 = arith.constant 0 : i32
    %c0_i32_1 = arith.constant 0 : i32
    return %c0_i32, %c0_i32_0 : i32, i32
  }
  func.func @transform_2(%arg0: i32) -> (i32, i32) {
    %c0_i32 = arith.constant 0 : i32
    %c0_i32_0 = arith.constant 0 : i32
    %c0_i32_1 = arith.constant 0 : i32
    return %c0_i32, %c0_i32_0 : i32, i32
  }
  func.func @transform_3(%arg0: i32) -> (i32, i32) {
    %c0_i32 = arith.constant 0 : i32
    %c0_i32_0 = arith.constant 0 : i32
    %c0_i32_1 = arith.constant 0 : i32
    return %c0_i32, %c0_i32_0 : i32, i32
  }
  func.func @transform_4(%arg0: i32) -> (i32, i32) {
    %c0_i32 = arith.constant 0 : i32
    %c0_i32_0 = arith.constant 0 : i32
    %c0_i32_1 = arith.constant 0 : i32
    return %c0_i32, %c0_i32_0 : i32, i32
  }
  func.func @transform_5(%arg0: i32) -> (i32, i32) {
    %c0_i32 = arith.constant 0 : i32
    %c0_i32_0 = arith.constant 0 : i32
    %c0_i32_1 = arith.constant 0 : i32
    return %c0_i32, %c0_i32_0 : i32, i32
  }
  func.func @transform_6(%arg0: i32) -> (i32, i32) {
    %c0_i32 = arith.constant 0 : i32
    %c0_i32_0 = arith.constant 0 : i32
    %c0_i32_1 = arith.constant 0 : i32
    return %c0_i32, %c0_i32_0 : i32, i32
  }
  func.func @transform_7(%arg0: i32) -> (i32, i32) {
    %c0_i32 = arith.constant 0 : i32
    %c0_i32_0 = arith.constant 0 : i32
    %c0_i32_1 = arith.constant 0 : i32
    return %c0_i32, %c0_i32_0 : i32, i32
  }
  func.func @transform_8(%arg0: i32) -> (i32, i32) {
    %c0_i32 = arith.constant 0 : i32
    %c0_i32_0 = arith.constant 0 : i32
    %c0_i32_1 = arith.constant 0 : i32
    return %c0_i32, %c0_i32_0 : i32, i32
  }
  func.func @transform_9(%arg0: i32) -> (i32, i32) {
    %c0_i32 = arith.constant 0 : i32
    %c0_i32_0 = arith.constant 0 : i32
    %c0_i32_1 = arith.constant 0 : i32
    return %c0_i32, %c0_i32_0 : i32, i32
  }
  func.func @transform_10(%arg0: i32) -> (i32, i32) {
    %c0_i32 = arith.constant 0 : i32
    %c0_i32_0 = arith.constant 0 : i32
    %c0_i32_1 = arith.constant 0 : i32
    return %c0_i32, %c0_i32_0 : i32, i32
  }
  func.func @transform_11(%arg0: i32) -> (i32, i32) {
    %c0_i32 = arith.constant 0 : i32
    %c0_i32_0 = arith.constant 0 : i32
    %c0_i32_1 = arith.constant 0 : i32
    return %c0_i32, %c0_i32_0 : i32, i32
  }
  func.func @transform_12(%arg0: i32) -> (i32, i32, i32) {
    %c0_i32 = arith.constant 0 : i32
    %c0_i32_0 = arith.constant 0 : i32
    %c0_i32_1 = arith.constant 0 : i32
    %c0_i32_2 = arith.constant 0 : i32
    return %c0_i32, %c0_i32_0, %c0_i32_1 : i32, i32, i32
  }
  func.func @transform_13(%arg0: i32) -> (i32, i32, i32) {
    %c0_i32 = arith.constant 0 : i32
    %c0_i32_0 = arith.constant 0 : i32
    %c0_i32_1 = arith.constant 0 : i32
    %c0_i32_2 = arith.constant 0 : i32
    return %c0_i32, %c0_i32_0, %c0_i32_1 : i32, i32, i32
  }
  func.func @transform_14(%arg0: i32) -> (i32, i32) {
    %c0_i32 = arith.constant 0 : i32
    %c0_i32_0 = arith.constant 0 : i32
    %c0_i32_1 = arith.constant 0 : i32
    return %c0_i32, %c0_i32_0 : i32, i32
  }
  func.func @transform_15(%arg0: i32) -> (i32, i32) {
    %c0_i32 = arith.constant 0 : i32
    %c0_i32_0 = arith.constant 0 : i32
    %c0_i32_1 = arith.constant 0 : i32
    return %c0_i32, %c0_i32_0 : i32, i32
  }
  func.func @transform_16(%arg0: i32) -> (i32, i32, i32) {
    %c0_i32 = arith.constant 0 : i32
    %c0_i32_0 = arith.constant 0 : i32
    %c0_i32_1 = arith.constant 0 : i32
    %c0_i32_2 = arith.constant 0 : i32
    return %c0_i32, %c0_i32_0, %c0_i32_1 : i32, i32, i32
  }
  func.func @transform_17(%arg0: i32) -> (i32, i32, i32) {
    %c0_i32 = arith.constant 0 : i32
    %c0_i32_0 = arith.constant 0 : i32
    %c0_i32_1 = arith.constant 0 : i32
    %c0_i32_2 = arith.constant 0 : i32
    return %c0_i32, %c0_i32_0, %c0_i32_1 : i32, i32, i32
  }
  func.func @transform_18(%arg0: i32) -> (i32, i32) {
    %c0_i32 = arith.constant 0 : i32
    %c0_i32_0 = arith.constant 0 : i32
    %c0_i32_1 = arith.constant 0 : i32
    return %c0_i32, %c0_i32_0 : i32, i32
  }
  func.func @transform_19(%arg0: i32) -> (i32, i32) {
    %c0_i32 = arith.constant 0 : i32
    %c0_i32_0 = arith.constant 0 : i32
    %c0_i32_1 = arith.constant 0 : i32
    return %c0_i32, %c0_i32_0 : i32, i32
  }
  func.func @transform_20(%arg0: i32) -> (i32, i32) {
    %c0_i32 = arith.constant 0 : i32
    %c0_i32_0 = arith.constant 0 : i32
    %c0_i32_1 = arith.constant 0 : i32
    return %c0_i32, %c0_i32_0 : i32, i32
  }
  func.func @transform_21(%arg0: i32) -> (i32, i32) {
    %c0_i32 = arith.constant 0 : i32
    %c0_i32_0 = arith.constant 0 : i32
    %c0_i32_1 = arith.constant 0 : i32
    return %c0_i32, %c0_i32_0 : i32, i32
  }
  func.func @transform_22(%arg0: i32) -> (i32, i32, i32) {
    %c0_i32 = arith.constant 0 : i32
    %c0_i32_0 = arith.constant 0 : i32
    %c0_i32_1 = arith.constant 0 : i32
    %c0_i32_2 = arith.constant 0 : i32
    return %c0_i32, %c0_i32_0, %c0_i32_1 : i32, i32, i32
  }
  func.func @transform_23(%arg0: i32) -> (i32, i32, i32) {
    %c0_i32 = arith.constant 0 : i32
    %c0_i32_0 = arith.constant 0 : i32
    %c0_i32_1 = arith.constant 0 : i32
    %c0_i32_2 = arith.constant 0 : i32
    return %c0_i32, %c0_i32_0, %c0_i32_1 : i32, i32, i32
  }
  func.func @transform_24(%arg0: i32) -> (i32, i32) {
    %c0_i32 = arith.constant 0 : i32
    %c0_i32_0 = arith.constant 0 : i32
    %c0_i32_1 = arith.constant 0 : i32
    return %c0_i32, %c0_i32_0 : i32, i32
  }
  func.func @transform_25(%arg0: i32) -> (i32, i32) {
    %c0_i32 = arith.constant 0 : i32
    %c0_i32_0 = arith.constant 0 : i32
    %c0_i32_1 = arith.constant 0 : i32
    return %c0_i32, %c0_i32_0 : i32, i32
  }
  func.func @transform_26(%arg0: i32) -> (i32, i32) {
    %c0_i32 = arith.constant 0 : i32
    %c0_i32_0 = arith.constant 0 : i32
    %c0_i32_1 = arith.constant 0 : i32
    return %c0_i32, %c0_i32_0 : i32, i32
  }
  func.func @transform_27(%arg0: i32) -> (i32, i32) {
    %c0_i32 = arith.constant 0 : i32
    %c0_i32_0 = arith.constant 0 : i32
    %c0_i32_1 = arith.constant 0 : i32
    return %c0_i32, %c0_i32_0 : i32, i32
  }
}

module attributes {stable_mosaic.version = 11 : i64} {
  func.func @kernel(%arg0: i32, %arg1: memref<256x1xi32, #tpu.memory_space<vmem>>, %arg2: memref<256x1xi32, #tpu.memory_space<vmem>>, %arg3: memref<1x256xi32, #tpu.memory_space<vmem>>, %arg4: memref<16x128xf32, #tpu.memory_space<vmem>>, %arg5: memref<16x8xf32, #tpu.memory_space<vmem>>, %arg6: memref<16x1xf32, #tpu.memory_space<vmem>>, %arg7: memref<128x128xf32, #tpu.memory_space<vmem>>, %arg8: memref<128x128xf32, #tpu.memory_space<vmem>>, %arg9: memref<1x128xf32, #tpu.memory_space<vmem>>, %arg10: memref<1x128xf32, #tpu.memory_space<vmem>>, %arg11: memref<1x128x128xf32, #tpu.memory_space<vmem>>, %arg12: memref<1x1x128xf32, #tpu.memory_space<vmem>>, %arg13: memref<128x128xf32, #tpu.memory_space<vmem>>, %arg14: memref<1x128xf32, #tpu.memory_space<vmem>>, %arg15: memref<1x128x128xf32, #tpu.memory_space<vmem>>, %arg16: memref<1x1x128xf32, #tpu.memory_space<vmem>>, %arg17: memref<1x128xf32, #tpu.memory_space<vmem>>, %arg18: memref<128x128xf32, #tpu.memory_space<vmem>>, %arg19: memref<128x128xf32, #tpu.memory_space<vmem>>, %arg20: memref<1x128xf32, #tpu.memory_space<vmem>>, %arg21: memref<1x128x128xf32, #tpu.memory_space<vmem>>, %arg22: memref<1x1x128xf32, #tpu.memory_space<vmem>>, %arg23: memref<128x128xf32, #tpu.memory_space<vmem>>, %arg24: memref<1x128xf32, #tpu.memory_space<vmem>>, %arg25: memref<128x128xf32, #tpu.memory_space<vmem>>, %arg26: memref<1x128xf32, #tpu.memory_space<vmem>>, %arg27: memref<16x128xf32, #tpu.memory_space<vmem>>, %arg28: memref<16x8xf32, #tpu.memory_space<vmem>>, %arg29: memref<16x128xf32, #tpu.memory_space<vmem>>, %arg30: memref<16x128xf32, #tpu.memory_space<vmem>>, %arg31: memref<16x128xf32, #tpu.memory_space<vmem>>, %arg32: memref<16x128xf32, #tpu.memory_space<vmem>>, %arg33: memref<16x128xf32, #tpu.memory_space<vmem>>, %arg34: memref<16x8xf32, #tpu.memory_space<vmem>>) attributes {dimension_semantics = [#tpu.dimension_semantics<arbitrary>], iteration_bounds = array<i64: 2>, scalar_prefetch = 0 : i64, scratch_operands = 5 : i64, tpu.core_type = #tpu.core_type<tc>, window_params = [{pipeline_mode = #tpu.pipeline_mode<synchronous>, transform_indices = @transform_0, window_bounds = array<i64: 256, 1>}, {pipeline_mode = #tpu.pipeline_mode<synchronous>, transform_indices = @transform_1, window_bounds = array<i64: 256, 1>}, {pipeline_mode = #tpu.pipeline_mode<synchronous>, transform_indices = @transform_2, window_bounds = array<i64: 1, 256>}, {pipeline_mode = #tpu.pipeline_mode<synchronous>, transform_indices = @transform_3, window_bounds = array<i64: 16, 128>}, {pipeline_mode = #tpu.pipeline_mode<synchronous>, transform_indices = @transform_4, window_bounds = array<i64: 16, 8>}, {pipeline_mode = #tpu.pipeline_mode<synchronous>, transform_indices = @transform_5, window_bounds = array<i64: 16, 1>}, {pipeline_mode = #tpu.pipeline_mode<synchronous>, transform_indices = @transform_6, window_bounds = array<i64: 128, 128>}, {pipeline_mode = #tpu.pipeline_mode<synchronous>, transform_indices = @transform_7, window_bounds = array<i64: 128, 128>}, {pipeline_mode = #tpu.pipeline_mode<synchronous>, transform_indices = @transform_8, window_bounds = array<i64: 1, 128>}, {pipeline_mode = #tpu.pipeline_mode<synchronous>, transform_indices = @transform_9, window_bounds = array<i64: 1, 128>}, {pipeline_mode = #tpu.pipeline_mode<synchronous>, transform_indices = @transform_10, window_bounds = array<i64: 1, 128, 128>}, {pipeline_mode = #tpu.pipeline_mode<synchronous>, transform_indices = @transform_11, window_bounds = array<i64: 1, 1, 128>}, {pipeline_mode = #tpu.pipeline_mode<synchronous>, transform_indices = @transform_12, window_bounds = array<i64: 128, 128>}, {pipeline_mode = #tpu.pipeline_mode<synchronous>, transform_indices = @transform_13, window_bounds = array<i64: 1, 128>}, {pipeline_mode = #tpu.pipeline_mode<synchronous>, transform_indices = @transform_14, window_bounds = array<i64: 1, 128, 128>}, {pipeline_mode = #tpu.pipeline_mode<synchronous>, transform_indices = @transform_15, window_bounds = array<i64: 1, 1, 128>}, {pipeline_mode = #tpu.pipeline_mode<synchronous>, transform_indices = @transform_16, window_bounds = array<i64: 1, 128>}, {pipeline_mode = #tpu.pipeline_mode<synchronous>, transform_indices = @transform_17, window_bounds = array<i64: 128, 128>}, {pipeline_mode = #tpu.pipeline_mode<synchronous>, transform_indices = @transform_18, window_bounds = array<i64: 128, 128>}, {pipeline_mode = #tpu.pipeline_mode<synchronous>, transform_indices = @transform_19, window_bounds = array<i64: 1, 128>}, {pipeline_mode = #tpu.pipeline_mode<synchronous>, transform_indices = @transform_20, window_bounds = array<i64: 1, 128, 128>}, {pipeline_mode = #tpu.pipeline_mode<synchronous>, transform_indices = @transform_21, window_bounds = array<i64: 1, 1, 128>}, {pipeline_mode = #tpu.pipeline_mode<synchronous>, transform_indices = @transform_22, window_bounds = array<i64: 128, 128>}, {pipeline_mode = #tpu.pipeline_mode<synchronous>, transform_indices = @transform_23, window_bounds = array<i64: 1, 128>}, {pipeline_mode = #tpu.pipeline_mode<synchronous>, transform_indices = @transform_24, window_bounds = array<i64: 128, 128>}, {pipeline_mode = #tpu.pipeline_mode<synchronous>, transform_indices = @transform_25, window_bounds = array<i64: 1, 128>}, {pipeline_mode = #tpu.pipeline_mode<synchronous>, transform_indices = @transform_26, window_bounds = array<i64: 16, 128>}, {pipeline_mode = #tpu.pipeline_mode<synchronous>, transform_indices = @transform_27, window_bounds = array<i64: 16, 8>}, {pipeline_mode = #tpu.pipeline_mode<synchronous>, transform_indices = @transform_28, window_bounds = array<i64: 16, 128>}]} {
    %c0_i32 = arith.constant 0 : i32
    %0 = arith.cmpi eq, %arg0, %c0_i32 : i32
    %1 = arith.extui %0 : i1 to i32
    %c0_i32_0 = arith.constant 0 : i32
    %2 = arith.cmpi ne, %1, %c0_i32_0 : i32
    scf.if %2 {
      %c0_53 = arith.constant 0 : index
      %c0_54 = arith.constant 0 : index
      %105 = vector.load %arg4[%c0_53, %c0_54] : memref<16x128xf32, #tpu.memory_space<vmem>>, vector<16x128xf32>
      %c0_55 = arith.constant 0 : index
      %c0_56 = arith.constant 0 : index
      %106 = vector.load %arg30[%c0_55, %c0_56] : memref<16x128xf32, #tpu.memory_space<vmem>>, vector<16x128xf32>
      tpu.vector_store %arg30[%c0_55, %c0_56], %105 {strides = array<i32>} : memref<16x128xf32, #tpu.memory_space<vmem>>, vector<16x128xf32>,
      %c0_57 = arith.constant 0 : index
      %c0_58 = arith.constant 0 : index
      %107 = vector.load %arg30[%c0_57, %c0_58] : memref<16x128xf32, #tpu.memory_space<vmem>>, vector<16x128xf32>
      %c0_59 = arith.constant 0 : index
      %c0_60 = arith.constant 0 : index
      %108 = vector.load %arg7[%c0_59, %c0_60] : memref<128x128xf32, #tpu.memory_space<vmem>>, vector<128x128xf32>
      %cst_61 = arith.constant dense<0.000000e+00> : vector<16x128xf32>
      %109 = tpu.matmul %107, %108, %cst_61 {dimension_numbers = #tpu.dot_dimension_numbers<[1], [0], [0], [1], [0, 0, 1, 1], [], []>} : vector<16x128xf32>, vector<128x128xf32>, vector<16x128xf32> -> vector<16x128xf32>
      %c0_62 = arith.constant 0 : index
      %c0_63 = arith.constant 0 : index
      %110 = vector.load %arg31[%c0_62, %c0_63] : memref<16x128xf32, #tpu.memory_space<vmem>>, vector<16x128xf32>
      tpu.vector_store %arg31[%c0_62, %c0_63], %109 {strides = array<i32>} : memref<16x128xf32, #tpu.memory_space<vmem>>, vector<16x128xf32>,
      %c0_64 = arith.constant 0 : index
      %c0_65 = arith.constant 0 : index
      %111 = vector.load %arg8[%c0_64, %c0_65] : memref<128x128xf32, #tpu.memory_space<vmem>>, vector<128x128xf32>
      %cst_66 = arith.constant dense<0.000000e+00> : vector<16x128xf32>
      %112 = tpu.matmul %107, %111, %cst_66 {dimension_numbers = #tpu.dot_dimension_numbers<[1], [0], [0], [1], [0, 0, 1, 1], [], []>} : vector<16x128xf32>, vector<128x128xf32>, vector<16x128xf32> -> vector<16x128xf32>
      %c0_67 = arith.constant 0 : index
      %c0_68 = arith.constant 0 : index
      %113 = vector.load %arg32[%c0_67, %c0_68] : memref<16x128xf32, #tpu.memory_space<vmem>>, vector<16x128xf32>
      tpu.vector_store %arg32[%c0_67, %c0_68], %112 {strides = array<i32>} : memref<16x128xf32, #tpu.memory_space<vmem>>, vector<16x128xf32>,
      %cst_69 = arith.constant 0.000000e+00 : f32
      %114 = vector.broadcast %cst_69 : f32 to vector<16x128xf32>
      %c0_70 = arith.constant 0 : index
      %c0_71 = arith.constant 0 : index
      %115 = vector.load %arg33[%c0_70, %c0_71] : memref<16x128xf32, #tpu.memory_space<vmem>>, vector<16x128xf32>
      tpu.vector_store %arg33[%c0_70, %c0_71], %114 {strides = array<i32>} : memref<16x128xf32, #tpu.memory_space<vmem>>, vector<16x128xf32>,
      %cst_72 = arith.constant 0.000000e+00 : f32
      %116 = vector.broadcast %cst_72 : f32 to vector<16x8xf32>
      %c0_73 = arith.constant 0 : index
      %c0_74 = arith.constant 0 : index
      %117 = vector.load %arg34[%c0_73, %c0_74] : memref<16x8xf32, #tpu.memory_space<vmem>>, vector<16x8xf32>
      tpu.vector_store %arg34[%c0_73, %c0_74], %116 {strides = array<i32>} : memref<16x8xf32, #tpu.memory_space<vmem>>, vector<16x8xf32>,
    } else {
    }
    %c128_i32 = arith.constant 128 : i32
    %3 = arith.muli %arg0, %c128_i32 : i32
    %4 = tpu.assume_multiple %3, 128 : i32
    %5 = arith.index_cast %4 : i32 to index
    %c0 = arith.constant 0 : index
    %6 = vector.load %arg1[%5, %c0] : memref<256x1xi32, #tpu.memory_space<vmem>>, vector<128x1xi32>
    %7 = arith.index_cast %4 : i32 to index
    %c0_1 = arith.constant 0 : index
    %8 = vector.load %arg2[%7, %c0_1] : memref<256x1xi32, #tpu.memory_space<vmem>>, vector<128x1xi32>
    %c0_2 = arith.constant 0 : index
    %9 = arith.index_cast %4 : i32 to index
    %10 = vector.load %arg3[%c0_2, %9] : memref<1x256xi32, #tpu.memory_space<vmem>>, vector<1x128xi32>
    %11 = tpu.iota {dimensions = array<i32: 1>} : vector<128x16xi32>
    %12 = vector.broadcast %6 : vector<128x1xi32> to vector<128x16xi32>
    %13 = arith.cmpi eq, %11, %12 : vector<128x16xi32>
    %14 = vector.broadcast %8 : vector<128x1xi32> to vector<128x16xi32>
    %15 = arith.cmpi eq, %11, %14 : vector<128x16xi32>
    %16 = tpu.iota {dimensions = array<i32: 0>} : vector<16x128xi32>
    %17 = vector.broadcast %10 : vector<1x128xi32> to vector<16x128xi32>
    %18 = arith.cmpi eq, %16, %17 : vector<16x128xi32>
    %19 = arith.extui %13 : vector<128x16xi1> to vector<128x16xi32>
    %20 = arith.sitofp %19 : vector<128x16xi32> to vector<128x16xf32>
    %21 = arith.extui %15 : vector<128x16xi1> to vector<128x16xi32>
    %22 = arith.sitofp %21 : vector<128x16xi32> to vector<128x16xf32>
    %23 = arith.extui %18 : vector<16x128xi1> to vector<16x128xi32>
    %24 = arith.sitofp %23 : vector<16x128xi32> to vector<16x128xf32>
    %25 = arith.subf %20, %22 : vector<128x16xf32>
    %c0_3 = arith.constant 0 : index
    %c0_4 = arith.constant 0 : index
    %26 = vector.load %arg5[%c0_3, %c0_4] : memref<16x8xf32, #tpu.memory_space<vmem>>, vector<16x8xf32>
    %cst = arith.constant dense<0.000000e+00> : vector<128x8xf32>
    %27 = tpu.matmul %25, %26, %cst {dimension_numbers = #tpu.dot_dimension_numbers<[1], [0], [0], [1], [0, 0, 1, 1], [], []>} : vector<128x16xf32>, vector<16x8xf32>, vector<128x8xf32> -> vector<128x8xf32>
    %28 = arith.mulf %27, %27 : vector<128x8xf32>
    %cst_5 = arith.constant dense<0.000000e+00> : vector<128xf32>
    %29 = vector.multi_reduction <add>, %28, %cst_5 [1] : vector<128x8xf32> to vector<128xf32>
    %30 = vector.shape_cast %29 : vector<128xf32> to vector<128x1xf32>
    %c0_6 = arith.constant 0 : index
    %c0_7 = arith.constant 0 : index
    %31 = vector.load %arg31[%c0_6, %c0_7] : memref<16x128xf32, #tpu.memory_space<vmem>>, vector<16x128xf32>
    %cst_8 = arith.constant dense<0.000000e+00> : vector<128x128xf32>
    %32 = tpu.matmul %20, %31, %cst_8 {dimension_numbers = #tpu.dot_dimension_numbers<[1], [0], [0], [1], [0, 0, 1, 1], [], []>} : vector<128x16xf32>, vector<16x128xf32>, vector<128x128xf32> -> vector<128x128xf32>
    %c0_9 = arith.constant 0 : index
    %c0_10 = arith.constant 0 : index
    %33 = vector.load %arg32[%c0_9, %c0_10] : memref<16x128xf32, #tpu.memory_space<vmem>>, vector<16x128xf32>
    %cst_11 = arith.constant dense<0.000000e+00> : vector<128x128xf32>
    %34 = tpu.matmul %22, %33, %cst_11 {dimension_numbers = #tpu.dot_dimension_numbers<[1], [0], [0], [1], [0, 0, 1, 1], [], []>} : vector<128x16xf32>, vector<16x128xf32>, vector<128x128xf32> -> vector<128x128xf32>
    %35 = arith.addf %32, %34 : vector<128x128xf32>
    %c0_12 = arith.constant 0 : index
    %c0_13 = arith.constant 0 : index
    %36 = vector.load %arg9[%c0_12, %c0_13] : memref<1x128xf32, #tpu.memory_space<vmem>>, vector<1x128xf32>
    %37 = vector.broadcast %30 : vector<128x1xf32> to vector<128x128xf32>
    %38 = vector.broadcast %36 : vector<1x128xf32> to vector<128x128xf32>
    %39 = arith.mulf %37, %38 : vector<128x128xf32>
    %40 = arith.addf %35, %39 : vector<128x128xf32>
    %c0_14 = arith.constant 0 : index
    %c0_15 = arith.constant 0 : index
    %41 = vector.load %arg10[%c0_14, %c0_15] : memref<1x128xf32, #tpu.memory_space<vmem>>, vector<1x128xf32>
    %42 = vector.broadcast %41 : vector<1x128xf32> to vector<128x128xf32>
    %43 = arith.addf %40, %42 : vector<128x128xf32>
    %44 = arith.negf %43 : vector<128x128xf32>
    %45 = math.exp %44 : vector<128x128xf32>
    %cst_16 = arith.constant 1.000000e+00 : f32
    %46 = vector.broadcast %cst_16 : f32 to vector<128x128xf32>
    %47 = arith.addf %46, %45 : vector<128x128xf32>
    %48 = arith.divf %46, %47 : vector<128x128xf32>
    %49 = arith.mulf %43, %48 : vector<128x128xf32>
    %c0_17 = arith.constant 0 : index
    %c0_18 = arith.constant 0 : index
    %c0_19 = arith.constant 0 : index
    %50 = vector.load %arg11[%c0_17, %c0_18, %c0_19] : memref<1x128x128xf32, #tpu.memory_space<vmem>>, vector<1x128x128xf32>
    %51 = vector.shape_cast %50 : vector<1x128x128xf32> to vector<128x128xf32>
    %cst_20 = arith.constant dense<0.000000e+00> : vector<128x128xf32>
    %52 = tpu.matmul %49, %51, %cst_20 {dimension_numbers = #tpu.dot_dimension_numbers<[1], [0], [0], [1], [0, 0, 1, 1], [], []>} : vector<128x128xf32>, vector<128x128xf32>, vector<128x128xf32> -> vector<128x128xf32>
    %c0_21 = arith.constant 0 : index
    %c0_22 = arith.constant 0 : index
    %c0_23 = arith.constant 0 : index
    %53 = vector.load %arg12[%c0_21, %c0_22, %c0_23] : memref<1x1x128xf32, #tpu.memory_space<vmem>>, vector<1x1x128xf32>
    %54 = vector.shape_cast %53 : vector<1x1x128xf32> to vector<1x128xf32>
    %55 = vector.broadcast %54 : vector<1x128xf32> to vector<128x128xf32>
    %56 = arith.addf %52, %55 : vector<128x128xf32>
    %57 = arith.negf %56 : vector<128x128xf32>
    %58 = math.exp %57 : vector<128x128xf32>
    %cst_24 = arith.constant 1.000000e+00 : f32
    %59 = vector.broadcast %cst_24 : f32 to vector<128x128xf32>
    %60 = arith.addf %59, %58 : vector<128x128xf32>
    %61 = arith.divf %59, %60 : vector<128x128xf32>
    %62 = arith.mulf %56, %61 : vector<128x128xf32>
    %c0_25 = arith.constant 0 : index
    %c0_26 = arith.constant 0 : index
    %63 = vector.load %arg13[%c0_25, %c0_26] : memref<128x128xf32, #tpu.memory_space<vmem>>, vector<128x128xf32>
    %cst_27 = arith.constant dense<0.000000e+00> : vector<128x128xf32>
    %64 = tpu.matmul %62, %63, %cst_27 {dimension_numbers = #tpu.dot_dimension_numbers<[1], [0], [0], [1], [0, 0, 1, 1], [], []>} : vector<128x128xf32>, vector<128x128xf32>, vector<128x128xf32> -> vector<128x128xf32>
    %c0_28 = arith.constant 0 : index
    %c0_29 = arith.constant 0 : index
    %65 = vector.load %arg14[%c0_28, %c0_29] : memref<1x128xf32, #tpu.memory_space<vmem>>, vector<1x128xf32>
    %66 = vector.broadcast %65 : vector<1x128xf32> to vector<128x128xf32>
    %67 = arith.addf %64, %66 : vector<128x128xf32>
    %68 = arith.negf %67 : vector<128x128xf32>
    %69 = math.exp %68 : vector<128x128xf32>
    %cst_30 = arith.constant 1.000000e+00 : f32
    %70 = vector.broadcast %cst_30 : f32 to vector<128x128xf32>
    %71 = arith.addf %70, %69 : vector<128x128xf32>
    %72 = arith.divf %70, %71 : vector<128x128xf32>
    %73 = arith.mulf %67, %72 : vector<128x128xf32>
    %c0_31 = arith.constant 0 : index
    %c0_32 = arith.constant 0 : index
    %c0_33 = arith.constant 0 : index
    %74 = vector.load %arg15[%c0_31, %c0_32, %c0_33] : memref<1x128x128xf32, #tpu.memory_space<vmem>>, vector<1x128x128xf32>
    %75 = vector.shape_cast %74 : vector<1x128x128xf32> to vector<128x128xf32>
    %cst_34 = arith.constant dense<0.000000e+00> : vector<128x128xf32>
    %76 = tpu.matmul %73, %75, %cst_34 {dimension_numbers = #tpu.dot_dimension_numbers<[1], [0], [0], [1], [0, 0, 1, 1], [], []>} : vector<128x128xf32>, vector<128x128xf32>, vector<128x128xf32> -> vector<128x128xf32>
    %c0_35 = arith.constant 0 : index
    %c0_36 = arith.constant 0 : index
    %c0_37 = arith.constant 0 : index
    %77 = vector.load %arg16[%c0_35, %c0_36, %c0_37] : memref<1x1x128xf32, #tpu.memory_space<vmem>>, vector<1x1x128xf32>
    %78 = vector.shape_cast %77 : vector<1x1x128xf32> to vector<1x128xf32>
    %79 = vector.broadcast %78 : vector<1x128xf32> to vector<128x128xf32>
    %80 = arith.addf %76, %79 : vector<128x128xf32>
    %81 = arith.negf %80 : vector<128x128xf32>
    %82 = math.exp %81 : vector<128x128xf32>
    %cst_38 = arith.constant 1.000000e+00 : f32
    %83 = vector.broadcast %cst_38 : f32 to vector<128x128xf32>
    %84 = arith.addf %83, %82 : vector<128x128xf32>
    %85 = arith.divf %83, %84 : vector<128x128xf32>
    %86 = arith.mulf %80, %85 : vector<128x128xf32>
    %c0_39 = arith.constant 0 : index
    %c0_40 = arith.constant 0 : index
    %87 = vector.load %arg17[%c0_39, %c0_40] : memref<1x128xf32, #tpu.memory_space<vmem>>, vector<1x128xf32>
    %88 = vector.broadcast %87 : vector<1x128xf32> to vector<128x128xf32>
    %89 = arith.mulf %86, %88 : vector<128x128xf32>
    %cst_41 = arith.constant dense<0.000000e+00> : vector<128xf32>
    %90 = vector.multi_reduction <add>, %89, %cst_41 [1] : vector<128x128xf32> to vector<128xf32>
    %91 = vector.shape_cast %90 : vector<128xf32> to vector<128x1xf32>
    %92 = vector.broadcast %91 : vector<128x1xf32> to vector<128x8xf32>
    %93 = arith.mulf %27, %92 : vector<128x8xf32>
    %c0_42 = arith.constant 0 : index
    %c0_43 = arith.constant 0 : index
    %94 = vector.load %arg34[%c0_42, %c0_43] : memref<16x8xf32, #tpu.memory_space<vmem>>, vector<16x8xf32>
    %cst_44 = arith.constant dense<0.000000e+00> : vector<16x8xf32>
    %95 = tpu.matmul %24, %93, %cst_44 {dimension_numbers = #tpu.dot_dimension_numbers<[1], [0], [0], [1], [0, 0, 1, 1], [], []>} : vector<16x128xf32>, vector<128x8xf32>, vector<16x8xf32> -> vector<16x8xf32>
    %96 = arith.addf %94, %95 : vector<16x8xf32>
    %c0_45 = arith.constant 0 : index
    %c0_46 = arith.constant 0 : index
    %97 = vector.load %arg34[%c0_45, %c0_46] : memref<16x8xf32, #tpu.memory_space<vmem>>, vector<16x8xf32>
    tpu.vector_store %arg34[%c0_45, %c0_46], %96 {strides = array<i32>} : memref<16x8xf32, #tpu.memory_space<vmem>>, vector<16x8xf32>,
    %c0_47 = arith.constant 0 : index
    %c0_48 = arith.constant 0 : index
    %98 = vector.load %arg33[%c0_47, %c0_48] : memref<16x128xf32, #tpu.memory_space<vmem>>, vector<16x128xf32>
    %cst_49 = arith.constant dense<0.000000e+00> : vector<16x128xf32>
    %99 = tpu.matmul %24, %62, %cst_49 {dimension_numbers = #tpu.dot_dimension_numbers<[1], [0], [0], [1], [0, 0, 1, 1], [], []>} : vector<16x128xf32>, vector<128x128xf32>, vector<16x128xf32> -> vector<16x128xf32>
    %100 = arith.addf %98, %99 : vector<16x128xf32>
    %c0_50 = arith.constant 0 : index
    %c0_51 = arith.constant 0 : index
    %101 = vector.load %arg33[%c0_50, %c0_51] : memref<16x128xf32, #tpu.memory_space<vmem>>, vector<16x128xf32>
    tpu.vector_store %arg33[%c0_50, %c0_51], %100 {strides = array<i32>} : memref<16x128xf32, #tpu.memory_space<vmem>>, vector<16x128xf32>,
    %c1_i32 = arith.constant 1 : i32
    %102 = arith.cmpi eq, %arg0, %c1_i32 : i32
    %103 = arith.extui %102 : i1 to i32
    %c0_i32_52 = arith.constant 0 : i32
    %104 = arith.cmpi ne, %103, %c0_i32_52 : i32
    scf.if %104 {
      %c0_53 = arith.constant 0 : index
      %c0_54 = arith.constant 0 : index
      %105 = vector.load %arg6[%c0_53, %c0_54] : memref<16x1xf32, #tpu.memory_space<vmem>>, vector<16x1xf32>
      %c0_55 = arith.constant 0 : index
      %c0_56 = arith.constant 0 : index
      %106 = vector.load %arg30[%c0_55, %c0_56] : memref<16x128xf32, #tpu.memory_space<vmem>>, vector<16x128xf32>
      %c0_57 = arith.constant 0 : index
      %c0_58 = arith.constant 0 : index
      %107 = vector.load %arg33[%c0_57, %c0_58] : memref<16x128xf32, #tpu.memory_space<vmem>>, vector<16x128xf32>
      %108 = vector.broadcast %105 : vector<16x1xf32> to vector<16x128xf32>
      %109 = arith.mulf %107, %108 : vector<16x128xf32>
      %c0_59 = arith.constant 0 : index
      %c0_60 = arith.constant 0 : index
      %110 = vector.load %arg18[%c0_59, %c0_60] : memref<128x128xf32, #tpu.memory_space<vmem>>, vector<128x128xf32>
      %cst_61 = arith.constant dense<0.000000e+00> : vector<16x128xf32>
      %111 = tpu.matmul %106, %110, %cst_61 {dimension_numbers = #tpu.dot_dimension_numbers<[1], [0], [0], [1], [0, 0, 1, 1], [], []>} : vector<16x128xf32>, vector<128x128xf32>, vector<16x128xf32> -> vector<16x128xf32>
      %c0_62 = arith.constant 0 : index
      %c0_63 = arith.constant 0 : index
      %112 = vector.load %arg19[%c0_62, %c0_63] : memref<128x128xf32, #tpu.memory_space<vmem>>, vector<128x128xf32>
      %cst_64 = arith.constant dense<0.000000e+00> : vector<16x128xf32>
      %113 = tpu.matmul %109, %112, %cst_64 {dimension_numbers = #tpu.dot_dimension_numbers<[1], [0], [0], [1], [0, 0, 1, 1], [], []>} : vector<16x128xf32>, vector<128x128xf32>, vector<16x128xf32> -> vector<16x128xf32>
      %114 = arith.addf %111, %113 : vector<16x128xf32>
      %c0_65 = arith.constant 0 : index
      %c0_66 = arith.constant 0 : index
      %115 = vector.load %arg20[%c0_65, %c0_66] : memref<1x128xf32, #tpu.memory_space<vmem>>, vector<1x128xf32>
      %116 = vector.broadcast %115 : vector<1x128xf32> to vector<16x128xf32>
      %117 = arith.addf %114, %116 : vector<16x128xf32>
      %118 = arith.negf %117 : vector<16x128xf32>
      %119 = math.exp %118 : vector<16x128xf32>
      %cst_67 = arith.constant 1.000000e+00 : f32
      %120 = vector.broadcast %cst_67 : f32 to vector<16x128xf32>
      %121 = arith.addf %120, %119 : vector<16x128xf32>
      %122 = arith.divf %120, %121 : vector<16x128xf32>
      %123 = arith.mulf %117, %122 : vector<16x128xf32>
      %c0_68 = arith.constant 0 : index
      %c0_69 = arith.constant 0 : index
      %c0_70 = arith.constant 0 : index
      %124 = vector.load %arg21[%c0_68, %c0_69, %c0_70] : memref<1x128x128xf32, #tpu.memory_space<vmem>>, vector<1x128x128xf32>
      %125 = vector.shape_cast %124 : vector<1x128x128xf32> to vector<128x128xf32>
      %cst_71 = arith.constant dense<0.000000e+00> : vector<16x128xf32>
      %126 = tpu.matmul %123, %125, %cst_71 {dimension_numbers = #tpu.dot_dimension_numbers<[1], [0], [0], [1], [0, 0, 1, 1], [], []>} : vector<16x128xf32>, vector<128x128xf32>, vector<16x128xf32> -> vector<16x128xf32>
      %c0_72 = arith.constant 0 : index
      %c0_73 = arith.constant 0 : index
      %c0_74 = arith.constant 0 : index
      %127 = vector.load %arg22[%c0_72, %c0_73, %c0_74] : memref<1x1x128xf32, #tpu.memory_space<vmem>>, vector<1x1x128xf32>
      %128 = vector.shape_cast %127 : vector<1x1x128xf32> to vector<1x128xf32>
      %129 = vector.broadcast %128 : vector<1x128xf32> to vector<16x128xf32>
      %130 = arith.addf %126, %129 : vector<16x128xf32>
      %131 = arith.negf %130 : vector<16x128xf32>
      %132 = math.exp %131 : vector<16x128xf32>
      %cst_75 = arith.constant 1.000000e+00 : f32
      %133 = vector.broadcast %cst_75 : f32 to vector<16x128xf32>
      %134 = arith.addf %133, %132 : vector<16x128xf32>
      %135 = arith.divf %133, %134 : vector<16x128xf32>
      %136 = arith.mulf %130, %135 : vector<16x128xf32>
      %c0_76 = arith.constant 0 : index
      %c0_77 = arith.constant 0 : index
      %137 = vector.load %arg23[%c0_76, %c0_77] : memref<128x128xf32, #tpu.memory_space<vmem>>, vector<128x128xf32>
      %cst_78 = arith.constant dense<0.000000e+00> : vector<16x128xf32>
      %138 = tpu.matmul %136, %137, %cst_78 {dimension_numbers = #tpu.dot_dimension_numbers<[1], [0], [0], [1], [0, 0, 1, 1], [], []>} : vector<16x128xf32>, vector<128x128xf32>, vector<16x128xf32> -> vector<16x128xf32>
      %c0_79 = arith.constant 0 : index
      %c0_80 = arith.constant 0 : index
      %139 = vector.load %arg24[%c0_79, %c0_80] : memref<1x128xf32, #tpu.memory_space<vmem>>, vector<1x128xf32>
      %140 = vector.broadcast %139 : vector<1x128xf32> to vector<16x128xf32>
      %141 = arith.addf %138, %140 : vector<16x128xf32>
      %142 = arith.addf %106, %141 : vector<16x128xf32>
      %c0_81 = arith.constant 0 : index
      %c0_82 = arith.constant 0 : index
      %143 = vector.load %arg27[%c0_81, %c0_82] : memref<16x128xf32, #tpu.memory_space<vmem>>, vector<16x128xf32>
      tpu.vector_store %arg27[%c0_81, %c0_82], %142 {strides = array<i32>} : memref<16x128xf32, #tpu.memory_space<vmem>>, vector<16x128xf32>,
      %c0_83 = arith.constant 0 : index
      %c0_84 = arith.constant 0 : index
      %144 = vector.load %arg5[%c0_83, %c0_84] : memref<16x8xf32, #tpu.memory_space<vmem>>, vector<16x8xf32>
      %c0_85 = arith.constant 0 : index
      %c0_86 = arith.constant 0 : index
      %145 = vector.load %arg34[%c0_85, %c0_86] : memref<16x8xf32, #tpu.memory_space<vmem>>, vector<16x8xf32>
      %146 = vector.broadcast %105 : vector<16x1xf32> to vector<16x8xf32>
      %147 = arith.mulf %145, %146 : vector<16x8xf32>
      %148 = arith.addf %144, %147 : vector<16x8xf32>
      %c0_87 = arith.constant 0 : index
      %c0_88 = arith.constant 0 : index
      %149 = vector.load %arg28[%c0_87, %c0_88] : memref<16x8xf32, #tpu.memory_space<vmem>>, vector<16x8xf32>
      tpu.vector_store %arg28[%c0_87, %c0_88], %148 {strides = array<i32>} : memref<16x8xf32, #tpu.memory_space<vmem>>, vector<16x8xf32>,
      %c0_89 = arith.constant 0 : index
      %c0_90 = arith.constant 0 : index
      %150 = vector.load %arg25[%c0_89, %c0_90] : memref<128x128xf32, #tpu.memory_space<vmem>>, vector<128x128xf32>
      %cst_91 = arith.constant dense<0.000000e+00> : vector<16x128xf32>
      %151 = tpu.matmul %142, %150, %cst_91 {dimension_numbers = #tpu.dot_dimension_numbers<[1], [0], [0], [1], [0, 0, 1, 1], [], []>} : vector<16x128xf32>, vector<128x128xf32>, vector<16x128xf32> -> vector<16x128xf32>
      %c0_92 = arith.constant 0 : index
      %c0_93 = arith.constant 0 : index
      %152 = vector.load %arg26[%c0_92, %c0_93] : memref<1x128xf32, #tpu.memory_space<vmem>>, vector<1x128xf32>
      %153 = vector.broadcast %152 : vector<1x128xf32> to vector<16x128xf32>
      %154 = arith.addf %151, %153 : vector<16x128xf32>
      %c0_94 = arith.constant 0 : index
      %c0_95 = arith.constant 0 : index
      %155 = vector.load %arg29[%c0_94, %c0_95] : memref<16x128xf32, #tpu.memory_space<vmem>>, vector<16x128xf32>
      tpu.vector_store %arg29[%c0_94, %c0_95], %154 {strides = array<i32>} : memref<16x128xf32, #tpu.memory_space<vmem>>, vector<16x128xf32>,
    } else {
    }
    return
  }
  func.func @transform_0(%arg0: i32) -> (i32, i32) {
    %c0_i32 = arith.constant 0 : i32
    %c0_i32_0 = arith.constant 0 : i32
    %c0_i32_1 = arith.constant 0 : i32
    return %c0_i32, %c0_i32_0 : i32, i32
  }
  func.func @transform_1(%arg0: i32) -> (i32, i32) {
    %c0_i32 = arith.constant 0 : i32
    %c0_i32_0 = arith.constant 0 : i32
    %c0_i32_1 = arith.constant 0 : i32
    return %c0_i32, %c0_i32_0 : i32, i32
  }
  func.func @transform_2(%arg0: i32) -> (i32, i32) {
    %c0_i32 = arith.constant 0 : i32
    %c0_i32_0 = arith.constant 0 : i32
    %c0_i32_1 = arith.constant 0 : i32
    return %c0_i32, %c0_i32_0 : i32, i32
  }
  func.func @transform_3(%arg0: i32) -> (i32, i32) {
    %c0_i32 = arith.constant 0 : i32
    %c0_i32_0 = arith.constant 0 : i32
    %c0_i32_1 = arith.constant 0 : i32
    return %c0_i32, %c0_i32_0 : i32, i32
  }
  func.func @transform_4(%arg0: i32) -> (i32, i32) {
    %c0_i32 = arith.constant 0 : i32
    %c0_i32_0 = arith.constant 0 : i32
    %c0_i32_1 = arith.constant 0 : i32
    return %c0_i32, %c0_i32_0 : i32, i32
  }
  func.func @transform_5(%arg0: i32) -> (i32, i32) {
    %c0_i32 = arith.constant 0 : i32
    %c0_i32_0 = arith.constant 0 : i32
    %c0_i32_1 = arith.constant 0 : i32
    return %c0_i32, %c0_i32_0 : i32, i32
  }
  func.func @transform_6(%arg0: i32) -> (i32, i32) {
    %c0_i32 = arith.constant 0 : i32
    %c0_i32_0 = arith.constant 0 : i32
    %c0_i32_1 = arith.constant 0 : i32
    return %c0_i32, %c0_i32_0 : i32, i32
  }
  func.func @transform_7(%arg0: i32) -> (i32, i32) {
    %c0_i32 = arith.constant 0 : i32
    %c0_i32_0 = arith.constant 0 : i32
    %c0_i32_1 = arith.constant 0 : i32
    return %c0_i32, %c0_i32_0 : i32, i32
  }
  func.func @transform_8(%arg0: i32) -> (i32, i32) {
    %c0_i32 = arith.constant 0 : i32
    %c0_i32_0 = arith.constant 0 : i32
    %c0_i32_1 = arith.constant 0 : i32
    return %c0_i32, %c0_i32_0 : i32, i32
  }
  func.func @transform_9(%arg0: i32) -> (i32, i32) {
    %c0_i32 = arith.constant 0 : i32
    %c0_i32_0 = arith.constant 0 : i32
    %c0_i32_1 = arith.constant 0 : i32
    return %c0_i32, %c0_i32_0 : i32, i32
  }
  func.func @transform_10(%arg0: i32) -> (i32, i32, i32) {
    %c0_i32 = arith.constant 0 : i32
    %c0_i32_0 = arith.constant 0 : i32
    %c0_i32_1 = arith.constant 0 : i32
    %c0_i32_2 = arith.constant 0 : i32
    return %c0_i32, %c0_i32_0, %c0_i32_1 : i32, i32, i32
  }
  func.func @transform_11(%arg0: i32) -> (i32, i32, i32) {
    %c0_i32 = arith.constant 0 : i32
    %c0_i32_0 = arith.constant 0 : i32
    %c0_i32_1 = arith.constant 0 : i32
    %c0_i32_2 = arith.constant 0 : i32
    return %c0_i32, %c0_i32_0, %c0_i32_1 : i32, i32, i32
  }
  func.func @transform_12(%arg0: i32) -> (i32, i32) {
    %c0_i32 = arith.constant 0 : i32
    %c0_i32_0 = arith.constant 0 : i32
    %c0_i32_1 = arith.constant 0 : i32
    return %c0_i32, %c0_i32_0 : i32, i32
  }
  func.func @transform_13(%arg0: i32) -> (i32, i32) {
    %c0_i32 = arith.constant 0 : i32
    %c0_i32_0 = arith.constant 0 : i32
    %c0_i32_1 = arith.constant 0 : i32
    return %c0_i32, %c0_i32_0 : i32, i32
  }
  func.func @transform_14(%arg0: i32) -> (i32, i32, i32) {
    %c0_i32 = arith.constant 0 : i32
    %c0_i32_0 = arith.constant 0 : i32
    %c0_i32_1 = arith.constant 0 : i32
    %c0_i32_2 = arith.constant 0 : i32
    return %c0_i32, %c0_i32_0, %c0_i32_1 : i32, i32, i32
  }
  func.func @transform_15(%arg0: i32) -> (i32, i32, i32) {
    %c0_i32 = arith.constant 0 : i32
    %c0_i32_0 = arith.constant 0 : i32
    %c0_i32_1 = arith.constant 0 : i32
    %c0_i32_2 = arith.constant 0 : i32
    return %c0_i32, %c0_i32_0, %c0_i32_1 : i32, i32, i32
  }
  func.func @transform_16(%arg0: i32) -> (i32, i32) {
    %c0_i32 = arith.constant 0 : i32
    %c0_i32_0 = arith.constant 0 : i32
    %c0_i32_1 = arith.constant 0 : i32
    return %c0_i32, %c0_i32_0 : i32, i32
  }
  func.func @transform_17(%arg0: i32) -> (i32, i32) {
    %c0_i32 = arith.constant 0 : i32
    %c0_i32_0 = arith.constant 0 : i32
    %c0_i32_1 = arith.constant 0 : i32
    return %c0_i32, %c0_i32_0 : i32, i32
  }
  func.func @transform_18(%arg0: i32) -> (i32, i32) {
    %c0_i32 = arith.constant 0 : i32
    %c0_i32_0 = arith.constant 0 : i32
    %c0_i32_1 = arith.constant 0 : i32
    return %c0_i32, %c0_i32_0 : i32, i32
  }
  func.func @transform_19(%arg0: i32) -> (i32, i32) {
    %c0_i32 = arith.constant 0 : i32
    %c0_i32_0 = arith.constant 0 : i32
    %c0_i32_1 = arith.constant 0 : i32
    return %c0_i32, %c0_i32_0 : i32, i32
  }
  func.func @transform_20(%arg0: i32) -> (i32, i32, i32) {
    %c0_i32 = arith.constant 0 : i32
    %c0_i32_0 = arith.constant 0 : i32
    %c0_i32_1 = arith.constant 0 : i32
    %c0_i32_2 = arith.constant 0 : i32
    return %c0_i32, %c0_i32_0, %c0_i32_1 : i32, i32, i32
  }
  func.func @transform_21(%arg0: i32) -> (i32, i32, i32) {
    %c0_i32 = arith.constant 0 : i32
    %c0_i32_0 = arith.constant 0 : i32
    %c0_i32_1 = arith.constant 0 : i32
    %c0_i32_2 = arith.constant 0 : i32
    return %c0_i32, %c0_i32_0, %c0_i32_1 : i32, i32, i32
  }
  func.func @transform_22(%arg0: i32) -> (i32, i32) {
    %c0_i32 = arith.constant 0 : i32
    %c0_i32_0 = arith.constant 0 : i32
    %c0_i32_1 = arith.constant 0 : i32
    return %c0_i32, %c0_i32_0 : i32, i32
  }
  func.func @transform_23(%arg0: i32) -> (i32, i32) {
    %c0_i32 = arith.constant 0 : i32
    %c0_i32_0 = arith.constant 0 : i32
    %c0_i32_1 = arith.constant 0 : i32
    return %c0_i32, %c0_i32_0 : i32, i32
  }
  func.func @transform_24(%arg0: i32) -> (i32, i32) {
    %c0_i32 = arith.constant 0 : i32
    %c0_i32_0 = arith.constant 0 : i32
    %c0_i32_1 = arith.constant 0 : i32
    return %c0_i32, %c0_i32_0 : i32, i32
  }
  func.func @transform_25(%arg0: i32) -> (i32, i32) {
    %c0_i32 = arith.constant 0 : i32
    %c0_i32_0 = arith.constant 0 : i32
    %c0_i32_1 = arith.constant 0 : i32
    return %c0_i32, %c0_i32_0 : i32, i32
  }
  func.func @transform_26(%arg0: i32) -> (i32, i32) {
    %c0_i32 = arith.constant 0 : i32
    %c0_i32_0 = arith.constant 0 : i32
    %c0_i32_1 = arith.constant 0 : i32
    return %c0_i32, %c0_i32_0 : i32, i32
  }
  func.func @transform_27(%arg0: i32) -> (i32, i32) {
    %c0_i32 = arith.constant 0 : i32
    %c0_i32_0 = arith.constant 0 : i32
    %c0_i32_1 = arith.constant 0 : i32
    return %c0_i32, %c0_i32_0 : i32, i32
  }
  func.func @transform_28(%arg0: i32) -> (i32, i32) {
    %c0_i32 = arith.constant 0 : i32
    %c0_i32_0 = arith.constant 0 : i32
    %c0_i32_1 = arith.constant 0 : i32
    return %c0_i32, %c0_i32_0 : i32, i32
  }
}

</mosaic_0001>

<bundles_post_ra>
// kernel: egnn_forward.2
= control target key start
LH: loop header
LB: loop body
LE: loop exit
PB: predicated region body
PF: predicated region fallthrough
CT: control target
= control target key end

     0   :  { %s8794_s0 = inlined_call_operand.hbm [shape: s32[256,1], index: 0, kind: input, shape index: {}]   ;;  %s8795_s1 = inlined_call_operand.hbm [shape: s32[256,1], index: 1, kind: input, shape index: {}]   ;;  %s8796_s2 = inlined_call_operand.hbm [shape: s32[1,256], index: 2, kind: input, shape index: {}]   ;;  %s8797_s3 = inlined_call_operand.hbm [shape: f32[16,128], index: 3, kind: input, shape index: {}]   ;;  %s8798_s4 = inlined_call_operand.hbm [shape: f32[16,8], index: 4, kind: input, shape index: {}]   ;;  %s8799_s5 = inlined_call_operand.hbm [shape: f32[16,1], index: 5, kind: input, shape index: {}]   ;;  %s8800_s6 = inlined_call_operand.hbm [shape: f32[128,128], index: 6, kind: input, shape index: {}]   ;;  %s8801_s7 = inlined_call_operand.hbm [shape: f32[1,128], index: 7, kind: input, shape index: {}]   ;;  %s8802_s8 = inlined_call_operand.hbm [shape: f32[128,128], index: 8, kind: input, shape index: {}]   ;;  %s8803_s9 = inlined_call_operand.hbm [shape: f32[128,128], index: 9, kind: input, shape index: {}]   ;;  %s8804_s10 = inlined_call_operand.hbm [shape: f32[1,128], index: 10, kind: input, shape index: {}]   ;;  %s8805_s11 = inlined_call_operand.hbm [shape: f32[1,128], index: 11, kind: input, shape index: {}]   ;;  %s8806_s12 = inlined_call_operand.hbm [shape: f32[1,128,128], index: 12, kind: input, shape index: {}]   ;;  %s8807_s13 = inlined_call_operand.hbm [shape: f32[1,1,128], index: 13, kind: input, shape index: {}]   ;;  %s8808_s14 = inlined_call_operand.hbm [shape: f32[128,128], index: 14, kind: input, shape index: {}]   ;;  %s8809_s15 = inlined_call_operand.hbm [shape: f32[1,128], index: 15, kind: input, shape index: {}]   ;;  %s8810_s16 = inlined_call_operand.hbm [shape: f32[1,128,128], index: 16, kind: input, shape index: {}]   ;;  %s8811_s17 = inlined_call_operand.hbm [shape: f32[1,1,128], index: 17, kind: input, shape index: {}]   ;;  %s8812_s18 = inlined_call_operand.hbm [shape: f32[1,128], index: 18, kind: input, shape index: {}]   ;;  %s8813_s19 = inlined_call_operand.hbm [shape: f32[128,128], index: 19, kind: input, shape index: {}]   ;;  %s8814_s20 = inlined_call_operand.hbm [shape: f32[128,128], index: 20, kind: input, shape index: {}]   ;;  %s8815_s21 = inlined_call_operand.hbm [shape: f32[1,128], index: 21, kind: input, shape index: {}]   ;;  %s8816_s22 = inlined_call_operand.hbm [shape: f32[1,128,128], index: 22, kind: input, shape index: {}]   ;;  %s8817_s23 = inlined_call_operand.hbm [shape: f32[1,1,128], index: 23, kind: input, shape index: {}]   ;;  %s8818_s24 = inlined_call_operand.hbm [shape: f32[128,128], index: 24, kind: input, shape index: {}]   ;;  %s8819_s25 = inlined_call_operand.hbm [shape: f32[1,128], index: 25, kind: input, shape index: {}]   ;;  %s8820_s26 = inlined_call_operand.hbm [shape: f32[16,128], index: 26, kind: output, shape index: {0}]   ;;  %s8821_s27 = inlined_call_operand.hbm [shape: f32[16,8], index: 27, kind: output, shape index: {1}]  }
   0x1   :  { %8858 = sst [smem:[#allocation70_spill]] %s8794_s0 }
   0x2   :  { %8859 = sst [smem:[#allocation71_spill]] %s8795_s1 }
   0x3   :  { %8860 = sst [smem:[#allocation72_spill]] %s8796_s2 }
   0x4   :  { %8861 = sst [smem:[#allocation73_spill]] %s8797_s3 }
   0x5   :  { %8862 = sst [smem:[#allocation74_spill]] %s8798_s4 }
   0x6   :  { %8863 = sst [smem:[#allocation75_spill]] %s8799_s5 }
   0x7   :  { %8864 = sst [smem:[#allocation76_spill]] %s8800_s6 }
   0x8   :  { %8865 = sst [smem:[#allocation77_spill]] %s8801_s7 }
   0x9   :  { %8866 = sst [smem:[#allocation78_spill]] %s8802_s8 }
   0xa   :  { %8867 = sst [smem:[#allocation79_spill]] %s8803_s9 }
   0xb   :  { %8868 = sst [smem:[#allocation80_spill]] %s8804_s10 }
   0xc   :  { %8869 = sst [smem:[#allocation81_spill]] %s8805_s11 }
   0xd   :  { %8870 = sst [smem:[#allocation82_spill]] %s8807_s13 }
   0xe   :  { %8871 = sst [smem:[#allocation83_spill]] %s8809_s15 }
   0xf   :  { %8872 = sst [smem:[#allocation84_spill]] %s8811_s17 }
  0x10   :  { %8873 = sst [smem:[#allocation85_spill]] %s8818_s24 }
  0x11   :  { %8874 = sst [smem:[#allocation86_spill]] %s8819_s25 }
  0x12   :  { %8875 = sst [smem:[#allocation87_spill]] %s8820_s26 }
  0x13   :  { %8876 = sst [smem:[#allocation88_spill]] %s8821_s27 }
  0x14   :  { %33 = vsyncpa [#allocation8], 0 }
  0x15   :  { %34 = vsyncpa [#allocation11], 0 }
  0x16   :  { %35 = vsyncpa [#allocation14], 0 }
  0x17   :  { %36 = vsyncpa [#allocation17], 0 }
  0x18   :  { %37 = vsyncpa [#allocation20], 0 }
  0x19   :  { %38 = vsyncpa [#allocation23], 0 }
  0x1a   :  { %39 = vsyncpa [#allocation26], 0 }
  0x1b   :  { %40 = vsyncpa [#allocation29], 0 }
  0x1c   :  { %41 = vsyncpa [#allocation32], 0 }
  0x1d   :  { %42 = vsyncpa [#allocation35], 0 }
  0x1e   :  { %43 = vsyncpa [#allocation38], 0 }
  0x1f   :  { %44 = vsyncpa [#allocation41], 0 }
  0x20   :  { %45 = vsyncpa [#allocation44], 0 }
  0x21   :  { %46 = vsyncpa [#allocation47], 0 }
  0x22   :  { %47 = vsyncpa [#allocation9], 0 }
  0x23   :  { %48 = vsyncpa [#allocation50], 0  ;;  %s7483_s7 = smov 0  }
  0x24 LB: > { %8877 = sst [smem:[#allocation67_spill]] %s7304_s7  ;;  %s7489_s4 = sadd.s32 4294967295, %s7304_s7   ;;  %s7304_s7 = sphi %s7483_s7, %s54_s7  }
  0x25   : > { %8878 = sst [smem:[#allocation68_spill]] %s7489_s4  ;;  %p4366_p0 = scmp.ge.s32.totalorder %s7304_s7, 1 }
  0x26   : > { %p647_p1 = scmp.lt.s32.totalorder %s7304_s7, 3  ;;  %p8844_p3 = scmp.eq.s32.totalorder %s7489_s4, 0 }
  0x27   : > { %s7306_s30 = smov [#allocation10]   ;;  %s7307_s5 = smov [#allocation13]  }
  0x28   : > { %p7495_p4 = pnand %p4366_p0, %p647_p1  ;;  %s672_s9 = sshll.u32 %s7306_s30, 4  ;;  %s7499_s9 = int_to_ptr.vmem [resolvable:$true] %s672_s9 }
  0x29   : > { %s696_s28 = sshll.u32 %s7307_s5, 4  ;;  %s7308_s10 = smov [#allocation16]   ;;  %s7503_s28 = int_to_ptr.vmem [resolvable:$true] %s696_s28 }
  0x2a   : > { %s8879_s8 = scalar_select %p7495_p4, 1, 0 }
  0x2b   : > { %p5999_p5 = pneg %p7495_p4  ;;  %s722_s29 = sshll.u32 %s7308_s10, 4  ;;  %s7511_s29 = int_to_ptr.vmem [resolvable:$true] %s722_s29 }
  0x2c   : > { %8880 = sst [smem:[#allocation69_spill]] %s8879_s8  ;;  %s7309_s1 = smov [#allocation19]  }
  0x2d   : > { %p7507_p6 = pnand %p8844_p3, %p5999_p5  ;;  %s7513_s6 = sshll.u32 %s7309_s1, 4  ;;  %s750_s6 = int_to_ptr.vmem [resolvable:$true] %s7513_s6 }
  0x2e   : > { %s8882_s3 = sld [smem:[#allocation71_spill]] }
  0x2f   : > { %p7523_p8 = pneg %p7507_p6 }
  0x34   : > { %s6454_s30 = scalar_lea.hbm %s8882_s3, 4096 }
  0x35   : > { %p6455_p7 = scmp.ne.s32.totalorder %s8882_s3, %s6454_s30  ;;  %p6461_p11 = scmp.lt.u32.totalorder %s6454_s30, %s8882_s3 }
  0x37   : > { %p6457_p9 = pnand %p7523_p8, %p6455_p7 }
  0x39   : > { %p6458_p10 = pneg %p6457_p9 }
  0x3b   : > { %p6463_p12 = pnand %p6461_p11, %p6458_p10 }
  0x3d   : > { %6466 = shalt.err (!%p6463_p12)
}
  0x3e   : > { %s6467_s7 = scalar_lea.vmem %s7499_s9, 4096  ;;  %p6475_p5 = scmp.lt.s32.totalorder %s7499_s9, %s7499_s9 }
  0x3f   : > { %p6468_p13 = scmp.ne.s32.totalorder %s7499_s9, %s6467_s7  ;;  %p6476_p2 = scmp.lt.s32.totalorder %s6467_s7, %s6467_s7 }
  0x41   : > { %p6470_p0 = pnand %p6468_p13, %p7523_p8  ;;  %p6477_p7 = por %p6476_p2, %p6475_p5 }
  0x43   : > { %p6471_p1 = pneg %p6470_p0 }
  0x45   : > { %p6478_p9 = pnand %p6477_p7, %p6471_p1 }
  0x47   : > { %6481 = shalt.err (!%p6478_p9)
}
  0x48   : > { %s8846_s11 = smov 128   ;;  %s8848_s2 = smov 8  }
  0x49   : > { %6005 = dma.hbm_to_vmem [thread:$0]  (!%p7507_p6), %s8882_s3, 4096, %s7499_s9, [#allocation11], %s8846_s11, %s8846_s11, %s8848_s2  }
  0x4a   : > { %s8884_s26 = sld [smem:[#allocation73_spill]] }
  0x50   : > { %s6482_s7 = scalar_lea.hbm %s8884_s26, 256 }
  0x51   : > { %p6483_p2 = scmp.ne.s32.totalorder %s8884_s26, %s6482_s7  ;;  %p6489_p12 = scmp.lt.u32.totalorder %s6482_s7, %s8884_s26 }
  0x53   : > { %p6485_p10 = pnand %p6483_p2, %p7523_p8 }
  0x55   : > { %p6486_p11 = pneg %p6485_p10 }
  0x57   : > { %p6491_p13 = pnand %p6489_p12, %p6486_p11 }
  0x59   : > { %6494 = shalt.err (!%p6491_p13)
}
  0x5a   : > { %s6495_s9 = scalar_lea.vmem %s7503_s28, 256  ;;  %p6503_p7 = scmp.lt.s32.totalorder %s7503_s28, %s7503_s28 }
  0x5b   : > { %p6496_p0 = scmp.ne.s32.totalorder %s7503_s28, %s6495_s9  ;;  %p6504_p9 = scmp.lt.s32.totalorder %s6495_s9, %s6495_s9 }
  0x5d   : > { %p6498_p1 = pnand %p6496_p0, %p7523_p8  ;;  %p6505_p2 = por %p6504_p9, %p6503_p7 }
  0x5f   : > { %p6499_p5 = pneg %p6498_p1 }
  0x61   : > { %p6506_p10 = pnand %p6505_p2, %p6499_p5 }
  0x63   : > { %6509 = shalt.err (!%p6506_p10)
}
  0x64   : > { %6011 = dma.hbm_to_vmem [thread:$0]  (!%p7507_p6), %s8884_s26, 256, %s7503_s28, [#allocation14], %s8846_s11, %s8846_s11, %s8848_s2  }
  0x65   : > { %s8885_s30 = sld [smem:[#allocation75_spill]] }
  0x6b   : > { %s6510_s5 = scalar_lea.hbm %s8885_s30, 256 }
  0x6c   : > { %p6511_p11 = scmp.ne.s32.totalorder %s8885_s30, %s6510_s5  ;;  %p6517_p0 = scmp.lt.u32.totalorder %s6510_s5, %s8885_s30 }
  0x6e   : > { %p6513_p12 = pnand %p6511_p11, %p7523_p8 }
  0x70   : > { %p6514_p13 = pneg %p6513_p12 }
  0x72   : > { %p6519_p1 = pnand %p6517_p0, %p6514_p13 }
  0x74   : > { %6522 = shalt.err (!%p6519_p1)
}
  0x75   : > { %s6523_s28 = scalar_lea.vmem %s7511_s29, 256  ;;  %p6531_p2 = scmp.lt.s32.totalorder %s7511_s29, %s7511_s29 }
  0x76   : > { %p6524_p5 = scmp.ne.s32.totalorder %s7511_s29, %s6523_s28  ;;  %p6532_p10 = scmp.lt.s32.totalorder %s6523_s28, %s6523_s28 }
  0x78   : > { %p6526_p7 = pnand %p6524_p5, %p7523_p8  ;;  %p6533_p11 = por %p6532_p10, %p6531_p2 }
  0x7a   : > { %p6527_p9 = pneg %p6526_p7 }
  0x7c   : > { %p6534_p12 = pnand %p6533_p11, %p6527_p9 }
  0x7e   : > { %6537 = shalt.err (!%p6534_p12)
}
  0x7f   : > { %6017 = dma.hbm_to_vmem [thread:$0]  (!%p7507_p6), %s8885_s30, 256, %s7511_s29, [#allocation17], %s8846_s11, %s8846_s11, %s8848_s2  }
  0x80   : > { %s8886_s5 = sld [smem:[#allocation77_spill]] }
  0x86   : > { %s6538_s10 = scalar_lea.hbm %s8886_s5, 16 }
  0x87   : > { %p6539_p13 = scmp.ne.s32.totalorder %s8886_s5, %s6538_s10  ;;  %p6545_p5 = scmp.lt.u32.totalorder %s6538_s10, %s8886_s5 }
  0x89   : > { %p6541_p0 = pnand %p6539_p13, %p7523_p8 }
  0x8b   : > { %p6542_p1 = pneg %p6541_p0 }
  0x8d   : > { %p6547_p7 = pnand %p6545_p5, %p6542_p1 }
  0x8f   : > { %6550 = shalt.err (!%p6547_p7)
}
  0x90   : > { %s6551_s24 = scalar_lea.vmem %s750_s6, 16  ;;  %s6558_s29 = scalar_lea.vmem %s750_s6, 32 }
  0x91   : > { %p6552_p9 = scmp.ne.s32.totalorder %s750_s6, %s6551_s24  ;;  %p6559_p11 = scmp.lt.s32.totalorder %s750_s6, %s750_s6 }
  0x92   : > { %p6560_p12 = scmp.lt.s32.totalorder %s6558_s29, %s6551_s24 }
  0x93   : > { %p6554_p2 = pnand %p6552_p9, %p7523_p8 }
  0x94   : > { %p6561_p3 = por %p6560_p12, %p6559_p11 }
  0x95   : > { %p6555_p10 = pneg %p6554_p2 }
  0x97   : > { %p6562_p4 = pnand %p6561_p3, %p6555_p10 }
  0x99   : > { %6565 = shalt.err (!%p6562_p4)
}
  0x9a   : > { %6023 = dma.hbm_to_vmem [thread:$0]  (!%p7507_p6), %s8886_s5, 16, %s750_s6, [#allocation20]  }
  0x9b   : > { %s7312_s8 = smov [#allocation22]   ;;  %s7313_s1 = smov [#allocation25]  }
  0x9c   : > { %s772_s10 = sshll.u32 %s7312_s8, 4  ;;  %s797_s7 = sshll.u32 %s7313_s1, 4  ;;  %s773_s10 = int_to_ptr.vmem [resolvable:$true] %s772_s10  ;;  %s798_s7 = int_to_ptr.vmem [resolvable:$true] %s797_s7 }
  0x9d   : > { %s8887_s11 = sld [smem:[#allocation79_spill]] }
  0xa3   : > { %s6566_s2 = scalar_lea.hbm %s8887_s11, 2048 }
  0xa4   : > { %p6567_p3 = scmp.ne.s32.totalorder %s8887_s11, %s6566_s2  ;;  %p6573_p0 = scmp.lt.u32.totalorder %s6566_s2, %s8887_s11 }
  0xa6   : > { %p6569_p4 = pnand %p6567_p3, %p7523_p8 }
  0xa8   : > { %p6570_p13 = pneg %p6569_p4 }
  0xaa   : > { %p6575_p1 = pnand %p6573_p0, %p6570_p13 }
  0xac   : > { %6578 = shalt.err (!%p6575_p1)
}
  0xad   : > { %s6579_s6 = scalar_lea.vmem %s773_s10, 2048  ;;  %p6587_p2 = scmp.lt.s32.totalorder %s773_s10, %s773_s10 }
  0xae   : > { %p6580_p5 = scmp.ne.s32.totalorder %s773_s10, %s6579_s6  ;;  %p6588_p10 = scmp.lt.s32.totalorder %s6579_s6, %s6579_s6 }
  0xb0   : > { %p6582_p7 = pnand %p6580_p5, %p7523_p8  ;;  %p6589_p11 = por %p6588_p10, %p6587_p2 }
  0xb2   : > { %p6583_p9 = pneg %p6582_p7 }
  0xb4   : > { %p6590_p12 = pnand %p6589_p11, %p6583_p9 }
  0xb6   : > { %6593 = shalt.err (!%p6590_p12)
}
  0xb7   : > { %s8888_s4 = smov 8   ;;  %s8889_s8 = smov 128  }
  0xb8   : > { %6029 = dma.hbm_to_vmem [thread:$0]  (!%p7507_p6), %s8887_s11, 2048, %s773_s10, [#allocation23], %s8889_s8, %s8889_s8, %s8888_s4  }
  0xb9   : > { %s8890_s28 = sld [smem:[#allocation81_spill]] }
  0xbf   : > { %s6594_s24 = scalar_lea.hbm %s8890_s28, 16 }
  0xc0   : > { %p6595_p3 = scmp.ne.s32.totalorder %s8890_s28, %s6594_s24  ;;  %p6601_p0 = scmp.lt.u32.totalorder %s6594_s24, %s8890_s28 }
  0xc2   : > { %p6597_p4 = pnand %p6595_p3, %p7523_p8 }
  0xc4   : > { %p6598_p13 = pneg %p6597_p4 }
  0xc6   : > { %p6603_p1 = pnand %p6601_p0, %p6598_p13 }
  0xc8   : > { %6606 = shalt.err (!%p6603_p1)
}
  0xc9   : > { %s6607_s3 = scalar_lea.vmem %s798_s7, 16  ;;  %s6614_s10 = scalar_lea.vmem %s798_s7, 32 }
  0xca   : > { %p6608_p5 = scmp.ne.s32.totalorder %s798_s7, %s6607_s3  ;;  %p6615_p2 = scmp.lt.s32.totalorder %s798_s7, %s798_s7 }
  0xcb   : > { %p6616_p10 = scmp.lt.s32.totalorder %s6614_s10, %s6607_s3 }
  0xcc   : > { %p6610_p7 = pnand %p6608_p5, %p7523_p8 }
  0xcd   : > { %p6617_p11 = por %p6616_p10, %p6615_p2 }
  0xce   : > { %p6611_p9 = pneg %p6610_p7 }
  0xd0   : > { %p6618_p12 = pnand %p6617_p11, %p6611_p9 }
  0xd2   : > { %6621 = shalt.err (!%p6618_p12)
}
  0xd3   : > { %6035 = dma.hbm_to_vmem [thread:$0]  (!%p7507_p6), %s8890_s28, 16, %s798_s7, [#allocation26]  }
  0xd4   : > { %s7314_s5 = smov [#allocation28]   ;;  %s7315_s24 = smov [#allocation31]  }
  0xd5   : > { %s821_s9 = sshll.u32 %s7314_s5, 4  ;;  %s845_s29 = sshll.u32 %s7315_s24, 4  ;;  %s822_s9 = int_to_ptr.vmem [resolvable:$true] %s821_s9  ;;  %s846_s29 = int_to_ptr.vmem [resolvable:$true] %s845_s29 }
  0xd6   : > { %s8891_s13 = sld [smem:[#allocation82_spill]] }
  0xdc   : > { %s6622_s11 = scalar_lea.hbm %s8891_s13, 16 }
  0xdd   : > { %p6623_p3 = scmp.ne.s32.totalorder %s8891_s13, %s6622_s11  ;;  %p6629_p0 = scmp.lt.u32.totalorder %s6622_s11, %s8891_s13 }
  0xdf   : > { %p6625_p4 = pnand %p6623_p3, %p7523_p8 }
  0xe1   : > { %p6626_p13 = pneg %p6625_p4 }
  0xe3   : > { %p6631_p1 = pnand %p6629_p0, %p6626_p13 }
  0xe5   : > { %6634 = shalt.err (!%p6631_p1)
}
  0xe6   : > { %s6635_s7 = scalar_lea.vmem %s822_s9, 16  ;;  %s6642_s1 = scalar_lea.vmem %s822_s9, 32 }
  0xe7   : > { %p6636_p5 = scmp.ne.s32.totalorder %s822_s9, %s6635_s7  ;;  %p6643_p2 = scmp.lt.s32.totalorder %s822_s9, %s822_s9 }
  0xe8   : > { %p6644_p10 = scmp.lt.s32.totalorder %s6642_s1, %s6635_s7 }
  0xe9   : > { %p6638_p7 = pnand %p6636_p5, %p7523_p8 }
  0xea   : > { %p6645_p11 = por %p6644_p10, %p6643_p2 }
  0xeb   : > { %p6639_p9 = pneg %p6638_p7 }
  0xed   : > { %p6646_p12 = pnand %p6645_p11, %p6639_p9 }
  0xef   : > { %6649 = shalt.err (!%p6646_p12)
}
  0xf0   : > { %6041 = dma.hbm_to_vmem [thread:$0]  (!%p7507_p6), %s8891_s13, 16, %s822_s9, [#allocation29]  }
  0xf1   : > { %s8892_s15 = sld [smem:[#allocation83_spill]] }
  0xf7   : > { %s6650_s25 = scalar_lea.hbm %s8892_s15, 16 }
  0xf8   : > { %p6651_p3 = scmp.ne.s32.totalorder %s8892_s15, %s6650_s25  ;;  %p6657_p0 = scmp.lt.u32.totalorder %s6650_s25, %s8892_s15 }
  0xfa   : > { %p6653_p4 = pnand %p6651_p3, %p7523_p8 }
  0xfc   : > { %p6654_p13 = pneg %p6653_p4 }
  0xfe   : > { %p6659_p1 = pnand %p6657_p0, %p6654_p13 }
 0x100   : > { %6662 = shalt.err (!%p6659_p1)
}
 0x101   : > { %s6663_s7 = scalar_lea.vmem %s846_s29, 16  ;;  %s6670_s9 = scalar_lea.vmem %s846_s29, 32 }
 0x102   : > { %p6664_p5 = scmp.ne.s32.totalorder %s846_s29, %s6663_s7  ;;  %p6671_p2 = scmp.lt.s32.totalorder %s846_s29, %s846_s29 }
 0x103   : > { %p6672_p10 = scmp.lt.s32.totalorder %s6670_s9, %s6663_s7 }
 0x104   : > { %p6666_p7 = pnand %p6664_p5, %p7523_p8 }
 0x105   : > { %p6673_p11 = por %p6672_p10, %p6671_p2 }
 0x106   : > { %p6667_p9 = pneg %p6666_p7 }
 0x108   : > { %p6674_p12 = pnand %p6673_p11, %p6667_p9 }
 0x10a   : > { %6677 = shalt.err (!%p6674_p12)
}
 0x10b   : > { %6047 = dma.hbm_to_vmem [thread:$0]  (!%p7507_p6), %s8892_s15, 16, %s846_s29, [#allocation32]  }
 0x10c   : > { %s7316_s24 = smov [#allocation34]   ;;  %s7317_s11 = smov [#allocation37]  }
 0x10d   : > { %s869_s26 = sshll.u32 %s7316_s24, 4  ;;  %s890_s25 = sshll.u32 %s7317_s11, 4  ;;  %s870_s26 = int_to_ptr.vmem [resolvable:$true] %s869_s26  ;;  %s891_s25 = int_to_ptr.vmem [resolvable:$true] %s890_s25 }
 0x10e   : > { %s8893_s17 = sld [smem:[#allocation84_spill]] }
 0x114   : > { %s6678_s10 = scalar_lea.hbm %s8893_s17, 16 }
 0x115   : > { %p6679_p3 = scmp.ne.s32.totalorder %s8893_s17, %s6678_s10  ;;  %p6685_p0 = scmp.lt.u32.totalorder %s6678_s10, %s8893_s17 }
 0x117   : > { %p6681_p4 = pnand %p6679_p3, %p7523_p8 }
 0x119   : > { %p6682_p13 = pneg %p6681_p4 }
 0x11b   : > { %p6687_p1 = pnand %p6685_p0, %p6682_p13 }
 0x11d   : > { %6690 = shalt.err (!%p6687_p1)
}
 0x11e   : > { %s6691_s29 = scalar_lea.vmem %s870_s26, 16  ;;  %s6698_s5 = scalar_lea.vmem %s870_s26, 32 }
 0x11f   : > { %p6692_p5 = scmp.ne.s32.totalorder %s870_s26, %s6691_s29  ;;  %p6699_p2 = scmp.lt.s32.totalorder %s870_s26, %s870_s26 }
 0x120   : > { %p6700_p10 = scmp.lt.s32.totalorder %s6698_s5, %s6691_s29 }
 0x121   : > { %p6694_p7 = pnand %p6692_p5, %p7523_p8 }
 0x122   : > { %p6701_p11 = por %p6700_p10, %p6699_p2 }
 0x123   : > { %p6695_p9 = pneg %p6694_p7 }
 0x125   : > { %p6702_p12 = pnand %p6701_p11, %p6695_p9 }
 0x127   : > { %6705 = shalt.err (!%p6702_p12)
}
 0x128   : > { %6053 = dma.hbm_to_vmem [thread:$0]  (!%p7507_p6), %s8893_s17, 16, %s870_s26, [#allocation35]  }
 0x129   : > { %s6706_s10 = scalar_lea.hbm %s8813_s19, 2048 }
 0x12a   : > { %p6707_p3 = scmp.ne.s32.totalorder %s8813_s19, %s6706_s10  ;;  %p6713_p0 = scmp.lt.u32.totalorder %s6706_s10, %s8813_s19 }
 0x12c   : > { %p6709_p4 = pnand %p6707_p3, %p7523_p8 }
 0x12e   : > { %p6710_p13 = pneg %p6709_p4 }
 0x130   : > { %p6715_p1 = pnand %p6713_p0, %p6710_p13 }
 0x132   : > { %6718 = shalt.err (!%p6715_p1)
}
 0x133   : > { %s6719_s29 = scalar_lea.vmem %s891_s25, 2048  ;;  %p6727_p2 = scmp.lt.s32.totalorder %s891_s25, %s891_s25 }
 0x134   : > { %p6720_p5 = scmp.ne.s32.totalorder %s891_s25, %s6719_s29  ;;  %p6728_p10 = scmp.lt.s32.totalorder %s6719_s29, %s6719_s29 }
 0x136   : > { %p6722_p7 = pnand %p6720_p5, %p7523_p8  ;;  %p6729_p11 = por %p6728_p10, %p6727_p2 }
 0x138   : > { %p6723_p9 = pneg %p6722_p7 }
 0x13a   : > { %p6730_p12 = pnand %p6729_p11, %p6723_p9 }
 0x13c   : > { %6733 = shalt.err (!%p6730_p12)
}
 0x13d   : > { %6059 = dma.hbm_to_vmem [thread:$0]  (!%p7507_p6), %s8813_s19, 2048, %s891_s25, [#allocation38], %s8889_s8, %s8889_s8, %s8888_s4  }
 0x13e   : > { %s7318_s24 = smov [#allocation40]   ;;  %s7319_s6 = smov [#allocation43]  }
 0x13f   : > { %s917_s11 = sshll.u32 %s7318_s24, 4  ;;  %s941_s3 = sshll.u32 %s7319_s6, 4  ;;  %s918_s11 = int_to_ptr.vmem [resolvable:$true] %s917_s11  ;;  %s942_s3 = int_to_ptr.vmem [resolvable:$true] %s941_s3 }
 0x140   : > { %s6734_s7 = scalar_lea.hbm %s8815_s21, 16 }
 0x141   : > { %p6735_p3 = scmp.ne.s32.totalorder %s8815_s21, %s6734_s7  ;;  %p6741_p0 = scmp.lt.u32.totalorder %s6734_s7, %s8815_s21 }
 0x143   : > { %p6737_p4 = pnand %p6735_p3, %p7523_p8 }
 0x145   : > { %p6738_p13 = pneg %p6737_p4 }
 0x147   : > { %p6743_p1 = pnand %p6741_p0, %p6738_p13 }
 0x149   : > { %6746 = shalt.err (!%p6743_p1)
}
 0x14a   : > { %s6747_s25 = scalar_lea.vmem %s918_s11, 16  ;;  %s6754_s5 = scalar_lea.vmem %s918_s11, 32 }
 0x14b   : > { %p6748_p5 = scmp.ne.s32.totalorder %s918_s11, %s6747_s25  ;;  %p6755_p2 = scmp.lt.s32.totalorder %s918_s11, %s918_s11 }
 0x14c   : > { %p6756_p10 = scmp.lt.s32.totalorder %s6754_s5, %s6747_s25 }
 0x14d   : > { %p6750_p7 = pnand %p6748_p5, %p7523_p8 }
 0x14e   : > { %p6757_p11 = por %p6756_p10, %p6755_p2 }
 0x14f   : > { %p6751_p9 = pneg %p6750_p7 }
 0x151   : > { %p6758_p12 = pnand %p6757_p11, %p6751_p9 }
 0x153   : > { %6761 = shalt.err (!%p6758_p12)
}
 0x154   : > { %6065 = dma.hbm_to_vmem [thread:$0]  (!%p7507_p6), %s8815_s21, 16, %s918_s11, [#allocation41]  }
 0x155   : > { %s6762_s7 = scalar_lea.hbm %s8817_s23, 16 }
 0x156   : > { %p6763_p3 = scmp.ne.s32.totalorder %s8817_s23, %s6762_s7  ;;  %p6769_p0 = scmp.lt.u32.totalorder %s6762_s7, %s8817_s23 }
 0x158   : > { %p6765_p4 = pnand %p6763_p3, %p7523_p8 }
 0x15a   : > { %p6766_p13 = pneg %p6765_p4 }
 0x15c   : > { %p6771_p1 = pnand %p6769_p0, %p6766_p13 }
 0x15e   : > { %6774 = shalt.err (!%p6771_p1)
}
 0x15f   : > { %s6775_s25 = scalar_lea.vmem %s942_s3, 16  ;;  %s6782_s11 = scalar_lea.vmem %s942_s3, 32 }
 0x160   : > { %p6776_p5 = scmp.ne.s32.totalorder %s942_s3, %s6775_s25  ;;  %p6783_p2 = scmp.lt.s32.totalorder %s942_s3, %s942_s3 }
 0x161   : > { %p6784_p10 = scmp.lt.s32.totalorder %s6782_s11, %s6775_s25 }
 0x162   : > { %p6778_p7 = pnand %p6776_p5, %p7523_p8 }
 0x163   : > { %p6785_p11 = por %p6784_p10, %p6783_p2 }
 0x164   : > { %p6779_p9 = pneg %p6778_p7 }
 0x166   : > { %p6786_p12 = pnand %p6785_p11, %p6779_p9 }
 0x168   : > { %6789 = shalt.err (!%p6786_p12)
}
 0x169   : > { %6071 = dma.hbm_to_vmem [thread:$0]  (!%p7507_p6), %s8817_s23, 16, %s942_s3, [#allocation44]  }
 0x16a   : > { %s7320_s6 = smov [#allocation7]   ;;  %s7321_s2 = smov [#allocation12]  }
 0x16b   : > { %s659_s10 = sshll.u32 %s7320_s6, 4  ;;  %s686_s7 = sshll.u32 %s7321_s2, 4  ;;  %s660_s10 = int_to_ptr.vmem [resolvable:$true] %s659_s10  ;;  %s687_s7 = int_to_ptr.vmem [resolvable:$true] %s686_s7 }
 0x16c   : > { %s8894_s29 = sld [smem:[#allocation70_spill]] }
 0x172   : > { %s6790_s26 = scalar_lea.hbm %s8894_s29, 4096 }
 0x173   : > { %p6791_p3 = scmp.ne.s32.totalorder %s8894_s29, %s6790_s26  ;;  %p6797_p0 = scmp.lt.u32.totalorder %s6790_s26, %s8894_s29 }
 0x175   : > { %p6793_p4 = pnand %p6791_p3, %p7523_p8 }
 0x177   : > { %p6794_p13 = pneg %p6793_p4 }
 0x179   : > { %p6799_p1 = pnand %p6797_p0, %p6794_p13 }
 0x17b   : > { %6802 = shalt.err (!%p6799_p1)
}
 0x17c   : > { %s6803_s3 = scalar_lea.vmem %s660_s10, 4096  ;;  %p6811_p2 = scmp.lt.s32.totalorder %s660_s10, %s660_s10 }
 0x17d   : > { %p6804_p5 = scmp.ne.s32.totalorder %s660_s10, %s6803_s3  ;;  %p6812_p10 = scmp.lt.s32.totalorder %s6803_s3, %s6803_s3 }
 0x17f   : > { %p6806_p7 = pnand %p6804_p5, %p7523_p8  ;;  %p6813_p11 = por %p6812_p10, %p6811_p2 }
 0x181   : > { %p6807_p9 = pneg %p6806_p7 }
 0x183   : > { %p6814_p12 = pnand %p6813_p11, %p6807_p9 }
 0x185   : > { %6817 = shalt.err (!%p6814_p12)
}
 0x186   : > { %6002 = dma.hbm_to_vmem [thread:$0]  (!%p7507_p6), %s8894_s29, 4096, %s660_s10, [#allocation8], %s8889_s8, %s8889_s8, %s8888_s4  }
 0x187   : > { %s8895_s9 = sld [smem:[#allocation72_spill]] }
 0x18d   : > { %s6818_s1 = scalar_lea.hbm %s8895_s9, 32 }
 0x18e   : > { %p6819_p3 = scmp.ne.s32.totalorder %s8895_s9, %s6818_s1  ;;  %p6825_p0 = scmp.lt.u32.totalorder %s6818_s1, %s8895_s9 }
 0x190   : > { %p6821_p4 = pnand %p6819_p3, %p7523_p8 }
 0x192   : > { %p6822_p13 = pneg %p6821_p4 }
 0x194   : > { %p6827_p1 = pnand %p6825_p0, %p6822_p13 }
 0x196   : > { %6830 = shalt.err (!%p6827_p1)
}
 0x197   : > { %s6831_s3 = scalar_lea.vmem %s687_s7, 32  ;;  %p6839_p2 = scmp.lt.s32.totalorder %s687_s7, %s687_s7 }
 0x198   : > { %p6832_p5 = scmp.ne.s32.totalorder %s687_s7, %s6831_s3  ;;  %p6840_p10 = scmp.lt.s32.totalorder %s6831_s3, %s6831_s3 }
 0x19a   : > { %p6834_p7 = pnand %p6832_p5, %p7523_p8  ;;  %p6841_p11 = por %p6840_p10, %p6839_p2 }
 0x19c   : > { %p6835_p9 = pneg %p6834_p7 }
 0x19e   : > { %p6842_p12 = pnand %p6841_p11, %p6835_p9 }
 0x1a0   : > { %6845 = shalt.err (!%p6842_p12)
}
 0x1a1   : > { %6008 = dma.hbm_to_vmem [thread:$0]  (!%p7507_p6), %s8895_s9, 32, %s687_s7, [#allocation11]  }
 0x1a2   : > { %s7322_s24 = smov [#allocation15]   ;;  %s7323_s2 = smov [#allocation18]  }
 0x1a3   : > { %s709_s6 = sshll.u32 %s7322_s24, 4  ;;  %s735_s1 = sshll.u32 %s7323_s2, 4  ;;  %s710_s6 = int_to_ptr.vmem [resolvable:$true] %s709_s6  ;;  %s736_s1 = int_to_ptr.vmem [resolvable:$true] %s735_s1 }
 0x1a4   : > { %s8896_s11 = sld [smem:[#allocation74_spill]] }
 0x1aa   : > { %s6846_s5 = scalar_lea.hbm %s8896_s11, 256 }
 0x1ab   : > { %p6847_p3 = scmp.ne.s32.totalorder %s8896_s11, %s6846_s5  ;;  %p6853_p0 = scmp.lt.u32.totalorder %s6846_s5, %s8896_s11 }
 0x1ad   : > { %p6849_p4 = pnand %p6847_p3, %p7523_p8 }
 0x1af   : > { %p6850_p13 = pneg %p6849_p4 }
 0x1b1   : > { %p6855_p1 = pnand %p6853_p0, %p6850_p13 }
 0x1b3   : > { %6858 = shalt.err (!%p6855_p1)
}
 0x1b4   : > { %s6859_s7 = scalar_lea.vmem %s710_s6, 256  ;;  %p6867_p2 = scmp.lt.s32.totalorder %s710_s6, %s710_s6 }
 0x1b5   : > { %p6860_p5 = scmp.ne.s32.totalorder %s710_s6, %s6859_s7  ;;  %p6868_p10 = scmp.lt.s32.totalorder %s6859_s7, %s6859_s7 }
 0x1b7   : > { %p6862_p7 = pnand %p6860_p5, %p7523_p8  ;;  %p6869_p11 = por %p6868_p10, %p6867_p2 }
 0x1b9   : > { %p6863_p9 = pneg %p6862_p7 }
 0x1bb   : > { %p6870_p12 = pnand %p6869_p11, %p6863_p9 }
 0x1bd   : > { %6873 = shalt.err (!%p6870_p12)
}
 0x1be   : > { %6014 = dma.hbm_to_vmem [thread:$0]  (!%p7507_p6), %s8896_s11, 256, %s710_s6, [#allocation14], %s8889_s8, %s8889_s8, %s8888_s4  }
 0x1bf   : > { %s8897_s2 = sld [smem:[#allocation76_spill]] }
 0x1c5   : > { %s6874_s26 = scalar_lea.hbm %s8897_s2, 2048 }
 0x1c6   : > { %p6875_p3 = scmp.ne.s32.totalorder %s8897_s2, %s6874_s26  ;;  %p6881_p0 = scmp.lt.u32.totalorder %s6874_s26, %s8897_s2 }
 0x1c8   : > { %p6877_p4 = pnand %p6875_p3, %p7523_p8 }
 0x1ca   : > { %p6878_p13 = pneg %p6877_p4 }
 0x1cc   : > { %p6883_p1 = pnand %p6881_p0, %p6878_p13 }
 0x1ce   : > { %6886 = shalt.err (!%p6883_p1)
}
 0x1cf   : > { %s6887_s7 = scalar_lea.vmem %s736_s1, 2048  ;;  %p6895_p2 = scmp.lt.s32.totalorder %s736_s1, %s736_s1 }
 0x1d0   : > { %p6888_p5 = scmp.ne.s32.totalorder %s736_s1, %s6887_s7  ;;  %p6896_p10 = scmp.lt.s32.totalorder %s6887_s7, %s6887_s7 }
 0x1d2   : > { %p6890_p7 = pnand %p6888_p5, %p7523_p8  ;;  %p6897_p11 = por %p6896_p10, %p6895_p2 }
 0x1d4   : > { %p6891_p9 = pneg %p6890_p7 }
 0x1d6   : > { %p6898_p12 = pnand %p6897_p11, %p6891_p9 }
 0x1d8   : > { %6901 = shalt.err (!%p6898_p12)
}
 0x1d9   : > { %6020 = dma.hbm_to_vmem [thread:$0]  (!%p7507_p6), %s8897_s2, 2048, %s736_s1, [#allocation17], %s8889_s8, %s8889_s8, %s8888_s4  }
 0x1da   : > { %s7324_s17 = smov [#allocation21]   ;;  %s7325_s24 = smov [#allocation24]  }
 0x1db   : > { %s759_s13 = sshll.u32 %s7324_s17, 4  ;;  %s786_s26 = sshll.u32 %s7325_s24, 4  ;;  %s760_s13 = int_to_ptr.vmem [resolvable:$true] %s759_s13  ;;  %s787_s26 = int_to_ptr.vmem [resolvable:$true] %s786_s26 }
 0x1dc   : > { %s8898_s3 = sld [smem:[#allocation78_spill]] }
 0x1e2   : > { %s6902_s10 = scalar_lea.hbm %s8898_s3, 2048 }
 0x1e3   : > { %p6903_p3 = scmp.ne.s32.totalorder %s8898_s3, %s6902_s10  ;;  %p6909_p0 = scmp.lt.u32.totalorder %s6902_s10, %s8898_s3 }
 0x1e5   : > { %p6905_p4 = pnand %p6903_p3, %p7523_p8 }
 0x1e7   : > { %p6906_p13 = pneg %p6905_p4 }
 0x1e9   : > { %p6911_p1 = pnand %p6909_p0, %p6906_p13 }
 0x1eb   : > { %6914 = shalt.err (!%p6911_p1)
}
 0x1ec   : > { %s6915_s1 = scalar_lea.vmem %s760_s13, 2048  ;;  %p6923_p2 = scmp.lt.s32.totalorder %s760_s13, %s760_s13 }
 0x1ed   : > { %p6916_p5 = scmp.ne.s32.totalorder %s760_s13, %s6915_s1  ;;  %p6924_p10 = scmp.lt.s32.totalorder %s6915_s1, %s6915_s1 }
 0x1ef   : > { %p6918_p7 = pnand %p6916_p5, %p7523_p8  ;;  %p6925_p11 = por %p6924_p10, %p6923_p2 }
 0x1f1   : > { %p6919_p9 = pneg %p6918_p7 }
 0x1f3   : > { %p6926_p12 = pnand %p6925_p11, %p6919_p9 }
 0x1f5   : > { %6929 = shalt.err (!%p6926_p12)
}
 0x1f6   : > { %6026 = dma.hbm_to_vmem [thread:$0]  (!%p7507_p6), %s8898_s3, 2048, %s760_s13, [#allocation20], %s8889_s8, %s8889_s8, %s8888_s4  }
 0x1f7   : > { %s8899_s24 = sld [smem:[#allocation80_spill]] }
 0x1fd   : > { %s6930_s25 = scalar_lea.hbm %s8899_s24, 16 }
 0x1fe   : > { %p6931_p3 = scmp.ne.s32.totalorder %s8899_s24, %s6930_s25  ;;  %p6937_p0 = scmp.lt.u32.totalorder %s6930_s25, %s8899_s24 }
 0x200   : > { %p6933_p4 = pnand %p6931_p3, %p7523_p8 }
 0x202   : > { %p6934_p13 = pneg %p6933_p4 }
 0x204   : > { %p6939_p1 = pnand %p6937_p0, %p6934_p13 }
 0x206   : > { %6942 = shalt.err (!%p6939_p1)
}
 0x207   : > { %s6943_s1 = scalar_lea.vmem %s787_s26, 16  ;;  %s6950_s13 = scalar_lea.vmem %s787_s26, 32 }
 0x208   : > { %p6944_p5 = scmp.ne.s32.totalorder %s787_s26, %s6943_s1  ;;  %p6951_p2 = scmp.lt.s32.totalorder %s787_s26, %s787_s26 }
 0x209   : > { %p6952_p10 = scmp.lt.s32.totalorder %s6950_s13, %s6943_s1 }
 0x20a   : > { %p6946_p7 = pnand %p6944_p5, %p7523_p8 }
 0x20b   : > { %p6953_p11 = por %p6952_p10, %p6951_p2 }
 0x20c   : > { %p6947_p9 = pneg %p6946_p7 }
 0x20e   : > { %p6954_p12 = pnand %p6953_p11, %p6947_p9 }
 0x210   : > { %6957 = shalt.err (!%p6954_p12)
}
 0x211   : > { %6032 = dma.hbm_to_vmem [thread:$0]  (!%p7507_p6), %s8899_s24, 16, %s787_s26, [#allocation23]  }
 0x212   : > { %s7326_s15 = smov [#allocation27]   ;;  %s7327_s25 = smov [#allocation30]  }
 0x213   : > { %s807_s17 = sshll.u32 %s7326_s15, 4  ;;  %s831_s5 = sshll.u32 %s7327_s25, 4  ;;  %s808_s17 = int_to_ptr.vmem [resolvable:$true] %s807_s17  ;;  %s832_s5 = int_to_ptr.vmem [resolvable:$true] %s831_s5 }
 0x214   : > { %s6958_s6 = scalar_lea.hbm %s8806_s12, 2048 }
 0x215   : > { %p6959_p3 = scmp.ne.s32.totalorder %s8806_s12, %s6958_s6  ;;  %p6965_p0 = scmp.lt.u32.totalorder %s6958_s6, %s8806_s12 }
 0x217   : > { %p6961_p4 = pnand %p6959_p3, %p7523_p8 }
 0x219   : > { %p6962_p13 = pneg %p6961_p4 }
 0x21b   : > { %p6967_p1 = pnand %p6965_p0, %p6962_p13 }
 0x21d   : > { %6970 = shalt.err (!%p6967_p1)
}
 0x21e   : > { %s6971_s26 = scalar_lea.vmem %s808_s17, 2048  ;;  %p6979_p2 = scmp.lt.s32.totalorder %s808_s17, %s808_s17 }
 0x21f   : > { %p6972_p5 = scmp.ne.s32.totalorder %s808_s17, %s6971_s26  ;;  %p6980_p10 = scmp.lt.s32.totalorder %s6971_s26, %s6971_s26 }
 0x221   : > { %p6974_p7 = pnand %p6972_p5, %p7523_p8  ;;  %p6981_p11 = por %p6980_p10, %p6979_p2 }
 0x223   : > { %p6975_p9 = pneg %p6974_p7 }
 0x225   : > { %p6982_p12 = pnand %p6981_p11, %p6975_p9 }
 0x227   : > { %6985 = shalt.err (!%p6982_p12)
}
 0x228   : > { %6038 = dma.hbm_to_vmem [thread:$0]  (!%p7507_p6), %s8806_s12, 2048, %s808_s17, [#allocation26], %s8889_s8, %s8889_s8, %s8888_s4  }
 0x229   : > { %s6986_s10 = scalar_lea.hbm %s8808_s14, 2048 }
 0x22a   : > { %p6987_p3 = scmp.ne.s32.totalorder %s8808_s14, %s6986_s10  ;;  %p6993_p0 = scmp.lt.u32.totalorder %s6986_s10, %s8808_s14 }
 0x22c   : > { %p6989_p4 = pnand %p6987_p3, %p7523_p8 }
 0x22e   : > { %p6990_p13 = pneg %p6989_p4 }
 0x230   : > { %p6995_p1 = pnand %p6993_p0, %p6990_p13 }
 0x232   : > { %6998 = shalt.err (!%p6995_p1)
}
 0x233   : > { %s6999_s9 = scalar_lea.vmem %s832_s5, 2048  ;;  %p7007_p2 = scmp.lt.s32.totalorder %s832_s5, %s832_s5 }
 0x234   : > { %p7000_p5 = scmp.ne.s32.totalorder %s832_s5, %s6999_s9  ;;  %p7008_p10 = scmp.lt.s32.totalorder %s6999_s9, %s6999_s9 }
 0x236   : > { %p7002_p7 = pnand %p7000_p5, %p7523_p8  ;;  %p7009_p11 = por %p7008_p10, %p7007_p2 }
 0x238   : > { %p7003_p9 = pneg %p7002_p7 }
 0x23a   : > { %p7010_p12 = pnand %p7009_p11, %p7003_p9 }
 0x23c   : > { %7013 = shalt.err (!%p7010_p12)
}
 0x23d   : > { %6044 = dma.hbm_to_vmem [thread:$0]  (!%p7507_p6), %s8808_s14, 2048, %s832_s5, [#allocation29], %s8889_s8, %s8889_s8, %s8888_s4  }
 0x23e   : > { %s7328_s2 = smov [#allocation33]   ;;  %s7329_s15 = smov [#allocation36]  }
 0x23f   : > { %s855_s11 = sshll.u32 %s7328_s2, 4  ;;  %s880_s25 = sshll.u32 %s7329_s15, 4  ;;  %s856_s11 = int_to_ptr.vmem [resolvable:$true] %s855_s11  ;;  %s881_s25 = int_to_ptr.vmem [resolvable:$true] %s880_s25 }
 0x240   : > { %s7014_s6 = scalar_lea.hbm %s8810_s16, 2048 }
 0x241   : > { %p7015_p3 = scmp.ne.s32.totalorder %s8810_s16, %s7014_s6  ;;  %p7021_p0 = scmp.lt.u32.totalorder %s7014_s6, %s8810_s16 }
 0x243   : > { %p7017_p4 = pnand %p7015_p3, %p7523_p8 }
 0x245   : > { %p7018_p13 = pneg %p7017_p4 }
 0x247   : > { %p7023_p1 = pnand %p7021_p0, %p7018_p13 }
 0x249   : > { %7026 = shalt.err (!%p7023_p1)
}
 0x24a   : > { %s7027_s5 = scalar_lea.vmem %s856_s11, 2048  ;;  %p7035_p2 = scmp.lt.s32.totalorder %s856_s11, %s856_s11 }
 0x24b   : > { %p7028_p5 = scmp.ne.s32.totalorder %s856_s11, %s7027_s5  ;;  %p7036_p10 = scmp.lt.s32.totalorder %s7027_s5, %s7027_s5 }
 0x24d   : > { %p7030_p7 = pnand %p7028_p5, %p7523_p8  ;;  %p7037_p11 = por %p7036_p10, %p7035_p2 }
 0x24f   : > { %p7031_p9 = pneg %p7030_p7 }
 0x251   : > { %p7038_p12 = pnand %p7037_p11, %p7031_p9 }
 0x253   : > { %7041 = shalt.err (!%p7038_p12)
}
 0x254   : > { %6050 = dma.hbm_to_vmem [thread:$0]  (!%p7507_p6), %s8810_s16, 2048, %s856_s11, [#allocation32], %s8889_s8, %s8889_s8, %s8888_s4  }
 0x255   : > { %s7042_s7 = scalar_lea.hbm %s8812_s18, 16 }
 0x256   : > { %p7043_p3 = scmp.ne.s32.totalorder %s8812_s18, %s7042_s7  ;;  %p7049_p0 = scmp.lt.u32.totalorder %s7042_s7, %s8812_s18 }
 0x258   : > { %p7045_p4 = pnand %p7043_p3, %p7523_p8 }
 0x25a   : > { %p7046_p13 = pneg %p7045_p4 }
 0x25c   : > { %p7051_p1 = pnand %p7049_p0, %p7046_p13 }
 0x25e   : > { %7054 = shalt.err (!%p7051_p1)
}
 0x25f   : > { %s7055_s17 = scalar_lea.vmem %s881_s25, 16  ;;  %s7062_s11 = scalar_lea.vmem %s881_s25, 32 }
 0x260   : > { %p7056_p5 = scmp.ne.s32.totalorder %s881_s25, %s7055_s17  ;;  %p7063_p2 = scmp.lt.s32.totalorder %s881_s25, %s881_s25 }
 0x261   : > { %p7064_p10 = scmp.lt.s32.totalorder %s7062_s11, %s7055_s17 }
 0x262   : > { %p7058_p7 = pnand %p7056_p5, %p7523_p8 }
 0x263   : > { %p7065_p11 = por %p7064_p10, %p7063_p2 }
 0x264   : > { %p7059_p9 = pneg %p7058_p7 }
 0x266   : > { %p7066_p12 = pnand %p7065_p11, %p7059_p9 }
 0x268   : > { %7069 = shalt.err (!%p7066_p12)
}
 0x269   : > { %6056 = dma.hbm_to_vmem [thread:$0]  (!%p7507_p6), %s8812_s18, 16, %s881_s25, [#allocation35]  }
 0x26a   : > { %s7330_s2 = smov [#allocation39]   ;;  %s7331_s10 = smov [#allocation42]  }
 0x26b   : > { %s903_s15 = sshll.u32 %s7330_s2, 4  ;;  %s927_s7 = sshll.u32 %s7331_s10, 4  ;;  %s904_s15 = int_to_ptr.vmem [resolvable:$true] %s903_s15  ;;  %s928_s7 = int_to_ptr.vmem [resolvable:$true] %s927_s7 }
 0x26c   : > { %s7070_s13 = scalar_lea.hbm %s8814_s20, 2048 }
 0x26d   : > { %p7071_p3 = scmp.ne.s32.totalorder %s8814_s20, %s7070_s13  ;;  %p7077_p0 = scmp.lt.u32.totalorder %s7070_s13, %s8814_s20 }
 0x26f   : > { %p7073_p4 = pnand %p7071_p3, %p7523_p8 }
 0x271   : > { %p7074_p13 = pneg %p7073_p4 }
 0x273   : > { %p7079_p1 = pnand %p7077_p0, %p7074_p13 }
 0x275   : > { %7082 = shalt.err (!%p7079_p1)
}
 0x276   : > { %s7083_s25 = scalar_lea.vmem %s904_s15, 2048  ;;  %p7091_p2 = scmp.lt.s32.totalorder %s904_s15, %s904_s15 }
 0x277   : > { %p7084_p5 = scmp.ne.s32.totalorder %s904_s15, %s7083_s25  ;;  %p7092_p10 = scmp.lt.s32.totalorder %s7083_s25, %s7083_s25 }
 0x279   : > { %p7086_p7 = pnand %p7084_p5, %p7523_p8  ;;  %p7093_p11 = por %p7092_p10, %p7091_p2 }
 0x27b   : > { %p7087_p9 = pneg %p7086_p7 }
 0x27d   : > { %p7094_p12 = pnand %p7093_p11, %p7087_p9 }
 0x27f   : > { %7097 = shalt.err (!%p7094_p12)
}
 0x280   : > { %6062 = dma.hbm_to_vmem [thread:$0]  (!%p7507_p6), %s8814_s20, 2048, %s904_s15, [#allocation38], %s8889_s8, %s8889_s8, %s8888_s4  }
 0x281   : > { %s7098_s1 = scalar_lea.hbm %s8816_s22, 2048 }
 0x282   : > { %p7099_p3 = scmp.ne.s32.totalorder %s8816_s22, %s7098_s1  ;;  %p7105_p0 = scmp.lt.u32.totalorder %s7098_s1, %s8816_s22 }
 0x284   : > { %p7101_p4 = pnand %p7099_p3, %p7523_p8 }
 0x286   : > { %p7102_p13 = pneg %p7101_p4 }
 0x288   : > { %p7107_p1 = pnand %p7105_p0, %p7102_p13 }
 0x28a   : > { %7110 = shalt.err (!%p7107_p1)
}
 0x28b   : > { %s7111_s5 = scalar_lea.vmem %s928_s7, 2048  ;;  %p7119_p2 = scmp.lt.s32.totalorder %s928_s7, %s928_s7 }
 0x28c   : > { %p7112_p5 = scmp.ne.s32.totalorder %s928_s7, %s7111_s5  ;;  %p7120_p10 = scmp.lt.s32.totalorder %s7111_s5, %s7111_s5 }
 0x28e   : > { %p7114_p7 = pnand %p7112_p5, %p7523_p8  ;;  %p7121_p11 = por %p7120_p10, %p7119_p2 }
 0x290   : > { %p7115_p9 = pneg %p7114_p7 }
 0x292   : > { %p7122_p12 = pnand %p7121_p11, %p7115_p9 }
 0x294   : > { %7125 = shalt.err (!%p7122_p12)
}
 0x295   : > { %6068 = dma.hbm_to_vmem [thread:$0]  (!%p7507_p6), %s8816_s22, 2048, %s928_s7, [#allocation41], %s8889_s8, %s8889_s8, %s8888_s4  }
 0x296   : > { %s7332_s26 = smov [#allocation45]   ;;  %s7333_s10 = smov [#allocation46]  }
 0x297   : > { %s951_s2 = sshll.u32 %s7332_s26, 4  ;;  %s965_s6 = sshll.u32 %s7333_s10, 4  ;;  %s952_s2 = int_to_ptr.vmem [resolvable:$true] %s951_s2  ;;  %s966_s6 = int_to_ptr.vmem [resolvable:$true] %s965_s6 }
 0x298   : > { %s8900_s9 = sld [smem:[#allocation85_spill]] }
 0x29e   : > { %s7126_s17 = scalar_lea.hbm %s8900_s9, 2048 }
 0x29f   : > { %p7127_p3 = scmp.ne.s32.totalorder %s8900_s9, %s7126_s17  ;;  %p7133_p0 = scmp.lt.u32.totalorder %s7126_s17, %s8900_s9 }
 0x2a1   : > { %p7129_p4 = pnand %p7127_p3, %p7523_p8 }
 0x2a3   : > { %p7130_p13 = pneg %p7129_p4 }
 0x2a5   : > { %p7135_p1 = pnand %p7133_p0, %p7130_p13 }
 0x2a7   : > { %7138 = shalt.err (!%p7135_p1)
}
 0x2a8   : > { %s7139_s7 = scalar_lea.vmem %s952_s2, 2048  ;;  %p7147_p2 = scmp.lt.s32.totalorder %s952_s2, %s952_s2 }
 0x2a9   : > { %p7140_p5 = scmp.ne.s32.totalorder %s952_s2, %s7139_s7  ;;  %p7148_p10 = scmp.lt.s32.totalorder %s7139_s7, %s7139_s7 }
 0x2ab   : > { %p7142_p7 = pnand %p7140_p5, %p7523_p8  ;;  %p7149_p11 = por %p7148_p10, %p7147_p2 }
 0x2ad   : > { %p7143_p9 = pneg %p7142_p7 }
 0x2af   : > { %p7150_p12 = pnand %p7149_p11, %p7143_p9 }
 0x2b1   : > { %7153 = shalt.err (!%p7150_p12)
}
 0x2b2   : > { %6074 = dma.hbm_to_vmem [thread:$0]  (!%p7507_p6), %s8900_s9, 2048, %s952_s2, [#allocation44], %s8889_s8, %s8889_s8, %s8888_s4  }
 0x2b3   : > { %s8901_s1 = sld [smem:[#allocation86_spill]] }
 0x2b9   : > { %s7154_s13 = scalar_lea.hbm %s8901_s1, 16 }
 0x2ba   : > { %p7155_p3 = scmp.ne.s32.totalorder %s8901_s1, %s7154_s13  ;;  %p7161_p0 = scmp.lt.u32.totalorder %s7154_s13, %s8901_s1 }
 0x2bc   : > { %p7157_p4 = pnand %p7155_p3, %p7523_p8 }
 0x2be   : > { %p7158_p13 = pneg %p7157_p4 }
 0x2c0   : > { %p7163_p1 = pnand %p7161_p0, %p7158_p13 }
 0x2c2   : > { %7166 = shalt.err (!%p7163_p1)
}
 0x2c3   : > { %s7167_s7 = scalar_lea.vmem %s966_s6, 16  ;;  %s7174_s4 = scalar_lea.vmem %s966_s6, 32 }
 0x2c4   : > { %p7168_p5 = scmp.ne.s32.totalorder %s966_s6, %s7167_s7  ;;  %p7175_p2 = scmp.lt.s32.totalorder %s966_s6, %s966_s6 }
 0x2c5   : > { %p7176_p10 = scmp.lt.s32.totalorder %s7174_s4, %s7167_s7 }
 0x2c6   : > { %p7170_p7 = pnand %p7168_p5, %p7523_p8 }
 0x2c7   : > { %p7177_p11 = por %p7176_p10, %p7175_p2 }
 0x2c8   : > { %p7171_p9 = pneg %p7170_p7 }
 0x2ca   : > { %p7178_p12 = pnand %p7177_p11, %p7171_p9 }
 0x2cc   : > { %7181 = shalt.err (!%p7178_p12)
}
 0x2cd   : > { %6077 = dma.hbm_to_vmem [thread:$0]  (!%p7507_p6), %s8901_s1, 16, %s966_s6, [#allocation47]  }
 0x2ce   : > { %s8902_s3 = sld [smem:[#allocation69_spill]] }
 0x2d4   : > { %p8903_p3 = scmp.ne.s32.totalorder %s8902_s3, 0 }
 0x2d5   : > { %s8904_s25 = sld [smem:[#allocation68_spill]] (!%p8903_p3) }
 0x2d6   : > { %978 = sbr.rel (%p8903_p3) target bundleno = 3716 (0xe84), region = 124 }
 0x2db   : > { %p8905_p4 = scmp.eq.s32.totalorder (!%p8903_p3), %s8904_s25, 0 }
 0x2dd   : > { %7239 = dma.done.wait (%p8905_p4), [#allocation8], 4096   ;;  %p8906_p8 = pmov %p8905_p4 }
 0x2de   : > { %p8907_p13 = pmov %p8905_p4 }
 0x2df   : > { %7241 = vsyncadd (%p8906_p8), [#allocation8], 4294963200 }
 0x2e0   : > { %7243 = dma.done.wait (%p8907_p13), [#allocation11], 4128   ;;  %p8908_p0 = pmov %p8905_p4 }
 0x2e2   : > { %7245 = vsyncadd (%p8908_p0), [#allocation11], 4294963168  ;;  %p8909_p1 = pmov %p8908_p0 }
 0x2e3   : > { %p8910_p6 = pmov %p8908_p0 }
 0x2e4   : > { %7247 = dma.done.wait (%p8909_p1), [#allocation14], 512  }
 0x2e5   : > { %7249 = vsyncadd (%p8910_p6), [#allocation14], 4294966784  ;;  %p8911_p5 = pmov %p8908_p0 }
 0x2e6   : > { %p8912_p7 = pmov %p8908_p0 }
 0x2e7   : > { %7251 = dma.done.wait (%p8911_p5), [#allocation17], 2304  }
 0x2e8   : > { %7253 = vsyncadd (%p8912_p7), [#allocation17], 4294964992  ;;  %p8913_p9 = pmov %p8908_p0 }
 0x2e9   : > { %p8914_p2 = pmov %p8908_p0 }
 0x2ea   : > { %7255 = dma.done.wait (%p8913_p9), [#allocation20], 2064  }
 0x2eb   : > { %7257 = vsyncadd (%p8914_p2), [#allocation20], 4294965232  ;;  %p8915_p10 = pmov %p8908_p0 }
 0x2ec   : > { %p8916_p11 = pmov %p8908_p0 }
 0x2ed   : > { %7259 = dma.done.wait (%p8915_p10), [#allocation23], 2064  }
 0x2ee   : > { %7261 = vsyncadd (%p8916_p11), [#allocation23], 4294965232  ;;  %p8917_p12 = pmov %p8908_p0 }
 0x2ef   : > { %p8918_p3 = pmov %p8908_p0 }
 0x2f0   : > { %7263 = dma.done.wait (%p8917_p12), [#allocation26], 2064  }
 0x2f1   : > { %7265 = vsyncadd (%p8918_p3), [#allocation26], 4294965232  ;;  %p8919_p4 = pmov %p8908_p0 }
 0x2f2   : > { %p8920_p8 = pmov %p8908_p0 }
 0x2f3   : > { %7267 = dma.done.wait (%p8919_p4), [#allocation29], 2064  }
 0x2f4   : > { %7269 = vsyncadd (%p8920_p8), [#allocation29], 4294965232  ;;  %p8921_p13 = pmov %p8908_p0 }
 0x2f6   : > { %7271 = dma.done.wait (%p8921_p13), [#allocation32], 2064  }
 0x2f7   : > { %7273 = vsyncadd (%p8908_p0), [#allocation32], 4294965232  ;;  %p8922_p1 = pmov %p8908_p0 }
 0x2f8   : > { %p8923_p6 = pmov %p8908_p0 }
 0x2f9   : > { %7275 = dma.done.wait (%p8922_p1), [#allocation35], 32  }
 0x2fa   : > { %7277 = vsyncadd (%p8923_p6), [#allocation35], 4294967264  ;;  %p8924_p5 = pmov %p8908_p0 }
 0x2fb   : > { %p8925_p7 = pmov %p8908_p0 }
 0x2fc   : > { %7279 = dma.done.wait (%p8924_p5), [#allocation38], 4096  }
 0x2fd   : > { %7281 = vsyncadd (%p8925_p7), [#allocation38], 4294963200  ;;  %p8926_p9 = pmov %p8908_p0 }
 0x2fe   : > { %p8927_p2 = pmov %p8908_p0 }
 0x2ff   : > { %7283 = dma.done.wait (%p8926_p9), [#allocation41], 2064  }
 0x300   : > { %7285 = vsyncadd (%p8927_p2), [#allocation41], 4294965232  ;;  %p8928_p10 = pmov %p8908_p0 }
 0x301   : > { %p8929_p11 = pmov %p8908_p0 }
 0x302   : > { %7287 = dma.done.wait (%p8928_p10), [#allocation44], 2064  }
 0x303   : > { %7289 = vsyncadd (%p8929_p11), [#allocation44], 4294965232  ;;  %p8930_p12 = pmov %p8908_p0 }
 0x304   : > { %p8931_p3 = pmov %p8908_p0 }
 0x305   : > { %7291 = dma.done.wait (%p8930_p12), [#allocation47], 16  }
 0x306   : > { %7293 = vsyncadd (%p8931_p3), [#allocation47], 4294967280  ;;  %p8932_p4 = scmp.ne.s32.totalorder %s8904_s25, 0 }
 0x307   : > { %v1146_v0 = vld [vmem:[#allocation18] sm:$0xff] (!%p8932_p4)  ;;  %v1147_v1 = vld [vmem:[#allocation18 + $0x8] sm:$0xff] (!%p8932_p4)  ;;  %v1148_v2 = vld [vmem:[#allocation18 + $0x10] sm:$0xff] (!%p8932_p4)  ;;  %vm1436_vm0 = vcmask (!%p8932_p4), 64512  }
 0x308   : > { %1143 = sbr.rel (%p8932_p4) target bundleno = 1240 (0x4d8), region = 232  ;;  %v5473_v3 = vpack.c.bf16 (!%p8932_p4), %v1147_v1, %v1146_v0  ;;  %v1149_v4 = vld [vmem:[#allocation18 + $0x18] sm:$0xff] (!%p8932_p4)  ;;  %v1150_v6 = vld [vmem:[#allocation18 + $0x20] sm:$0xff] (!%p8932_p4)  ;;  %v1151_v7 = vld [vmem:[#allocation18 + $0x28] sm:$0xff] (!%p8932_p4) }
 0x309   : > { %v5477_v5 = vpack.c.bf16 (!%p8932_p4), %v1149_v4, %v1148_v2  ;;  %v5481_v8 = vpack.c.bf16 (!%p8932_p4), %v1151_v7, %v1150_v6  ;;  %v1152_v9 = vld [vmem:[#allocation18 + $0x30] sm:$0xff] (!%p8932_p4)  ;;  %v1153_v11 = vld [vmem:[#allocation18 + $0x38] sm:$0xff] (!%p8932_p4)  ;;  %v1248_v12 = vld [vmem:[#allocation21] sm:$0xff] (!%p8932_p4) }
 0x30a   : > { %5474 = vmatprep.subr.bf16.mxu0 (!%p8932_p4), %v5473_v3  ;;  %v1144_v10 = vld [vmem:[#allocation13] sm:$0xff] (!%p8932_p4)  ;;  %v1251_v16 = vld [vmem:[#allocation21 + $0x18] sm:$0xff] (!%p8932_p4)  ;;  %v1252_v18 = vld [vmem:[#allocation21 + $0x20] sm:$0xff] (!%p8932_p4)  ;;  %v5485_v19 = vpack.c.bf16 (!%p8932_p4), %v1153_v11, %v1152_v9 }
 0x30b   : > { %5476 = vmatpush3.bf16.msra.mxu0 (!%p8932_p4), %v5473_v3  ;;  %4938 = vmatprep.mubr.f32.mxu0 (!%p8932_p4), %v1144_v10  ;;  %v1249_v13 = vld [vmem:[#allocation21 + $0x8] sm:$0xff] (!%p8932_p4)  ;;  %v1250_v15 = vld [vmem:[#allocation21 + $0x10] sm:$0xff] (!%p8932_p4)  ;;  %v1154_v21 = vld [vmem:[#allocation18 + $0x40] sm:$0xff] (!%p8932_p4) }
 0x30c   : > { %5478 = vmatprep.subr.bf16.mxu0 (!%p8932_p4), %v5477_v5  ;;  %v5505_v14 = vpack.c.bf16 (!%p8932_p4), %v1249_v13, %v1248_v12  ;;  %v5509_v17 = vpack.c.bf16 (!%p8932_p4), %v1251_v16, %v1250_v15  ;;  %v1253_v20 = vld [vmem:[#allocation21 + $0x28] sm:$0xff] (!%p8932_p4)  ;;  %v1254_v24 = vld [vmem:[#allocation21 + $0x30] sm:$0xff] (!%p8932_p4)  ;;  %v1255_v25 = vld [vmem:[#allocation21 + $0x38] sm:$0xff] (!%p8932_p4)  ;;  %v7334_v15 = vmov (!%p8932_p4), 0.0  }
 0x30d   : > { %v1155_v22 = vld [vmem:[#allocation18 + $0x48] sm:$0xff] (!%p8932_p4)  ;;  %v5513_v23 = vpack.c.bf16 (!%p8932_p4), %v1253_v20, %v1252_v18  ;;  %v1156_v27 = vld [vmem:[#allocation18 + $0x50] sm:$0xff] (!%p8932_p4)  ;;  %v1157_v28 = vld [vmem:[#allocation18 + $0x58] sm:$0xff] (!%p8932_p4)  ;;  %v5517_v29 = vpack.c.bf16 (!%p8932_p4), %v1255_v25, %v1254_v24  ;;  %1434 = vst [vmem:[#allocation5] sm:$0xff] (!%p8932_p4), %v7334_v15 }
 0x30e   : > { %5506 = vmatprep.subr.bf16.mxu1 (!%p8932_p4), %v5505_v14  ;;  %v5489_v26 = vpack.c.bf16 (!%p8932_p4), %v1155_v22, %v1154_v21  ;;  %v1256_v30 = vld [vmem:[#allocation21 + $0x40] sm:$0xff] (!%p8932_p4)  ;;  %v1257_v31 = vld [vmem:[#allocation21 + $0x48] sm:$0xff] (!%p8932_p4)  ;;  %v5493_v32 = vpack.c.bf16 (!%p8932_p4), %v1157_v28, %v1156_v27  ;;  %v1161_v38 = vld [vmem:[#allocation18 + $0x78] sm:$0xff] (!%p8932_p4)  ;;  %1435 = vst [vmem:[#allocation5 + $0x8] sm:$0xff] (!%p8932_p4), %v7334_v15 }
 0x30f   : > { %5480 = vmatpush3.bf16.msra.mxu0 %v5477_v5  ;;  %5508 = vmatpush3.bf16.msra.mxu1 %v5505_v14  ;;  %v1158_v33 = vld [vmem:[#allocation18 + $0x60] sm:$0xff]  ;;  %v1159_v34 = vld [vmem:[#allocation18 + $0x68] sm:$0xff]  ;;  %v5521_v35 = vpack.c.bf16 %v1257_v31, %v1256_v30  ;;  %v1160_v37 = vld [vmem:[#allocation18 + $0x70] sm:$0xff]  ;;  %1437 = vst.msk [vmem:[#allocation6] sm:$0xff] %vm1436_vm0, %v7334_v15 }
 0x310   : > { %5482 = vmatprep.subr.bf16.mxu0 %v5481_v8  ;;  %5510 = vmatprep.subr.bf16.mxu1 %v5509_v17  ;;  %v5497_v36 = vpack.c.bf16 %v1159_v34, %v1158_v33  ;;  %v5501_v39 = vpack.c.bf16 %v1161_v38, %v1160_v37  ;;  %v1341_v40 = vld [vmem:[#allocation22] sm:$0xff]  ;;  %v1342_v41 = vld [vmem:[#allocation22 + $0x8] sm:$0xff]  ;;  %v1343_v43 = vld [vmem:[#allocation22 + $0x10] sm:$0xff]  ;;  %1438 = vst.msk [vmem:[#allocation6 + $0x8] sm:$0xff] %vm1436_vm0, %v7334_v15 }
 0x311   : > { %v5537_v42 = vpack.c.bf16 %v1342_v41, %v1341_v40  ;;  %v1344_v44 = vld [vmem:[#allocation22 + $0x18] sm:$0xff]  ;;  %v1345_v47 = vld [vmem:[#allocation22 + $0x20] sm:$0xff]  ;;  %v1346_v48 = vld [vmem:[#allocation22 + $0x28] sm:$0xff] }
 0x312   : > { %v1145_v45 = vld [vmem:[#allocation13 + $0x8] sm:$0xff]  ;;  %v5541_v46 = vpack.c.bf16 %v1344_v44, %v1343_v43  ;;  %v5545_v49 = vpack.c.bf16 %v1346_v48, %v1345_v47  ;;  %v1349_v53 = vld [vmem:[#allocation22 + $0x40] sm:$0xff]  ;;  %v1350_v54 = vld [vmem:[#allocation22 + $0x48] sm:$0xff] }
 0x313   : > { %5484 = vmatpush3.bf16.msra.mxu0 %v5481_v8  ;;  %5512 = vmatpush3.bf16.msra.mxu1 %v5509_v17  ;;  %v1347_v50 = vld [vmem:[#allocation22 + $0x30] sm:$0xff]  ;;  %v1348_v51 = vld [vmem:[#allocation22 + $0x38] sm:$0xff]  ;;  %v5553_v55 = vpack.c.bf16 %v1350_v54, %v1349_v53  ;;  %v1260_v62 = vld [vmem:[#allocation21 + $0x60] sm:$0xff] }
 0x314   : > { %5486 = vmatprep.subr.bf16.mxu0 %v5485_v19  ;;  %5514 = vmatprep.subr.bf16.mxu1 %v5513_v23  ;;  %v5549_v52 = vpack.c.bf16 %v1348_v51, %v1347_v50  ;;  %v1258_v56 = vld [vmem:[#allocation21 + $0x50] sm:$0xff]  ;;  %v1259_v57 = vld [vmem:[#allocation21 + $0x58] sm:$0xff]  ;;  %v1261_v63 = vld [vmem:[#allocation21 + $0x68] sm:$0xff] }
 0x315   : > { %v1351_v58 = vld [vmem:[#allocation22 + $0x50] sm:$0xff]  ;;  %v5525_v59 = vpack.c.bf16 %v1259_v57, %v1258_v56  ;;  %v1352_v60 = vld [vmem:[#allocation22 + $0x58] sm:$0xff]  ;;  %v1353_v0 = vld [vmem:[#allocation22 + $0x60] sm:$0xff]  ;;  %v5529_v1 = vpack.c.bf16 %v1261_v63, %v1260_v62 }
 0x316   : > { %v5557_v61 = vpack.c.bf16 %v1352_v60, %v1351_v58  ;;  %v1354_v2 = vld [vmem:[#allocation22 + $0x68] sm:$0xff]  ;;  %v1262_v4 = vld [vmem:[#allocation21 + $0x70] sm:$0xff]  ;;  %v1263_v5 = vld [vmem:[#allocation21 + $0x78] sm:$0xff] }
 0x317   : > { %5488 = vmatpush3.bf16.msra.mxu0 %v5485_v19  ;;  %5516 = vmatpush3.bf16.msra.mxu1 %v5513_v23  ;;  %v5561_v3 = vpack.c.bf16 %v1354_v2, %v1353_v0  ;;  %v1355_v6 = vld [vmem:[#allocation22 + $0x70] sm:$0xff]  ;;  %v5533_v7 = vpack.c.bf16 %v1263_v5, %v1262_v4  ;;  %v1356_v8 = vld [vmem:[#allocation22 + $0x78] sm:$0xff] }
 0x318   : > { %5490 = vmatprep.subr.bf16.mxu0 %v5489_v26  ;;  %5518 = vmatprep.subr.bf16.mxu1 %v5517_v29  ;;  %v5565_v9 = vpack.c.bf16 %v1356_v8, %v1355_v6  ;;  %v4421_v10 = vld [vmem:[#allocation19] ss:$0 sm:$0xff] }
 0x31b   : > { %5492 = vmatpush3.bf16.msra.mxu0 %v5489_v26  ;;  %5520 = vmatpush3.bf16.msra.mxu1 %v5517_v29 }
 0x31c   : > { %5494 = vmatprep.subr.bf16.mxu0 %v5493_v32  ;;  %5522 = vmatprep.subr.bf16.mxu1 %v5521_v35 }
 0x31f   : > { %5496 = vmatpush3.bf16.msra.mxu0 %v5493_v32  ;;  %5524 = vmatpush3.bf16.msra.mxu1 %v5521_v35 }
 0x320   : > { %5498 = vmatprep.subr.bf16.mxu0 %v5497_v36  ;;  %5526 = vmatprep.subr.bf16.mxu1 %v5525_v59 }
 0x323   : > { %5500 = vmatpush3.bf16.msra.mxu0 %v5497_v36  ;;  %5528 = vmatpush3.bf16.msra.mxu1 %v5525_v59 }
 0x324   : > { %5502 = vmatprep.subr.bf16.mxu0 %v5501_v39  ;;  %5530 = vmatprep.subr.bf16.mxu1 %v5529_v1 }
 0x327   : > { %5504 = vmatpush3.bf16.msra.mxu0 %v5501_v39  ;;  %5532 = vmatpush3.bf16.msra.mxu1 %v5529_v1 }
 0x328   : > { %5538 = vmatprep.subr.bf16.mxu0 %v5537_v42  ;;  %5534 = vmatprep.subr.bf16.mxu1 %v5533_v7 }
 0x32a   : > { %4939 = vmatmul.mubr.f32.vlgmr.msra.gmra.mrb[0].mxu0 %v1145_v45 }
 0x32b   : > { %5540 = vmatpush3.bf16.msra.mxu0 %v5537_v42  ;;  %5536 = vmatpush3.bf16.msra.mxu1 %v5533_v7 }
 0x32c   : > { %5542 = vmatprep.subr.bf16.mxu0 %v5541_v46 }
 0x32f   : > { %5544 = vmatpush3.bf16.msra.mxu0 %v5541_v46 }
 0x330   : > { %5546 = vmatprep.subr.bf16.mxu0 %v5545_v49 }
 0x333   : > { %5548 = vmatpush3.bf16.msra.mxu0 %v5545_v49 }
 0x334   : > { %5550 = vmatprep.subr.bf16.mxu0 %v5549_v52 }
 0x337   : > { %5552 = vmatpush3.bf16.msra.mxu0 %v5549_v52 }
 0x338   : > { %5554 = vmatprep.subr.bf16.mxu0 %v5553_v55 }
 0x33b   : > { %5556 = vmatpush3.bf16.msra.mxu0 %v5553_v55 }
 0x33c   : > { %5558 = vmatprep.subr.bf16.mxu0 %v5557_v61 }
 0x33f   : > { %5560 = vmatpush3.bf16.msra.mxu0 %v5557_v61 }
 0x340   : > { %5562 = vmatprep.subr.bf16.mxu0 %v5561_v3 }
 0x343   : > { %5564 = vmatpush3.bf16.msra.mxu0 %v5561_v3 }
 0x344   : > { %5566 = vmatprep.subr.bf16.mxu0 %v5565_v9 }
 0x347   : > { %5568 = vmatpush3.bf16.msra.mxu0 %v5565_v9 }
 0x3fd   : > { %v4940_v11 = vpop.f32.mrb[0].mxu0 }
 0x3fe   : > { %v1241_v12 = vadd.f32 %v4940_v11, %v4421_v10  ;;  %v1235_v13 = vpop.f32.mrb[1].mxu0 }
 0x3ff   : > { %v1236_v14 = vadd.f32 %v4421_v10, %v1235_v13 }
 0x400   : > { %1245 = vst [vmem:[#allocation2 + $0x8] sm:$0xff] %v1241_v12 }
 0x401   : > { %1244 = vst [vmem:[#allocation2] sm:$0xff] %v1236_v14  ;;  %4973 = vmatprep.mubr.f32.mxu1 %v1236_v14  ;;  %5008 = vmatprep.mubr.f32.mxu0 %v1236_v14 }
 0x402   : > { %4974 = vmatmul.mubr.f32.vlgmr.msra.gmra.mrb[0].mxu1 %v1241_v12  ;;  %5009 = vmatmul.mubr.f32.vlgmr.msra.gmra.mrb[2].mxu0 %v1241_v12 }
 0x4d5   : > { %v4975_v16 = vpop.f32.mrb[0].mxu1  ;;  %v5010_v17 = vpop.f32.mrb[2].mxu0 }
 0x4d6   : > { %1340 = vst [vmem:[#allocation3 + $0x8] sm:$0xff] %v4975_v16  ;;  %1433 = vst [vmem:[#allocation4 + $0x8] sm:$0xff] %v5010_v17  ;;  %v1330_v18 = vpop.f32.mrb[1].mxu1  ;;  %v1423_v19 = vpop.f32.mrb[3].mxu0 }
 0x4d7   : > { %1339 = vst [vmem:[#allocation3] sm:$0xff] %v1330_v18  ;;  %1432 = vst [vmem:[#allocation4] sm:$0xff] %v1423_v19 }
 0x4d8 PF: > { %s8933_s27 = sld [smem:[#allocation68_spill]]  ;;  %v7335_v20 = vmov 0   ;;  %v1701_v31 = vld [vmem:[#allocation15] sm:$0xff]  ;;  %v1702_v32 = vld [vmem:[#allocation15 + $0x8] sm:$0xff]  ;;  %v1478_v62 = vlaneseq  ;;  %vm1703_vm3 = vcmask 130048   ;;  %v7336_v4 = vmov 0.0  }
 0x4d9   : > { %6180 = vset.pattern.permute.xlu1 %v7335_v20  ;;  %6179 = vset.pattern.permute.xlu0 %v7335_v20  ;;  %v5569_v34 = vpack.c.bf16 %v1702_v32, %v1701_v31 }
 0x4da   : > { %v8152_v63 = vand.u32 127, %v1478_v62 }
 0x4db   : > { %5570 = vmatprep.subr.bf16.mxu0 %v5569_v34 }
 0x4dc   : > { %5572 = vmatpush3.bf16.msra.mxu0 %v5569_v34 }
 0x4dd   : > { %v1965_v30 = vld [vmem:[#allocation4 + $0x8] sm:$0xff]  ;;  %v1963_v60 = vld [vmem:[#allocation3 + $0x8] sm:$0xff] }
 0x4de   : > { %s8111_s0 = sshll.u32 %s8933_s27, 7  ;;  %v1964_v29 = vld [vmem:[#allocation4] sm:$0xff]  ;;  %v1962_v59 = vld [vmem:[#allocation3] sm:$0xff]  ;;  %p4580_p8 = scmp.ne.s32.totalorder %s8933_s27, 1 }
 0x4df   : > { %s8114_s6 = scalar_lea.vmem [#allocation7], %s8111_s0  ;;  %s8119_s26 = scalar_lea.vmem [#allocation10], %s8111_s0  ;;  %v5573_v33 = vpack.c.bf16 %v1965_v30, %v1964_v29  ;;  %v5577_v61 = vpack.c.bf16 %v1963_v60, %v1962_v59 }
 0x4e0   : > { %v1442_v21 = vld [vmem:[%s8114_s6 + $0x8] sm:$0xff]  ;;  %v1441_v22 = vld [vmem:[%s8114_s6] sm:$0xff]  ;;  %v1460_v25 = vld [vmem:[%s8119_s26 + $0x10] sm:$0xff]  ;;  %s1474_s10 = sshra.s32 %s8111_s0, 7 }
 0x4e1   : > { %1484 = vperm.xlu1 %6180, %v1442_v21   ;;  %1481 = vperm.xlu0 %6179, %v1441_v22   ;;  %v1459_v23 = vld [vmem:[%s8119_s26 + $0x8] sm:$0xff]  ;;  %v1458_v24 = vld [vmem:[%s8119_s26] sm:$0xff]  ;;  %v1443_v26 = vld [vmem:[%s8114_s6 + $0x10] sm:$0xff]  ;;  %s1476_s13 = scalar_lea.vmem [#allocation12], %s1474_s10 }
 0x4e2   : > { %v1461_v27 = vld [vmem:[%s8119_s26 + $0x18] sm:$0xff]  ;;  %v1462_v35 = vld [vmem:[%s8119_s26 + $0x20] sm:$0xff]  ;;  %5574 = vmatprep.subr.bf16.mxu1 %v5573_v33  ;;  %v1463_v37 = vld [vmem:[%s8119_s26 + $0x28] sm:$0xff] }
 0x4e3   : > { %v1444_v28 = vld [vmem:[%s8114_s6 + $0x18] sm:$0xff]  ;;  %v1445_v36 = vld [vmem:[%s8114_s6 + $0x20] sm:$0xff]  ;;  %5576 = vmatpush3.bf16.msra.mxu1 %v5573_v33  ;;  %v1446_v38 = vld [vmem:[%s8114_s6 + $0x28] sm:$0xff] }
 0x4e4   : > { %v1464_v39 = vld [vmem:[%s8119_s26 + $0x30] sm:$0xff]  ;;  %v1465_v41 = vld [vmem:[%s8119_s26 + $0x38] sm:$0xff]  ;;  %v1466_v43 = vld [vmem:[%s8119_s26 + $0x40] sm:$0xff]  ;;  %5578 = vmatprep.subr.bf16.mxu1 %v5577_v61 }
 0x4e5   : > { %1548 = vperm.xlu1 %6180, %v1459_v23   ;;  %1545 = vperm.xlu0 %6179, %v1458_v24   ;;  %v1447_v40 = vld [vmem:[%s8114_s6 + $0x30] sm:$0xff]  ;;  %v1448_v42 = vld [vmem:[%s8114_s6 + $0x38] sm:$0xff]  ;;  %v1449_v44 = vld [vmem:[%s8114_s6 + $0x40] sm:$0xff] }
 0x4e6   : > { %v1467_v45 = vld [vmem:[%s8119_s26 + $0x48] sm:$0xff]  ;;  %v1468_v47 = vld [vmem:[%s8119_s26 + $0x50] sm:$0xff]  ;;  %v1469_v49 = vld [vmem:[%s8119_s26 + $0x58] sm:$0xff] }
 0x4e7   : > { %v1450_v46 = vld [vmem:[%s8114_s6 + $0x48] sm:$0xff]  ;;  %v1451_v48 = vld [vmem:[%s8114_s6 + $0x50] sm:$0xff]  ;;  %v1452_v50 = vld [vmem:[%s8114_s6 + $0x58] sm:$0xff] }
 0x4e8   : > { %v1470_v51 = vld [vmem:[%s8119_s26 + $0x60] sm:$0xff]  ;;  %v1471_v53 = vld [vmem:[%s8119_s26 + $0x68] sm:$0xff]  ;;  %v1472_v55 = vld [vmem:[%s8119_s26 + $0x70] sm:$0xff] }
 0x4e9   : > { %1551 = vperm.xlu1 %6180, %v1460_v25   ;;  %1487 = vperm.xlu0 %6179, %v1443_v26   ;;  %v1453_v52 = vld [vmem:[%s8114_s6 + $0x60] sm:$0xff]  ;;  %v1454_v54 = vld [vmem:[%s8114_s6 + $0x68] sm:$0xff]  ;;  %v1455_v56 = vld [vmem:[%s8114_s6 + $0x70] sm:$0xff] }
 0x4ea   : > { %v1473_v57 = vld [vmem:[%s8119_s26 + $0x78] sm:$0xff] }
 0x4eb   : > { %v1456_v58 = vld [vmem:[%s8114_s6 + $0x78] sm:$0xff] }
 0x4ed   : > { %1554 = vperm.xlu1 %6180, %v1461_v27   ;;  %1490 = vperm.xlu0 %6179, %v1444_v28  }
 0x4f1   : > { %1557 = vperm.xlu1 %6180, %v1462_v35   ;;  %1493 = vperm.xlu0 %6179, %v1445_v36  }
 0x4f5   : > { %1560 = vperm.xlu1 %6180, %v1463_v37   ;;  %1496 = vperm.xlu0 %6179, %v1446_v38  }
 0x4f9   : > { %1563 = vperm.xlu1 %6180, %v1464_v39   ;;  %1499 = vperm.xlu0 %6179, %v1447_v40  }
 0x4fd   : > { %1566 = vperm.xlu1 %6180, %v1465_v41   ;;  %1502 = vperm.xlu0 %6179, %v1448_v42  }
 0x501   : > { %1569 = vperm.xlu1 %6180, %v1466_v43   ;;  %1505 = vperm.xlu0 %6179, %v1449_v44  }
 0x505   : > { %1572 = vperm.xlu1 %6180, %v1467_v45   ;;  %1508 = vperm.xlu0 %6179, %v1450_v46  }
 0x509   : > { %1575 = vperm.xlu1 %6180, %v1468_v47   ;;  %1511 = vperm.xlu0 %6179, %v1451_v48  }
 0x50d   : > { %1578 = vperm.xlu1 %6180, %v1469_v49   ;;  %1514 = vperm.xlu0 %6179, %v1452_v50  }
 0x511   : > { %1581 = vperm.xlu1 %6180, %v1470_v51   ;;  %1517 = vperm.xlu0 %6179, %v1453_v52  }
 0x515   : > { %1584 = vperm.xlu1 %6180, %v1471_v53   ;;  %1520 = vperm.xlu0 %6179, %v1454_v54  }
 0x519   : > { %1587 = vperm.xlu1 %6180, %v1472_v55   ;;  %1523 = vperm.xlu0 %6179, %v1455_v56  }
 0x51d   : > { %1590 = vperm.xlu1 %6180, %v1473_v57   ;;  %1526 = vperm.xlu0 %6179, %v1456_v58  }
 0x560   : > { %v1485_v0 = vpop.permute.xlu1 %1484  ;;  %v1482_v1 = vpop.permute.xlu0 %1481 }
 0x561   : > { %vm1529_vm1 = vcmp.eq.s32.totalorder %v8152_v63, %v1485_v0  ;;  %vm1528_vm2 = vcmp.eq.s32.totalorder %v8152_v63, %v1482_v1 }
 0x562   : > { %v8159_v5 = vsel %vm1529_vm1, 1.0, %v7336_v4  ;;  %v8162_v6 = vsel %vm1528_vm2, 1.0, %v7336_v4 }
 0x564   : > { %v1549_v2 = vpop.permute.xlu1 %1548  ;;  %v1546_v3 = vpop.permute.xlu0 %1545 }
 0x565   : > { %vm1593_vm4 = vcmp.eq.s32.totalorder %v8152_v63, %v1549_v2  ;;  %vm1592_vm5 = vcmp.eq.s32.totalorder %v8152_v63, %v1546_v3 }
 0x566   : > { %v4441_v7 = vsel %vm1593_vm4, 1.0, %v7336_v4  ;;  %v4440_v8 = vsel %vm1592_vm5, 1.0, %v7336_v4 }
 0x567   : > { %v1686_v9 = vsub.f32 %v8159_v5, %v4441_v7  ;;  %5043 = vmatprep.mubr.msk.f32.mxu1 %vm1703_vm3, %v4440_v8  ;;  %v1685_v10 = vsub.f32 %v8162_v6, %v4440_v8 }
 0x568   : > { %v1552_v11 = vpop.permute.xlu1 %1551  ;;  %5044 = vmatmul.mubr.msk.f32.vlgmr.msra.gmra.mrb[0].mxu1 %vm1703_vm3, %v4441_v7  ;;  %v1488_v12 = vpop.permute.xlu0 %1487 }
 0x569   : > { %vm1594_vm6 = vcmp.eq.s32.totalorder %v8152_v63, %v1552_v11  ;;  %vm1530_vm7 = vcmp.eq.s32.totalorder %v8152_v63, %v1488_v12  ;;  %5015 = vmatprep.mubr.msk.f32.mxu0 %vm1703_vm3, %v1685_v10  ;;  %5580 = vmatpush3.bf16.msra.mxu1 %v5577_v61 }
 0x56a   : > { %v4442_v13 = vsel %vm1594_vm6, 1.0, %v7336_v4  ;;  %v8175_v14 = vsel %vm1530_vm7, 1.0, %v7336_v4  ;;  %5016 = vmatmul.mubr.msk.f32.vlgmr.msra.gmra.mrb[0].mxu0 %vm1703_vm3, %v1686_v9 }
 0x56b   : > { %v1687_v15 = vsub.f32 %v8175_v14, %v4442_v13  ;;  %5046 = vmatprep.mubr.msk.f32.mxu1 %vm1703_vm3, %v4442_v13 }
 0x56c   : > { %v1555_v16 = vpop.permute.xlu1 %1554  ;;  %v1491_v17 = vpop.permute.xlu0 %1490 }
 0x56d   : > { %vm1595_vm8 = vcmp.eq.s32.totalorder %v8152_v63, %v1555_v16  ;;  %vm1531_vm9 = vcmp.eq.s32.totalorder %v8152_v63, %v1491_v17  ;;  %5018 = vmatprep.mubr.msk.f32.mxu0 %vm1703_vm3, %v1687_v15 }
 0x56e   : > { %v4443_v18 = vsel %vm1595_vm8, 1.0, %v7336_v4  ;;  %v8185_v19 = vsel %vm1531_vm9, 1.0, %v7336_v4 }
 0x56f   : > { %v1688_v20 = vsub.f32 %v8185_v19, %v4443_v18  ;;  %5047 = vmatmul.mubr.msk.f32.gmra.mrb[2].mxu1 %vm1703_vm3, %v4443_v18 }
 0x570   : > { %v1558_v21 = vpop.permute.xlu1 %1557  ;;  %v1494_v22 = vpop.permute.xlu0 %1493 }
 0x571   : > { %vm1596_vm10 = vcmp.eq.s32.totalorder %v8152_v63, %v1558_v21  ;;  %vm1532_vm11 = vcmp.eq.s32.totalorder %v8152_v63, %v1494_v22  ;;  %5019 = vmatmul.mubr.msk.f32.gmra.mrb[2].mxu0 %vm1703_vm3, %v1688_v20 }
 0x572   : > { %v4444_v23 = vsel %vm1596_vm10, 1.0, %v7336_v4  ;;  %v8194_v24 = vsel %vm1532_vm11, 1.0, %v7336_v4 }
 0x573   : > { %v1689_v25 = vsub.f32 %v8194_v24, %v4444_v23  ;;  %5049 = vmatprep.mubr.msk.f32.mxu1 %vm1703_vm3, %v4444_v23 }
 0x574   : > { %v1561_v26 = vpop.permute.xlu1 %1560  ;;  %v1497_v27 = vpop.permute.xlu0 %1496 }
 0x575   : > { %vm1597_vm12 = vcmp.eq.s32.totalorder %v8152_v63, %v1561_v26  ;;  %vm1533_vm13 = vcmp.eq.s32.totalorder %v8152_v63, %v1497_v27  ;;  %5021 = vmatprep.mubr.msk.f32.mxu0 %vm1703_vm3, %v1689_v25 }
 0x576   : > { %v4445_v28 = vsel %vm1597_vm12, 1.0, %v7336_v4  ;;  %v8203_v29 = vsel %vm1533_vm13, 1.0, %v7336_v4 }
 0x577   : > { %v1690_v30 = vsub.f32 %v8203_v29, %v4445_v28  ;;  %5050 = vmatmul.mubr.msk.f32.gmra.mrb[4].mxu1 %vm1703_vm3, %v4445_v28 }
 0x578   : > { %v1564_v31 = vpop.permute.xlu1 %1563  ;;  %v1500_v32 = vpop.permute.xlu0 %1499 }
 0x579   : > { %vm1598_vm14 = vcmp.eq.s32.totalorder %v8152_v63, %v1564_v31  ;;  %vm1534_vm15 = vcmp.eq.s32.totalorder %v8152_v63, %v1500_v32  ;;  %5022 = vmatmul.mubr.msk.f32.gmra.mrb[4].mxu0 %vm1703_vm3, %v1690_v30 }
 0x57a   : > { %v4446_v33 = vsel %vm1598_vm14, 1.0, %v7336_v4  ;;  %v8212_v34 = vsel %vm1534_vm15, 1.0, %v7336_v4 }
 0x57b   : > { %v1691_v35 = vsub.f32 %v8212_v34, %v4446_v33  ;;  %5052 = vmatprep.mubr.msk.f32.mxu1 %vm1703_vm3, %v4446_v33 }
 0x57c   : > { %v1567_v36 = vpop.permute.xlu1 %1566  ;;  %v1503_v37 = vpop.permute.xlu0 %1502 }
 0x57d   : > { %vm1599_vm0 = vcmp.eq.s32.totalorder %v8152_v63, %v1567_v36  ;;  %vm1535_vm1 = vcmp.eq.s32.totalorder %v8152_v63, %v1503_v37  ;;  %5024 = vmatprep.mubr.msk.f32.mxu0 %vm1703_vm3, %v1691_v35  ;;  %v2526_v36 = vld [vmem:[#allocation27] sm:$0xff]  ;;  %v2527_v37 = vld [vmem:[#allocation27 + $0x8] sm:$0xff] }
 0x57e   : > { %v4447_v38 = vsel %vm1599_vm0, 1.0, %v7336_v4  ;;  %v8221_v39 = vsel %vm1535_vm1, 1.0, %v7336_v4 }
 0x57f   : > { %v1692_v40 = vsub.f32 %v8221_v39, %v4447_v38  ;;  %5053 = vmatmul.mubr.msk.f32.gmra.mrb[6].mxu1 %vm1703_vm3, %v4447_v38  ;;  %v5581_v38 = vpack.c.bf16 %v2527_v37, %v2526_v36 }
 0x580   : > { %v1570_v41 = vpop.permute.xlu1 %1569  ;;  %v1506_v42 = vpop.permute.xlu0 %1505 }
 0x581   : > { %vm1600_vm2 = vcmp.eq.s32.totalorder %v8152_v63, %v1570_v41  ;;  %vm1536_vm4 = vcmp.eq.s32.totalorder %v8152_v63, %v1506_v42  ;;  %5025 = vmatmul.mubr.msk.f32.gmra.mrb[6].mxu0 %vm1703_vm3, %v1692_v40  ;;  %5582 = vmatprep.subr.bf16.mxu0 %v5581_v38  ;;  %v2528_v40 = vld [vmem:[#allocation27 + $0x10] sm:$0xff]  ;;  %v2529_v41 = vld [vmem:[#allocation27 + $0x18] sm:$0xff] }
 0x582   : > { %v4448_v43 = vsel %vm1600_vm2, 1.0, %v7336_v4  ;;  %v8230_v44 = vsel %vm1536_vm4, 1.0, %v7336_v4  ;;  %vm1913_vm4 = vcmask 64512   ;;  %5584 = vmatpush3.bf16.msra.mxu0 %v5581_v38 }
 0x583   : > { %v1693_v45 = vsub.f32 %v8230_v44, %v4448_v43  ;;  %5055 = vmatprep.mubr.msk.f32.mxu1 %vm1703_vm3, %v4448_v43 }
 0x584   : > { %v1573_v46 = vpop.permute.xlu1 %1572  ;;  %v1509_v47 = vpop.permute.xlu0 %1508 }
 0x585   : > { %vm1601_vm5 = vcmp.eq.s32.totalorder %v8152_v63, %v1573_v46  ;;  %vm1537_vm6 = vcmp.eq.s32.totalorder %v8152_v63, %v1509_v47  ;;  %5027 = vmatprep.mubr.msk.f32.mxu0 %vm1703_vm3, %v1693_v45 }
 0x586   : > { %v4449_v48 = vsel %vm1601_vm5, 1.0, %v7336_v4  ;;  %v8239_v49 = vsel %vm1537_vm6, 1.0, %v7336_v4 }
 0x587   : > { %v1694_v50 = vsub.f32 %v8239_v49, %v4449_v48  ;;  %5056 = vmatmul.mubr.msk.f32.gmra.mrb[8].mxu1 %vm1703_vm3, %v4449_v48  ;;  %v2530_v48 = vld [vmem:[#allocation27 + $0x20] sm:$0xff] }
 0x588   : > { %v1576_v51 = vpop.permute.xlu1 %1575  ;;  %v1512_v52 = vpop.permute.xlu0 %1511 }
 0x589   : > { %vm1602_vm7 = vcmp.eq.s32.totalorder %v8152_v63, %v1576_v51  ;;  %vm1538_vm8 = vcmp.eq.s32.totalorder %v8152_v63, %v1512_v52  ;;  %5028 = vmatmul.mubr.msk.f32.gmra.mrb[8].mxu0 %vm1703_vm3, %v1694_v50 }
 0x58a   : > { %v4450_v53 = vsel %vm1602_vm7, 1.0, %v7336_v4  ;;  %v4434_v54 = vsel %vm1538_vm8, 1.0, %v7336_v4 }
 0x58b   : > { %v1695_v55 = vsub.f32 %v4434_v54, %v4450_v53  ;;  %5058 = vmatprep.mubr.msk.f32.mxu1 %vm1703_vm3, %v4450_v53 }
 0x58c   : > { %v1579_v56 = vpop.permute.xlu1 %1578  ;;  %v1515_v57 = vpop.permute.xlu0 %1514 }
 0x58d   : > { %vm1603_vm9 = vcmp.eq.s32.totalorder %v8152_v63, %v1579_v56  ;;  %vm1539_vm10 = vcmp.eq.s32.totalorder %v8152_v63, %v1515_v57  ;;  %5030 = vmatprep.mubr.msk.f32.mxu0 %vm1703_vm3, %v1695_v55  ;;  %v2533_v55 = vld [vmem:[#allocation27 + $0x38] sm:$0xff] }
 0x58e   : > { %v4451_v58 = vsel %vm1603_vm9, 1.0, %v7336_v4  ;;  %v4435_v59 = vsel %vm1539_vm10, 1.0, %v7336_v4 }
 0x58f   : > { %v1696_v60 = vsub.f32 %v4435_v59, %v4451_v58  ;;  %5059 = vmatmul.mubr.msk.f32.gmra.mrb[10].mxu1 %vm1703_vm3, %v4451_v58 }
 0x590   : > { %v1582_v61 = vpop.permute.xlu1 %1581  ;;  %v1518_v0 = vpop.permute.xlu0 %1517 }
 0x591   : > { %vm1604_vm11 = vcmp.eq.s32.totalorder %v8152_v63, %v1582_v61  ;;  %vm1540_vm12 = vcmp.eq.s32.totalorder %v8152_v63, %v1518_v0  ;;  %5031 = vmatmul.mubr.msk.f32.gmra.mrb[10].mxu0 %vm1703_vm3, %v1696_v60  ;;  %v2534_v60 = vld [vmem:[#allocation27 + $0x40] sm:$0xff]  ;;  %v2535_v61 = vld [vmem:[#allocation27 + $0x48] sm:$0xff] }
 0x592   : > { %v4452_v1 = vsel %vm1604_vm11, 1.0, %v7336_v4  ;;  %v4436_v2 = vsel %vm1540_vm12, 1.0, %v7336_v4  ;;  %v5597_v0 = vpack.c.bf16 %v2535_v61, %v2534_v60 }
 0x593   : > { %v1697_v3 = vsub.f32 %v4436_v2, %v4452_v1  ;;  %5061 = vmatprep.mubr.msk.f32.mxu1 %vm1703_vm3, %v4452_v1 }
 0x594   : > { %v1585_v7 = vpop.permute.xlu1 %1584  ;;  %v1521_v8 = vpop.permute.xlu0 %1520 }
 0x595   : > { %vm1605_vm13 = vcmp.eq.s32.totalorder %v8152_v63, %v1585_v7  ;;  %vm1541_vm14 = vcmp.eq.s32.totalorder %v8152_v63, %v1521_v8  ;;  %5033 = vmatprep.mubr.msk.f32.mxu0 %vm1703_vm3, %v1697_v3  ;;  %v2536_v7 = vld [vmem:[#allocation27 + $0x50] sm:$0xff]  ;;  %v2537_v8 = vld [vmem:[#allocation27 + $0x58] sm:$0xff] }
 0x596   : > { %v4453_v9 = vsel %vm1605_vm13, 1.0, %v7336_v4  ;;  %v4437_v10 = vsel %vm1541_vm14, 1.0, %v7336_v4 }
 0x597   : > { %v1698_v11 = vsub.f32 %v4437_v10, %v4453_v9  ;;  %5062 = vmatmul.mubr.msk.f32.gmra.mrb[12].mxu1 %vm1703_vm3, %v4453_v9 }
 0x598   : > { %v1588_v12 = vpop.permute.xlu1 %1587  ;;  %v1524_v13 = vpop.permute.xlu0 %1523 }
 0x599   : > { %vm1606_vm15 = vcmp.eq.s32.totalorder %v8152_v63, %v1588_v12  ;;  %vm1542_vm0 = vcmp.eq.s32.totalorder %v8152_v63, %v1524_v13  ;;  %5034 = vmatmul.mubr.msk.f32.gmra.mrb[12].mxu0 %vm1703_vm3, %v1698_v11  ;;  %v2538_v13 = vld [vmem:[#allocation27 + $0x60] sm:$0xff] }
 0x59a   : > { %v4454_v15 = vsel %vm1606_vm15, 1.0, %v7336_v4  ;;  %v4438_v16 = vsel %vm1542_vm0, 1.0, %v7336_v4 }
 0x59b   : > { %v1699_v17 = vsub.f32 %v4438_v16, %v4454_v15  ;;  %5064 = vmatprep.mubr.msk.f32.mxu1 %vm1703_vm3, %v4454_v15  ;;  %v2539_v15 = vld [vmem:[#allocation27 + $0x68] sm:$0xff] }
 0x59c   : > { %v1591_v18 = vpop.permute.xlu1 %1590  ;;  %v1527_v20 = vpop.permute.xlu0 %1526 }
 0x59d   : > { %vm1607_vm1 = vcmp.eq.s32.totalorder %v8152_v63, %v1591_v18  ;;  %vm1543_vm2 = vcmp.eq.s32.totalorder %v8152_v63, %v1527_v20  ;;  %5036 = vmatprep.mubr.msk.f32.mxu0 %vm1703_vm3, %v1699_v17 }
 0x59e   : > { %v4455_v21 = vsel %vm1607_vm1, 1.0, %v7336_v4  ;;  %v4439_v22 = vsel %vm1543_vm2, 1.0, %v7336_v4 }
 0x59f   : > { %v1700_v23 = vsub.f32 %v4439_v22, %v4455_v21  ;;  %5065 = vmatmul.mubr.msk.f32.gmra.mrb[14].mxu1 %vm1703_vm3, %v4455_v21  ;;  %v2540_v21 = vld [vmem:[#allocation27 + $0x70] sm:$0xff] }
 0x5a0   : > { %5071 = vmatprep.mubr.msk.f32.mxu1 %vm1703_vm3, %v8162_v6 }
 0x5a1   : > { %5037 = vmatmul.mubr.msk.f32.gmra.mrb[14].mxu0 %vm1703_vm3, %v1700_v23 }
 0x5a3   : > { %5072 = vmatmul.mubr.msk.f32.vlgmr.msra.gmra.mrb[0].mxu1 %vm1703_vm3, %v8159_v5 }
 0x5a4   : > { %5074 = vmatprep.mubr.msk.f32.mxu1 %vm1703_vm3, %v8175_v14 }
 0x5a7   : > { %5075 = vmatmul.mubr.msk.f32.gmra.mrb[2].mxu1 %vm1703_vm3, %v8185_v19 }
 0x5a8   : > { %5077 = vmatprep.mubr.msk.f32.mxu1 %vm1703_vm3, %v8194_v24 }
 0x5ab   : > { %5078 = vmatmul.mubr.msk.f32.gmra.mrb[4].mxu1 %vm1703_vm3, %v8203_v29 }
 0x5ac   : > { %5080 = vmatprep.mubr.msk.f32.mxu1 %vm1703_vm3, %v8212_v34 }
 0x5af   : > { %5081 = vmatmul.mubr.msk.f32.gmra.mrb[6].mxu1 %vm1703_vm3, %v8221_v39 }
 0x5b0   : > { %5083 = vmatprep.mubr.msk.f32.mxu1 %vm1703_vm3, %v8230_v44  ;;  %v5585_v44 = vpack.c.bf16 %v2529_v41, %v2528_v40 }
 0x5b2   : > { %5586 = vmatprep.subr.bf16.mxu0 %v5585_v44 }
 0x5b3   : > { %5084 = vmatmul.mubr.msk.f32.gmra.mrb[8].mxu1 %vm1703_vm3, %v8239_v49  ;;  %5588 = vmatpush3.bf16.msra.mxu0 %v5585_v44  ;;  %v2531_v49 = vld [vmem:[#allocation27 + $0x28] sm:$0xff] }
 0x5b4   : > { %5086 = vmatprep.mubr.msk.f32.mxu1 %vm1703_vm3, %v4434_v54  ;;  %v5589_v50 = vpack.c.bf16 %v2531_v49, %v2530_v48  ;;  %v2532_v54 = vld [vmem:[#allocation27 + $0x30] sm:$0xff] }
 0x5b5   : > { %v5593_v57 = vpack.c.bf16 %v2533_v55, %v2532_v54 }
 0x5b6   : > { %5590 = vmatprep.subr.bf16.mxu0 %v5589_v50 }
 0x5b7   : > { %5087 = vmatmul.mubr.msk.f32.gmra.mrb[10].mxu1 %vm1703_vm3, %v4435_v59  ;;  %5592 = vmatpush3.bf16.msra.mxu0 %v5589_v50 }
 0x5b8   : > { %5089 = vmatprep.mubr.msk.f32.mxu1 %vm1703_vm3, %v4436_v2  ;;  %5594 = vmatprep.subr.bf16.mxu0 %v5593_v57 }
 0x5bb   : > { %5090 = vmatmul.mubr.msk.f32.gmra.mrb[12].mxu1 %vm1703_vm3, %v4437_v10  ;;  %5596 = vmatpush3.bf16.msra.mxu0 %v5593_v57  ;;  %v5601_v10 = vpack.c.bf16 %v2537_v8, %v2536_v7  ;;  %v8405_v57 = vld [vmem:[#allocation25] ss:$0 sm:$0xff] }
 0x5bc   : > { %5092 = vmatprep.mubr.msk.f32.mxu1 %vm1703_vm3, %v4438_v16  ;;  %5598 = vmatprep.subr.bf16.mxu0 %v5597_v0  ;;  %v5605_v16 = vpack.c.bf16 %v2539_v15, %v2538_v13 }
 0x5bf   : > { %5093 = vmatmul.mubr.msk.f32.gmra.mrb[14].mxu1 %vm1703_vm3, %v4439_v22  ;;  %5600 = vmatpush3.bf16.msra.mxu0 %v5597_v0  ;;  %v2541_v22 = vld [vmem:[#allocation27 + $0x78] sm:$0xff] }
 0x5c0   : > { %5602 = vmatprep.subr.bf16.mxu0 %v5601_v10 }
 0x5c3   : > { %5604 = vmatpush3.bf16.msra.mxu0 %v5601_v10 }
 0x5c4   : > { %5606 = vmatprep.subr.bf16.mxu0 %v5605_v16 }
 0x5c7   : > { %5608 = vmatpush3.bf16.msra.mxu0 %v5605_v16 }
 0x63d   : > { %v8306_v63 = vpop.f32.mrb[0].mxu0 }
 0x63e   : > { %v1898_v4 = vmul.f32 %v8306_v63, %v8306_v63  ;;  %v8310_v5 = vpop.f32.mrb[1].mxu0 }
 0x63f   : > { %v1897_v6 = vmul.f32 %v8310_v5, %v8310_v5 }
 0x640   : > { %v1917_v14 = vsel %vm1913_vm4, %v1898_v4, 0.0  ;;  %v5609_v4 = vpack.c.bf16 %v2541_v22, %v2540_v21 }
 0x641   : > { %1918 = vadd.xlane.f32.xlu1 %v1917_v14  ;;  %v1914_v19 = vsel %vm1913_vm4, %v1897_v6, 0.0 }
 0x642   : > { %1915 = vadd.xlane.f32.xlu0 %v1914_v19  ;;  %5610 = vmatprep.subr.bf16.mxu0 %v5609_v4 }
 0x643   : > { %5612 = vmatpush3.bf16.msra.mxu0 %v5609_v4 }
 0x644   : > { %v8316_v24 = vpop.f32.mrb[2].mxu0 }
 0x645   : > { %v8318_v25 = vpop.f32.mrb[3].mxu0  ;;  %v1900_v27 = vmul.f32 %v8316_v24, %v8316_v24 }
 0x646   : > { %v1899_v26 = vmul.f32 %v8318_v25, %v8318_v25 }
 0x647   : > { %v1923_v30 = vsel %vm1913_vm4, %v1900_v27, 0.0 }
 0x648   : > { %v1920_v28 = vsel %vm1913_vm4, %v1899_v26, 0.0 }
 0x649   : > { %1921 = vadd.xlane.f32.xlu0 %v1920_v28 }
 0x64c   : > { %v8325_v29 = vpop.f32.mrb[4].mxu0 }
 0x64d   : > { %v1902_v31 = vmul.f32 %v8325_v29, %v8325_v29  ;;  %1924 = vadd.xlane.f32.xlu0 %v1923_v30  ;;  %v8330_v32 = vpop.f32.mrb[5].mxu0 }
 0x64e   : > { %v1901_v33 = vmul.f32 %v8330_v32, %v8330_v32 }
 0x64f   : > { %v1929_v34 = vsel %vm1913_vm4, %v1902_v31, 0.0 }
 0x650   : > { %v1926_v35 = vsel %vm1913_vm4, %v1901_v33, 0.0 }
 0x651   : > { %1930 = vadd.xlane.f32.xlu0 %v1929_v34  ;;  %1927 = vadd.xlane.f32.xlu1 %v1926_v35 }
 0x654   : > { %v8336_v39 = vpop.f32.mrb[6].mxu0 }
 0x655   : > { %v1904_v42 = vmul.f32 %v8336_v39, %v8336_v39  ;;  %v8340_v43 = vpop.f32.mrb[7].mxu0 }
 0x656   : > { %v1903_v45 = vmul.f32 %v8340_v43, %v8340_v43 }
 0x657   : > { %v1935_v46 = vsel %vm1913_vm4, %v1904_v42, 0.0 }
 0x658   : > { %1936 = vadd.xlane.f32.xlu0 %v1935_v46  ;;  %v1932_v47 = vsel %vm1913_vm4, %v1903_v45, 0.0 }
 0x659   : > { %1933 = vadd.xlane.f32.xlu1 %v1932_v47 }
 0x65c   : > { %v8346_v51 = vpop.f32.mrb[8].mxu0 }
 0x65d   : > { %v1906_v52 = vmul.f32 %v8346_v51, %v8346_v51  ;;  %v8350_v53 = vpop.f32.mrb[9].mxu0 }
 0x65e   : > { %v1905_v56 = vmul.f32 %v8350_v53, %v8350_v53 }
 0x65f   : > { %v1941_v58 = vsel %vm1913_vm4, %v1906_v52, 0.0  ;;  %v8402_v52 = vld [vmem:[#allocation24] ss:$0 sm:$0xff] }
 0x660   : > { %1942 = vadd.xlane.f32.xlu0 %v1941_v58  ;;  %v1938_v59 = vsel %vm1913_vm4, %v1905_v56, 0.0 }
 0x661   : > { %1939 = vadd.xlane.f32.xlu1 %v1938_v59 }
 0x664   : > { %v8356_v1 = vpop.f32.mrb[10].mxu0 }
 0x665   : > { %v1908_v2 = vmul.f32 %v8356_v1, %v8356_v1  ;;  %v8360_v3 = vpop.f32.mrb[11].mxu0 }
 0x666   : > { %v1907_v9 = vmul.f32 %v8360_v3, %v8360_v3 }
 0x667   : > { %v1947_v11 = vsel %vm1913_vm4, %v1908_v2, 0.0 }
 0x668   : > { %1948 = vadd.xlane.f32.xlu0 %v1947_v11  ;;  %v1944_v12 = vsel %vm1913_vm4, %v1907_v9, 0.0 }
 0x669   : > { %1945 = vadd.xlane.f32.xlu1 %v1944_v12 }
 0x66c   : > { %v8366_v17 = vpop.f32.mrb[12].mxu0 }
 0x66d   : > { %v1910_v18 = vmul.f32 %v8366_v17, %v8366_v17  ;;  %v8370_v20 = vpop.f32.mrb[13].mxu0 }
 0x66e   : > { %v1909_v23 = vmul.f32 %v8370_v20, %v8370_v20 }
 0x66f   : > { %v1953_v6 = vsel %vm1913_vm4, %v1910_v18, 0.0 }
 0x670   : > { %1954 = vadd.xlane.f32.xlu0 %v1953_v6  ;;  %v1950_v14 = vsel %vm1913_vm4, %v1909_v23, 0.0 }
 0x671   : > { %1951 = vadd.xlane.f32.xlu1 %v1950_v14 }
 0x674   : > { %v8376_v19 = vpop.f32.mrb[14].mxu0 }
 0x675   : > { %v1912_v26 = vmul.f32 %v8376_v19, %v8376_v19  ;;  %v8380_v27 = vpop.f32.mrb[15].mxu0 }
 0x676   : > { %v1911_v28 = vmul.f32 %v8380_v27, %v8380_v27  ;;  %v5073_v30 = vpop.f32.mrb[0].mxu1 }
 0x677   : > { %v2273_v31 = vpop.f32.mrb[1].mxu1  ;;  %v1959_v33 = vsel %vm1913_vm4, %v1912_v26, 0.0 }
 0x678   : > { %1960 = vadd.xlane.f32.xlu0 %v1959_v33  ;;  %v1956_v34 = vsel %vm1913_vm4, %v1911_v28, 0.0 }
 0x679   : > { %1957 = vadd.xlane.f32.xlu1 %v1956_v34 }
 0x67a   : > { %v5076_v35 = vpop.f32.mrb[2].mxu1 }
 0x67b   : > { %v2283_v36 = vpop.f32.mrb[3].mxu1 }
 0x67e   : > { %v5079_v37 = vpop.f32.mrb[4].mxu1 }
 0x67f   : > { %v2293_v38 = vpop.f32.mrb[5].mxu1 }
 0x682   : > { %v5082_v40 = vpop.f32.mrb[6].mxu1 }
 0x683   : > { %v2303_v41 = vpop.f32.mrb[7].mxu1 }
 0x686   : > { %v8386_v42 = vpop.f32.mrb[8].mxu1 }
 0x687   : > { %v8388_v44 = vpop.f32.mrb[9].mxu1 }
 0x68a   : > { %v8390_v45 = vpop.f32.mrb[10].mxu1 }
 0x68b   : > { %v8392_v46 = vpop.f32.mrb[11].mxu1 }
 0x68e   : > { %v8394_v47 = vpop.f32.mrb[12].mxu1 }
 0x68f   : > { %v8396_v48 = vpop.f32.mrb[13].mxu1 }
 0x692   : > { %v8398_v49 = vpop.f32.mrb[14].mxu1 }
 0x693   : > { %v8400_v50 = vpop.f32.mrb[15].mxu1 }
 0x6ce   : > { %v1919_v54 = vpop.xlane.xlu1 %1918 }
 0x6cf   : > { %v2360_v55 = vmul.f32 %v8402_v52, %v1919_v54  ;;  %v1916_v56 = vpop.xlane.xlu0 %1915 }
 0x6d0   : > { %v2359_v58 = vmul.f32 %v8402_v52, %v1916_v56 }
 0x6d1   : > { %v2376_v59 = vadd.f32 %v5073_v30, %v2360_v55 }
 0x6d2   : > { %v2375_v60 = vadd.f32 %v2359_v58, %v2273_v31 }
 0x6d3   : > { %v8409_v61 = vadd.f32 %v8405_v57, %v2376_v59 }
 0x6d4   : > { %v2398_v0 = vadd.f32 %v8405_v57, %v2375_v60 }
 0x6d5   : > { %v4509_v2 = vmul.f32 -1.442695, %v8409_v61 }
 0x6d6   : > { %v4508_v7 = vmul.f32 -1.442695, %v2398_v0  ;;  %v1922_v8 = vpop.xlane.xlu0 %1921 }
 0x6d7   : > { %6181 = vpow2.f32 %v4509_v2  ;;  %v2361_v9 = vmul.f32 %v8402_v52, %v1922_v8 }
 0x6d8   : > { %6183 = vpow2.f32 %v4508_v7 }
 0x6d9   : > { %v2377_v10 = vadd.f32 %v2361_v9, %v2283_v36 }
 0x6da   : > { %v1925_v11 = vpop.xlane.xlu0 %1924 }
 0x6db   : > { %v8415_v12 = vadd.f32 %v8405_v57, %v2377_v10  ;;  %v2362_v13 = vmul.f32 %v8402_v52, %v1925_v11 }
 0x6dd   : > { %v4510_v15 = vmul.f32 -1.442695, %v8415_v12  ;;  %v2378_v16 = vadd.f32 %v5076_v35, %v2362_v13 }
 0x6de   : > { %v1928_v18 = vpop.xlane.xlu1 %1927  ;;  %v1931_v21 = vpop.xlane.xlu0 %1930 }
 0x6df   : > { %6185 = vpow2.f32 %v4510_v15  ;;  %v8420_v22 = vadd.f32 %v8405_v57, %v2378_v16  ;;  %v2363_v23 = vmul.f32 %v8402_v52, %v1928_v18  ;;  %v2364_v4 = vmul.f32 %v8402_v52, %v1931_v21 }
 0x6e1   : > { %v6182_v6 = vpop.eup %6181  ;;  %v4511_v14 = vmul.f32 -1.442695, %v8420_v22  ;;  %v2379_v26 = vadd.f32 %v2363_v23, %v2293_v38  ;;  %v2380_v28 = vadd.f32 %v5079_v37, %v2364_v4 }
 0x6e2   : > { %v6184_v30 = vpop.eup %6183  ;;  %v2463_v31 = vadd.f32 1.0, %v6182_v6 }
 0x6e3   : > { %v2462_v33 = vadd.f32 1.0, %v6184_v30  ;;  %6187 = vpow2.f32 %v4511_v14  ;;  %v8426_v34 = vadd.f32 %v8405_v57, %v2379_v26  ;;  %v8429_v35 = vadd.f32 %v8405_v57, %v2380_v28 }
 0x6e4   : > { %6189 = vrcp.f32 %v2463_v31 }
 0x6e5   : > { %6191 = vrcp.f32 %v2462_v33  ;;  %v4512_v36 = vmul.f32 -1.442695, %v8426_v34  ;;  %v4513_v54 = vmul.f32 -1.442695, %v8429_v35  ;;  %v1937_v55 = vpop.xlane.xlu0 %1936 }
 0x6e6   : > { %v2366_v38 = vmul.f32 %v8402_v52, %v1937_v55  ;;  %v1934_v37 = vpop.xlane.xlu1 %1933 }
 0x6e7   : > { %6193 = vpow2.f32 %v4512_v36  ;;  %v2365_v56 = vmul.f32 %v8402_v52, %v1934_v37 }
 0x6e8   : > { %6195 = vpow2.f32 %v4513_v54  ;;  %v2382_v58 = vadd.f32 %v5082_v40, %v2366_v38 }
 0x6e9   : > { %v6186_v59 = vpop.eup %6185  ;;  %v2381_v60 = vadd.f32 %v2365_v56, %v2303_v41 }
 0x6ea   : > { %v2464_v2 = vadd.f32 1.0, %v6186_v59  ;;  %v8436_v7 = vadd.f32 %v8405_v57, %v2382_v58 }
 0x6eb   : > { %v8439_v8 = vadd.f32 %v8405_v57, %v2381_v60 }
 0x6ec   : > { %6197 = vrcp.f32 %v2464_v2  ;;  %v4515_v9 = vmul.f32 -1.442695, %v8436_v7 }
 0x6ed   : > { %v6188_v10 = vpop.eup %6187  ;;  %v4514_v11 = vmul.f32 -1.442695, %v8439_v8  ;;  %v1943_v13 = vpop.xlane.xlu0 %1942 }
 0x6ee   : > { %v6190_v15 = vpop.eup %6189  ;;  %v2465_v16 = vadd.f32 1.0, %v6188_v10  ;;  %6199 = vpow2.f32 %v4515_v9  ;;  %v2368_v40 = vmul.f32 %v8402_v52, %v1943_v13  ;;  %v1940_v41 = vpop.xlane.xlu1 %1939 }
 0x6ef   : > { %v6192_v18 = vpop.eup %6191  ;;  %6201 = vpow2.f32 %v4514_v11  ;;  %v2367_v21 = vmul.f32 %v8402_v52, %v1940_v41  ;;  %v2511_v14 = vmul.f32 %v6190_v15, %v8409_v61 }
 0x6f0   : > { %6203 = vrcp.f32 %v2465_v16  ;;  %v2384_v23 = vadd.f32 %v8386_v42, %v2368_v40  ;;  %v2510_v4 = vmul.f32 %v6192_v18, %v2398_v0 }
 0x6f1   : > { %v6194_v6 = vpop.eup %6193  ;;  %v2383_v26 = vadd.f32 %v2367_v21, %v8388_v44 }
 0x6f2   : > { %v6196_v28 = vpop.eup %6195  ;;  %v2466_v30 = vadd.f32 1.0, %v6194_v6  ;;  %v8449_v31 = vadd.f32 %v8405_v57, %v2384_v23  ;;  %5127 = vmatprep.mubr.f32.mxu0 %v2510_v4 }
 0x6f3   : > { %v2467_v33 = vadd.f32 1.0, %v6196_v28  ;;  %v8452_v36 = vadd.f32 %v8405_v57, %v2383_v26  ;;  %5128 = vmatmul.mubr.f32.vlgmr.msra.gmra.mrb[16].mxu0 %v2511_v14 }
 0x6f4   : > { %6205 = vrcp.f32 %v2466_v30  ;;  %v4517_v42 = vmul.f32 -1.442695, %v8449_v31 }
 0x6f5   : > { %6207 = vrcp.f32 %v2467_v33  ;;  %v4516_v0 = vmul.f32 -1.442695, %v8452_v36  ;;  %v1949_v61 = vpop.xlane.xlu0 %1948 }
 0x6f6   : > { %v6198_v54 = vpop.eup %6197  ;;  %6209 = vpow2.f32 %v4517_v42  ;;  %v2370_v44 = vmul.f32 %v8402_v52, %v1949_v61  ;;  %v1946_v55 = vpop.xlane.xlu1 %1945 }
 0x6f7   : > { %6211 = vpow2.f32 %v4516_v0  ;;  %v2369_v38 = vmul.f32 %v8402_v52, %v1946_v55  ;;  %v2512_v37 = vmul.f32 %v6198_v54, %v8415_v12 }
 0x6f8   : > { %v6200_v56 = vpop.eup %6199  ;;  %v2386_v58 = vadd.f32 %v8390_v45, %v2370_v44 }
 0x6f9   : > { %v6202_v59 = vpop.eup %6201  ;;  %v2469_v60 = vadd.f32 1.0, %v6200_v56  ;;  %v2385_v2 = vadd.f32 %v2369_v38, %v8392_v46  ;;  %5130 = vmatprep.mubr.f32.mxu0 %v2512_v37 }
 0x6fa   : > { %v6204_v9 = vpop.eup %6203  ;;  %v2468_v10 = vadd.f32 1.0, %v6202_v59  ;;  %v8462_v11 = vadd.f32 %v8405_v57, %v2386_v58 }
 0x6fb   : > { %6213 = vrcp.f32 %v2469_v60  ;;  %v8465_v13 = vadd.f32 %v8405_v57, %v2385_v2  ;;  %v2513_v15 = vmul.f32 %v6204_v9, %v8420_v22 }
 0x6fc   : > { %6215 = vrcp.f32 %v2468_v10  ;;  %v4519_v12 = vmul.f32 -1.442695, %v8462_v11 }
 0x6fd   : > { %v4518_v45 = vmul.f32 -1.442695, %v8465_v13  ;;  %5131 = vmatmul.mubr.f32.gmra.mrb[18].mxu0 %v2513_v15  ;;  %v1955_v16 = vpop.xlane.xlu0 %1954 }
 0x6fe   : > { %v6206_v46 = vpop.eup %6205  ;;  %6217 = vpow2.f32 %v4519_v12  ;;  %v2372_v40 = vmul.f32 %v8402_v52, %v1955_v16  ;;  %v1952_v41 = vpop.xlane.xlu1 %1951 }
 0x6ff   : > { %v6208_v18 = vpop.eup %6207  ;;  %6219 = vpow2.f32 %v4518_v45  ;;  %v2371_v21 = vmul.f32 %v8402_v52, %v1952_v41  ;;  %v2514_v23 = vmul.f32 %v6206_v46, %v8426_v34 }
 0x700   : > { %v6210_v4 = vpop.eup %6209  ;;  %v2388_v22 = vadd.f32 %v8394_v47, %v2372_v40  ;;  %v2515_v6 = vmul.f32 %v6208_v18, %v8429_v35 }
 0x701   : > { %v6212_v14 = vpop.eup %6211  ;;  %v2471_v26 = vadd.f32 1.0, %v6210_v4  ;;  %v2387_v28 = vadd.f32 %v2371_v21, %v8396_v48  ;;  %5133 = vmatprep.mubr.f32.mxu0 %v2514_v23 }
 0x702   : > { %v2470_v30 = vadd.f32 1.0, %v6212_v14  ;;  %v2411_v33 = vadd.f32 %v8405_v57, %v2388_v22  ;;  %5134 = vmatmul.mubr.f32.gmra.mrb[20].mxu0 %v2515_v6 }
 0x703   : > { %6221 = vrcp.f32 %v2471_v26  ;;  %v2410_v42 = vadd.f32 %v8405_v57, %v2387_v28 }
 0x704   : > { %6223 = vrcp.f32 %v2470_v30  ;;  %v4521_v0 = vmul.f32 -1.442695, %v2411_v33 }
 0x705   : > { %v6214_v34 = vpop.eup %6213  ;;  %v4520_v61 = vmul.f32 -1.442695, %v2410_v42  ;;  %v1961_v54 = vpop.xlane.xlu0 %1960 }
 0x706   : > { %v6216_v47 = vpop.eup %6215  ;;  %6225 = vpow2.f32 %v4521_v0  ;;  %v2374_v35 = vmul.f32 %v8402_v52, %v1961_v54  ;;  %v1958_v44 = vpop.xlane.xlu1 %1957  ;;  %v2517_v56 = vmul.f32 %v6214_v34, %v8436_v7  ;;  %v2807_v0 = vld [vmem:[#allocation30 + $0x8] sm:$0xff] }
 0x707   : > { %6227 = vpow2.f32 %v4520_v61  ;;  %v2373_v48 = vmul.f32 %v8402_v52, %v1958_v44  ;;  %v2516_v55 = vmul.f32 %v6216_v47, %v8439_v8  ;;  %v3086_v61 = vld [vmem:[#allocation33] sm:$0xff]  ;;  %v3087_v54 = vld [vmem:[#allocation33 + $0x8] sm:$0xff]  ;;  %v2809_v44 = vld [vmem:[#allocation30 + $0x18] sm:$0xff] }
 0x708   : > { %v6218_v38 = vpop.eup %6217  ;;  %v2390_v37 = vadd.f32 %v8398_v49, %v2374_v35  ;;  %v5645_v47 = vpack.c.bf16 %v3087_v54, %v3086_v61  ;;  %v2808_v35 = vld [vmem:[#allocation30 + $0x10] sm:$0xff] }
 0x709   : > { %v6220_v58 = vpop.eup %6219  ;;  %v2473_v59 = vadd.f32 1.0, %v6218_v38  ;;  %v2389_v60 = vadd.f32 %v2373_v48, %v8400_v50  ;;  %5136 = vmatprep.mubr.f32.mxu0 %v2516_v55  ;;  %v3089_v48 = vld [vmem:[#allocation33 + $0x18] sm:$0xff] }
 0x70a   : > { %v2472_v2 = vadd.f32 1.0, %v6220_v58  ;;  %v2413_v9 = vadd.f32 %v8405_v57, %v2390_v37  ;;  %5137 = vmatmul.mubr.f32.gmra.mrb[22].mxu0 %v2517_v56  ;;  %5646 = vmatprep.subr.bf16.mxu1 %v5645_v47  ;;  %v2810_v38 = vld [vmem:[#allocation30 + $0x20] sm:$0xff]  ;;  %v2811_v37 = vld [vmem:[#allocation30 + $0x28] sm:$0xff] }
 0x70b   : > { %6229 = vrcp.f32 %v2473_v59  ;;  %v2412_v10 = vadd.f32 %v8405_v57, %v2389_v60  ;;  %5648 = vmatpush3.bf16.msra.mxu1 %v5645_v47  ;;  %v5621_v56 = vpack.c.bf16 %v2811_v37, %v2810_v38  ;;  %v3090_v58 = vld [vmem:[#allocation33 + $0x20] sm:$0xff]  ;;  %v3091_v59 = vld [vmem:[#allocation33 + $0x28] sm:$0xff] }
 0x70c   : > { %6231 = vrcp.f32 %v2472_v2  ;;  %v4523_v52 = vmul.f32 -1.442695, %v2413_v9  ;;  %v5653_v60 = vpack.c.bf16 %v3091_v59, %v3090_v58  ;;  %v2812_v2 = vld [vmem:[#allocation30 + $0x30] sm:$0xff] }
 0x70d   : > { %v6222_v8 = vpop.eup %6221  ;;  %v4522_v15 = vmul.f32 -1.442695, %v2412_v10 }
 0x70e   : > { %v6224_v12 = vpop.eup %6223  ;;  %6233 = vpow2.f32 %v4523_v52  ;;  %v2519_v50 = vmul.f32 %v6222_v8, %v8449_v31  ;;  %v3092_v52 = vld [vmem:[#allocation33 + $0x30] sm:$0xff]  ;;  %v3093_v8 = vld [vmem:[#allocation33 + $0x38] sm:$0xff] }
 0x70f   : > { %6235 = vpow2.f32 %v4522_v15  ;;  %v2518_v49 = vmul.f32 %v6224_v12, %v8452_v36  ;;  %v5657_v15 = vpack.c.bf16 %v3093_v8, %v3092_v52  ;;  %v2814_v12 = vld [vmem:[#allocation30 + $0x40] sm:$0xff] }
 0x710   : > { %v6226_v7 = vpop.eup %6225 }
 0x711   : > { %v6228_v45 = vpop.eup %6227  ;;  %v2475_v16 = vadd.f32 1.0, %v6226_v7  ;;  %5139 = vmatprep.mubr.f32.mxu0 %v2518_v49  ;;  %v2815_v49 = vld [vmem:[#allocation30 + $0x48] sm:$0xff] }
 0x712   : > { %v2474_v46 = vadd.f32 1.0, %v6228_v45  ;;  %5140 = vmatmul.mubr.f32.gmra.mrb[24].mxu0 %v2519_v50  ;;  %v5629_v7 = vpack.c.bf16 %v2815_v49, %v2814_v12  ;;  %v3094_v50 = vld [vmem:[#allocation33 + $0x40] sm:$0xff]  ;;  %v3095_v45 = vld [vmem:[#allocation33 + $0x48] sm:$0xff] }
 0x713   : > { %6237 = vrcp.f32 %v2475_v16  ;;  %v5661_v16 = vpack.c.bf16 %v3095_v45, %v3094_v50 }
 0x714   : > { %6239 = vrcp.f32 %v2474_v46  ;;  %v2816_v46 = vld [vmem:[#allocation30 + $0x50] sm:$0xff] }
 0x715   : > { %v6230_v57 = vpop.eup %6229 }
 0x716   : > { %v6232_v40 = vpop.eup %6231  ;;  %v2521_v21 = vmul.f32 %v6230_v57, %v8462_v11  ;;  %v2806_v11 = vld [vmem:[#allocation30] sm:$0xff]  ;;  %v2817_v57 = vld [vmem:[#allocation30 + $0x58] sm:$0xff] }
 0x717   : > { %v2520_v41 = vmul.f32 %v6232_v40, %v8465_v13  ;;  %v5613_v34 = vpack.c.bf16 %v2807_v0, %v2806_v11  ;;  %v5633_v40 = vpack.c.bf16 %v2817_v57, %v2816_v46  ;;  %v8490_v0 = vld [vmem:[#allocation28] ss:$0 sm:$0xff] }
 0x718   : > { %v6234_v18 = vpop.eup %6233 }
 0x719   : > { %v6236_v23 = vpop.eup %6235  ;;  %v2477_v4 = vadd.f32 1.0, %v6234_v18  ;;  %5142 = vmatprep.mubr.f32.mxu0 %v2520_v41  ;;  %5614 = vmatprep.subr.bf16.mxu0 %v5613_v34  ;;  %v3096_v41 = vld [vmem:[#allocation33 + $0x50] sm:$0xff]  ;;  %v3097_v18 = vld [vmem:[#allocation33 + $0x58] sm:$0xff] }
 0x71a   : > { %v2476_v36 = vadd.f32 1.0, %v6236_v23  ;;  %5143 = vmatmul.mubr.f32.gmra.mrb[26].mxu0 %v2521_v21  ;;  %v5665_v21 = vpack.c.bf16 %v3097_v18, %v3096_v41  ;;  %v2818_v23 = vld [vmem:[#allocation30 + $0x60] sm:$0xff] }
 0x71b   : > { %6241 = vrcp.f32 %v2477_v4  ;;  %5616 = vmatpush3.bf16.msra.mxu0 %v5613_v34  ;;  %v2819_v4 = vld [vmem:[#allocation30 + $0x68] sm:$0xff] }
 0x71c   : > { %6243 = vrcp.f32 %v2476_v36  ;;  %v5637_v36 = vpack.c.bf16 %v2819_v4, %v2818_v23 }
 0x71d   : > { %v6238_v31 = vpop.eup %6237 }
 0x71e   : > { %v6240_v22 = vpop.eup %6239  ;;  %v2523_v14 = vmul.f32 %v6238_v31, %v2411_v33  ;;  %v3088_v33 = vld [vmem:[#allocation33 + $0x10] sm:$0xff]  ;;  %v3098_v31 = vld [vmem:[#allocation33 + $0x60] sm:$0xff] }
 0x71f   : > { %v2522_v6 = vmul.f32 %v6240_v22, %v2410_v42  ;;  %v5617_v42 = vpack.c.bf16 %v2809_v44, %v2808_v35  ;;  %v5649_v55 = vpack.c.bf16 %v3089_v48, %v3088_v33  ;;  %v3099_v22 = vld [vmem:[#allocation33 + $0x68] sm:$0xff] }
 0x721   : > { %5145 = vmatprep.mubr.f32.mxu0 %v2522_v6  ;;  %5618 = vmatprep.subr.bf16.mxu0 %v5617_v42  ;;  %v5669_v6 = vpack.c.bf16 %v3099_v22, %v3098_v31 }
 0x722   : > { %5146 = vmatmul.mubr.f32.gmra.mrb[28].mxu0 %v2523_v14  ;;  %5650 = vmatprep.subr.bf16.mxu1 %v5649_v55  ;;  %v2820_v14 = vld [vmem:[#allocation30 + $0x70] sm:$0xff] }
 0x723   : > { %5620 = vmatpush3.bf16.msra.mxu0 %v5617_v42  ;;  %5652 = vmatpush3.bf16.msra.mxu1 %v5649_v55 }
 0x724   : > { %5622 = vmatprep.subr.bf16.mxu0 %v5621_v56  ;;  %5654 = vmatprep.subr.bf16.mxu1 %v5653_v60 }
 0x725   : > { %v6242_v26 = vpop.eup %6241 }
 0x726   : > { %v6244_v28 = vpop.eup %6243  ;;  %v2525_v13 = vmul.f32 %v6242_v26, %v2413_v9  ;;  %v2813_v9 = vld [vmem:[#allocation30 + $0x38] sm:$0xff] }
 0x727   : > { %v2524_v30 = vmul.f32 %v6244_v28, %v2412_v10  ;;  %5624 = vmatpush3.bf16.msra.mxu0 %v5621_v56  ;;  %v5625_v10 = vpack.c.bf16 %v2813_v9, %v2812_v2  ;;  %5656 = vmatpush3.bf16.msra.mxu1 %v5653_v60  ;;  %v2821_v26 = vld [vmem:[#allocation30 + $0x78] sm:$0xff] }
 0x728   : > { %5658 = vmatprep.subr.bf16.mxu1 %v5657_v15  ;;  %v5641_v28 = vpack.c.bf16 %v2821_v26, %v2820_v14 }
 0x729   : > { %5148 = vmatprep.mubr.f32.mxu0 %v2524_v30  ;;  %5626 = vmatprep.subr.bf16.mxu0 %v5625_v10  ;;  %v3100_v30 = vld [vmem:[#allocation33 + $0x70] sm:$0xff] }
 0x72a   : > { %5149 = vmatmul.mubr.f32.gmra.mrb[30].mxu0 %v2525_v13  ;;  %v3101_v13 = vld [vmem:[#allocation33 + $0x78] sm:$0xff] }
 0x72b   : > { %5628 = vmatpush3.bf16.msra.mxu0 %v5625_v10  ;;  %5660 = vmatpush3.bf16.msra.mxu1 %v5657_v15  ;;  %v5673_v11 = vpack.c.bf16 %v3101_v13, %v3100_v30 }
 0x72c   : > { %5630 = vmatprep.subr.bf16.mxu0 %v5629_v7  ;;  %5662 = vmatprep.subr.bf16.mxu1 %v5661_v16 }
 0x72f   : > { %5632 = vmatpush3.bf16.msra.mxu0 %v5629_v7  ;;  %5664 = vmatpush3.bf16.msra.mxu1 %v5661_v16 }
 0x730   : > { %5634 = vmatprep.subr.bf16.mxu0 %v5633_v40  ;;  %5666 = vmatprep.subr.bf16.mxu1 %v5665_v21 }
 0x733   : > { %5636 = vmatpush3.bf16.msra.mxu0 %v5633_v40  ;;  %5668 = vmatpush3.bf16.msra.mxu1 %v5665_v21 }
 0x734   : > { %5638 = vmatprep.subr.bf16.mxu0 %v5637_v36  ;;  %5670 = vmatprep.subr.bf16.mxu1 %v5669_v6 }
 0x737   : > { %5640 = vmatpush3.bf16.msra.mxu0 %v5637_v36  ;;  %5672 = vmatpush3.bf16.msra.mxu1 %v5669_v6 }
 0x738   : > { %5642 = vmatprep.subr.bf16.mxu0 %v5641_v28  ;;  %5674 = vmatprep.subr.bf16.mxu1 %v5673_v11 }
 0x73b   : > { %5644 = vmatpush3.bf16.msra.mxu0 %v5641_v28  ;;  %5676 = vmatpush3.bf16.msra.mxu1 %v5673_v11 }
 0x7c6   : > { %v5129_v34 = vpop.f32.mrb[16].mxu0 }
 0x7c7   : > { %v2621_v61 = vadd.f32 %v5129_v34, %v8490_v0  ;;  %v2615_v54 = vpop.f32.mrb[17].mxu0 }
 0x7c8   : > { %v2616_v47 = vadd.f32 %v8490_v0, %v2615_v54 }
 0x7c9   : > { %v4526_v35 = vmul.f32 -1.442695, %v2621_v61 }
 0x7ca   : > { %v4525_v44 = vmul.f32 -1.442695, %v2616_v47 }
 0x7cb   : > { %6245 = vpow2.f32 %v4526_v35 }
 0x7cc   : > { %6247 = vpow2.f32 %v4525_v44 }
 0x7d0   : > { %v5132_v42 = vpop.f32.mrb[18].mxu0 }
 0x7d1   : > { %v2631_v33 = vadd.f32 %v5132_v42, %v8490_v0  ;;  %v2625_v48 = vpop.f32.mrb[19].mxu0 }
 0x7d2   : > { %v2626_v55 = vadd.f32 %v8490_v0, %v2625_v48 }
 0x7d3   : > { %v4528_v38 = vmul.f32 -1.442695, %v2631_v33 }
 0x7d4   : > { %v4527_v37 = vmul.f32 -1.442695, %v2626_v55 }
 0x7d5   : > { %v6246_v56 = vpop.eup %6245  ;;  %6249 = vpow2.f32 %v4528_v38  ;;  %v5135_v58 = vpop.f32.mrb[20].mxu0 }
 0x7d6   : > { %v6248_v59 = vpop.eup %6247  ;;  %v2743_v60 = vadd.f32 1.0, %v6246_v56  ;;  %6251 = vpow2.f32 %v4527_v37  ;;  %v8497_v2 = vadd.f32 %v5135_v58, %v8490_v0  ;;  %v2635_v9 = vpop.f32.mrb[21].mxu0 }
 0x7d7   : > { %v2742_v10 = vadd.f32 1.0, %v6248_v59  ;;  %v8500_v52 = vadd.f32 %v8490_v0, %v2635_v9 }
 0x7d8   : > { %6253 = vrcp.f32 %v2743_v60  ;;  %v4530_v8 = vmul.f32 -1.442695, %v8497_v2 }
 0x7d9   : > { %6255 = vrcp.f32 %v2742_v10  ;;  %v4529_v15 = vmul.f32 -1.442695, %v8500_v52 }
 0x7da   : > { %6257 = vpow2.f32 %v4530_v8 }
 0x7db   : > { %6259 = vpow2.f32 %v4529_v15 }
 0x7dd   : > { %v5138_v12 = vpop.f32.mrb[22].mxu0 }
 0x7de   : > { %v8505_v49 = vadd.f32 %v5138_v12, %v8490_v0  ;;  %v2645_v7 = vpop.f32.mrb[23].mxu0 }
 0x7df   : > { %v6250_v50 = vpop.eup %6249  ;;  %v8508_v45 = vadd.f32 %v8490_v0, %v2645_v7 }
 0x7e0   : > { %v6252_v16 = vpop.eup %6251  ;;  %v2745_v46 = vadd.f32 1.0, %v6250_v50  ;;  %v4532_v57 = vmul.f32 -1.442695, %v8505_v49 }
 0x7e1   : > { %v2744_v40 = vadd.f32 1.0, %v6252_v16  ;;  %v4531_v41 = vmul.f32 -1.442695, %v8508_v45 }
 0x7e2   : > { %v6254_v18 = vpop.eup %6253  ;;  %6261 = vrcp.f32 %v2745_v46 }
 0x7e3   : > { %v6256_v21 = vpop.eup %6255  ;;  %v2791_v23 = vmul.f32 %v6254_v18, %v2621_v61  ;;  %6263 = vrcp.f32 %v2744_v40 }
 0x7e4   : > { %v6258_v4 = vpop.eup %6257  ;;  %v2790_v36 = vmul.f32 %v6256_v21, %v2616_v47  ;;  %6265 = vpow2.f32 %v4532_v57 }
 0x7e5   : > { %v6260_v31 = vpop.eup %6259  ;;  %v2747_v22 = vadd.f32 1.0, %v6258_v4  ;;  %6267 = vpow2.f32 %v4531_v41  ;;  %v5141_v6 = vpop.f32.mrb[24].mxu0 }
 0x7e6   : > { %v2746_v14 = vadd.f32 1.0, %v6260_v31  ;;  %v8513_v26 = vadd.f32 %v5141_v6, %v8490_v0  ;;  %v2655_v28 = vpop.f32.mrb[25].mxu0  ;;  %5183 = vmatprep.mubr.f32.mxu0 %v2790_v36  ;;  %v8515_v30 = vpack.c.bf16 %v2791_v23, %v2790_v36 }
 0x7e7   : > { %6269 = vrcp.f32 %v2747_v22  ;;  %v8518_v13 = vadd.f32 %v8490_v0, %v2655_v28  ;;  %5184 = vmatmul.mubr.f32.vlgmr.msra.gmra.mrb[32].mxu0 %v2791_v23 }
 0x7e8   : > { %6271 = vrcp.f32 %v2746_v14  ;;  %v4534_v11 = vmul.f32 -1.442695, %v8513_v26  ;;  %5710 = vmatprep.subr.bf16.mxu1 %v8515_v30 }
 0x7e9   : > { %v4533_v34 = vmul.f32 -1.442695, %v8518_v13 }
 0x7ea   : > { %6273 = vpow2.f32 %v4534_v11 }
 0x7eb   : > { %6275 = vpow2.f32 %v4533_v34 }
 0x7ec   : > { %v6262_v61 = vpop.eup %6261 }
 0x7ed   : > { %v6264_v54 = vpop.eup %6263  ;;  %v2793_v47 = vmul.f32 %v6262_v61, %v2631_v33  ;;  %v5144_v35 = vpop.f32.mrb[26].mxu0 }
 0x7ee   : > { %v6266_v44 = vpop.eup %6265  ;;  %v2792_v42 = vmul.f32 %v6264_v54, %v2626_v55  ;;  %v8524_v48 = vadd.f32 %v5144_v35, %v8490_v0  ;;  %v2665_v38 = vpop.f32.mrb[27].mxu0 }
 0x7ef   : > { %v6268_v37 = vpop.eup %6267  ;;  %v2749_v56 = vadd.f32 1.0, %v6266_v44  ;;  %v8527_v58 = vadd.f32 %v8490_v0, %v2665_v38 }
 0x7f0   : > { %v2748_v59 = vadd.f32 1.0, %v6268_v37  ;;  %v4536_v60 = vmul.f32 -1.442695, %v8524_v48  ;;  %5186 = vmatprep.mubr.f32.mxu0 %v2792_v42  ;;  %v8530_v9 = vpack.c.bf16 %v2793_v47, %v2792_v42 }
 0x7f1   : > { %v6270_v10 = vpop.eup %6269  ;;  %6277 = vrcp.f32 %v2749_v56  ;;  %v4535_v33 = vmul.f32 -1.442695, %v8527_v58  ;;  %5187 = vmatmul.mubr.f32.gmra.mrb[34].mxu0 %v2793_v47 }
 0x7f2   : > { %v6272_v55 = vpop.eup %6271  ;;  %v2795_v8 = vmul.f32 %v6270_v10, %v8497_v2  ;;  %6279 = vrcp.f32 %v2748_v59 }
 0x7f3   : > { %v2794_v15 = vmul.f32 %v6272_v55, %v8500_v52  ;;  %6281 = vpow2.f32 %v4536_v60 }
 0x7f4   : > { %v6274_v12 = vpop.eup %6273  ;;  %6283 = vpow2.f32 %v4535_v33 }
 0x7f5   : > { %v6276_v7 = vpop.eup %6275  ;;  %v2751_v50 = vadd.f32 1.0, %v6274_v12  ;;  %v5147_v16 = vpop.f32.mrb[28].mxu0  ;;  %5189 = vmatprep.mubr.f32.mxu0 %v2794_v15  ;;  %v8535_v46 = vpack.c.bf16 %v2795_v8, %v2794_v15 }
 0x7f6   : > { %v2750_v57 = vadd.f32 1.0, %v6276_v7  ;;  %v2681_v40 = vadd.f32 %v5147_v16, %v8490_v0  ;;  %v2675_v41 = vpop.f32.mrb[29].mxu0  ;;  %5190 = vmatmul.mubr.f32.gmra.mrb[36].mxu0 %v2795_v8 }
 0x7f7   : > { %6285 = vrcp.f32 %v2751_v50  ;;  %v2676_v2 = vadd.f32 %v8490_v0, %v2675_v41 }
 0x7f8   : > { %6287 = vrcp.f32 %v2750_v57  ;;  %v4538_v18 = vmul.f32 -1.442695, %v2681_v40 }
 0x7f9   : > { %v4537_v52 = vmul.f32 -1.442695, %v2676_v2 }
 0x7fa   : > { %6289 = vpow2.f32 %v4538_v18 }
 0x7fb   : > { %v6278_v21 = vpop.eup %6277  ;;  %6291 = vpow2.f32 %v4537_v52 }
 0x7fc   : > { %v6280_v23 = vpop.eup %6279  ;;  %v2797_v4 = vmul.f32 %v6278_v21, %v8505_v49 }
 0x7fd   : > { %v6282_v36 = vpop.eup %6281  ;;  %v2796_v31 = vmul.f32 %v6280_v23, %v8508_v45  ;;  %v5150_v22 = vpop.f32.mrb[30].mxu0  ;;  %v8557_v23 = vld [vmem:[#allocation31] ss:$0 sm:$0xff] }
 0x7fe   : > { %v6284_v6 = vpop.eup %6283  ;;  %v2753_v14 = vadd.f32 1.0, %v6282_v36  ;;  %v2691_v28 = vadd.f32 %v5150_v22, %v8490_v0  ;;  %v2685_v11 = vpop.f32.mrb[31].mxu0 }
 0x7ff   : > { %v2752_v34 = vadd.f32 1.0, %v6284_v6  ;;  %5192 = vmatprep.mubr.f32.mxu0 %v2796_v31  ;;  %v2686_v61 = vadd.f32 %v8490_v0, %v2685_v11  ;;  %v8543_v54 = vpack.c.bf16 %v2797_v4, %v2796_v31 }
 0x800   : > { %6293 = vrcp.f32 %v2753_v14  ;;  %v4540_v47 = vmul.f32 -1.442695, %v2691_v28  ;;  %5193 = vmatmul.mubr.f32.gmra.mrb[38].mxu0 %v2797_v4 }
 0x801   : > { %v6286_v35 = vpop.eup %6285  ;;  %6295 = vrcp.f32 %v2752_v34  ;;  %v4539_v49 = vmul.f32 -1.442695, %v2686_v61 }
 0x802   : > { %v6288_v44 = vpop.eup %6287  ;;  %v2799_v45 = vmul.f32 %v6286_v35, %v8513_v26  ;;  %6297 = vpow2.f32 %v4540_v47 }
 0x803   : > { %v2798_v42 = vmul.f32 %v6288_v44, %v8518_v13  ;;  %6299 = vpow2.f32 %v4539_v49 }
 0x804   : > { %v6290_v38 = vpop.eup %6289 }
 0x805   : > { %v6292_v37 = vpop.eup %6291  ;;  %v2755_v56 = vadd.f32 1.0, %v6290_v38  ;;  %5195 = vmatprep.mubr.f32.mxu0 %v2798_v42  ;;  %v8547_v0 = vpack.c.bf16 %v2799_v45, %v2798_v42 }
 0x806   : > { %v2754_v59 = vadd.f32 1.0, %v6292_v37  ;;  %5196 = vmatmul.mubr.f32.gmra.mrb[40].mxu0 %v2799_v45 }
 0x807   : > { %6301 = vrcp.f32 %v2755_v56 }
 0x808   : > { %6303 = vrcp.f32 %v2754_v59 }
 0x80a   : > { %v6294_v60 = vpop.eup %6293 }
 0x80b   : > { %v6296_v10 = vpop.eup %6295  ;;  %v2801_v33 = vmul.f32 %v6294_v60, %v8524_v48 }
 0x80c   : > { %v6298_v55 = vpop.eup %6297  ;;  %v2800_v26 = vmul.f32 %v6296_v10, %v8527_v58 }
 0x80d   : > { %v6300_v8 = vpop.eup %6299  ;;  %v2757_v13 = vadd.f32 1.0, %v6298_v55 }
 0x80e   : > { %v2756_v15 = vadd.f32 1.0, %v6300_v8  ;;  %5198 = vmatprep.mubr.f32.mxu0 %v2800_v26  ;;  %v8551_v12 = vpack.c.bf16 %v2801_v33, %v2800_v26 }
 0x80f   : > { %6305 = vrcp.f32 %v2757_v13  ;;  %5199 = vmatmul.mubr.f32.gmra.mrb[42].mxu0 %v2801_v33 }
 0x810   : > { %6307 = vrcp.f32 %v2756_v15 }
 0x811   : > { %v6302_v7 = vpop.eup %6301 }
 0x812   : > { %v6304_v50 = vpop.eup %6303  ;;  %v2803_v16 = vmul.f32 %v6302_v7, %v2681_v40 }
 0x813   : > { %v2802_v57 = vmul.f32 %v6304_v50, %v2676_v2 }
 0x815   : > { %5201 = vmatprep.mubr.f32.mxu0 %v2802_v57  ;;  %v8553_v41 = vpack.c.bf16 %v2803_v16, %v2802_v57 }
 0x816   : > { %5202 = vmatmul.mubr.f32.gmra.mrb[44].mxu0 %v2803_v16 }
 0x819   : > { %v6306_v48 = vpop.eup %6305 }
 0x81a   : > { %v6308_v18 = vpop.eup %6307  ;;  %v2805_v58 = vmul.f32 %v6306_v48, %v2691_v28 }
 0x81b   : > { %v2804_v52 = vmul.f32 %v6308_v18, %v2686_v61 }
 0x81d   : > { %5204 = vmatprep.mubr.f32.mxu0 %v2804_v52  ;;  %v8555_v21 = vpack.c.bf16 %v2805_v58, %v2804_v52 }
 0x81e   : > { %5205 = vmatmul.mubr.f32.gmra.mrb[46].mxu0 %v2805_v58 }
 0x8ba   : > { %v5185_v4 = vpop.f32.mrb[32].mxu0 }
 0x8bb   : > { %v2901_v36 = vadd.f32 %v5185_v4, %v8557_v23  ;;  %v2895_v31 = vpop.f32.mrb[33].mxu0 }
 0x8bc   : > { %v2896_v40 = vadd.f32 %v8557_v23, %v2895_v31 }
 0x8bd   : > { %v4543_v2 = vmul.f32 -1.442695, %v2901_v36 }
 0x8be   : > { %v4542_v22 = vmul.f32 -1.442695, %v2896_v40 }
 0x8bf   : > { %6309 = vpow2.f32 %v4543_v2 }
 0x8c0   : > { %6311 = vpow2.f32 %v4542_v22 }
 0x8c4   : > { %v5188_v6 = vpop.f32.mrb[34].mxu0 }
 0x8c5   : > { %v8562_v14 = vadd.f32 %v5188_v6, %v8557_v23  ;;  %v2905_v28 = vpop.f32.mrb[35].mxu0 }
 0x8c6   : > { %v2906_v11 = vadd.f32 %v8557_v23, %v2905_v28 }
 0x8c7   : > { %v4545_v34 = vmul.f32 -1.442695, %v8562_v14 }
 0x8c8   : > { %v4544_v61 = vmul.f32 -1.442695, %v2906_v11 }
 0x8c9   : > { %v6310_v47 = vpop.eup %6309  ;;  %6313 = vpow2.f32 %v4545_v34  ;;  %v5191_v35 = vpop.f32.mrb[36].mxu0 }
 0x8ca   : > { %v6312_v49 = vpop.eup %6311  ;;  %v3023_v44 = vadd.f32 1.0, %v6310_v47  ;;  %6315 = vpow2.f32 %v4544_v61  ;;  %v8567_v45 = vadd.f32 %v5191_v35, %v8557_v23  ;;  %v2915_v42 = vpop.f32.mrb[37].mxu0 }
 0x8cb   : > { %v3022_v38 = vadd.f32 1.0, %v6312_v49  ;;  %v8570_v37 = vadd.f32 %v8557_v23, %v2915_v42 }
 0x8cc   : > { %6317 = vrcp.f32 %v3023_v44  ;;  %v4547_v56 = vmul.f32 -1.442695, %v8567_v45 }
 0x8cd   : > { %6319 = vrcp.f32 %v3022_v38  ;;  %v4546_v59 = vmul.f32 -1.442695, %v8570_v37 }
 0x8ce   : > { %6321 = vpow2.f32 %v4547_v56 }
 0x8cf   : > { %6323 = vpow2.f32 %v4546_v59 }
 0x8d3   : > { %v6314_v60 = vpop.eup %6313  ;;  %v5194_v10 = vpop.f32.mrb[38].mxu0 }
 0x8d4   : > { %v6316_v33 = vpop.eup %6315  ;;  %v3025_v55 = vadd.f32 1.0, %v6314_v60  ;;  %v8575_v26 = vadd.f32 %v5194_v10, %v8557_v23  ;;  %v2925_v8 = vpop.f32.mrb[39].mxu0 }
 0x8d5   : > { %v3024_v13 = vadd.f32 1.0, %v6316_v33  ;;  %v8578_v15 = vadd.f32 %v8557_v23, %v2925_v8 }
 0x8d6   : > { %v6318_v7 = vpop.eup %6317  ;;  %6325 = vrcp.f32 %v3025_v55  ;;  %v4549_v50 = vmul.f32 -1.442695, %v8575_v26 }
 0x8d7   : > { %v6320_v16 = vpop.eup %6319  ;;  %6327 = vrcp.f32 %v3024_v13  ;;  %v4548_v57 = vmul.f32 -1.442695, %v8578_v15  ;;  %v3071_v52 = vmul.f32 %v6318_v7, %v2901_v36 }
 0x8d8   : > { %v6322_v48 = vpop.eup %6321  ;;  %v3070_v18 = vmul.f32 %v6320_v16, %v2896_v40  ;;  %6329 = vpow2.f32 %v4549_v50 }
 0x8d9   : > { %v6324_v58 = vpop.eup %6323  ;;  %v3027_v4 = vadd.f32 1.0, %v6322_v48  ;;  %6331 = vpow2.f32 %v4548_v57  ;;  %v5197_v31 = vpop.f32.mrb[40].mxu0 }
 0x8da   : > { %v3026_v2 = vadd.f32 1.0, %v6324_v58  ;;  %v8583_v22 = vadd.f32 %v5197_v31, %v8557_v23  ;;  %v2935_v6 = vpop.f32.mrb[41].mxu0  ;;  %5239 = vmatprep.mubr.f32.mxu1 %v3070_v18 }
 0x8db   : > { %6333 = vrcp.f32 %v3027_v4  ;;  %v8586_v28 = vadd.f32 %v8557_v23, %v2935_v6  ;;  %5240 = vmatmul.mubr.f32.vlgmr.msra.gmra.mrb[16].mxu1 %v3071_v52 }
 0x8dc   : > { %6335 = vrcp.f32 %v3026_v2  ;;  %v4551_v40 = vmul.f32 -1.442695, %v8583_v22  ;;  %5712 = vmatpush3.bf16.msra.mxu1 %v8515_v30 }
 0x8dd   : > { %v4550_v36 = vmul.f32 -1.442695, %v8586_v28  ;;  %5714 = vmatprep.subr.bf16.mxu1 %v8530_v9 }
 0x8de   : > { %6337 = vpow2.f32 %v4551_v40 }
 0x8df   : > { %6339 = vpow2.f32 %v4550_v36 }
 0x8e0   : > { %v6326_v34 = vpop.eup %6325  ;;  %5716 = vmatpush3.bf16.msra.mxu1 %v8530_v9 }
 0x8e1   : > { %v6328_v61 = vpop.eup %6327  ;;  %5718 = vmatprep.subr.bf16.mxu1 %v8535_v46  ;;  %v3073_v42 = vmul.f32 %v6326_v34, %v8562_v14 }
 0x8e2   : > { %v6330_v47 = vpop.eup %6329  ;;  %v3072_v35 = vmul.f32 %v6328_v61, %v2906_v11  ;;  %v5200_v49 = vpop.f32.mrb[42].mxu0 }
 0x8e3   : > { %v6332_v44 = vpop.eup %6331  ;;  %v3029_v38 = vadd.f32 1.0, %v6330_v47  ;;  %v8596_v30 = vadd.f32 %v5200_v49, %v8557_v23  ;;  %v2945_v56 = vpop.f32.mrb[43].mxu0 }
 0x8e4   : > { %v3028_v59 = vadd.f32 1.0, %v6332_v44  ;;  %v8599_v60 = vadd.f32 %v8557_v23, %v2945_v56  ;;  %5720 = vmatpush3.bf16.msra.mxu1 %v8535_v46  ;;  %5242 = vmatprep.mubr.f32.mxu1 %v3072_v35 }
 0x8e5   : > { %v6334_v9 = vpop.eup %6333  ;;  %6341 = vrcp.f32 %v3029_v38  ;;  %v4553_v11 = vmul.f32 -1.442695, %v8596_v30  ;;  %5722 = vmatprep.subr.bf16.mxu1 %v8543_v54  ;;  %5243 = vmatmul.mubr.f32.gmra.mrb[18].mxu1 %v3073_v42 }
 0x8e6   : > { %v6336_v14 = vpop.eup %6335  ;;  %6343 = vrcp.f32 %v3028_v59  ;;  %v4552_v10 = vmul.f32 -1.442695, %v8599_v60  ;;  %v3075_v8 = vmul.f32 %v6334_v9, %v8567_v45 }
 0x8e7   : > { %v3074_v33 = vmul.f32 %v6336_v14, %v8570_v37  ;;  %6345 = vpow2.f32 %v4553_v11 }
 0x8e8   : > { %v6338_v55 = vpop.eup %6337  ;;  %6347 = vpow2.f32 %v4552_v10  ;;  %5724 = vmatpush3.bf16.msra.mxu1 %v8543_v54 }
 0x8e9   : > { %v6340_v46 = vpop.eup %6339  ;;  %v3031_v13 = vadd.f32 1.0, %v6338_v55  ;;  %5726 = vmatprep.subr.bf16.mxu1 %v8547_v0  ;;  %v5203_v7 = vpop.f32.mrb[44].mxu0  ;;  %5245 = vmatprep.mubr.f32.mxu1 %v3074_v33 }
 0x8ea   : > { %v3030_v50 = vadd.f32 1.0, %v6340_v46  ;;  %v8610_v16 = vadd.f32 %v5203_v7, %v8557_v23  ;;  %v2955_v57 = vpop.f32.mrb[45].mxu0  ;;  %5246 = vmatmul.mubr.f32.gmra.mrb[20].mxu1 %v3075_v8 }
 0x8eb   : > { %6349 = vrcp.f32 %v3031_v13  ;;  %v2956_v37 = vadd.f32 %v8557_v23, %v2955_v57 }
 0x8ec   : > { %6351 = vrcp.f32 %v3030_v50  ;;  %v4555_v45 = vmul.f32 -1.442695, %v8610_v16  ;;  %5728 = vmatpush3.bf16.msra.mxu1 %v8547_v0 }
 0x8ed   : > { %v4554_v54 = vmul.f32 -1.442695, %v2956_v37  ;;  %5730 = vmatprep.subr.bf16.mxu1 %v8551_v12 }
 0x8ee   : > { %6353 = vpow2.f32 %v4555_v45 }
 0x8ef   : > { %v6342_v48 = vpop.eup %6341  ;;  %6355 = vpow2.f32 %v4554_v54 }
 0x8f0   : > { %v6344_v18 = vpop.eup %6343  ;;  %5732 = vmatpush3.bf16.msra.mxu1 %v8551_v12  ;;  %v3077_v2 = vmul.f32 %v6342_v48, %v8575_v26 }
 0x8f1   : > { %v6346_v58 = vpop.eup %6345  ;;  %v3076_v52 = vmul.f32 %v6344_v18, %v8578_v15  ;;  %5734 = vmatprep.subr.bf16.mxu1 %v8553_v41  ;;  %v5206_v4 = vpop.f32.mrb[46].mxu0 }
 0x8f2   : > { %v6348_v31 = vpop.eup %6347  ;;  %v3033_v6 = vadd.f32 1.0, %v6346_v58  ;;  %v2971_v0 = vadd.f32 %v5206_v4, %v8557_v23  ;;  %v2965_v40 = vpop.f32.mrb[47].mxu0 }
 0x8f3   : > { %v3032_v36 = vadd.f32 1.0, %v6348_v31  ;;  %5248 = vmatprep.mubr.f32.mxu1 %v3076_v52  ;;  %v2966_v34 = vadd.f32 %v8557_v23, %v2965_v40 }
 0x8f4   : > { %6357 = vrcp.f32 %v3033_v6  ;;  %v4557_v61 = vmul.f32 -1.442695, %v2971_v0  ;;  %5249 = vmatmul.mubr.f32.gmra.mrb[22].mxu1 %v3077_v2 }
 0x8f5   : > { %v6350_v12 = vpop.eup %6349  ;;  %6359 = vrcp.f32 %v3032_v36  ;;  %v4556_v15 = vmul.f32 -1.442695, %v2966_v34  ;;  %5736 = vmatpush3.bf16.msra.mxu1 %v8553_v41 }
 0x8f6   : > { %v6352_v47 = vpop.eup %6351  ;;  %6361 = vpow2.f32 %v4557_v61  ;;  %5738 = vmatprep.subr.bf16.mxu1 %v8555_v21  ;;  %v3079_v49 = vmul.f32 %v6350_v12, %v8583_v22 }
 0x8f7   : > { %v3078_v26 = vmul.f32 %v6352_v47, %v8586_v28  ;;  %6363 = vpow2.f32 %v4556_v15 }
 0x8f8   : > { %v6354_v35 = vpop.eup %6353 }
 0x8f9   : > { %v6356_v44 = vpop.eup %6355  ;;  %v3035_v23 = vadd.f32 1.0, %v6354_v35  ;;  %5740 = vmatpush3.bf16.msra.mxu1 %v8555_v21  ;;  %5251 = vmatprep.mubr.f32.mxu1 %v3078_v26 }
 0x8fa   : > { %v3034_v42 = vadd.f32 1.0, %v6356_v44  ;;  %5252 = vmatmul.mubr.f32.gmra.mrb[24].mxu1 %v3079_v49 }
 0x8fb   : > { %6365 = vrcp.f32 %v3035_v23 }
 0x8fc   : > { %6367 = vrcp.f32 %v3034_v42 }
 0x8fe   : > { %v6358_v41 = vpop.eup %6357 }
 0x8ff   : > { %v6360_v38 = vpop.eup %6359  ;;  %v3081_v28 = vmul.f32 %v6358_v41, %v8596_v30  ;;  %v8630_v30 = vld [vmem:[#allocation34] ss:$0 sm:$0xff] }
 0x900   : > { %v6362_v56 = vpop.eup %6361  ;;  %v3080_v59 = vmul.f32 %v6360_v38, %v8599_v60 }
 0x901   : > { %v6364_v9 = vpop.eup %6363  ;;  %v3037_v11 = vadd.f32 1.0, %v6362_v56  ;;  %v8651_v56 = vld [vmem:[#allocation36] ss:$0 sm:$0xff] }
 0x902   : > { %v3036_v14 = vadd.f32 1.0, %v6364_v9  ;;  %5254 = vmatprep.mubr.f32.mxu1 %v3080_v59 }
 0x903   : > { %6369 = vrcp.f32 %v3037_v11  ;;  %5255 = vmatmul.mubr.f32.gmra.mrb[26].mxu1 %v3081_v28 }
 0x904   : > { %6371 = vrcp.f32 %v3036_v14 }
 0x905   : > { %v6366_v21 = vpop.eup %6365 }
 0x906   : > { %v6368_v22 = vpop.eup %6367  ;;  %v3083_v33 = vmul.f32 %v6366_v21, %v8610_v16 }
 0x907   : > { %v3082_v10 = vmul.f32 %v6368_v22, %v2956_v37 }
 0x909   : > { %5257 = vmatprep.mubr.f32.mxu1 %v3082_v10 }
 0x90a   : > { %5258 = vmatmul.mubr.f32.gmra.mrb[28].mxu1 %v3083_v33 }
 0x90d   : > { %v6370_v55 = vpop.eup %6369 }
 0x90e   : > { %v6372_v8 = vpop.eup %6371  ;;  %v3085_v60 = vmul.f32 %v6370_v55, %v2971_v0 }
 0x90f   : > { %v3084_v46 = vmul.f32 %v6372_v8, %v2966_v34 }
 0x911   : > { %5260 = vmatprep.mubr.f32.mxu1 %v3084_v46 }
 0x912   : > { %5261 = vmatmul.mubr.f32.gmra.mrb[30].mxu1 %v3085_v60 }
 0x9ae   : > { %v5241_v13 = vpop.f32.mrb[16].mxu1 }
 0x9af   : > { %v3181_v7 = vadd.f32 %v5241_v13, %v8630_v30  ;;  %v3175_v50 = vpop.f32.mrb[17].mxu1 }
 0x9b0   : > { %v3176_v57 = vadd.f32 %v8630_v30, %v3175_v50 }
 0x9b1   : > { %v4560_v45 = vmul.f32 -1.442695, %v3181_v7 }
 0x9b2   : > { %v4559_v37 = vmul.f32 -1.442695, %v3176_v57 }
 0x9b3   : > { %6373 = vpow2.f32 %v4560_v45 }
 0x9b4   : > { %6375 = vpow2.f32 %v4559_v37 }
 0x9b8   : > { %v5244_v16 = vpop.f32.mrb[18].mxu1 }
 0x9b9   : > { %v3191_v54 = vadd.f32 %v5244_v16, %v8630_v30  ;;  %v3185_v48 = vpop.f32.mrb[19].mxu1 }
 0x9ba   : > { %v3186_v18 = vadd.f32 %v8630_v30, %v3185_v48 }
 0x9bb   : > { %v4562_v58 = vmul.f32 -1.442695, %v3191_v54 }
 0x9bc   : > { %v4561_v52 = vmul.f32 -1.442695, %v3186_v18 }
 0x9bd   : > { %v6374_v4 = vpop.eup %6373  ;;  %6377 = vpow2.f32 %v4562_v58  ;;  %v5247_v31 = vpop.f32.mrb[20].mxu1 }
 0x9be   : > { %v6376_v2 = vpop.eup %6375  ;;  %v3303_v6 = vadd.f32 1.0, %v6374_v4  ;;  %6379 = vpow2.f32 %v4561_v52  ;;  %v8637_v0 = vadd.f32 %v5247_v31, %v8630_v30  ;;  %v3195_v40 = vpop.f32.mrb[21].mxu1 }
 0x9bf   : > { %v3302_v36 = vadd.f32 1.0, %v6376_v2  ;;  %v8640_v34 = vadd.f32 %v8630_v30, %v3195_v40 }
 0x9c0   : > { %6381 = vrcp.f32 %v3303_v6  ;;  %v4564_v61 = vmul.f32 -1.442695, %v8637_v0 }
 0x9c1   : > { %6383 = vrcp.f32 %v3302_v36  ;;  %v4563_v12 = vmul.f32 -1.442695, %v8640_v34 }
 0x9c2   : > { %6385 = vpow2.f32 %v4564_v61 }
 0x9c3   : > { %6387 = vpow2.f32 %v4563_v12 }
 0x9c7   : > { %v6378_v15 = vpop.eup %6377  ;;  %v5250_v47 = vpop.f32.mrb[22].mxu1 }
 0x9c8   : > { %v6380_v26 = vpop.eup %6379  ;;  %v3305_v35 = vadd.f32 1.0, %v6378_v15  ;;  %v8645_v49 = vadd.f32 %v5250_v47, %v8630_v30  ;;  %v3205_v44 = vpop.f32.mrb[23].mxu1 }
 0x9c9   : > { %v3304_v23 = vadd.f32 1.0, %v6380_v26  ;;  %v8648_v42 = vadd.f32 %v8630_v30, %v3205_v44 }
 0x9ca   : > { %v6382_v41 = vpop.eup %6381  ;;  %6389 = vrcp.f32 %v3305_v35  ;;  %v4566_v38 = vmul.f32 -1.442695, %v8645_v49 }
 0x9cb   : > { %v6384_v59 = vpop.eup %6383  ;;  %v3351_v9 = vmul.f32 %v6382_v41, %v3181_v7  ;;  %6391 = vrcp.f32 %v3304_v23  ;;  %v4565_v28 = vmul.f32 -1.442695, %v8648_v42 }
 0x9cc   : > { %v6386_v11 = vpop.eup %6385  ;;  %v3350_v14 = vmul.f32 %v6384_v59, %v3176_v57  ;;  %6393 = vpow2.f32 %v4566_v38 }
 0x9cd   : > { %v6388_v21 = vpop.eup %6387  ;;  %v3307_v22 = vadd.f32 1.0, %v6386_v11  ;;  %6395 = vpow2.f32 %v4565_v28  ;;  %v5253_v10 = vpop.f32.mrb[24].mxu1  ;;  %v3374_v33 = vmul.f32 %v8651_v56, %v3351_v9 }
 0x9ce   : > { %v3306_v55 = vadd.f32 1.0, %v6388_v21  ;;  %v8656_v8 = vadd.f32 %v5253_v10, %v8630_v30  ;;  %v3215_v46 = vpop.f32.mrb[25].mxu1  ;;  %v3373_v60 = vmul.f32 %v8651_v56, %v3350_v14 }
 0x9cf   : > { %6397 = vrcp.f32 %v3307_v22  ;;  %v8660_v13 = vadd.f32 %v8630_v30, %v3215_v46  ;;  %3391 = vadd.xlane.f32.xlu0 %v3374_v33 }
 0x9d0   : > { %6399 = vrcp.f32 %v3306_v55  ;;  %v4568_v7 = vmul.f32 -1.442695, %v8656_v8  ;;  %3389 = vadd.xlane.f32.xlu1 %v3373_v60 }
 0x9d1   : > { %v4567_v50 = vmul.f32 -1.442695, %v8660_v13 }
 0x9d2   : > { %6401 = vpow2.f32 %v4568_v7 }
 0x9d3   : > { %6403 = vpow2.f32 %v4567_v50 }
 0x9d4   : > { %v6390_v57 = vpop.eup %6389 }
 0x9d5   : > { %v6392_v45 = vpop.eup %6391  ;;  %v3353_v37 = vmul.f32 %v6390_v57, %v3191_v54 }
 0x9d6   : > { %v6394_v16 = vpop.eup %6393  ;;  %v3352_v48 = vmul.f32 %v6392_v45, %v3186_v18  ;;  %v5256_v58 = vpop.f32.mrb[26].mxu1 }
 0x9d7   : > { %v6396_v52 = vpop.eup %6395  ;;  %v3309_v4 = vadd.f32 1.0, %v6394_v16  ;;  %v8665_v31 = vadd.f32 %v5256_v58, %v8630_v30  ;;  %v3225_v2 = vpop.f32.mrb[27].mxu1  ;;  %v3376_v6 = vmul.f32 %v8651_v56, %v3353_v37 }
 0x9d8   : > { %v3308_v40 = vadd.f32 1.0, %v6396_v52  ;;  %v8669_v36 = vadd.f32 %v8630_v30, %v3225_v2  ;;  %v3375_v61 = vmul.f32 %v8651_v56, %v3352_v48 }
 0x9d9   : > { %v6398_v12 = vpop.eup %6397  ;;  %6405 = vrcp.f32 %v3309_v4  ;;  %v4570_v54 = vmul.f32 -1.442695, %v8665_v31  ;;  %3395 = vadd.xlane.f32.xlu0 %v3376_v6 }
 0x9da   : > { %v6400_v18 = vpop.eup %6399  ;;  %v3355_v15 = vmul.f32 %v6398_v12, %v8637_v0  ;;  %6407 = vrcp.f32 %v3308_v40  ;;  %v4569_v47 = vmul.f32 -1.442695, %v8669_v36  ;;  %3393 = vadd.xlane.f32.xlu1 %v3375_v61 }
 0x9db   : > { %v3354_v26 = vmul.f32 %v6400_v18, %v8640_v34  ;;  %6409 = vpow2.f32 %v4570_v54 }
 0x9dc   : > { %v6402_v35 = vpop.eup %6401  ;;  %6411 = vpow2.f32 %v4569_v47  ;;  %v3378_v44 = vmul.f32 %v8651_v56, %v3355_v15 }
 0x9dd   : > { %v6404_v23 = vpop.eup %6403  ;;  %v3311_v41 = vadd.f32 1.0, %v6402_v35  ;;  %v5259_v38 = vpop.f32.mrb[28].mxu1  ;;  %v3377_v59 = vmul.f32 %v8651_v56, %v3354_v26 }
 0x9de   : > { %v3310_v9 = vadd.f32 1.0, %v6404_v23  ;;  %v8679_v28 = vadd.f32 %v5259_v38, %v8630_v30  ;;  %3399 = vadd.xlane.f32.xlu0 %v3378_v44  ;;  %v3235_v0 = vpop.f32.mrb[29].mxu1 }
 0x9df   : > { %6413 = vrcp.f32 %v3311_v41  ;;  %v3236_v11 = vadd.f32 %v8630_v30, %v3235_v0  ;;  %3397 = vadd.xlane.f32.xlu1 %v3377_v59 }
 0x9e0   : > { %6415 = vrcp.f32 %v3310_v9  ;;  %v4572_v34 = vmul.f32 -1.442695, %v8679_v28 }
 0x9e1   : > { %v4571_v14 = vmul.f32 -1.442695, %v3236_v11 }
 0x9e2   : > { %6417 = vpow2.f32 %v4572_v34 }
 0x9e3   : > { %v6406_v21 = vpop.eup %6405  ;;  %6419 = vpow2.f32 %v4571_v14 }
 0x9e4   : > { %v6408_v22 = vpop.eup %6407  ;;  %v3357_v10 = vmul.f32 %v6406_v21, %v8645_v49 }
 0x9e5   : > { %v6410_v33 = vpop.eup %6409  ;;  %v3356_v55 = vmul.f32 %v6408_v22, %v8648_v42  ;;  %v5262_v46 = vpop.f32.mrb[30].mxu1 }
 0x9e6   : > { %v6412_v60 = vpop.eup %6411  ;;  %v3313_v7 = vadd.f32 1.0, %v6410_v33  ;;  %v3251_v50 = vadd.f32 %v5262_v46, %v8630_v30  ;;  %v3380_v57 = vmul.f32 %v8651_v56, %v3357_v10  ;;  %v3245_v45 = vpop.f32.mrb[31].mxu1  ;;  %v7337_v46 = vmov 1.0  }
 0x9e7   : > { %v3312_v37 = vadd.f32 1.0, %v6412_v60  ;;  %v3246_v16 = vadd.f32 %v8630_v30, %v3245_v45  ;;  %v3379_v48 = vmul.f32 %v8651_v56, %v3356_v55 }
 0x9e8   : > { %6421 = vrcp.f32 %v3313_v7  ;;  %v4574_v58 = vmul.f32 -1.442695, %v3251_v50  ;;  %3403 = vadd.xlane.f32.xlu0 %v3380_v57 }
 0x9e9   : > { %v6414_v49 = vpop.eup %6413  ;;  %6423 = vrcp.f32 %v3312_v37  ;;  %v4573_v52 = vmul.f32 -1.442695, %v3246_v16  ;;  %3401 = vadd.xlane.f32.xlu1 %v3379_v48 }
 0x9ea   : > { %v6416_v42 = vpop.eup %6415  ;;  %v3359_v4 = vmul.f32 %v6414_v49, %v8656_v8  ;;  %6425 = vpow2.f32 %v4574_v58 }
 0x9eb   : > { %v3358_v2 = vmul.f32 %v6416_v42, %v8660_v13  ;;  %6427 = vpow2.f32 %v4573_v52 }
 0x9ec   : > { %v6418_v6 = vpop.eup %6417  ;;  %v3382_v40 = vmul.f32 %v8651_v56, %v3359_v4 }
 0x9ed   : > { %v6420_v30 = vpop.eup %6419  ;;  %v3315_v61 = vadd.f32 1.0, %v6418_v6  ;;  %v3381_v12 = vmul.f32 %v8651_v56, %v3358_v2 }
 0x9ee   : > { %v3314_v54 = vadd.f32 1.0, %v6420_v30  ;;  %3407 = vadd.xlane.f32.xlu0 %v3382_v40 }
 0x9ef   : > { %6429 = vrcp.f32 %v3315_v61  ;;  %3405 = vadd.xlane.f32.xlu1 %v3381_v12 }
 0x9f0   : > { %6431 = vrcp.f32 %v3314_v54 }
 0x9f2   : > { %v6422_v18 = vpop.eup %6421 }
 0x9f3   : > { %v6424_v15 = vpop.eup %6423  ;;  %v3361_v8 = vmul.f32 %v6422_v18, %v8665_v31 }
 0x9f4   : > { %v6426_v47 = vpop.eup %6425  ;;  %v3360_v13 = vmul.f32 %v6424_v15, %v8669_v36 }
 0x9f5   : > { %v6428_v26 = vpop.eup %6427  ;;  %v3317_v35 = vadd.f32 1.0, %v6426_v47  ;;  %v3384_v44 = vmul.f32 %v8651_v56, %v3361_v8 }
 0x9f6   : > { %v3316_v23 = vadd.f32 1.0, %v6428_v26  ;;  %v3383_v41 = vmul.f32 %v8651_v56, %v3360_v13 }
 0x9f7   : > { %6433 = vrcp.f32 %v3317_v35  ;;  %3411 = vadd.xlane.f32.xlu0 %v3384_v44  ;;  %v3518_v44 = vld [vmem:[#allocation5] sm:$0xff] }
 0x9f8   : > { %6435 = vrcp.f32 %v3316_v23  ;;  %3409 = vadd.xlane.f32.xlu1 %v3383_v41 }
 0x9f9   : > { %v6430_v38 = vpop.eup %6429 }
 0x9fa   : > { %v6432_v59 = vpop.eup %6431  ;;  %v3363_v9 = vmul.f32 %v6430_v38, %v8679_v28  ;;  %v1609_v28 = vshrl.u32 %v1478_v62, 7  ;;  %v3438_v38 = vld [vmem:[#allocation6 + $0x8] sm:$0xff] }
 0x9fb   : > { %v3362_v31 = vmul.f32 %v6432_v59, %v3236_v11  ;;  %v8704_v11 = vld [vmem:[%s1476_s13] ss:$0 sm:$0xff] }
 0x9fc   : > { %v3386_v0 = vmul.f32 %v8651_v56, %v3363_v9  ;;  %v8706_v55 = vadd.s32 8, %v1609_v28  ;;  %vm1615_vm3 = vcmp.eq.s32.totalorder %v1609_v28, %v8704_v11  ;;  %v3604_v28 = vld [vmem:[#allocation16 + $0x8] sm:$0xff] (!%p4580_p8) }
 0x9fd   : > { %v3385_v36 = vmul.f32 %v8651_v56, %v3362_v31  ;;  %5295 = vmatprep.mubr.msk.f32.mxu0 %vm1615_vm3, %v7337_v46  ;;  %5330 = vmatprep.mubr.msk.f32.mxu1 %vm1615_vm3, %v7337_v46 }
 0x9fe   : > { %3415 = vadd.xlane.f32.xlu0 %v3386_v0  ;;  %vm1616_vm5 = vcmp.eq.s32.totalorder %v8706_v55, %v8704_v11  ;;  %v3603_v0 = vld [vmem:[#allocation16] sm:$0xff] (!%p4580_p8) }
 0x9ff   : > { %3413 = vadd.xlane.f32.xlu1 %v3385_v36  ;;  %5331 = vmatmul.mubr.msk.f32.vlgmr.msra.gmra.mrb[32].mxu1 %vm1616_vm5, %v7337_v46  ;;  %v3637_v36 = vld [vmem:[#allocation39] sm:$0xff] (!%p4580_p8)  ;;  %v3642_v55 = vld [vmem:[#allocation39 + $0x28] sm:$0xff] (!%p4580_p8) }
 0xa00   : > { %v3641_v11 = vld [vmem:[#allocation39 + $0x20] sm:$0xff] (!%p4580_p8) }
 0xa01   : > { %v6434_v34 = vpop.eup %6433 }
 0xa02   : > { %v6436_v14 = vpop.eup %6435  ;;  %v3365_v21 = vmul.f32 %v6434_v34, %v3251_v50  ;;  %v7338_v34 = vmov (!%p4580_p8), 0  }
 0xa03   : > { %v3364_v22 = vmul.f32 %v6436_v14, %v3246_v16  ;;  %6437 = vset.pattern.permute.xlu0 (!%p4580_p8), %v7338_v34  ;;  %v3638_v14 = vld [vmem:[#allocation39 + $0x8] sm:$0xff] (!%p4580_p8)  ;;  %v8741_v34 = vld [vmem:[#allocation2 + $0x8] sm:$0xff] (!%p4580_p8) }
 0xa04   : > { %v3388_v10 = vmul.f32 %v8651_v56, %v3365_v21  ;;  %v3639_v21 = vld [vmem:[#allocation39 + $0x10] sm:$0xff] (!%p4580_p8) }
 0xa05   : > { %v3387_v33 = vmul.f32 %v8651_v56, %v3364_v22  ;;  %v3640_v22 = vld [vmem:[#allocation39 + $0x18] sm:$0xff] (!%p4580_p8) }
 0xa06   : > { %3419 = vadd.xlane.f32.xlu0 %v3388_v10  ;;  %v5741_v10 = vpack.c.bf16 (!%p4580_p8), %v3638_v14, %v3637_v36  ;;  %v3826_v14 = vld [vmem:[#allocation42] sm:$0xff] (!%p4580_p8) }
 0xa07   : > { %3417 = vadd.xlane.f32.xlu1 %v3387_v33  ;;  %v5745_v33 = vpack.c.bf16 (!%p4580_p8), %v3640_v22, %v3639_v21  ;;  %v3827_v21 = vld [vmem:[#allocation42 + $0x8] sm:$0xff] (!%p4580_p8) }
 0xa08   : > { %v5805_v22 = vpack.c.bf16 (!%p4580_p8), %v3827_v21, %v3826_v14  ;;  %v4584_v21 = vld [vmem:[#allocation43] ss:$0 sm:$0xff] (!%p4580_p8) }
 0xa0a   : > { %5806 = vmatprep.subr.bf16.mxu1 (!%p4580_p8), %v5805_v22 }
 0xa0b   : > { %5808 = vmatpush3.bf16.msra.mxu1 (!%p4580_p8), %v5805_v22 }
 0xa1c   : > { %3611 = vperm.xlu0 (!%p4580_p8), %6437, %v3603_v0   ;;  %v3636_v0 = vld [vmem:[#allocation37 + $0x78] sm:$0xff] (!%p4580_p8) }
 0xa20   : > { %3616 = vperm.xlu0 (!%p4580_p8), %6437, %v3604_v28  }
 0xa5c   : > { %v3392_v56 = vpop.xlane.xlu0 %3391 }
 0xa5d   : > { %v3422_v62 = vmul.f32 %v8306_v63, %v3392_v56  ;;  %v3390_v60 = vpop.xlane.xlu1 %3389  ;;  %v3643_v56 = vld [vmem:[#allocation39 + $0x30] sm:$0xff] (!%p4580_p8) }
 0xa5e   : > { %v3421_v7 = vmul.f32 %v3390_v60, %v8310_v5 }
 0xa60   : > { %v5677_v50 = vpack.c.bf16 %v3422_v62, %v3421_v7  ;;  %v3644_v62 = vld [vmem:[#allocation39 + $0x38] sm:$0xff] (!%p4580_p8)  ;;  %v3645_v7 = vld [vmem:[#allocation39 + $0x40] sm:$0xff] (!%p4580_p8) }
 0xa61   : > { %v5753_v60 = vpack.c.bf16 (!%p4580_p8), %v3644_v62, %v3643_v56  ;;  %v3832_v56 = vld [vmem:[#allocation42 + $0x30] sm:$0xff] (!%p4580_p8)  ;;  %v3833_v62 = vld [vmem:[#allocation42 + $0x38] sm:$0xff] (!%p4580_p8) }
 0xa62   : > { %5678 = vmatprep.subr.bf16.mxu0 %v5677_v50 }
 0xa63   : > { %5680 = vmatpush3.bf16.msra.mxu0 %v5677_v50  ;;  %v3646_v50 = vld [vmem:[#allocation39 + $0x48] sm:$0xff] (!%p4580_p8) }
 0xa66   : > { %v3396_v57 = vpop.xlane.xlu0 %3395 }
 0xa67   : > { %v3424_v45 = vmul.f32 %v8316_v24, %v3396_v57  ;;  %v3394_v37 = vpop.xlane.xlu1 %3393  ;;  %v5757_v57 = vpack.c.bf16 (!%p4580_p8), %v3646_v50, %v3645_v7  ;;  %v3834_v7 = vld [vmem:[#allocation42 + $0x40] sm:$0xff] (!%p4580_p8)  ;;  %v3835_v50 = vld [vmem:[#allocation42 + $0x48] sm:$0xff] (!%p4580_p8) }
 0xa68   : > { %v3423_v16 = vmul.f32 %v3394_v37, %v8318_v25  ;;  %v3648_v37 = vld [vmem:[#allocation39 + $0x58] sm:$0xff] (!%p4580_p8) }
 0xa6a   : > { %v5681_v48 = vpack.c.bf16 %v3424_v45, %v3423_v16  ;;  %v3647_v45 = vld [vmem:[#allocation39 + $0x50] sm:$0xff] (!%p4580_p8) }
 0xa6b   : > { %v3400_v58 = vpop.xlane.xlu0 %3399  ;;  %v5761_v16 = vpack.c.bf16 (!%p4580_p8), %v3648_v37, %v3647_v45  ;;  %v3836_v45 = vld [vmem:[#allocation42 + $0x50] sm:$0xff] (!%p4580_p8)  ;;  %v3837_v37 = vld [vmem:[#allocation42 + $0x58] sm:$0xff] (!%p4580_p8) }
 0xa6c   : > { %v3426_v49 = vmul.f32 %v8325_v29, %v3400_v58  ;;  %5682 = vmatprep.subr.bf16.mxu0 %v5681_v48  ;;  %v3398_v52 = vpop.xlane.xlu1 %3397  ;;  %v3650_v58 = vld [vmem:[#allocation39 + $0x68] sm:$0xff] (!%p4580_p8) }
 0xa6d   : > { %v3425_v63 = vmul.f32 %v3398_v52, %v8330_v32  ;;  %5684 = vmatpush3.bf16.msra.mxu0 %v5681_v48  ;;  %v3649_v48 = vld [vmem:[#allocation39 + $0x60] sm:$0xff] (!%p4580_p8)  ;;  %v3651_v52 = vld [vmem:[#allocation39 + $0x70] sm:$0xff] (!%p4580_p8) }
 0xa6f   : > { %v5685_v42 = vpack.c.bf16 %v3426_v49, %v3425_v63  ;;  %v5765_v49 = vpack.c.bf16 (!%p4580_p8), %v3650_v58, %v3649_v48  ;;  %v3652_v63 = vld [vmem:[#allocation39 + $0x78] sm:$0xff] (!%p4580_p8)  ;;  %v3838_v48 = vld [vmem:[#allocation42 + $0x60] sm:$0xff] (!%p4580_p8)  ;;  %v3839_v58 = vld [vmem:[#allocation42 + $0x68] sm:$0xff] (!%p4580_p8) }
 0xa71   : > { %5686 = vmatprep.subr.bf16.mxu0 %v5685_v42 }
 0xa72   : > { %5688 = vmatpush3.bf16.msra.mxu0 %v5685_v42  ;;  %v5769_v42 = vpack.c.bf16 (!%p4580_p8), %v3652_v63, %v3651_v52  ;;  %v3840_v52 = vld [vmem:[#allocation42 + $0x70] sm:$0xff] (!%p4580_p8)  ;;  %v3841_v63 = vld [vmem:[#allocation42 + $0x78] sm:$0xff] (!%p4580_p8) }
 0xa75   : > { %v3404_v5 = vpop.xlane.xlu0 %3403 }
 0xa76   : > { %v3428_v4 = vmul.f32 %v8336_v39, %v3404_v5  ;;  %v3402_v2 = vpop.xlane.xlu1 %3401  ;;  %v3621_v5 = vld [vmem:[#allocation37] sm:$0xff] (!%p4580_p8) }
 0xa77   : > { %v3427_v24 = vmul.f32 %v3402_v2, %v8340_v43 }
 0xa79   : > { %v5689_v6 = vpack.c.bf16 %v3428_v4, %v3427_v24  ;;  %v3622_v4 = vld [vmem:[#allocation37 + $0x8] sm:$0xff] (!%p4580_p8) }
 0xa7a   : > { %v5773_v2 = vpack.c.bf16 (!%p4580_p8), %v3622_v4, %v3621_v5  ;;  %v4581_v5 = vld [vmem:[#allocation40] ss:$0 sm:$0xff] (!%p4580_p8) }
 0xa7b   : > { %5690 = vmatprep.subr.bf16.mxu0 %v5689_v6  ;;  %v3408_v25 = vpop.xlane.xlu0 %3407 }
 0xa7c   : > { %5692 = vmatpush3.bf16.msra.mxu0 %v5689_v6  ;;  %v3430_v29 = vmul.f32 %v8346_v51, %v3408_v25  ;;  %v3406_v40 = vpop.xlane.xlu1 %3405  ;;  %v4040_v25 = vld [vmem:[#allocation15] sm:$0xff] (!%p4580_p8) }
 0xa7d   : > { %v3429_v30 = vmul.f32 %v3406_v40, %v8350_v53 }
 0xa7f   : > { %v5693_v32 = vpack.c.bf16 %v3430_v29, %v3429_v30 }
 0xa81   : > { %5694 = vmatprep.subr.bf16.mxu0 %v5693_v32 }
 0xa82   : > { %5696 = vmatpush3.bf16.msra.mxu0 %v5693_v32 }
 0xa84   : > { %v3412_v61 = vpop.xlane.xlu0 %3411 }
 0xa85   : > { %v3432_v12 = vmul.f32 %v8356_v1, %v3412_v61  ;;  %v3410_v54 = vpop.xlane.xlu1 %3409 }
 0xa86   : > { %v3431_v39 = vmul.f32 %v3410_v54, %v8360_v3  ;;  %v3624_v54 = vld [vmem:[#allocation37 + $0x18] sm:$0xff] (!%p4580_p8) }
 0xa88   : > { %v5697_v18 = vpack.c.bf16 %v3432_v12, %v3431_v39  ;;  %v3623_v12 = vld [vmem:[#allocation37 + $0x10] sm:$0xff] (!%p4580_p8) }
 0xa8a   : > { %5698 = vmatprep.subr.bf16.mxu0 %v5697_v18 }
 0xa8b   : > { %5700 = vmatpush3.bf16.msra.mxu0 %v5697_v18  ;;  %v3416_v43 = vpop.xlane.xlu0 %3415  ;;  %v4041_v18 = vld [vmem:[#allocation15 + $0x8] sm:$0xff] (!%p4580_p8) }
 0xa8c   : > { %v3434_v15 = vmul.f32 %v8366_v17, %v3416_v43  ;;  %v3414_v8 = vpop.xlane.xlu1 %3413  ;;  %v3519_v17 = vld [vmem:[#allocation5 + $0x8] sm:$0xff] }
 0xa8d   : > { %v3433_v51 = vmul.f32 %v3414_v8, %v8370_v20 }
 0xa8f   : > { %v5701_v47 = vpack.c.bf16 %v3434_v15, %v3433_v51  ;;  %v5777_v51 = vpack.c.bf16 (!%p4580_p8), %v3624_v54, %v3623_v12 }
 0xa91   : > { %5702 = vmatprep.subr.bf16.mxu0 %v5701_v47 }
 0xa92   : > { %5704 = vmatpush3.bf16.msra.mxu0 %v5701_v47  ;;  %v8737_v47 = vld [vmem:[#allocation2] sm:$0xff] (!%p4580_p8) }
 0xa93   : > { %v3420_v53 = vpop.xlane.xlu0 %3419 }
 0xa94   : > { %v3436_v13 = vmul.f32 %v8376_v19, %v3420_v53  ;;  %v3418_v26 = vpop.xlane.xlu1 %3417  ;;  %v3437_v19 = vld [vmem:[#allocation6] sm:$0xff]  ;;  %v3625_v53 = vld [vmem:[#allocation37 + $0x20] sm:$0xff] (!%p4580_p8) }
 0xa95   : > { %v3435_v1 = vmul.f32 %v3418_v26, %v8380_v27 }
 0xa97   : > { %v5705_v35 = vpack.c.bf16 %v3436_v13, %v3435_v1  ;;  %v3626_v13 = vld [vmem:[#allocation37 + $0x28] sm:$0xff] (!%p4580_p8) }
 0xa98   : > { %v5781_v1 = vpack.c.bf16 (!%p4580_p8), %v3626_v13, %v3625_v53  ;;  %v3941_v53 = vld [vmem:[#allocation45 + $0x18] sm:$0xff] (!%p4580_p8) }
 0xa99   : > { %5706 = vmatprep.subr.bf16.mxu0 %v5705_v35 }
 0xa9a   : > { %5708 = vmatpush3.bf16.msra.mxu0 %v5705_v35  ;;  %v3627_v35 = vld [vmem:[#allocation37 + $0x30] sm:$0xff] (!%p4580_p8) }
 0xa9b   : > { %5742 = vmatprep.subr.bf16.mxu0 (!%p4580_p8), %v5741_v10  ;;  %v3612_v29 = vpop.permute.xlu0 (!%p4580_p8), %3611 }
 0xa9d   : > { %5296 = vmatmul.mubr.msk.f32.vlgmr.msra.gmra.mrb[48].mxu0 %vm1616_vm5, %v7337_v46  ;;  %v5749_v46 = vpack.c.bf16 (!%p4580_p8), %v3642_v55, %v3641_v11  ;;  %v3830_v11 = vld [vmem:[#allocation42 + $0x20] sm:$0xff] (!%p4580_p8)  ;;  %v3831_v55 = vld [vmem:[#allocation42 + $0x28] sm:$0xff] (!%p4580_p8) }
 0xa9e   : > { %5744 = vmatpush3.bf16.msra.mxu0 (!%p4580_p8), %v5741_v10  ;;  %v3828_v10 = vld [vmem:[#allocation42 + $0x10] sm:$0xff] (!%p4580_p8) }
 0xa9f   : > { %5746 = vmatprep.subr.bf16.mxu0 (!%p4580_p8), %v5745_v33  ;;  %v3617_v43 = vpop.permute.xlu0 (!%p4580_p8), %3616 }
 0xaa2   : > { %5748 = vmatpush3.bf16.msra.mxu0 (!%p4580_p8), %v5745_v33  ;;  %v3829_v33 = vld [vmem:[#allocation42 + $0x18] sm:$0xff] (!%p4580_p8) }
 0xaa3   : > { %5750 = vmatprep.subr.bf16.mxu0 (!%p4580_p8), %v5749_v46  ;;  %v5809_v28 = vpack.c.bf16 (!%p4580_p8), %v3829_v33, %v3828_v10 }
 0xaa5   : > { %5810 = vmatprep.subr.bf16.mxu1 (!%p4580_p8), %v5809_v28 }
 0xaa6   : > { %5752 = vmatpush3.bf16.msra.mxu0 (!%p4580_p8), %v5749_v46  ;;  %5812 = vmatpush3.bf16.msra.mxu1 (!%p4580_p8), %v5809_v28  ;;  %v5813_v46 = vpack.c.bf16 (!%p4580_p8), %v3831_v55, %v3830_v11 }
 0xaa7   : > { %5754 = vmatprep.subr.bf16.mxu0 (!%p4580_p8), %v5753_v60 }
 0xaa8   : > { %5814 = vmatprep.subr.bf16.mxu1 (!%p4580_p8), %v5813_v46 }
 0xaaa   : > { %5756 = vmatpush3.bf16.msra.mxu0 (!%p4580_p8), %v5753_v60  ;;  %5816 = vmatpush3.bf16.msra.mxu1 (!%p4580_p8), %v5813_v46  ;;  %v5817_v60 = vpack.c.bf16 (!%p4580_p8), %v3833_v62, %v3832_v56 }
 0xaab   : > { %5758 = vmatprep.subr.bf16.mxu0 (!%p4580_p8), %v5757_v57 }
 0xaac   : > { %5818 = vmatprep.subr.bf16.mxu1 (!%p4580_p8), %v5817_v60 }
 0xaae   : > { %5760 = vmatpush3.bf16.msra.mxu0 (!%p4580_p8), %v5757_v57  ;;  %5820 = vmatpush3.bf16.msra.mxu1 (!%p4580_p8), %v5817_v60  ;;  %v5821_v57 = vpack.c.bf16 (!%p4580_p8), %v3835_v50, %v3834_v7 }
 0xaaf   : > { %5762 = vmatprep.subr.bf16.mxu0 (!%p4580_p8), %v5761_v16 }
 0xab0   : > { %5822 = vmatprep.subr.bf16.mxu1 (!%p4580_p8), %v5821_v57 }
 0xab2   : > { %5764 = vmatpush3.bf16.msra.mxu0 (!%p4580_p8), %v5761_v16  ;;  %5824 = vmatpush3.bf16.msra.mxu1 (!%p4580_p8), %v5821_v57  ;;  %v5825_v16 = vpack.c.bf16 (!%p4580_p8), %v3837_v37, %v3836_v45  ;;  %v4587_v37 = vld [vmem:[#allocation46] ss:$0 sm:$0xff] (!%p4580_p8) }
 0xab3   : > { %5766 = vmatprep.subr.bf16.mxu0 (!%p4580_p8), %v5765_v49 }
 0xab4   : > { %5826 = vmatprep.subr.bf16.mxu1 (!%p4580_p8), %v5825_v16 }
 0xab6   : > { %5768 = vmatpush3.bf16.msra.mxu0 (!%p4580_p8), %v5765_v49  ;;  %5828 = vmatpush3.bf16.msra.mxu1 (!%p4580_p8), %v5825_v16  ;;  %v5829_v49 = vpack.c.bf16 (!%p4580_p8), %v3839_v58, %v3838_v48 }
 0xab7   : > { %5770 = vmatprep.subr.bf16.mxu0 (!%p4580_p8), %v5769_v42 }
 0xab8   : > { %5830 = vmatprep.subr.bf16.mxu1 (!%p4580_p8), %v5829_v49 }
 0xaba   : > { %5772 = vmatpush3.bf16.msra.mxu0 (!%p4580_p8), %v5769_v42  ;;  %5832 = vmatpush3.bf16.msra.mxu1 (!%p4580_p8), %v5829_v49  ;;  %v5833_v42 = vpack.c.bf16 (!%p4580_p8), %v3841_v63, %v3840_v52 }
 0xabb   : > { %5774 = vmatprep.subr.bf16.mxu0 (!%p4580_p8), %v5773_v2 }
 0xabc   : > { %5834 = vmatprep.subr.bf16.mxu1 (!%p4580_p8), %v5833_v42 }
 0xabe   : > { %5836 = vmatpush3.bf16.msra.mxu1 (!%p4580_p8), %v5833_v42 }
 0xad2   : > { %v5332_v3 = vpop.f32.mrb[32].mxu1 }
 0xad3   : > { %v3586_v20 = vpop.f32.mrb[33].mxu1  ;;  %v3596_v23 = vadd.f32 %v5332_v3, %v3519_v17  ;;  %v3628_v3 = vld [vmem:[#allocation37 + $0x38] sm:$0xff] (!%p4580_p8) }
 0xad4   : > { %v3595_v41 = vadd.f32 %v3586_v20, %v3518_v44  ;;  %v5785_v17 = vpack.c.bf16 (!%p4580_p8), %v3628_v3, %v3627_v35  ;;  %v3629_v44 = vld [vmem:[#allocation37 + $0x40] sm:$0xff] (!%p4580_p8)  ;;  %v3630_v20 = vld [vmem:[#allocation37 + $0x48] sm:$0xff] (!%p4580_p8)  ;;  %v3944_v3 = vld [vmem:[#allocation45 + $0x30] sm:$0xff] (!%p4580_p8) }
 0xad5   : > { %3598 = vst [vmem:[#allocation5 + $0x8] sm:$0xff] %v3596_v23  ;;  %v5789_v23 = vpack.c.bf16 (!%p4580_p8), %v3630_v20, %v3629_v44  ;;  %v3946_v20 = vld [vmem:[#allocation45 + $0x40] sm:$0xff] (!%p4580_p8) }
 0xad6   : > { %3597 = vst [vmem:[#allocation5] sm:$0xff] %v3595_v41  ;;  %v3631_v41 = vld [vmem:[#allocation37 + $0x50] sm:$0xff] (!%p4580_p8) }
 0xadc   : > { %v3608_v32 = vld [vmem:[#allocation5 + $0x8] sm:$0xff] (!%p4580_p8) }
 0xadd   : > { %v3607_v6 = vld [vmem:[#allocation5] sm:$0xff] (!%p4580_p8)  ;;  %v3620_v15 = vmul.f32 (!%p4580_p8), %v3617_v43, %v3608_v32 }
 0xade   : > { %v3619_v30 = vmul.f32 (!%p4580_p8), %v3612_v29, %v3607_v6 }
 0xae0   : > { %5365 = vmatprep.mubr.f32.mxu0 (!%p4580_p8), %v3619_v30 }
 0xae1   : > { %5366 = vmatmul.mubr.f32.vlgmr.msra.gmra.mrb[0].mxu0 (!%p4580_p8), %v3620_v15  ;;  %v3939_v15 = vld [vmem:[#allocation45 + $0x8] sm:$0xff] (!%p4580_p8) }
 0xae2   : > { %5776 = vmatpush3.bf16.msra.mxu0 (!%p4580_p8), %v5773_v2  ;;  %5400 = vmatprep.mubr.f32.mxu0 (!%p4580_p8), %v8737_v47 }
 0xae3   : > { %5778 = vmatprep.subr.bf16.mxu0 (!%p4580_p8), %v5777_v51 }
 0xae6   : > { %5780 = vmatpush3.bf16.msra.mxu0 (!%p4580_p8), %v5777_v51  ;;  %v3940_v51 = vld [vmem:[#allocation45 + $0x10] sm:$0xff] (!%p4580_p8) }
 0xae7   : > { %5782 = vmatprep.subr.bf16.mxu0 (!%p4580_p8), %v5781_v1  ;;  %v5841_v13 = vpack.c.bf16 (!%p4580_p8), %v3941_v53, %v3940_v51 }
 0xaea   : > { %5784 = vmatpush3.bf16.msra.mxu0 (!%p4580_p8), %v5781_v1  ;;  %v3943_v1 = vld [vmem:[#allocation45 + $0x28] sm:$0xff] (!%p4580_p8) }
 0xaeb   : > { %5786 = vmatprep.subr.bf16.mxu0 (!%p4580_p8), %v5785_v17 }
 0xaee   : > { %5788 = vmatpush3.bf16.msra.mxu0 (!%p4580_p8), %v5785_v17  ;;  %v3945_v17 = vld [vmem:[#allocation45 + $0x38] sm:$0xff] (!%p4580_p8) }
 0xaef   : > { %5790 = vmatprep.subr.bf16.mxu0 (!%p4580_p8), %v5789_v23  ;;  %v5849_v44 = vpack.c.bf16 (!%p4580_p8), %v3945_v17, %v3944_v3 }
 0xaf2   : > { %5792 = vmatpush3.bf16.msra.mxu0 (!%p4580_p8), %v5789_v23  ;;  %v3947_v23 = vld [vmem:[#allocation45 + $0x48] sm:$0xff] (!%p4580_p8) }
 0xb6e   : > { %3602 = sbr.rel (%p4580_p8) target bundleno = 3650 (0xe42), region = 236 }
 0xb70   : > { %v5297_v59 = vpop.f32.mrb[48].mxu0 }
 0xb71   : > { %v3515_v9 = vadd.f32 %v5297_v59, %v3438_v38  ;;  %v3505_v27 = vpop.f32.mrb[49].mxu0  ;;  %v3632_v38 = vld [vmem:[#allocation37 + $0x58] sm:$0xff] (!%p4580_p8)  ;;  %v3633_v59 = vld [vmem:[#allocation37 + $0x60] sm:$0xff] (!%p4580_p8) }
 0xb72   : > { %v3514_v31 = vadd.f32 %v3505_v27, %v3437_v19  ;;  %v5793_v19 = vpack.c.bf16 (!%p4580_p8), %v3632_v38, %v3631_v41  ;;  %v5853_v41 = vpack.c.bf16 (!%p4580_p8), %v3947_v23, %v3946_v20  ;;  %v3948_v38 = vld [vmem:[#allocation45 + $0x50] sm:$0xff] (!%p4580_p8) }
 0xb73   : > { %3517 = vst.msk [vmem:[#allocation6 + $0x8] sm:$0xff] %vm1913_vm4, %v3515_v9  ;;  %v3634_v9 = vld [vmem:[#allocation37 + $0x68] sm:$0xff] (!%p4580_p8) }
 0xb74   : > { %3516 = vst.msk [vmem:[#allocation6] sm:$0xff] %vm1913_vm4, %v3514_v31  ;;  %5794 = vmatprep.subr.bf16.mxu0 (!%p4580_p8), %v5793_v19  ;;  %v5797_v27 = vpack.c.bf16 (!%p4580_p8), %v3634_v9, %v3633_v59  ;;  %v3635_v31 = vld [vmem:[#allocation37 + $0x70] sm:$0xff] (!%p4580_p8)  ;;  %v3950_v9 = vld [vmem:[#allocation45 + $0x60] sm:$0xff] (!%p4580_p8) }
 0xb75   : > { %5796 = vmatpush3.bf16.msra.mxu0 %v5793_v19  ;;  %v5801_v36 = vpack.c.bf16 %v3636_v0, %v3635_v31  ;;  %v3949_v19 = vld [vmem:[#allocation45 + $0x58] sm:$0xff]  ;;  %v3952_v0 = vld [vmem:[#allocation45 + $0x70] sm:$0xff] }
 0xb76   : > { %5798 = vmatprep.subr.bf16.mxu0 %v5797_v27  ;;  %v5857_v59 = vpack.c.bf16 %v3949_v19, %v3948_v38 }
 0xb79   : > { %5800 = vmatpush3.bf16.msra.mxu0 %v5797_v27  ;;  %v3951_v27 = vld [vmem:[#allocation45 + $0x68] sm:$0xff] }
 0xb7a   : > { %v4043_v61 = vld [vmem:[#allocation6 + $0x8] sm:$0xff]  ;;  %5802 = vmatprep.subr.bf16.mxu0 %v5801_v36  ;;  %v5861_v31 = vpack.c.bf16 %v3951_v27, %v3950_v9 }
 0xb7b   : > { %v4042_v24 = vld [vmem:[#allocation6] sm:$0xff]  ;;  %v4045_v8 = vmul.f32 %v4043_v61, %v3617_v43  ;;  %v3938_v43 = vld [vmem:[#allocation45] sm:$0xff] }
 0xb7c   : > { %v4044_v40 = vmul.f32 %v4042_v24, %v3612_v29 }
 0xb7d   : > { %v4047_v26 = vadd.f32 %v4045_v8, %v4041_v18  ;;  %5804 = vmatpush3.bf16.msra.mxu0 %v5801_v36  ;;  %v5837_v8 = vpack.c.bf16 %v3939_v15, %v3938_v43  ;;  %v3953_v36 = vld [vmem:[#allocation45 + $0x78] sm:$0xff] }
 0xb7e   : > { %v4046_v39 = vadd.f32 %v4044_v40, %v4040_v25  ;;  %v5865_v14 = vpack.c.bf16 %v3953_v36, %v3952_v0 }
 0xb7f   : > { %4049 = vst.msk [vmem:[#allocation49 + $0x8] sm:$0xff] %vm1913_vm4, %v4047_v26  ;;  %5838 = vmatprep.subr.bf16.mxu1 %v5837_v8  ;;  %v3942_v26 = vld [vmem:[#allocation45 + $0x20] sm:$0xff] }
 0xb80   : > { %4048 = vst.msk [vmem:[#allocation49] sm:$0xff] %vm1913_vm4, %v4046_v39  ;;  %5401 = vmatmul.mubr.f32.vlgmr.msra.gmra.mrb[0].mxu0 %v8741_v34  ;;  %v5845_v35 = vpack.c.bf16 %v3943_v1, %v3942_v26 }
 0xc53   : > { %v5402_v4 = vpop.f32.mrb[0].mxu0 }
 0xc54   : > { %v3811_v2 = vadd.f32 %v5402_v4, %v4581_v5  ;;  %v3794_v24 = vpop.f32.mrb[1].mxu0 }
 0xc55   : > { %v3810_v6 = vadd.f32 %v4581_v5, %v3794_v24 }
 0xc56   : > { %v4583_v25 = vmul.f32 -1.442695, %v3811_v2 }
 0xc57   : > { %v4582_v29 = vmul.f32 -1.442695, %v3810_v6 }
 0xc58   : > { %6438 = vpow2.f32 %v4583_v25 }
 0xc59   : > { %6440 = vpow2.f32 %v4582_v29 }
 0xc62   : > { %v6439_v40 = vpop.eup %6438 }
 0xc63   : > { %v6441_v30 = vpop.eup %6440  ;;  %v3819_v32 = vadd.f32 1.0, %v6439_v40 }
 0xc64   : > { %v3818_v61 = vadd.f32 1.0, %v6441_v30 }
 0xc65   : > { %6442 = vrcp.f32 %v3819_v32 }
 0xc66   : > { %6444 = vrcp.f32 %v3818_v61 }
 0xc6f   : > { %v6443_v12 = vpop.eup %6442 }
 0xc70   : > { %v6445_v54 = vpop.eup %6444  ;;  %v3825_v18 = vmul.f32 %v6443_v12, %v3811_v2 }
 0xc71   : > { %v3824_v39 = vmul.f32 %v6445_v54, %v3810_v6 }
 0xc73   : > { %5435 = vmatprep.mubr.f32.mxu1 %v3824_v39 }
 0xc74   : > { %5436 = vmatmul.mubr.f32.vlgmr.msra.gmra.mrb[0].mxu1 %v3825_v18 }
 0xc75   : > { %5840 = vmatpush3.bf16.msra.mxu1 %v5837_v8 }
 0xc76   : > { %5842 = vmatprep.subr.bf16.mxu1 %v5841_v13 }
 0xc79   : > { %5844 = vmatpush3.bf16.msra.mxu1 %v5841_v13 }
 0xc7a   : > { %5846 = vmatprep.subr.bf16.mxu1 %v5845_v35 }
 0xc7d   : > { %5848 = vmatpush3.bf16.msra.mxu1 %v5845_v35 }
 0xc7e   : > { %5850 = vmatprep.subr.bf16.mxu1 %v5849_v44 }
 0xc81   : > { %5852 = vmatpush3.bf16.msra.mxu1 %v5849_v44 }
 0xc82   : > { %5854 = vmatprep.subr.bf16.mxu1 %v5853_v41 }
 0xc85   : > { %5856 = vmatpush3.bf16.msra.mxu1 %v5853_v41 }
 0xc86   : > { %5858 = vmatprep.subr.bf16.mxu1 %v5857_v59 }
 0xc89   : > { %5860 = vmatpush3.bf16.msra.mxu1 %v5857_v59 }
 0xc8a   : > { %5862 = vmatprep.subr.bf16.mxu1 %v5861_v31 }
 0xc8d   : > { %5864 = vmatpush3.bf16.msra.mxu1 %v5861_v31 }
 0xc8e   : > { %5866 = vmatprep.subr.bf16.mxu1 %v5865_v14 }
 0xc91   : > { %5868 = vmatpush3.bf16.msra.mxu1 %v5865_v14 }
 0xd47   : > { %v5437_v22 = vpop.f32.mrb[0].mxu1 }
 0xd48   : > { %v3921_v10 = vadd.f32 %v5437_v22, %v4584_v21  ;;  %v3915_v33 = vpop.f32.mrb[1].mxu1 }
 0xd49   : > { %v3916_v28 = vadd.f32 %v4584_v21, %v3915_v33 }
 0xd4a   : > { %v4586_v11 = vmul.f32 -1.442695, %v3921_v10 }
 0xd4b   : > { %v4585_v55 = vmul.f32 -1.442695, %v3916_v28 }
 0xd4c   : > { %6446 = vpow2.f32 %v4586_v11 }
 0xd4d   : > { %6448 = vpow2.f32 %v4585_v55 }
 0xd56   : > { %v6447_v46 = vpop.eup %6446 }
 0xd57   : > { %v6449_v56 = vpop.eup %6448  ;;  %v3931_v62 = vadd.f32 1.0, %v6447_v46 }
 0xd58   : > { %v3930_v60 = vadd.f32 1.0, %v6449_v56 }
 0xd59   : > { %6450 = vrcp.f32 %v3931_v62 }
 0xd5a   : > { %6452 = vrcp.f32 %v3930_v60 }
 0xd63   : > { %v6451_v7 = vpop.eup %6450 }
 0xd64   : > { %v6453_v50 = vpop.eup %6452  ;;  %v3937_v45 = vmul.f32 %v6451_v7, %v3921_v10 }
 0xd65   : > { %v3936_v57 = vmul.f32 %v6453_v50, %v3916_v28 }
 0xd67   : > { %5470 = vmatprep.mubr.f32.mxu1 %v3936_v57 }
 0xd68   : > { %5471 = vmatmul.mubr.f32.vlgmr.msra.gmra.mrb[2].mxu1 %v3937_v45 }
 0xe3b   : > { %v5472_v16 = vpop.f32.mrb[2].mxu1 }
 0xe3c   : > { %v4033_v48 = vadd.f32 %v5472_v16, %v4587_v37  ;;  %v4027_v58 = vpop.f32.mrb[3].mxu1 }
 0xe3d   : > { %v4028_v49 = vadd.f32 %v4587_v37, %v4027_v58 }
 0xe3e   : > { %v4037_v52 = vadd.f32 %v4033_v48, %v8741_v34 }
 0xe3f   : > { %v4036_v63 = vadd.f32 %v4028_v49, %v8737_v47 }
 0xe40   : > { %4039 = vst [vmem:[#allocation48 + $0x8] sm:$0xff] %v4037_v52 }
 0xe41   : > { %4038 = vst [vmem:[#allocation48] sm:$0xff] %v4036_v63 }
 0xe42 PF: > { %s8934_s17 = sld [smem:[#allocation68_spill]]  ;;  %s7339_s11 = smov [#allocation48]  }
 0xe43   : > { %s4056_s5 = sshll.u32 %s7339_s11, 4  ;;  %s4057_s5 = int_to_ptr.vmem [resolvable:$true] %s4056_s5 }
 0xe44   : > { %s7182_s15 = scalar_lea.vmem %s4057_s5, 256  ;;  %p7189_p5 = scmp.lt.s32.totalorder %s4057_s5, %s4057_s5 }
 0xe45   : > { %p7183_p0 = scmp.ne.s32.totalorder %s4057_s5, %s7182_s15  ;;  %p7190_p7 = scmp.lt.s32.totalorder %s7182_s15, %s7182_s15 }
 0xe47   : > { %p7191_p9 = por %p7190_p7, %p7189_p5 }
 0xe48   : > { %p6130_p13 = scmp.eq.s32.totalorder %s8934_s17, 1 }
 0xe4a   : > { %p7184_p1 = pnand %p7183_p0, %p6130_p13 }
 0xe4c   : > { %p7185_p6 = pneg %p7184_p1 }
 0xe4e   : > { %p7192_p2 = pnand %p7191_p9, %p7185_p6 }
 0xe50   : > { %7195 = shalt.err (!%p7192_p2)
}
 0xe51   : > { %s8935_s8 = sld [smem:[#allocation87_spill]] }
 0xe57   : > { %s7196_s2 = scalar_lea.hbm %s8935_s8, 256 }
 0xe58   : > { %p7197_p10 = scmp.ne.s32.totalorder %s8935_s8, %s7196_s2  ;;  %p7202_p3 = scmp.lt.u32.totalorder %s7196_s2, %s8935_s8 }
 0xe5a   : > { %p7198_p11 = pnand %p7197_p10, %p6130_p13 }
 0xe5c   : > { %p7199_p12 = pneg %p7198_p11 }
 0xe5e   : > { %p7204_p4 = pnand %p7202_p3, %p7199_p12 }
 0xe60   : > { %7207 = shalt.err (!%p7204_p4)
}
 0xe61   : > { %s7340_s6 = smov 128   ;;  %s7341_s26 = smov 8  }
 0xe62   : > { %5992 = dma.vmem_to_hbm [thread:$0]  (%p6130_p13), %s4057_s5, 256, %s8935_s8, [#allocation9], %s7340_s6, %s7340_s6, %s7341_s26  }
 0xe63   : > { %s7342_s11 = smov [#allocation49]  }
 0xe64   : > { %s4069_s15 = sshll.u32 %s7342_s11, 4  ;;  %s4070_s15 = int_to_ptr.vmem [resolvable:$true] %s4069_s15 }
 0xe65   : > { %s7208_s7 = scalar_lea.vmem %s4070_s15, 256  ;;  %p7215_p6 = scmp.lt.s32.totalorder %s4070_s15, %s4070_s15 }
 0xe66   : > { %p7209_p8 = scmp.ne.s32.totalorder %s4070_s15, %s7208_s7  ;;  %p7216_p5 = scmp.lt.s32.totalorder %s7208_s7, %s7208_s7 }
 0xe68   : > { %p7210_p0 = pnand %p7209_p8, %p6130_p13  ;;  %p7217_p7 = por %p7216_p5, %p7215_p6 }
 0xe6a   : > { %p7211_p1 = pneg %p7210_p0 }
 0xe6c   : > { %p7218_p9 = pnand %p7217_p7, %p7211_p1 }
 0xe6e   : > { %7221 = shalt.err (!%p7218_p9)
}
 0xe6f   : > { %s8936_s3 = sld [smem:[#allocation88_spill]] }
 0xe75   : > { %s7222_s25 = scalar_lea.hbm %s8936_s3, 256 }
 0xe76   : > { %p7223_p2 = scmp.ne.s32.totalorder %s8936_s3, %s7222_s25  ;;  %p7228_p12 = scmp.lt.u32.totalorder %s7222_s25, %s8936_s3 }
 0xe78   : > { %p7224_p10 = pnand %p7223_p2, %p6130_p13 }
 0xe7a   : > { %p7225_p11 = pneg %p7224_p10 }
 0xe7c   : > { %p7230_p3 = pnand %p7228_p12, %p7225_p11 }
 0xe7e   : > { %7233 = shalt.err (!%p7230_p3)
}
 0xe7f   : > { %5994 = dma.vmem_to_hbm [thread:$0]  (%p6130_p13), %s4070_s15, 256, %s8936_s3, [#allocation50], %s7340_s6, %s7340_s6, %s7341_s26  }
 0xe80   : > { %7295 = dma.done.wait (%p6130_p13), [#allocation9], 256  }
 0xe81   : > { %7297 = vsyncadd (%p6130_p13), [#allocation9], 4294967040 }
 0xe82   : > { %7299 = dma.done.wait (%p6130_p13), [#allocation50], 256  }
 0xe83   : > { %7301 = vsyncadd (%p6130_p13), [#allocation50], 4294967040 }
 0xe84 PF: > { %s8937_s7 = sld [smem:[#allocation67_spill]] }
 0xe8a   : > { %s54_s7 = sadd.s32 1, %s8937_s7  }
 0xe8b   : > { %p51_p4 = scmp.ge.s32.totalorder %s54_s7, 4  }
 0xe8d   :  { %53 = sbr.rel (!%p51_p4) target bundleno = 36 (0x24), region = 272 }
 0xe94   :  { %4089 = vsyncpa [#allocation8], 1 }
 0xe95   :  { %4091 = vsyncpa [#allocation8 + $0x1], 1 }
 0xe96   :  { %4092 = vsyncpa [#allocation11], 1 }
 0xe97   :  { %4093 = vsyncpa [#allocation14], 1 }
 0xe98   :  { %4094 = vsyncpa [#allocation17], 1 }
 0xe99   :  { %4095 = vsyncpa [#allocation20], 1 }
 0xe9a   :  { %4096 = vsyncpa [#allocation23], 1 }
 0xe9b   :  { %4097 = vsyncpa [#allocation26], 1 }
 0xe9c   :  { %4098 = vsyncpa [#allocation29], 1 }
 0xe9d   :  { %4099 = vsyncpa [#allocation32], 1 }
 0xe9e   :  { %4100 = vsyncpa [#allocation35], 1 }
 0xe9f   :  { %4101 = vsyncpa [#allocation38], 1 }
 0xea0   :  { %4102 = vsyncpa [#allocation41], 1 }
 0xea1   :  { %4103 = vsyncpa [#allocation44], 1 }
 0xea2   :  { %4104 = vsyncpa [#allocation47], 1 }
 0xea3   :  { %4105 = vsyncpa [#allocation9], 1 }
 0xea4   :  { %4107 = vsyncpa [#allocation9 + $0x1], 1 }
 0xea5   :  { %4108 = vsyncpa [#allocation50], 1 }

// kernel: egnn_forward.3
= control target key start
LH: loop header
LB: loop body
LE: loop exit
PB: predicated region body
PF: predicated region fallthrough
CT: control target
= control target key end

     0   :  { %s8911_s0 = inlined_call_operand.hbm [shape: s32[256,1], index: 0, kind: input, shape index: {}]   ;;  %s8912_s1 = inlined_call_operand.hbm [shape: s32[256,1], index: 1, kind: input, shape index: {}]   ;;  %s8913_s2 = inlined_call_operand.hbm [shape: s32[1,256], index: 2, kind: input, shape index: {}]   ;;  %s8914_s3 = inlined_call_operand.hbm [shape: f32[16,128], index: 3, kind: input, shape index: {}]   ;;  %s8915_s4 = inlined_call_operand.hbm [shape: f32[16,8], index: 4, kind: input, shape index: {}]   ;;  %s8916_s5 = inlined_call_operand.hbm [shape: f32[16,1], index: 5, kind: input, shape index: {}]   ;;  %s8917_s6 = inlined_call_operand.hbm [shape: f32[128,128], index: 6, kind: input, shape index: {}]   ;;  %s8918_s7 = inlined_call_operand.hbm [shape: f32[128,128], index: 7, kind: input, shape index: {}]   ;;  %s8919_s8 = inlined_call_operand.hbm [shape: f32[1,128], index: 8, kind: input, shape index: {}]   ;;  %s8920_s9 = inlined_call_operand.hbm [shape: f32[1,128], index: 9, kind: input, shape index: {}]   ;;  %s8921_s10 = inlined_call_operand.hbm [shape: f32[1,128,128], index: 10, kind: input, shape index: {}]   ;;  %s8922_s11 = inlined_call_operand.hbm [shape: f32[1,1,128], index: 11, kind: input, shape index: {}]   ;;  %s8923_s12 = inlined_call_operand.hbm [shape: f32[128,128], index: 12, kind: input, shape index: {}]   ;;  %s8924_s13 = inlined_call_operand.hbm [shape: f32[1,128], index: 13, kind: input, shape index: {}]   ;;  %s8925_s14 = inlined_call_operand.hbm [shape: f32[1,128,128], index: 14, kind: input, shape index: {}]   ;;  %s8926_s15 = inlined_call_operand.hbm [shape: f32[1,1,128], index: 15, kind: input, shape index: {}]   ;;  %s8927_s16 = inlined_call_operand.hbm [shape: f32[1,128], index: 16, kind: input, shape index: {}]   ;;  %s8928_s17 = inlined_call_operand.hbm [shape: f32[128,128], index: 17, kind: input, shape index: {}]   ;;  %s8929_s18 = inlined_call_operand.hbm [shape: f32[128,128], index: 18, kind: input, shape index: {}]   ;;  %s8930_s19 = inlined_call_operand.hbm [shape: f32[1,128], index: 19, kind: input, shape index: {}]   ;;  %s8931_s20 = inlined_call_operand.hbm [shape: f32[1,128,128], index: 20, kind: input, shape index: {}]   ;;  %s8932_s21 = inlined_call_operand.hbm [shape: f32[1,1,128], index: 21, kind: input, shape index: {}]   ;;  %s8933_s22 = inlined_call_operand.hbm [shape: f32[128,128], index: 22, kind: input, shape index: {}]   ;;  %s8934_s23 = inlined_call_operand.hbm [shape: f32[1,128], index: 23, kind: input, shape index: {}]   ;;  %s8935_s24 = inlined_call_operand.hbm [shape: f32[128,128], index: 24, kind: input, shape index: {}]   ;;  %s8936_s25 = inlined_call_operand.hbm [shape: f32[1,128], index: 25, kind: input, shape index: {}]   ;;  %s8937_s26 = inlined_call_operand.hbm [shape: f32[16,128], index: 26, kind: output, shape index: {0}]   ;;  %s8938_s27 = inlined_call_operand.hbm [shape: f32[16,8], index: 27, kind: output, shape index: {1}]   ;;  %s8939_s28 = inlined_call_operand.hbm [shape: f32[16,128], index: 28, kind: output, shape index: {2}]  }
   0x1   :  { %8979 = sst [smem:[#allocation71_spill]] %s8911_s0 }
   0x2   :  { %8980 = sst [smem:[#allocation72_spill]] %s8912_s1 }
   0x3   :  { %8981 = sst [smem:[#allocation73_spill]] %s8913_s2 }
   0x4   :  { %8982 = sst [smem:[#allocation74_spill]] %s8914_s3 }
   0x5   :  { %8983 = sst [smem:[#allocation75_spill]] %s8915_s4 }
   0x6   :  { %8984 = sst [smem:[#allocation76_spill]] %s8916_s5 }
   0x7   :  { %8985 = sst [smem:[#allocation77_spill]] %s8917_s6 }
   0x8   :  { %8986 = sst [smem:[#allocation78_spill]] %s8918_s7 }
   0x9   :  { %8987 = sst [smem:[#allocation79_spill]] %s8919_s8 }
   0xa   :  { %8988 = sst [smem:[#allocation80_spill]] %s8920_s9 }
   0xb   :  { %8989 = sst [smem:[#allocation81_spill]] %s8921_s10 }
   0xc   :  { %8990 = sst [smem:[#allocation82_spill]] %s8922_s11 }
   0xd   :  { %8991 = sst [smem:[#allocation83_spill]] %s8923_s12 }
   0xe   :  { %8992 = sst [smem:[#allocation84_spill]] %s8924_s13 }
   0xf   :  { %8993 = sst [smem:[#allocation85_spill]] %s8936_s25 }
  0x10   :  { %8994 = sst [smem:[#allocation86_spill]] %s8937_s26 }
  0x11   :  { %8995 = sst [smem:[#allocation87_spill]] %s8938_s27 }
  0x12   :  { %8996 = sst [smem:[#allocation88_spill]] %s8939_s28 }
  0x13   :  { %34 = vsyncpa [#allocation8], 0 }
  0x14   :  { %35 = vsyncpa [#allocation11], 0 }
  0x15   :  { %36 = vsyncpa [#allocation14], 0 }
  0x16   :  { %37 = vsyncpa [#allocation17], 0 }
  0x17   :  { %38 = vsyncpa [#allocation20], 0 }
  0x18   :  { %39 = vsyncpa [#allocation23], 0 }
  0x19   :  { %40 = vsyncpa [#allocation26], 0 }
  0x1a   :  { %41 = vsyncpa [#allocation29], 0 }
  0x1b   :  { %42 = vsyncpa [#allocation32], 0 }
  0x1c   :  { %43 = vsyncpa [#allocation35], 0 }
  0x1d   :  { %44 = vsyncpa [#allocation38], 0 }
  0x1e   :  { %45 = vsyncpa [#allocation41], 0 }
  0x1f   :  { %46 = vsyncpa [#allocation44], 0 }
  0x20   :  { %47 = vsyncpa [#allocation47], 0 }
  0x21   :  { %48 = vsyncpa [#allocation9], 0 }
  0x22   :  { %49 = vsyncpa [#allocation50], 0  ;;  %s7573_s8 = smov 0  }
  0x23 LB: > { %8997 = sst [smem:[#allocation68_spill]] %s7388_s8  ;;  %s7579_s5 = sadd.s32 4294967295, %s7388_s8   ;;  %s7388_s8 = sphi %s7573_s8, %s55_s8  }
  0x24   : > { %8998 = sst [smem:[#allocation69_spill]] %s7579_s5  ;;  %p4415_p0 = scmp.ge.s32.totalorder %s7388_s8, 1 }
  0x25   : > { %p669_p1 = scmp.lt.s32.totalorder %s7388_s8, 3  ;;  %p8963_p3 = scmp.eq.s32.totalorder %s7579_s5, 0 }
  0x26   : > { %s7390_s30 = smov [#allocation10]   ;;  %s7391_s6 = smov [#allocation13]  }
  0x27   : > { %p7585_p4 = pnand %p4415_p0, %p669_p1  ;;  %s694_s3 = sshll.u32 %s7390_s30, 4  ;;  %s7589_s3 = int_to_ptr.vmem [resolvable:$true] %s694_s3 }
  0x28   : > { %s718_s10 = sshll.u32 %s7391_s6, 4  ;;  %s7392_s11 = smov [#allocation16]   ;;  %s7593_s10 = int_to_ptr.vmem [resolvable:$true] %s718_s10 }
  0x29   : > { %s8999_s9 = scalar_select %p7585_p4, 1, 0 }
  0x2a   : > { %p6054_p5 = pneg %p7585_p4  ;;  %s744_s29 = sshll.u32 %s7392_s11, 4  ;;  %s7601_s29 = int_to_ptr.vmem [resolvable:$true] %s744_s29 }
  0x2b   : > { %9000 = sst [smem:[#allocation70_spill]] %s8999_s9  ;;  %s7393_s2 = smov [#allocation19]  }
  0x2c   : > { %p7597_p6 = pnand %p8963_p3, %p6054_p5  ;;  %s7603_s7 = sshll.u32 %s7393_s2, 4  ;;  %s771_s7 = int_to_ptr.vmem [resolvable:$true] %s7603_s7 }
  0x2d   : > { %s9002_s4 = sld [smem:[#allocation72_spill]] }
  0x2e   : > { %p7613_p8 = pneg %p7597_p6 }
  0x33   : > { %s6512_s30 = scalar_lea.hbm %s9002_s4, 4096 }
  0x34   : > { %p6513_p7 = scmp.ne.s32.totalorder %s9002_s4, %s6512_s30  ;;  %p6519_p11 = scmp.lt.u32.totalorder %s6512_s30, %s9002_s4 }
  0x36   : > { %p6515_p9 = pnand %p7613_p8, %p6513_p7 }
  0x38   : > { %p6516_p10 = pneg %p6515_p9 }
  0x3a   : > { %p6521_p12 = pnand %p6519_p11, %p6516_p10 }
  0x3c   : > { %6524 = shalt.err (!%p6521_p12)
}
  0x3d   : > { %s6525_s8 = scalar_lea.vmem %s7589_s3, 4096  ;;  %p6533_p5 = scmp.lt.s32.totalorder %s7589_s3, %s7589_s3 }
  0x3e   : > { %p6526_p13 = scmp.ne.s32.totalorder %s7589_s3, %s6525_s8  ;;  %p6534_p2 = scmp.lt.s32.totalorder %s6525_s8, %s6525_s8 }
  0x40   : > { %p6528_p0 = pnand %p6526_p13, %p7613_p8  ;;  %p6535_p7 = por %p6534_p2, %p6533_p5 }
  0x42   : > { %p6529_p1 = pneg %p6528_p0 }
  0x44   : > { %p6536_p9 = pnand %p6535_p7, %p6529_p1 }
  0x46   : > { %6539 = shalt.err (!%p6536_p9)
}
  0x47   : > { %s8968_s12 = smov 128   ;;  %s8970_s1 = smov 8  }
  0x48   : > { %6060 = dma.hbm_to_vmem [thread:$0]  (!%p7597_p6), %s9002_s4, 4096, %s7589_s3, [#allocation11], %s8968_s12, %s8968_s12, %s8970_s1  }
  0x49   : > { %s9004_s26 = sld [smem:[#allocation74_spill]] }
  0x4f   : > { %s6540_s8 = scalar_lea.hbm %s9004_s26, 256 }
  0x50   : > { %p6541_p2 = scmp.ne.s32.totalorder %s9004_s26, %s6540_s8  ;;  %p6547_p12 = scmp.lt.u32.totalorder %s6540_s8, %s9004_s26 }
  0x52   : > { %p6543_p10 = pnand %p6541_p2, %p7613_p8 }
  0x54   : > { %p6544_p11 = pneg %p6543_p10 }
  0x56   : > { %p6549_p13 = pnand %p6547_p12, %p6544_p11 }
  0x58   : > { %6552 = shalt.err (!%p6549_p13)
}
  0x59   : > { %s6553_s3 = scalar_lea.vmem %s7593_s10, 256  ;;  %p6561_p7 = scmp.lt.s32.totalorder %s7593_s10, %s7593_s10 }
  0x5a   : > { %p6554_p0 = scmp.ne.s32.totalorder %s7593_s10, %s6553_s3  ;;  %p6562_p9 = scmp.lt.s32.totalorder %s6553_s3, %s6553_s3 }
  0x5c   : > { %p6556_p1 = pnand %p6554_p0, %p7613_p8  ;;  %p6563_p2 = por %p6562_p9, %p6561_p7 }
  0x5e   : > { %p6557_p5 = pneg %p6556_p1 }
  0x60   : > { %p6564_p10 = pnand %p6563_p2, %p6557_p5 }
  0x62   : > { %6567 = shalt.err (!%p6564_p10)
}
  0x63   : > { %6066 = dma.hbm_to_vmem [thread:$0]  (!%p7597_p6), %s9004_s26, 256, %s7593_s10, [#allocation14], %s8968_s12, %s8968_s12, %s8970_s1  }
  0x64   : > { %s9005_s30 = sld [smem:[#allocation76_spill]] }
  0x6a   : > { %s6568_s6 = scalar_lea.hbm %s9005_s30, 256 }
  0x6b   : > { %p6569_p11 = scmp.ne.s32.totalorder %s9005_s30, %s6568_s6  ;;  %p6575_p0 = scmp.lt.u32.totalorder %s6568_s6, %s9005_s30 }
  0x6d   : > { %p6571_p12 = pnand %p6569_p11, %p7613_p8 }
  0x6f   : > { %p6572_p13 = pneg %p6571_p12 }
  0x71   : > { %p6577_p1 = pnand %p6575_p0, %p6572_p13 }
  0x73   : > { %6580 = shalt.err (!%p6577_p1)
}
  0x74   : > { %s6581_s10 = scalar_lea.vmem %s7601_s29, 256  ;;  %p6589_p2 = scmp.lt.s32.totalorder %s7601_s29, %s7601_s29 }
  0x75   : > { %p6582_p5 = scmp.ne.s32.totalorder %s7601_s29, %s6581_s10  ;;  %p6590_p10 = scmp.lt.s32.totalorder %s6581_s10, %s6581_s10 }
  0x77   : > { %p6584_p7 = pnand %p6582_p5, %p7613_p8  ;;  %p6591_p11 = por %p6590_p10, %p6589_p2 }
  0x79   : > { %p6585_p9 = pneg %p6584_p7 }
  0x7b   : > { %p6592_p12 = pnand %p6591_p11, %p6585_p9 }
  0x7d   : > { %6595 = shalt.err (!%p6592_p12)
}
  0x7e   : > { %6072 = dma.hbm_to_vmem [thread:$0]  (!%p7597_p6), %s9005_s30, 256, %s7601_s29, [#allocation17], %s8968_s12, %s8968_s12, %s8970_s1  }
  0x7f   : > { %s9006_s6 = sld [smem:[#allocation78_spill]] }
  0x85   : > { %s6596_s11 = scalar_lea.hbm %s9006_s6, 2048 }
  0x86   : > { %p6597_p13 = scmp.ne.s32.totalorder %s9006_s6, %s6596_s11  ;;  %p6603_p5 = scmp.lt.u32.totalorder %s6596_s11, %s9006_s6 }
  0x88   : > { %p6599_p0 = pnand %p6597_p13, %p7613_p8 }
  0x8a   : > { %p6600_p1 = pneg %p6599_p0 }
  0x8c   : > { %p6605_p7 = pnand %p6603_p5, %p6600_p1 }
  0x8e   : > { %6608 = shalt.err (!%p6605_p7)
}
  0x8f   : > { %s6609_s25 = scalar_lea.vmem %s771_s7, 2048  ;;  %p6617_p11 = scmp.lt.s32.totalorder %s771_s7, %s771_s7 }
  0x90   : > { %p6610_p9 = scmp.ne.s32.totalorder %s771_s7, %s6609_s25  ;;  %p6618_p12 = scmp.lt.s32.totalorder %s6609_s25, %s6609_s25 }
  0x92   : > { %p6612_p2 = pnand %p6610_p9, %p7613_p8  ;;  %p6619_p3 = por %p6618_p12, %p6617_p11 }
  0x94   : > { %p6613_p10 = pneg %p6612_p2 }
  0x96   : > { %p6620_p4 = pnand %p6619_p3, %p6613_p10 }
  0x98   : > { %6623 = shalt.err (!%p6620_p4)
}
  0x99   : > { %6078 = dma.hbm_to_vmem [thread:$0]  (!%p7597_p6), %s9006_s6, 2048, %s771_s7, [#allocation20], %s8968_s12, %s8968_s12, %s8970_s1  }
  0x9a   : > { %s7396_s5 = smov [#allocation22]   ;;  %s7397_s11 = smov [#allocation25]  }
  0x9b   : > { %s795_s9 = sshll.u32 %s7396_s5, 4  ;;  %s819_s2 = sshll.u32 %s7397_s11, 4  ;;  %s796_s9 = int_to_ptr.vmem [resolvable:$true] %s795_s9  ;;  %s820_s2 = int_to_ptr.vmem [resolvable:$true] %s819_s2 }
  0x9c   : > { %s9007_s10 = sld [smem:[#allocation80_spill]] }
  0xa2   : > { %s6624_s25 = scalar_lea.hbm %s9007_s10, 16 }
  0xa3   : > { %p6625_p3 = scmp.ne.s32.totalorder %s9007_s10, %s6624_s25  ;;  %p6631_p0 = scmp.lt.u32.totalorder %s6624_s25, %s9007_s10 }
  0xa5   : > { %p6627_p4 = pnand %p6625_p3, %p7613_p8 }
  0xa7   : > { %p6628_p13 = pneg %p6627_p4 }
  0xa9   : > { %p6633_p1 = pnand %p6631_p0, %p6628_p13 }
  0xab   : > { %6636 = shalt.err (!%p6633_p1)
}
  0xac   : > { %s6637_s7 = scalar_lea.vmem %s796_s9, 16  ;;  %s6644_s27 = scalar_lea.vmem %s796_s9, 32 }
  0xad   : > { %p6638_p5 = scmp.ne.s32.totalorder %s796_s9, %s6637_s7  ;;  %p6645_p2 = scmp.lt.s32.totalorder %s796_s9, %s796_s9 }
  0xae   : > { %p6646_p10 = scmp.lt.s32.totalorder %s6644_s27, %s6637_s7 }
  0xaf   : > { %p6640_p7 = pnand %p6638_p5, %p7613_p8 }
  0xb0   : > { %p6647_p11 = por %p6646_p10, %p6645_p2 }
  0xb1   : > { %p6641_p9 = pneg %p6640_p7 }
  0xb3   : > { %p6648_p12 = pnand %p6647_p11, %p6641_p9 }
  0xb5   : > { %6651 = shalt.err (!%p6648_p12)
}
  0xb6   : > { %6084 = dma.hbm_to_vmem [thread:$0]  (!%p7597_p6), %s9007_s10, 16, %s796_s9, [#allocation23]  }
  0xb7   : > { %s9008_s11 = sld [smem:[#allocation82_spill]] }
  0xbd   : > { %s6652_s8 = scalar_lea.hbm %s9008_s11, 16 }
  0xbe   : > { %p6653_p3 = scmp.ne.s32.totalorder %s9008_s11, %s6652_s8  ;;  %p6659_p0 = scmp.lt.u32.totalorder %s6652_s8, %s9008_s11 }
  0xc0   : > { %p6655_p4 = pnand %p6653_p3, %p7613_p8 }
  0xc2   : > { %p6656_p13 = pneg %p6655_p4 }
  0xc4   : > { %p6661_p1 = pnand %p6659_p0, %p6656_p13 }
  0xc6   : > { %6664 = shalt.err (!%p6661_p1)
}
  0xc7   : > { %s6665_s27 = scalar_lea.vmem %s820_s2, 16  ;;  %s6672_s9 = scalar_lea.vmem %s820_s2, 32 }
  0xc8   : > { %p6666_p5 = scmp.ne.s32.totalorder %s820_s2, %s6665_s27  ;;  %p6673_p2 = scmp.lt.s32.totalorder %s820_s2, %s820_s2 }
  0xc9   : > { %p6674_p10 = scmp.lt.s32.totalorder %s6672_s9, %s6665_s27 }
  0xca   : > { %p6668_p7 = pnand %p6666_p5, %p7613_p8 }
  0xcb   : > { %p6675_p11 = por %p6674_p10, %p6673_p2 }
  0xcc   : > { %p6669_p9 = pneg %p6668_p7 }
  0xce   : > { %p6676_p12 = pnand %p6675_p11, %p6669_p9 }
  0xd0   : > { %6679 = shalt.err (!%p6676_p12)
}
  0xd1   : > { %6090 = dma.hbm_to_vmem [thread:$0]  (!%p7597_p6), %s9008_s11, 16, %s820_s2, [#allocation26]  }
  0xd2   : > { %s7398_s30 = smov [#allocation28]   ;;  %s7399_s8 = smov [#allocation31]  }
  0xd3   : > { %s843_s5 = sshll.u32 %s7398_s30, 4  ;;  %s867_s3 = sshll.u32 %s7399_s8, 4  ;;  %s844_s5 = int_to_ptr.vmem [resolvable:$true] %s843_s5  ;;  %s868_s3 = int_to_ptr.vmem [resolvable:$true] %s867_s3 }
  0xd4   : > { %s9009_s13 = sld [smem:[#allocation84_spill]] }
  0xda   : > { %s6680_s7 = scalar_lea.hbm %s9009_s13, 16 }
  0xdb   : > { %p6681_p3 = scmp.ne.s32.totalorder %s9009_s13, %s6680_s7  ;;  %p6687_p0 = scmp.lt.u32.totalorder %s6680_s7, %s9009_s13 }
  0xdd   : > { %p6683_p4 = pnand %p6681_p3, %p7613_p8 }
  0xdf   : > { %p6684_p13 = pneg %p6683_p4 }
  0xe1   : > { %p6689_p1 = pnand %p6687_p0, %p6684_p13 }
  0xe3   : > { %6692 = shalt.err (!%p6689_p1)
}
  0xe4   : > { %s6693_s2 = scalar_lea.vmem %s844_s5, 16  ;;  %s6700_s4 = scalar_lea.vmem %s844_s5, 32 }
  0xe5   : > { %p6694_p5 = scmp.ne.s32.totalorder %s844_s5, %s6693_s2  ;;  %p6701_p2 = scmp.lt.s32.totalorder %s844_s5, %s844_s5 }
  0xe6   : > { %p6702_p10 = scmp.lt.s32.totalorder %s6700_s4, %s6693_s2 }
  0xe7   : > { %p6696_p7 = pnand %p6694_p5, %p7613_p8 }
  0xe8   : > { %p6703_p11 = por %p6702_p10, %p6701_p2 }
  0xe9   : > { %p6697_p9 = pneg %p6696_p7 }
  0xeb   : > { %p6704_p12 = pnand %p6703_p11, %p6697_p9 }
  0xed   : > { %6707 = shalt.err (!%p6704_p12)
}
  0xee   : > { %6096 = dma.hbm_to_vmem [thread:$0]  (!%p7597_p6), %s9009_s13, 16, %s844_s5, [#allocation29]  }
  0xef   : > { %s6708_s29 = scalar_lea.hbm %s8926_s15, 16 }
  0xf0   : > { %p6709_p3 = scmp.ne.s32.totalorder %s8926_s15, %s6708_s29  ;;  %p6715_p0 = scmp.lt.u32.totalorder %s6708_s29, %s8926_s15 }
  0xf2   : > { %p6711_p4 = pnand %p6709_p3, %p7613_p8 }
  0xf4   : > { %p6712_p13 = pneg %p6711_p4 }
  0xf6   : > { %p6717_p1 = pnand %p6715_p0, %p6712_p13 }
  0xf8   : > { %6720 = shalt.err (!%p6717_p1)
}
  0xf9   : > { %s6721_s2 = scalar_lea.vmem %s868_s3, 16  ;;  %s6728_s5 = scalar_lea.vmem %s868_s3, 32 }
  0xfa   : > { %p6722_p5 = scmp.ne.s32.totalorder %s868_s3, %s6721_s2  ;;  %p6729_p2 = scmp.lt.s32.totalorder %s868_s3, %s868_s3 }
  0xfb   : > { %p6730_p10 = scmp.lt.s32.totalorder %s6728_s5, %s6721_s2 }
  0xfc   : > { %p6724_p7 = pnand %p6722_p5, %p7613_p8 }
  0xfd   : > { %p6731_p11 = por %p6730_p10, %p6729_p2 }
  0xfe   : > { %p6725_p9 = pneg %p6724_p7 }
 0x100   : > { %p6732_p12 = pnand %p6731_p11, %p6725_p9 }
 0x102   : > { %6735 = shalt.err (!%p6732_p12)
}
 0x103   : > { %6102 = dma.hbm_to_vmem [thread:$0]  (!%p7597_p6), %s8926_s15, 16, %s868_s3, [#allocation32]  }
 0x104   : > { %s7400_s8 = smov [#allocation34]   ;;  %s7401_s25 = smov [#allocation37]  }
 0x105   : > { %s888_s12 = sshll.u32 %s7400_s8, 4  ;;  %s915_s29 = sshll.u32 %s7401_s25, 4  ;;  %s889_s12 = int_to_ptr.vmem [resolvable:$true] %s888_s12  ;;  %s916_s29 = int_to_ptr.vmem [resolvable:$true] %s915_s29 }
 0x106   : > { %s6736_s9 = scalar_lea.hbm %s8928_s17, 2048 }
 0x107   : > { %p6737_p3 = scmp.ne.s32.totalorder %s8928_s17, %s6736_s9  ;;  %p6743_p0 = scmp.lt.u32.totalorder %s6736_s9, %s8928_s17 }
 0x109   : > { %p6739_p4 = pnand %p6737_p3, %p7613_p8 }
 0x10b   : > { %p6740_p13 = pneg %p6739_p4 }
 0x10d   : > { %p6745_p1 = pnand %p6743_p0, %p6740_p13 }
 0x10f   : > { %6748 = shalt.err (!%p6745_p1)
}
 0x110   : > { %s6749_s3 = scalar_lea.vmem %s889_s12, 2048  ;;  %p6757_p2 = scmp.lt.s32.totalorder %s889_s12, %s889_s12 }
 0x111   : > { %p6750_p5 = scmp.ne.s32.totalorder %s889_s12, %s6749_s3  ;;  %p6758_p10 = scmp.lt.s32.totalorder %s6749_s3, %s6749_s3 }
 0x113   : > { %p6752_p7 = pnand %p6750_p5, %p7613_p8  ;;  %p6759_p11 = por %p6758_p10, %p6757_p2 }
 0x115   : > { %p6753_p9 = pneg %p6752_p7 }
 0x117   : > { %p6760_p12 = pnand %p6759_p11, %p6753_p9 }
 0x119   : > { %6763 = shalt.err (!%p6760_p12)
}
 0x11a   : > { %s9010_s30 = smov 128   ;;  %s6764_s9 = scalar_lea.hbm %s8930_s19, 16 }
 0x11b   : > { %6108 = dma.hbm_to_vmem [thread:$0]  (!%p7597_p6), %s8928_s17, 2048, %s889_s12, [#allocation35], %s9010_s30, %s9010_s30, %s8970_s1  }
 0x11c   : > { %p6765_p3 = scmp.ne.s32.totalorder %s8930_s19, %s6764_s9  ;;  %p6771_p0 = scmp.lt.u32.totalorder %s6764_s9, %s8930_s19 }
 0x11e   : > { %p6767_p4 = pnand %p6765_p3, %p7613_p8 }
 0x120   : > { %p6768_p13 = pneg %p6767_p4 }
 0x122   : > { %p6773_p1 = pnand %p6771_p0, %p6768_p13 }
 0x124   : > { %6776 = shalt.err (!%p6773_p1)
}
 0x125   : > { %s6777_s3 = scalar_lea.vmem %s916_s29, 16  ;;  %s6784_s12 = scalar_lea.vmem %s916_s29, 32 }
 0x126   : > { %p6778_p5 = scmp.ne.s32.totalorder %s916_s29, %s6777_s3  ;;  %p6785_p2 = scmp.lt.s32.totalorder %s916_s29, %s916_s29 }
 0x127   : > { %p6786_p10 = scmp.lt.s32.totalorder %s6784_s12, %s6777_s3 }
 0x128   : > { %p6780_p7 = pnand %p6778_p5, %p7613_p8 }
 0x129   : > { %p6787_p11 = por %p6786_p10, %p6785_p2 }
 0x12a   : > { %p6781_p9 = pneg %p6780_p7 }
 0x12c   : > { %p6788_p12 = pnand %p6787_p11, %p6781_p9 }
 0x12e   : > { %6791 = shalt.err (!%p6788_p12)
}
 0x12f   : > { %6114 = dma.hbm_to_vmem [thread:$0]  (!%p7597_p6), %s8930_s19, 16, %s916_s29, [#allocation38]  }
 0x130   : > { %s7402_s7 = smov [#allocation40]   ;;  %s7403_s9 = smov [#allocation43]  }
 0x131   : > { %s939_s27 = sshll.u32 %s7402_s7, 4  ;;  %s963_s26 = sshll.u32 %s7403_s9, 4  ;;  %s940_s27 = int_to_ptr.vmem [resolvable:$true] %s939_s27  ;;  %s964_s26 = int_to_ptr.vmem [resolvable:$true] %s963_s26 }
 0x132   : > { %s6792_s4 = scalar_lea.hbm %s8932_s21, 16 }
 0x133   : > { %p6793_p3 = scmp.ne.s32.totalorder %s8932_s21, %s6792_s4  ;;  %p6799_p0 = scmp.lt.u32.totalorder %s6792_s4, %s8932_s21 }
 0x135   : > { %p6795_p4 = pnand %p6793_p3, %p7613_p8 }
 0x137   : > { %p6796_p13 = pneg %p6795_p4 }
 0x139   : > { %p6801_p1 = pnand %p6799_p0, %p6796_p13 }
 0x13b   : > { %6804 = shalt.err (!%p6801_p1)
}
 0x13c   : > { %s6805_s29 = scalar_lea.vmem %s940_s27, 16  ;;  %s6812_s25 = scalar_lea.vmem %s940_s27, 32 }
 0x13d   : > { %p6806_p5 = scmp.ne.s32.totalorder %s940_s27, %s6805_s29  ;;  %p6813_p2 = scmp.lt.s32.totalorder %s940_s27, %s940_s27 }
 0x13e   : > { %p6814_p10 = scmp.lt.s32.totalorder %s6812_s25, %s6805_s29 }
 0x13f   : > { %p6808_p7 = pnand %p6806_p5, %p7613_p8 }
 0x140   : > { %p6815_p11 = por %p6814_p10, %p6813_p2 }
 0x141   : > { %p6809_p9 = pneg %p6808_p7 }
 0x143   : > { %p6816_p12 = pnand %p6815_p11, %p6809_p9 }
 0x145   : > { %6819 = shalt.err (!%p6816_p12)
}
 0x146   : > { %6120 = dma.hbm_to_vmem [thread:$0]  (!%p7597_p6), %s8932_s21, 16, %s940_s27, [#allocation41]  }
 0x147   : > { %s6820_s5 = scalar_lea.hbm %s8934_s23, 16 }
 0x148   : > { %p6821_p3 = scmp.ne.s32.totalorder %s8934_s23, %s6820_s5  ;;  %p6827_p0 = scmp.lt.u32.totalorder %s6820_s5, %s8934_s23 }
 0x14a   : > { %p6823_p4 = pnand %p6821_p3, %p7613_p8 }
 0x14c   : > { %p6824_p13 = pneg %p6823_p4 }
 0x14e   : > { %p6829_p1 = pnand %p6827_p0, %p6824_p13 }
 0x150   : > { %6832 = shalt.err (!%p6829_p1)
}
 0x151   : > { %s6833_s29 = scalar_lea.vmem %s964_s26, 16  ;;  %s6840_s27 = scalar_lea.vmem %s964_s26, 32 }
 0x152   : > { %p6834_p5 = scmp.ne.s32.totalorder %s964_s26, %s6833_s29  ;;  %p6841_p2 = scmp.lt.s32.totalorder %s964_s26, %s964_s26 }
 0x153   : > { %p6842_p10 = scmp.lt.s32.totalorder %s6840_s27, %s6833_s29 }
 0x154   : > { %p6836_p7 = pnand %p6834_p5, %p7613_p8 }
 0x155   : > { %p6843_p11 = por %p6842_p10, %p6841_p2 }
 0x156   : > { %p6837_p9 = pneg %p6836_p7 }
 0x158   : > { %p6844_p12 = pnand %p6843_p11, %p6837_p9 }
 0x15a   : > { %6847 = shalt.err (!%p6844_p12)
}
 0x15b   : > { %6126 = dma.hbm_to_vmem [thread:$0]  (!%p7597_p6), %s8934_s23, 16, %s964_s26, [#allocation44]  }
 0x15c   : > { %s7404_s9 = smov [#allocation7]   ;;  %s7405_s2 = smov [#allocation12]  }
 0x15d   : > { %s681_s1 = sshll.u32 %s7404_s9, 4  ;;  %s708_s5 = sshll.u32 %s7405_s2, 4  ;;  %s682_s1 = int_to_ptr.vmem [resolvable:$true] %s681_s1  ;;  %s709_s5 = int_to_ptr.vmem [resolvable:$true] %s708_s5 }
 0x15e   : > { %s9011_s12 = sld [smem:[#allocation71_spill]] }
 0x164   : > { %s6848_s8 = scalar_lea.hbm %s9011_s12, 4096 }
 0x165   : > { %p6849_p3 = scmp.ne.s32.totalorder %s9011_s12, %s6848_s8  ;;  %p6855_p0 = scmp.lt.u32.totalorder %s6848_s8, %s9011_s12 }
 0x167   : > { %p6851_p4 = pnand %p6849_p3, %p7613_p8 }
 0x169   : > { %p6852_p13 = pneg %p6851_p4 }
 0x16b   : > { %p6857_p1 = pnand %p6855_p0, %p6852_p13 }
 0x16d   : > { %6860 = shalt.err (!%p6857_p1)
}
 0x16e   : > { %s6861_s26 = scalar_lea.vmem %s682_s1, 4096  ;;  %p6869_p2 = scmp.lt.s32.totalorder %s682_s1, %s682_s1 }
 0x16f   : > { %p6862_p5 = scmp.ne.s32.totalorder %s682_s1, %s6861_s26  ;;  %p6870_p10 = scmp.lt.s32.totalorder %s6861_s26, %s6861_s26 }
 0x171   : > { %p6864_p7 = pnand %p6862_p5, %p7613_p8  ;;  %p6871_p11 = por %p6870_p10, %p6869_p2 }
 0x173   : > { %p6865_p9 = pneg %p6864_p7 }
 0x175   : > { %p6872_p12 = pnand %p6871_p11, %p6865_p9 }
 0x177   : > { %6875 = shalt.err (!%p6872_p12)
}
 0x178   : > { %s9012_s7 = smov 8   ;;  %s9013_s3 = sld [smem:[#allocation73_spill]] }
 0x179   : > { %6057 = dma.hbm_to_vmem [thread:$0]  (!%p7597_p6), %s9011_s12, 4096, %s682_s1, [#allocation8], %s9010_s30, %s9010_s30, %s9012_s7  }
 0x17e   : > { %s6876_s8 = scalar_lea.hbm %s9013_s3, 32 }
 0x17f   : > { %p6877_p3 = scmp.ne.s32.totalorder %s9013_s3, %s6876_s8  ;;  %p6883_p0 = scmp.lt.u32.totalorder %s6876_s8, %s9013_s3 }
 0x181   : > { %p6879_p4 = pnand %p6877_p3, %p7613_p8 }
 0x183   : > { %p6880_p13 = pneg %p6879_p4 }
 0x185   : > { %p6885_p1 = pnand %p6883_p0, %p6880_p13 }
 0x187   : > { %6888 = shalt.err (!%p6885_p1)
}
 0x188   : > { %s6889_s6 = scalar_lea.vmem %s709_s5, 32  ;;  %p6897_p2 = scmp.lt.s32.totalorder %s709_s5, %s709_s5 }
 0x189   : > { %p6890_p5 = scmp.ne.s32.totalorder %s709_s5, %s6889_s6  ;;  %p6898_p10 = scmp.lt.s32.totalorder %s6889_s6, %s6889_s6 }
 0x18b   : > { %p6892_p7 = pnand %p6890_p5, %p7613_p8  ;;  %p6899_p11 = por %p6898_p10, %p6897_p2 }
 0x18d   : > { %p6893_p9 = pneg %p6892_p7 }
 0x18f   : > { %p6900_p12 = pnand %p6899_p11, %p6893_p9 }
 0x191   : > { %6903 = shalt.err (!%p6900_p12)
}
 0x192   : > { %6063 = dma.hbm_to_vmem [thread:$0]  (!%p7597_p6), %s9013_s3, 32, %s709_s5, [#allocation11]  }
 0x193   : > { %s7406_s2 = smov [#allocation15]   ;;  %s7407_s8 = smov [#allocation18]  }
 0x194   : > { %s731_s4 = sshll.u32 %s7406_s2, 4  ;;  %s757_s29 = sshll.u32 %s7407_s8, 4  ;;  %s732_s4 = int_to_ptr.vmem [resolvable:$true] %s731_s4  ;;  %s758_s29 = int_to_ptr.vmem [resolvable:$true] %s757_s29 }
 0x195   : > { %s9014_s26 = sld [smem:[#allocation75_spill]] }
 0x19b   : > { %s6904_s10 = scalar_lea.hbm %s9014_s26, 256 }
 0x19c   : > { %p6905_p3 = scmp.ne.s32.totalorder %s9014_s26, %s6904_s10  ;;  %p6911_p0 = scmp.lt.u32.totalorder %s6904_s10, %s9014_s26 }
 0x19e   : > { %p6907_p4 = pnand %p6905_p3, %p7613_p8 }
 0x1a0   : > { %p6908_p13 = pneg %p6907_p4 }
 0x1a2   : > { %p6913_p1 = pnand %p6911_p0, %p6908_p13 }
 0x1a4   : > { %6916 = shalt.err (!%p6913_p1)
}
 0x1a5   : > { %s6917_s5 = scalar_lea.vmem %s732_s4, 256  ;;  %p6925_p2 = scmp.lt.s32.totalorder %s732_s4, %s732_s4 }
 0x1a6   : > { %p6918_p5 = scmp.ne.s32.totalorder %s732_s4, %s6917_s5  ;;  %p6926_p10 = scmp.lt.s32.totalorder %s6917_s5, %s6917_s5 }
 0x1a8   : > { %p6920_p7 = pnand %p6918_p5, %p7613_p8  ;;  %p6927_p11 = por %p6926_p10, %p6925_p2 }
 0x1aa   : > { %p6921_p9 = pneg %p6920_p7 }
 0x1ac   : > { %p6928_p12 = pnand %p6927_p11, %p6921_p9 }
 0x1ae   : > { %6931 = shalt.err (!%p6928_p12)
}
 0x1af   : > { %6069 = dma.hbm_to_vmem [thread:$0]  (!%p7597_p6), %s9014_s26, 256, %s732_s4, [#allocation14], %s9010_s30, %s9010_s30, %s9012_s7  }
 0x1b0   : > { %s9015_s2 = sld [smem:[#allocation77_spill]] }
 0x1b6   : > { %s6932_s8 = scalar_lea.hbm %s9015_s2, 2048 }
 0x1b7   : > { %p6933_p3 = scmp.ne.s32.totalorder %s9015_s2, %s6932_s8  ;;  %p6939_p0 = scmp.lt.u32.totalorder %s6932_s8, %s9015_s2 }
 0x1b9   : > { %p6935_p4 = pnand %p6933_p3, %p7613_p8 }
 0x1bb   : > { %p6936_p13 = pneg %p6935_p4 }
 0x1bd   : > { %p6941_p1 = pnand %p6939_p0, %p6936_p13 }
 0x1bf   : > { %6944 = shalt.err (!%p6941_p1)
}
 0x1c0   : > { %s6945_s5 = scalar_lea.vmem %s758_s29, 2048  ;;  %p6953_p2 = scmp.lt.s32.totalorder %s758_s29, %s758_s29 }
 0x1c1   : > { %p6946_p5 = scmp.ne.s32.totalorder %s758_s29, %s6945_s5  ;;  %p6954_p10 = scmp.lt.s32.totalorder %s6945_s5, %s6945_s5 }
 0x1c3   : > { %p6948_p7 = pnand %p6946_p5, %p7613_p8  ;;  %p6955_p11 = por %p6954_p10, %p6953_p2 }
 0x1c5   : > { %p6949_p9 = pneg %p6948_p7 }
 0x1c7   : > { %p6956_p12 = pnand %p6955_p11, %p6949_p9 }
 0x1c9   : > { %6959 = shalt.err (!%p6956_p12)
}
 0x1ca   : > { %6075 = dma.hbm_to_vmem [thread:$0]  (!%p7597_p6), %s9015_s2, 2048, %s758_s29, [#allocation17], %s9010_s30, %s9010_s30, %s9012_s7  }
 0x1cb   : > { %s7408_s10 = smov [#allocation21]   ;;  %s7409_s9 = smov [#allocation24]  }
 0x1cc   : > { %s784_s12 = sshll.u32 %s7408_s10, 4  ;;  %s805_s8 = sshll.u32 %s7409_s9, 4  ;;  %s785_s12 = int_to_ptr.vmem [resolvable:$true] %s784_s12  ;;  %s806_s8 = int_to_ptr.vmem [resolvable:$true] %s805_s8 }
 0x1cd   : > { %s9016_s6 = sld [smem:[#allocation79_spill]] }
 0x1d3   : > { %s6960_s1 = scalar_lea.hbm %s9016_s6, 16 }
 0x1d4   : > { %p6961_p3 = scmp.ne.s32.totalorder %s9016_s6, %s6960_s1  ;;  %p6967_p0 = scmp.lt.u32.totalorder %s6960_s1, %s9016_s6 }
 0x1d6   : > { %p6963_p4 = pnand %p6961_p3, %p7613_p8 }
 0x1d8   : > { %p6964_p13 = pneg %p6963_p4 }
 0x1da   : > { %p6969_p1 = pnand %p6967_p0, %p6964_p13 }
 0x1dc   : > { %6972 = shalt.err (!%p6969_p1)
}
 0x1dd   : > { %s6973_s29 = scalar_lea.vmem %s785_s12, 16  ;;  %s6980_s11 = scalar_lea.vmem %s785_s12, 32 }
 0x1de   : > { %p6974_p5 = scmp.ne.s32.totalorder %s785_s12, %s6973_s29  ;;  %p6981_p2 = scmp.lt.s32.totalorder %s785_s12, %s785_s12 }
 0x1df   : > { %p6982_p10 = scmp.lt.s32.totalorder %s6980_s11, %s6973_s29 }
 0x1e0   : > { %p6976_p7 = pnand %p6974_p5, %p7613_p8 }
 0x1e1   : > { %p6983_p11 = por %p6982_p10, %p6981_p2 }
 0x1e2   : > { %p6977_p9 = pneg %p6976_p7 }
 0x1e4   : > { %p6984_p12 = pnand %p6983_p11, %p6977_p9 }
 0x1e6   : > { %6987 = shalt.err (!%p6984_p12)
}
 0x1e7   : > { %6081 = dma.hbm_to_vmem [thread:$0]  (!%p7597_p6), %s9016_s6, 16, %s785_s12, [#allocation20]  }
 0x1e8   : > { %s9017_s27 = sld [smem:[#allocation81_spill]] }
 0x1ee   : > { %s6988_s25 = scalar_lea.hbm %s9017_s27, 2048 }
 0x1ef   : > { %p6989_p3 = scmp.ne.s32.totalorder %s9017_s27, %s6988_s25  ;;  %p6995_p0 = scmp.lt.u32.totalorder %s6988_s25, %s9017_s27 }
 0x1f1   : > { %p6991_p4 = pnand %p6989_p3, %p7613_p8 }
 0x1f3   : > { %p6992_p13 = pneg %p6991_p4 }
 0x1f5   : > { %p6997_p1 = pnand %p6995_p0, %p6992_p13 }
 0x1f7   : > { %7000 = shalt.err (!%p6997_p1)
}
 0x1f8   : > { %s7001_s11 = scalar_lea.vmem %s806_s8, 2048  ;;  %p7009_p2 = scmp.lt.s32.totalorder %s806_s8, %s806_s8 }
 0x1f9   : > { %p7002_p5 = scmp.ne.s32.totalorder %s806_s8, %s7001_s11  ;;  %p7010_p10 = scmp.lt.s32.totalorder %s7001_s11, %s7001_s11 }
 0x1fb   : > { %p7004_p7 = pnand %p7002_p5, %p7613_p8  ;;  %p7011_p11 = por %p7010_p10, %p7009_p2 }
 0x1fd   : > { %p7005_p9 = pneg %p7004_p7 }
 0x1ff   : > { %p7012_p12 = pnand %p7011_p11, %p7005_p9 }
 0x201   : > { %7015 = shalt.err (!%p7012_p12)
}
 0x202   : > { %6087 = dma.hbm_to_vmem [thread:$0]  (!%p7597_p6), %s9017_s27, 2048, %s806_s8, [#allocation23], %s9010_s30, %s9010_s30, %s9012_s7  }
 0x203   : > { %s7410_s10 = smov [#allocation27]   ;;  %s7411_s9 = smov [#allocation30]  }
 0x204   : > { %s829_s13 = sshll.u32 %s7410_s10, 4  ;;  %s853_s25 = sshll.u32 %s7411_s9, 4  ;;  %s830_s13 = int_to_ptr.vmem [resolvable:$true] %s829_s13  ;;  %s854_s25 = int_to_ptr.vmem [resolvable:$true] %s853_s25 }
 0x205   : > { %s9018_s4 = sld [smem:[#allocation83_spill]] }
 0x20b   : > { %s7016_s29 = scalar_lea.hbm %s9018_s4, 2048 }
 0x20c   : > { %p7017_p3 = scmp.ne.s32.totalorder %s9018_s4, %s7016_s29  ;;  %p7023_p0 = scmp.lt.u32.totalorder %s7016_s29, %s9018_s4 }
 0x20e   : > { %p7019_p4 = pnand %p7017_p3, %p7613_p8 }
 0x210   : > { %p7020_p13 = pneg %p7019_p4 }
 0x212   : > { %p7025_p1 = pnand %p7023_p0, %p7020_p13 }
 0x214   : > { %7028 = shalt.err (!%p7025_p1)
}
 0x215   : > { %s7029_s8 = scalar_lea.vmem %s830_s13, 2048  ;;  %p7037_p2 = scmp.lt.s32.totalorder %s830_s13, %s830_s13 }
 0x216   : > { %p7030_p5 = scmp.ne.s32.totalorder %s830_s13, %s7029_s8  ;;  %p7038_p10 = scmp.lt.s32.totalorder %s7029_s8, %s7029_s8 }
 0x218   : > { %p7032_p7 = pnand %p7030_p5, %p7613_p8  ;;  %p7039_p11 = por %p7038_p10, %p7037_p2 }
 0x21a   : > { %p7033_p9 = pneg %p7032_p7 }
 0x21c   : > { %p7040_p12 = pnand %p7039_p11, %p7033_p9 }
 0x21e   : > { %7043 = shalt.err (!%p7040_p12)
}
 0x21f   : > { %6093 = dma.hbm_to_vmem [thread:$0]  (!%p7597_p6), %s9018_s4, 2048, %s830_s13, [#allocation26], %s9010_s30, %s9010_s30, %s9012_s7  }
 0x220   : > { %s7044_s9 = scalar_lea.hbm %s8925_s14, 2048 }
 0x221   : > { %p7045_p3 = scmp.ne.s32.totalorder %s8925_s14, %s7044_s9  ;;  %p7051_p0 = scmp.lt.u32.totalorder %s7044_s9, %s8925_s14 }
 0x223   : > { %p7047_p4 = pnand %p7045_p3, %p7613_p8 }
 0x225   : > { %p7048_p13 = pneg %p7047_p4 }
 0x227   : > { %p7053_p1 = pnand %p7051_p0, %p7048_p13 }
 0x229   : > { %7056 = shalt.err (!%p7053_p1)
}
 0x22a   : > { %s7057_s12 = scalar_lea.vmem %s854_s25, 2048  ;;  %p7065_p2 = scmp.lt.s32.totalorder %s854_s25, %s854_s25 }
 0x22b   : > { %p7058_p5 = scmp.ne.s32.totalorder %s854_s25, %s7057_s12  ;;  %p7066_p10 = scmp.lt.s32.totalorder %s7057_s12, %s7057_s12 }
 0x22d   : > { %p7060_p7 = pnand %p7058_p5, %p7613_p8  ;;  %p7067_p11 = por %p7066_p10, %p7065_p2 }
 0x22f   : > { %p7061_p9 = pneg %p7060_p7 }
 0x231   : > { %p7068_p12 = pnand %p7067_p11, %p7061_p9 }
 0x233   : > { %7071 = shalt.err (!%p7068_p12)
}
 0x234   : > { %6099 = dma.hbm_to_vmem [thread:$0]  (!%p7597_p6), %s8925_s14, 2048, %s854_s25, [#allocation29], %s9010_s30, %s9010_s30, %s9012_s7  }
 0x235   : > { %s7412_s2 = smov [#allocation33]   ;;  %s7413_s3 = smov [#allocation36]  }
 0x236   : > { %s878_s6 = sshll.u32 %s7412_s2, 4  ;;  %s901_s10 = sshll.u32 %s7413_s3, 4  ;;  %s879_s6 = int_to_ptr.vmem [resolvable:$true] %s878_s6  ;;  %s902_s10 = int_to_ptr.vmem [resolvable:$true] %s901_s10 }
 0x237   : > { %s7072_s5 = scalar_lea.hbm %s8927_s16, 16 }
 0x238   : > { %p7073_p3 = scmp.ne.s32.totalorder %s8927_s16, %s7072_s5  ;;  %p7079_p0 = scmp.lt.u32.totalorder %s7072_s5, %s8927_s16 }
 0x23a   : > { %p7075_p4 = pnand %p7073_p3, %p7613_p8 }
 0x23c   : > { %p7076_p13 = pneg %p7075_p4 }
 0x23e   : > { %p7081_p1 = pnand %p7079_p0, %p7076_p13 }
 0x240   : > { %7084 = shalt.err (!%p7081_p1)
}
 0x241   : > { %s7085_s25 = scalar_lea.vmem %s879_s6, 16  ;;  %s7092_s8 = scalar_lea.vmem %s879_s6, 32 }
 0x242   : > { %p7086_p5 = scmp.ne.s32.totalorder %s879_s6, %s7085_s25  ;;  %p7093_p2 = scmp.lt.s32.totalorder %s879_s6, %s879_s6 }
 0x243   : > { %p7094_p10 = scmp.lt.s32.totalorder %s7092_s8, %s7085_s25 }
 0x244   : > { %p7088_p7 = pnand %p7086_p5, %p7613_p8 }
 0x245   : > { %p7095_p11 = por %p7094_p10, %p7093_p2 }
 0x246   : > { %p7089_p9 = pneg %p7088_p7 }
 0x248   : > { %p7096_p12 = pnand %p7095_p11, %p7089_p9 }
 0x24a   : > { %7099 = shalt.err (!%p7096_p12)
}
 0x24b   : > { %6105 = dma.hbm_to_vmem [thread:$0]  (!%p7597_p6), %s8927_s16, 16, %s879_s6, [#allocation32]  }
 0x24c   : > { %s7100_s5 = scalar_lea.hbm %s8929_s18, 2048 }
 0x24d   : > { %p7101_p3 = scmp.ne.s32.totalorder %s8929_s18, %s7100_s5  ;;  %p7107_p0 = scmp.lt.u32.totalorder %s7100_s5, %s8929_s18 }
 0x24f   : > { %p7103_p4 = pnand %p7101_p3, %p7613_p8 }
 0x251   : > { %p7104_p13 = pneg %p7103_p4 }
 0x253   : > { %p7109_p1 = pnand %p7107_p0, %p7104_p13 }
 0x255   : > { %7112 = shalt.err (!%p7109_p1)
}
 0x256   : > { %s7113_s25 = scalar_lea.vmem %s902_s10, 2048  ;;  %p7121_p2 = scmp.lt.s32.totalorder %s902_s10, %s902_s10 }
 0x257   : > { %p7114_p5 = scmp.ne.s32.totalorder %s902_s10, %s7113_s25  ;;  %p7122_p10 = scmp.lt.s32.totalorder %s7113_s25, %s7113_s25 }
 0x259   : > { %p7116_p7 = pnand %p7114_p5, %p7613_p8  ;;  %p7123_p11 = por %p7122_p10, %p7121_p2 }
 0x25b   : > { %p7117_p9 = pneg %p7116_p7 }
 0x25d   : > { %p7124_p12 = pnand %p7123_p11, %p7117_p9 }
 0x25f   : > { %7127 = shalt.err (!%p7124_p12)
}
 0x260   : > { %6111 = dma.hbm_to_vmem [thread:$0]  (!%p7597_p6), %s8929_s18, 2048, %s902_s10, [#allocation35], %s9010_s30, %s9010_s30, %s9012_s7  }
 0x261   : > { %s7414_s2 = smov [#allocation39]   ;;  %s7415_s9 = smov [#allocation42]  }
 0x262   : > { %s925_s3 = sshll.u32 %s7414_s2, 4  ;;  %s949_s1 = sshll.u32 %s7415_s9, 4  ;;  %s926_s3 = int_to_ptr.vmem [resolvable:$true] %s925_s3  ;;  %s950_s1 = int_to_ptr.vmem [resolvable:$true] %s949_s1 }
 0x263   : > { %s7128_s11 = scalar_lea.hbm %s8931_s20, 2048 }
 0x264   : > { %p7129_p3 = scmp.ne.s32.totalorder %s8931_s20, %s7128_s11  ;;  %p7135_p0 = scmp.lt.u32.totalorder %s7128_s11, %s8931_s20 }
 0x266   : > { %p7131_p4 = pnand %p7129_p3, %p7613_p8 }
 0x268   : > { %p7132_p13 = pneg %p7131_p4 }
 0x26a   : > { %p7137_p1 = pnand %p7135_p0, %p7132_p13 }
 0x26c   : > { %7140 = shalt.err (!%p7137_p1)
}
 0x26d   : > { %s7141_s10 = scalar_lea.vmem %s926_s3, 2048  ;;  %p7149_p2 = scmp.lt.s32.totalorder %s926_s3, %s926_s3 }
 0x26e   : > { %p7142_p5 = scmp.ne.s32.totalorder %s926_s3, %s7141_s10  ;;  %p7150_p10 = scmp.lt.s32.totalorder %s7141_s10, %s7141_s10 }
 0x270   : > { %p7144_p7 = pnand %p7142_p5, %p7613_p8  ;;  %p7151_p11 = por %p7150_p10, %p7149_p2 }
 0x272   : > { %p7145_p9 = pneg %p7144_p7 }
 0x274   : > { %p7152_p12 = pnand %p7151_p11, %p7145_p9 }
 0x276   : > { %7155 = shalt.err (!%p7152_p12)
}
 0x277   : > { %6117 = dma.hbm_to_vmem [thread:$0]  (!%p7597_p6), %s8931_s20, 2048, %s926_s3, [#allocation38], %s9010_s30, %s9010_s30, %s9012_s7  }
 0x278   : > { %s7156_s29 = scalar_lea.hbm %s8933_s22, 2048 }
 0x279   : > { %p7157_p3 = scmp.ne.s32.totalorder %s8933_s22, %s7156_s29  ;;  %p7163_p0 = scmp.lt.u32.totalorder %s7156_s29, %s8933_s22 }
 0x27b   : > { %p7159_p4 = pnand %p7157_p3, %p7613_p8 }
 0x27d   : > { %p7160_p13 = pneg %p7159_p4 }
 0x27f   : > { %p7165_p1 = pnand %p7163_p0, %p7160_p13 }
 0x281   : > { %7168 = shalt.err (!%p7165_p1)
}
 0x282   : > { %s7169_s6 = scalar_lea.vmem %s950_s1, 2048  ;;  %p7177_p2 = scmp.lt.s32.totalorder %s950_s1, %s950_s1 }
 0x283   : > { %p7170_p5 = scmp.ne.s32.totalorder %s950_s1, %s7169_s6  ;;  %p7178_p10 = scmp.lt.s32.totalorder %s7169_s6, %s7169_s6 }
 0x285   : > { %p7172_p7 = pnand %p7170_p5, %p7613_p8  ;;  %p7179_p11 = por %p7178_p10, %p7177_p2 }
 0x287   : > { %p7173_p9 = pneg %p7172_p7 }
 0x289   : > { %p7180_p12 = pnand %p7179_p11, %p7173_p9 }
 0x28b   : > { %7183 = shalt.err (!%p7180_p12)
}
 0x28c   : > { %6123 = dma.hbm_to_vmem [thread:$0]  (!%p7597_p6), %s8933_s22, 2048, %s950_s1, [#allocation41], %s9010_s30, %s9010_s30, %s9012_s7  }
 0x28d   : > { %s7416_s8 = smov [#allocation45]   ;;  %s7417_s9 = smov [#allocation46]  }
 0x28e   : > { %s973_s2 = sshll.u32 %s7416_s8, 4  ;;  %s987_s5 = sshll.u32 %s7417_s9, 4  ;;  %s974_s2 = int_to_ptr.vmem [resolvable:$true] %s973_s2  ;;  %s988_s5 = int_to_ptr.vmem [resolvable:$true] %s987_s5 }
 0x28f   : > { %s7184_s12 = scalar_lea.hbm %s8935_s24, 2048 }
 0x290   : > { %p7185_p3 = scmp.ne.s32.totalorder %s8935_s24, %s7184_s12  ;;  %p7191_p0 = scmp.lt.u32.totalorder %s7184_s12, %s8935_s24 }
 0x292   : > { %p7187_p4 = pnand %p7185_p3, %p7613_p8 }
 0x294   : > { %p7188_p13 = pneg %p7187_p4 }
 0x296   : > { %p7193_p1 = pnand %p7191_p0, %p7188_p13 }
 0x298   : > { %7196 = shalt.err (!%p7193_p1)
}
 0x299   : > { %s7197_s1 = scalar_lea.vmem %s974_s2, 2048  ;;  %p7205_p2 = scmp.lt.s32.totalorder %s974_s2, %s974_s2 }
 0x29a   : > { %p7198_p5 = scmp.ne.s32.totalorder %s974_s2, %s7197_s1  ;;  %p7206_p10 = scmp.lt.s32.totalorder %s7197_s1, %s7197_s1 }
 0x29c   : > { %p7200_p7 = pnand %p7198_p5, %p7613_p8  ;;  %p7207_p11 = por %p7206_p10, %p7205_p2 }
 0x29e   : > { %p7201_p9 = pneg %p7200_p7 }
 0x2a0   : > { %p7208_p12 = pnand %p7207_p11, %p7201_p9 }
 0x2a2   : > { %7211 = shalt.err (!%p7208_p12)
}
 0x2a3   : > { %6129 = dma.hbm_to_vmem [thread:$0]  (!%p7597_p6), %s8935_s24, 2048, %s974_s2, [#allocation44], %s9010_s30, %s9010_s30, %s9012_s7  }
 0x2a4   : > { %s9019_s11 = sld [smem:[#allocation85_spill]] }
 0x2aa   : > { %s7212_s12 = scalar_lea.hbm %s9019_s11, 16 }
 0x2ab   : > { %p7213_p3 = scmp.ne.s32.totalorder %s9019_s11, %s7212_s12  ;;  %p7219_p0 = scmp.lt.u32.totalorder %s7212_s12, %s9019_s11 }
 0x2ad   : > { %p7215_p4 = pnand %p7213_p3, %p7613_p8 }
 0x2af   : > { %p7216_p13 = pneg %p7215_p4 }
 0x2b1   : > { %p7221_p1 = pnand %p7219_p0, %p7216_p13 }
 0x2b3   : > { %7224 = shalt.err (!%p7221_p1)
}
 0x2b4   : > { %s7225_s1 = scalar_lea.vmem %s988_s5, 16  ;;  %s7232_s30 = scalar_lea.vmem %s988_s5, 32 }
 0x2b5   : > { %p7226_p5 = scmp.ne.s32.totalorder %s988_s5, %s7225_s1  ;;  %p7233_p2 = scmp.lt.s32.totalorder %s988_s5, %s988_s5 }
 0x2b6   : > { %p7234_p10 = scmp.lt.s32.totalorder %s7232_s30, %s7225_s1 }
 0x2b7   : > { %p7228_p7 = pnand %p7226_p5, %p7613_p8 }
 0x2b8   : > { %p7235_p11 = por %p7234_p10, %p7233_p2 }
 0x2b9   : > { %p7229_p9 = pneg %p7228_p7 }
 0x2bb   : > { %p7236_p12 = pnand %p7235_p11, %p7229_p9 }
 0x2bd   : > { %7239 = shalt.err (!%p7236_p12)
}
 0x2be   : > { %6132 = dma.hbm_to_vmem [thread:$0]  (!%p7597_p6), %s9019_s11, 16, %s988_s5, [#allocation47]  }
 0x2bf   : > { %s9020_s10 = sld [smem:[#allocation70_spill]] }
 0x2c5   : > { %p9021_p3 = scmp.ne.s32.totalorder %s9020_s10, 0 }
 0x2c6   : > { %s9022_s8 = sld [smem:[#allocation69_spill]] (!%p9021_p3) }
 0x2c7   : > { %1000 = sbr.rel (%p9021_p3) target bundleno = 3729 (0xe91), region = 124 }
 0x2cc   : > { %p9023_p4 = scmp.eq.s32.totalorder (!%p9021_p3), %s9022_s8, 0 }
 0x2ce   : > { %7323 = dma.done.wait (%p9023_p4), [#allocation8], 4096   ;;  %p9024_p8 = pmov %p9023_p4 }
 0x2cf   : > { %p9025_p13 = pmov %p9023_p4 }
 0x2d0   : > { %7325 = vsyncadd (%p9024_p8), [#allocation8], 4294963200 }
 0x2d1   : > { %7327 = dma.done.wait (%p9025_p13), [#allocation11], 4128   ;;  %p9026_p0 = pmov %p9023_p4 }
 0x2d3   : > { %7329 = vsyncadd (%p9026_p0), [#allocation11], 4294963168  ;;  %p9027_p1 = pmov %p9026_p0 }
 0x2d4   : > { %p9028_p6 = pmov %p9026_p0 }
 0x2d5   : > { %7331 = dma.done.wait (%p9027_p1), [#allocation14], 512  }
 0x2d6   : > { %7333 = vsyncadd (%p9028_p6), [#allocation14], 4294966784  ;;  %p9029_p5 = pmov %p9026_p0 }
 0x2d7   : > { %p9030_p7 = pmov %p9026_p0 }
 0x2d8   : > { %7335 = dma.done.wait (%p9029_p5), [#allocation17], 2304  }
 0x2d9   : > { %7337 = vsyncadd (%p9030_p7), [#allocation17], 4294964992  ;;  %p9031_p9 = pmov %p9026_p0 }
 0x2da   : > { %p9032_p2 = pmov %p9026_p0 }
 0x2db   : > { %7339 = dma.done.wait (%p9031_p9), [#allocation20], 2064  }
 0x2dc   : > { %7341 = vsyncadd (%p9032_p2), [#allocation20], 4294965232  ;;  %p9033_p10 = pmov %p9026_p0 }
 0x2dd   : > { %p9034_p11 = pmov %p9026_p0 }
 0x2de   : > { %7343 = dma.done.wait (%p9033_p10), [#allocation23], 2064  }
 0x2df   : > { %7345 = vsyncadd (%p9034_p11), [#allocation23], 4294965232  ;;  %p9035_p12 = pmov %p9026_p0 }
 0x2e0   : > { %p9036_p3 = pmov %p9026_p0 }
 0x2e1   : > { %7347 = dma.done.wait (%p9035_p12), [#allocation26], 2064  }
 0x2e2   : > { %7349 = vsyncadd (%p9036_p3), [#allocation26], 4294965232  ;;  %p9037_p4 = pmov %p9026_p0 }
 0x2e3   : > { %p9038_p8 = pmov %p9026_p0 }
 0x2e4   : > { %7351 = dma.done.wait (%p9037_p4), [#allocation29], 2064  }
 0x2e5   : > { %7353 = vsyncadd (%p9038_p8), [#allocation29], 4294965232  ;;  %p9039_p13 = pmov %p9026_p0 }
 0x2e7   : > { %7355 = dma.done.wait (%p9039_p13), [#allocation32], 32  }
 0x2e8   : > { %7357 = vsyncadd (%p9026_p0), [#allocation32], 4294967264  ;;  %p9040_p1 = pmov %p9026_p0 }
 0x2e9   : > { %p9041_p6 = pmov %p9026_p0 }
 0x2ea   : > { %7359 = dma.done.wait (%p9040_p1), [#allocation35], 4096  }
 0x2eb   : > { %7361 = vsyncadd (%p9041_p6), [#allocation35], 4294963200  ;;  %p9042_p5 = pmov %p9026_p0 }
 0x2ec   : > { %p9043_p7 = pmov %p9026_p0 }
 0x2ed   : > { %7363 = dma.done.wait (%p9042_p5), [#allocation38], 2064  }
 0x2ee   : > { %7365 = vsyncadd (%p9043_p7), [#allocation38], 4294965232  ;;  %p9044_p9 = pmov %p9026_p0 }
 0x2ef   : > { %p9045_p2 = pmov %p9026_p0 }
 0x2f0   : > { %7367 = dma.done.wait (%p9044_p9), [#allocation41], 2064  }
 0x2f1   : > { %7369 = vsyncadd (%p9045_p2), [#allocation41], 4294965232  ;;  %p9046_p10 = pmov %p9026_p0 }
 0x2f2   : > { %p9047_p11 = pmov %p9026_p0 }
 0x2f3   : > { %7371 = dma.done.wait (%p9046_p10), [#allocation44], 2064  }
 0x2f4   : > { %7373 = vsyncadd (%p9047_p11), [#allocation44], 4294965232  ;;  %p9048_p12 = pmov %p9026_p0 }
 0x2f5   : > { %p9049_p3 = pmov %p9026_p0 }
 0x2f6   : > { %7375 = dma.done.wait (%p9048_p12), [#allocation47], 16  }
 0x2f7   : > { %7377 = vsyncadd (%p9049_p3), [#allocation47], 4294967280  ;;  %p9050_p4 = scmp.ne.s32.totalorder %s9022_s8, 0 }
 0x2f8   : > { %v1174_v0 = vld [vmem:[#allocation18] sm:$0xff] (!%p9050_p4)  ;;  %v1175_v1 = vld [vmem:[#allocation18 + $0x8] sm:$0xff] (!%p9050_p4)  ;;  %v1176_v5 = vld [vmem:[#allocation18 + $0x10] sm:$0xff] (!%p9050_p4)  ;;  %vm1362_vm0 = vcmask (!%p9050_p4), 64512   ;;  %v7418_v50 = vmov (!%p9050_p4), 0.0  }
 0x2f9   : > { %1167 = sbr.rel (%p9050_p4) target bundleno = 1010 (0x3f2), region = 232  ;;  %v1267_v2 = vld [vmem:[#allocation19] sm:$0xff] (!%p9050_p4)  ;;  %v5524_v3 = vpack.c.bf16 (!%p9050_p4), %v1175_v1, %v1174_v0  ;;  %v1268_v4 = vld [vmem:[#allocation19 + $0x8] sm:$0xff] (!%p9050_p4)  ;;  %v1177_v6 = vld [vmem:[#allocation18 + $0x18] sm:$0xff] (!%p9050_p4)  ;;  %1360 = vst [vmem:[#allocation5] sm:$0xff] (!%p9050_p4), %v7418_v50 }
 0x2fa   : > { %v5556_v7 = vpack.c.bf16 (!%p9050_p4), %v1268_v4, %v1267_v2  ;;  %v5528_v8 = vpack.c.bf16 (!%p9050_p4), %v1177_v6, %v1176_v5  ;;  %v1269_v9 = vld [vmem:[#allocation19 + $0x10] sm:$0xff] (!%p9050_p4)  ;;  %v1270_v10 = vld [vmem:[#allocation19 + $0x18] sm:$0xff] (!%p9050_p4)  ;;  %v1178_v11 = vld [vmem:[#allocation18 + $0x20] sm:$0xff] (!%p9050_p4)  ;;  %1361 = vst [vmem:[#allocation5 + $0x8] sm:$0xff] (!%p9050_p4), %v7418_v50 }
 0x2fb   : > { %5525 = vmatprep.subr.bf16.mxu0 (!%p9050_p4), %v5524_v3  ;;  %v5560_v12 = vpack.c.bf16 (!%p9050_p4), %v1270_v10, %v1269_v9  ;;  %v1179_v13 = vld [vmem:[#allocation18 + $0x28] sm:$0xff] (!%p9050_p4)  ;;  %v1271_v14 = vld [vmem:[#allocation19 + $0x20] sm:$0xff] (!%p9050_p4)  ;;  %v1180_v18 = vld [vmem:[#allocation18 + $0x30] sm:$0xff] (!%p9050_p4)  ;;  %1363 = vst.msk [vmem:[#allocation6] sm:$0xff] (!%p9050_p4), %vm1362_vm0, %v7418_v50 }
 0x2fc   : > { %v1272_v15 = vld [vmem:[#allocation19 + $0x28] sm:$0xff] (!%p9050_p4)  ;;  %5557 = vmatprep.subr.bf16.mxu1 (!%p9050_p4), %v5556_v7  ;;  %5527 = vmatpush3.bf16.msra.mxu0 (!%p9050_p4), %v5524_v3  ;;  %v5532_v16 = vpack.c.bf16 (!%p9050_p4), %v1179_v13, %v1178_v11  ;;  %v1181_v19 = vld [vmem:[#allocation18 + $0x38] sm:$0xff] (!%p9050_p4)  ;;  %v1273_v20 = vld [vmem:[#allocation19 + $0x30] sm:$0xff] (!%p9050_p4)  ;;  %1364 = vst.msk [vmem:[#allocation6 + $0x8] sm:$0xff] (!%p9050_p4), %vm1362_vm0, %v7418_v50 }
 0x2fd   : > { %5559 = vmatpush3.bf16.msra.mxu1 (!%p9050_p4), %v5556_v7  ;;  %5529 = vmatprep.subr.bf16.mxu0 (!%p9050_p4), %v5528_v8  ;;  %v5564_v17 = vpack.c.bf16 (!%p9050_p4), %v1272_v15, %v1271_v14  ;;  %v1274_v21 = vld [vmem:[#allocation19 + $0x38] sm:$0xff] (!%p9050_p4)  ;;  %v5536_v22 = vpack.c.bf16 (!%p9050_p4), %v1181_v19, %v1180_v18  ;;  %v1182_v24 = vld [vmem:[#allocation18 + $0x40] sm:$0xff] (!%p9050_p4)  ;;  %v1183_v25 = vld [vmem:[#allocation18 + $0x48] sm:$0xff] (!%p9050_p4) }
 0x2fe   : > { %5561 = vmatprep.subr.bf16.mxu1 (!%p9050_p4), %v5560_v12  ;;  %v5568_v23 = vpack.c.bf16 (!%p9050_p4), %v1274_v21, %v1273_v20  ;;  %v1168_v26 = vld [vmem:[#allocation13] sm:$0xff] (!%p9050_p4)  ;;  %v1275_v27 = vld [vmem:[#allocation19 + $0x40] sm:$0xff] (!%p9050_p4)  ;;  %v1276_v28 = vld [vmem:[#allocation19 + $0x48] sm:$0xff] (!%p9050_p4)  ;;  %v5540_v30 = vpack.c.bf16 (!%p9050_p4), %v1183_v25, %v1182_v24 }
 0x2ff   : > { %1170 = vst [vmem:[#allocation2] sm:$0xff] (!%p9050_p4), %v1168_v26  ;;  %4989 = vmatprep.mubr.f32.mxu0 (!%p9050_p4), %v1168_v26  ;;  %5024 = vmatprep.mubr.f32.mxu1 (!%p9050_p4), %v1168_v26  ;;  %v1169_v29 = vld [vmem:[#allocation13 + $0x8] sm:$0xff] (!%p9050_p4)  ;;  %v5572_v31 = vpack.c.bf16 (!%p9050_p4), %v1276_v28, %v1275_v27  ;;  %v1184_v32 = vld [vmem:[#allocation18 + $0x50] sm:$0xff] (!%p9050_p4)  ;;  %v1186_v38 = vld [vmem:[#allocation18 + $0x60] sm:$0xff] (!%p9050_p4) }
 0x300   : > { %5531 = vmatpush3.bf16.msra.mxu0 %v5528_v8  ;;  %1171 = vst [vmem:[#allocation2 + $0x8] sm:$0xff] %v1169_v29  ;;  %v1185_v33 = vld [vmem:[#allocation18 + $0x58] sm:$0xff]  ;;  %v1277_v34 = vld [vmem:[#allocation19 + $0x50] sm:$0xff]  ;;  %v1187_v39 = vld [vmem:[#allocation18 + $0x68] sm:$0xff] }
 0x301   : > { %5563 = vmatpush3.bf16.msra.mxu1 %v5560_v12  ;;  %5533 = vmatprep.subr.bf16.mxu0 %v5532_v16  ;;  %v1278_v35 = vld [vmem:[#allocation19 + $0x58] sm:$0xff]  ;;  %v5544_v36 = vpack.c.bf16 %v1185_v33, %v1184_v32  ;;  %v1279_v40 = vld [vmem:[#allocation19 + $0x60] sm:$0xff]  ;;  %v1280_v41 = vld [vmem:[#allocation19 + $0x68] sm:$0xff]  ;;  %v5548_v42 = vpack.c.bf16 %v1187_v39, %v1186_v38 }
 0x302   : > { %5565 = vmatprep.subr.bf16.mxu1 %v5564_v17  ;;  %v5576_v37 = vpack.c.bf16 %v1278_v35, %v1277_v34  ;;  %v5580_v43 = vpack.c.bf16 %v1280_v41, %v1279_v40  ;;  %v1188_v44 = vld [vmem:[#allocation18 + $0x70] sm:$0xff]  ;;  %v1189_v45 = vld [vmem:[#allocation18 + $0x78] sm:$0xff] }
 0x303   : > { %v1281_v46 = vld [vmem:[#allocation19 + $0x70] sm:$0xff]  ;;  %v1282_v47 = vld [vmem:[#allocation19 + $0x78] sm:$0xff]  ;;  %v5552_v48 = vpack.c.bf16 %v1189_v45, %v1188_v44 }
 0x304   : > { %5535 = vmatpush3.bf16.msra.mxu0 %v5532_v16  ;;  %v5584_v49 = vpack.c.bf16 %v1282_v47, %v1281_v46 }
 0x305   : > { %5567 = vmatpush3.bf16.msra.mxu1 %v5564_v17  ;;  %5537 = vmatprep.subr.bf16.mxu0 %v5536_v22 }
 0x306   : > { %5569 = vmatprep.subr.bf16.mxu1 %v5568_v23 }
 0x308   : > { %5539 = vmatpush3.bf16.msra.mxu0 %v5536_v22 }
 0x309   : > { %5571 = vmatpush3.bf16.msra.mxu1 %v5568_v23  ;;  %5541 = vmatprep.subr.bf16.mxu0 %v5540_v30 }
 0x30a   : > { %5573 = vmatprep.subr.bf16.mxu1 %v5572_v31 }
 0x30c   : > { %5543 = vmatpush3.bf16.msra.mxu0 %v5540_v30 }
 0x30d   : > { %5575 = vmatpush3.bf16.msra.mxu1 %v5572_v31  ;;  %5545 = vmatprep.subr.bf16.mxu0 %v5544_v36 }
 0x30e   : > { %5577 = vmatprep.subr.bf16.mxu1 %v5576_v37 }
 0x310   : > { %5547 = vmatpush3.bf16.msra.mxu0 %v5544_v36 }
 0x311   : > { %5579 = vmatpush3.bf16.msra.mxu1 %v5576_v37  ;;  %5549 = vmatprep.subr.bf16.mxu0 %v5548_v42 }
 0x312   : > { %5581 = vmatprep.subr.bf16.mxu1 %v5580_v43 }
 0x314   : > { %5551 = vmatpush3.bf16.msra.mxu0 %v5548_v42 }
 0x315   : > { %5583 = vmatpush3.bf16.msra.mxu1 %v5580_v43  ;;  %5553 = vmatprep.subr.bf16.mxu0 %v5552_v48 }
 0x316   : > { %5585 = vmatprep.subr.bf16.mxu1 %v5584_v49 }
 0x318   : > { %5555 = vmatpush3.bf16.msra.mxu0 %v5552_v48 }
 0x319   : > { %5587 = vmatpush3.bf16.msra.mxu1 %v5584_v49 }
 0x31b   : > { %4990 = vmatmul.mubr.f32.vlgmr.msra.gmra.mrb[0].mxu0 %v1169_v29 }
 0x31c   : > { %5025 = vmatmul.mubr.f32.vlgmr.msra.gmra.mrb[0].mxu1 %v1169_v29 }
 0x3ee   : > { %v4991_v51 = vpop.f32.mrb[0].mxu0 }
 0x3ef   : > { %1266 = vst [vmem:[#allocation3 + $0x8] sm:$0xff] %v4991_v51  ;;  %v5026_v52 = vpop.f32.mrb[0].mxu1  ;;  %v1256_v53 = vpop.f32.mrb[1].mxu0 }
 0x3f0   : > { %1359 = vst [vmem:[#allocation4 + $0x8] sm:$0xff] %v5026_v52  ;;  %1265 = vst [vmem:[#allocation3] sm:$0xff] %v1256_v53  ;;  %v1349_v54 = vpop.f32.mrb[1].mxu1 }
 0x3f1   : > { %1358 = vst [vmem:[#allocation4] sm:$0xff] %v1349_v54 }
 0x3f2 PF: > { %s9051_s28 = sld [smem:[#allocation69_spill]]  ;;  %v7419_v55 = vmov 0   ;;  %v1627_v2 = vld [vmem:[#allocation15] sm:$0xff]  ;;  %v1628_v3 = vld [vmem:[#allocation15 + $0x8] sm:$0xff]  ;;  %v1404_v33 = vlaneseq  ;;  %vm1629_vm3 = vcmask 130048   ;;  %v7420_v39 = vmov 0.0  }
 0x3f3   : > { %6238 = vset.pattern.permute.xlu1 %v7419_v55  ;;  %6237 = vset.pattern.permute.xlu0 %v7419_v55  ;;  %v5588_v5 = vpack.c.bf16 %v1628_v3, %v1627_v2 }
 0x3f4   : > { %v8242_v34 = vand.u32 127, %v1404_v33 }
 0x3f5   : > { %5589 = vmatprep.subr.bf16.mxu0 %v5588_v5 }
 0x3f6   : > { %5591 = vmatpush3.bf16.msra.mxu0 %v5588_v5  ;;  %v1889_v31 = vld [vmem:[#allocation3 + $0x8] sm:$0xff] }
 0x3f7   : > { %v1891_v1 = vld [vmem:[#allocation4 + $0x8] sm:$0xff]  ;;  %v1888_v30 = vld [vmem:[#allocation3] sm:$0xff] }
 0x3f8   : > { %s8201_s0 = sshll.u32 %s9051_s28, 7  ;;  %v1890_v0 = vld [vmem:[#allocation4] sm:$0xff]  ;;  %v5596_v32 = vpack.c.bf16 %v1889_v31, %v1888_v30  ;;  %p4628_p8 = scmp.ne.s32.totalorder %s9051_s28, 1 }
 0x3f9   : > { %s8204_s5 = scalar_lea.vmem [#allocation7], %s8201_s0  ;;  %s8209_s9 = scalar_lea.vmem [#allocation10], %s8201_s0  ;;  %v5592_v4 = vpack.c.bf16 %v1891_v1, %v1890_v0 }
 0x3fa   : > { %v1368_v56 = vld [vmem:[%s8204_s5 + $0x8] sm:$0xff]  ;;  %v1367_v57 = vld [vmem:[%s8204_s5] sm:$0xff]  ;;  %v1386_v60 = vld [vmem:[%s8209_s9 + $0x10] sm:$0xff]  ;;  %s1400_s29 = sshra.s32 %s8201_s0, 7 }
 0x3fb   : > { %1410 = vperm.xlu1 %6238, %v1368_v56   ;;  %1407 = vperm.xlu0 %6237, %v1367_v57   ;;  %v1385_v58 = vld [vmem:[%s8209_s9 + $0x8] sm:$0xff]  ;;  %v1384_v59 = vld [vmem:[%s8209_s9] sm:$0xff]  ;;  %v1369_v61 = vld [vmem:[%s8204_s5 + $0x10] sm:$0xff]  ;;  %s1402_s12 = scalar_lea.vmem [#allocation12], %s1400_s29 }
 0x3fc   : > { %v1387_v62 = vld [vmem:[%s8209_s9 + $0x18] sm:$0xff]  ;;  %v1388_v6 = vld [vmem:[%s8209_s9 + $0x20] sm:$0xff]  ;;  %5593 = vmatprep.subr.bf16.mxu1 %v5592_v4  ;;  %v1389_v8 = vld [vmem:[%s8209_s9 + $0x28] sm:$0xff] }
 0x3fd   : > { %v1370_v63 = vld [vmem:[%s8204_s5 + $0x18] sm:$0xff]  ;;  %v1371_v7 = vld [vmem:[%s8204_s5 + $0x20] sm:$0xff]  ;;  %5595 = vmatpush3.bf16.msra.mxu1 %v5592_v4  ;;  %v1372_v9 = vld [vmem:[%s8204_s5 + $0x28] sm:$0xff] }
 0x3fe   : > { %v1390_v10 = vld [vmem:[%s8209_s9 + $0x30] sm:$0xff]  ;;  %v1391_v12 = vld [vmem:[%s8209_s9 + $0x38] sm:$0xff]  ;;  %v1392_v14 = vld [vmem:[%s8209_s9 + $0x40] sm:$0xff]  ;;  %5597 = vmatprep.subr.bf16.mxu1 %v5596_v32 }
 0x3ff   : > { %1474 = vperm.xlu1 %6238, %v1385_v58   ;;  %1471 = vperm.xlu0 %6237, %v1384_v59   ;;  %v1373_v11 = vld [vmem:[%s8204_s5 + $0x30] sm:$0xff]  ;;  %v1374_v13 = vld [vmem:[%s8204_s5 + $0x38] sm:$0xff]  ;;  %v1375_v15 = vld [vmem:[%s8204_s5 + $0x40] sm:$0xff] }
 0x400   : > { %v1393_v16 = vld [vmem:[%s8209_s9 + $0x48] sm:$0xff]  ;;  %v1394_v18 = vld [vmem:[%s8209_s9 + $0x50] sm:$0xff]  ;;  %v1395_v20 = vld [vmem:[%s8209_s9 + $0x58] sm:$0xff] }
 0x401   : > { %v1376_v17 = vld [vmem:[%s8204_s5 + $0x48] sm:$0xff]  ;;  %v1377_v19 = vld [vmem:[%s8204_s5 + $0x50] sm:$0xff]  ;;  %v1378_v21 = vld [vmem:[%s8204_s5 + $0x58] sm:$0xff] }
 0x402   : > { %v1396_v22 = vld [vmem:[%s8209_s9 + $0x60] sm:$0xff]  ;;  %v1397_v24 = vld [vmem:[%s8209_s9 + $0x68] sm:$0xff]  ;;  %v1398_v26 = vld [vmem:[%s8209_s9 + $0x70] sm:$0xff] }
 0x403   : > { %1477 = vperm.xlu1 %6238, %v1386_v60   ;;  %1413 = vperm.xlu0 %6237, %v1369_v61   ;;  %v1379_v23 = vld [vmem:[%s8204_s5 + $0x60] sm:$0xff]  ;;  %v1380_v25 = vld [vmem:[%s8204_s5 + $0x68] sm:$0xff]  ;;  %v1381_v27 = vld [vmem:[%s8204_s5 + $0x70] sm:$0xff] }
 0x404   : > { %v1399_v28 = vld [vmem:[%s8209_s9 + $0x78] sm:$0xff] }
 0x405   : > { %v1382_v29 = vld [vmem:[%s8204_s5 + $0x78] sm:$0xff] }
 0x407   : > { %1480 = vperm.xlu1 %6238, %v1387_v62   ;;  %1416 = vperm.xlu0 %6237, %v1370_v63  }
 0x40b   : > { %1483 = vperm.xlu1 %6238, %v1388_v6   ;;  %1419 = vperm.xlu0 %6237, %v1371_v7  }
 0x40f   : > { %1486 = vperm.xlu1 %6238, %v1389_v8   ;;  %1422 = vperm.xlu0 %6237, %v1372_v9  }
 0x413   : > { %1489 = vperm.xlu1 %6238, %v1390_v10   ;;  %1425 = vperm.xlu0 %6237, %v1373_v11  }
 0x417   : > { %1492 = vperm.xlu1 %6238, %v1391_v12   ;;  %1428 = vperm.xlu0 %6237, %v1374_v13  }
 0x41b   : > { %1495 = vperm.xlu1 %6238, %v1392_v14   ;;  %1431 = vperm.xlu0 %6237, %v1375_v15  }
 0x41f   : > { %1498 = vperm.xlu1 %6238, %v1393_v16   ;;  %1434 = vperm.xlu0 %6237, %v1376_v17  }
 0x423   : > { %1501 = vperm.xlu1 %6238, %v1394_v18   ;;  %1437 = vperm.xlu0 %6237, %v1377_v19  }
 0x427   : > { %1504 = vperm.xlu1 %6238, %v1395_v20   ;;  %1440 = vperm.xlu0 %6237, %v1378_v21  }
 0x42b   : > { %1507 = vperm.xlu1 %6238, %v1396_v22   ;;  %1443 = vperm.xlu0 %6237, %v1379_v23  }
 0x42f   : > { %1510 = vperm.xlu1 %6238, %v1397_v24   ;;  %1446 = vperm.xlu0 %6237, %v1380_v25  }
 0x433   : > { %1513 = vperm.xlu1 %6238, %v1398_v26   ;;  %1449 = vperm.xlu0 %6237, %v1381_v27  }
 0x437   : > { %1516 = vperm.xlu1 %6238, %v1399_v28   ;;  %1452 = vperm.xlu0 %6237, %v1382_v29  }
 0x47a   : > { %v1411_v35 = vpop.permute.xlu1 %1410  ;;  %v1408_v36 = vpop.permute.xlu0 %1407 }
 0x47b   : > { %vm1455_vm1 = vcmp.eq.s32.totalorder %v8242_v34, %v1411_v35  ;;  %vm1454_vm2 = vcmp.eq.s32.totalorder %v8242_v34, %v1408_v36 }
 0x47c   : > { %v8249_v40 = vsel %vm1455_vm1, 1.0, %v7420_v39  ;;  %v8252_v41 = vsel %vm1454_vm2, 1.0, %v7420_v39 }
 0x47e   : > { %v1475_v37 = vpop.permute.xlu1 %1474  ;;  %v1472_v38 = vpop.permute.xlu0 %1471 }
 0x47f   : > { %vm1519_vm4 = vcmp.eq.s32.totalorder %v8242_v34, %v1475_v37  ;;  %vm1518_vm5 = vcmp.eq.s32.totalorder %v8242_v34, %v1472_v38 }
 0x480   : > { %v4489_v42 = vsel %vm1519_vm4, 1.0, %v7420_v39  ;;  %v4488_v43 = vsel %vm1518_vm5, 1.0, %v7420_v39 }
 0x481   : > { %v1612_v44 = vsub.f32 %v8249_v40, %v4489_v42  ;;  %5059 = vmatprep.mubr.msk.f32.mxu1 %vm1629_vm3, %v4488_v43  ;;  %v1611_v45 = vsub.f32 %v8252_v41, %v4488_v43 }
 0x482   : > { %v1478_v46 = vpop.permute.xlu1 %1477  ;;  %5060 = vmatmul.mubr.msk.f32.vlgmr.msra.gmra.mrb[0].mxu1 %vm1629_vm3, %v4489_v42  ;;  %v1414_v47 = vpop.permute.xlu0 %1413 }
 0x483   : > { %vm1520_vm6 = vcmp.eq.s32.totalorder %v8242_v34, %v1478_v46  ;;  %vm1456_vm7 = vcmp.eq.s32.totalorder %v8242_v34, %v1414_v47  ;;  %5031 = vmatprep.mubr.msk.f32.mxu0 %vm1629_vm3, %v1611_v45  ;;  %5599 = vmatpush3.bf16.msra.mxu1 %v5596_v32 }
 0x484   : > { %v4490_v48 = vsel %vm1520_vm6, 1.0, %v7420_v39  ;;  %v8265_v49 = vsel %vm1456_vm7, 1.0, %v7420_v39  ;;  %5032 = vmatmul.mubr.msk.f32.vlgmr.msra.gmra.mrb[0].mxu0 %vm1629_vm3, %v1612_v44 }
 0x485   : > { %v1613_v50 = vsub.f32 %v8265_v49, %v4490_v48  ;;  %5062 = vmatprep.mubr.msk.f32.mxu1 %vm1629_vm3, %v4490_v48 }
 0x486   : > { %v1481_v51 = vpop.permute.xlu1 %1480  ;;  %v1417_v52 = vpop.permute.xlu0 %1416 }
 0x487   : > { %vm1521_vm8 = vcmp.eq.s32.totalorder %v8242_v34, %v1481_v51  ;;  %vm1457_vm9 = vcmp.eq.s32.totalorder %v8242_v34, %v1417_v52  ;;  %5034 = vmatprep.mubr.msk.f32.mxu0 %vm1629_vm3, %v1613_v50 }
 0x488   : > { %v4491_v53 = vsel %vm1521_vm8, 1.0, %v7420_v39  ;;  %v8275_v54 = vsel %vm1457_vm9, 1.0, %v7420_v39 }
 0x489   : > { %v1614_v55 = vsub.f32 %v8275_v54, %v4491_v53  ;;  %5063 = vmatmul.mubr.msk.f32.gmra.mrb[2].mxu1 %vm1629_vm3, %v4491_v53 }
 0x48a   : > { %v1484_v56 = vpop.permute.xlu1 %1483  ;;  %v1420_v57 = vpop.permute.xlu0 %1419 }
 0x48b   : > { %vm1522_vm10 = vcmp.eq.s32.totalorder %v8242_v34, %v1484_v56  ;;  %vm1458_vm11 = vcmp.eq.s32.totalorder %v8242_v34, %v1420_v57  ;;  %5035 = vmatmul.mubr.msk.f32.gmra.mrb[2].mxu0 %vm1629_vm3, %v1614_v55 }
 0x48c   : > { %v4492_v58 = vsel %vm1522_vm10, 1.0, %v7420_v39  ;;  %v8284_v59 = vsel %vm1458_vm11, 1.0, %v7420_v39 }
 0x48d   : > { %v1615_v60 = vsub.f32 %v8284_v59, %v4492_v58  ;;  %5065 = vmatprep.mubr.msk.f32.mxu1 %vm1629_vm3, %v4492_v58 }
 0x48e   : > { %v1487_v61 = vpop.permute.xlu1 %1486  ;;  %v1423_v62 = vpop.permute.xlu0 %1422 }
 0x48f   : > { %vm1523_vm12 = vcmp.eq.s32.totalorder %v8242_v34, %v1487_v61  ;;  %vm1459_vm13 = vcmp.eq.s32.totalorder %v8242_v34, %v1423_v62  ;;  %5037 = vmatprep.mubr.msk.f32.mxu0 %vm1629_vm3, %v1615_v60 }
 0x490   : > { %v4493_v63 = vsel %vm1523_vm12, 1.0, %v7420_v39  ;;  %v8293_v0 = vsel %vm1459_vm13, 1.0, %v7420_v39 }
 0x491   : > { %v1616_v1 = vsub.f32 %v8293_v0, %v4493_v63  ;;  %5066 = vmatmul.mubr.msk.f32.gmra.mrb[4].mxu1 %vm1629_vm3, %v4493_v63 }
 0x492   : > { %v1490_v2 = vpop.permute.xlu1 %1489  ;;  %v1426_v3 = vpop.permute.xlu0 %1425 }
 0x493   : > { %vm1524_vm14 = vcmp.eq.s32.totalorder %v8242_v34, %v1490_v2  ;;  %vm1460_vm15 = vcmp.eq.s32.totalorder %v8242_v34, %v1426_v3  ;;  %5038 = vmatmul.mubr.msk.f32.gmra.mrb[4].mxu0 %vm1629_vm3, %v1616_v1 }
 0x494   : > { %v4494_v4 = vsel %vm1524_vm14, 1.0, %v7420_v39  ;;  %v8302_v5 = vsel %vm1460_vm15, 1.0, %v7420_v39 }
 0x495   : > { %v1617_v6 = vsub.f32 %v8302_v5, %v4494_v4  ;;  %5068 = vmatprep.mubr.msk.f32.mxu1 %vm1629_vm3, %v4494_v4 }
 0x496   : > { %v1493_v7 = vpop.permute.xlu1 %1492  ;;  %v1429_v8 = vpop.permute.xlu0 %1428 }
 0x497   : > { %vm1525_vm0 = vcmp.eq.s32.totalorder %v8242_v34, %v1493_v7  ;;  %vm1461_vm1 = vcmp.eq.s32.totalorder %v8242_v34, %v1429_v8  ;;  %5040 = vmatprep.mubr.msk.f32.mxu0 %vm1629_vm3, %v1617_v6  ;;  %v2452_v7 = vld [vmem:[#allocation24] sm:$0xff]  ;;  %v2453_v8 = vld [vmem:[#allocation24 + $0x8] sm:$0xff] }
 0x498   : > { %v4495_v9 = vsel %vm1525_vm0, 1.0, %v7420_v39  ;;  %v8311_v10 = vsel %vm1461_vm1, 1.0, %v7420_v39 }
 0x499   : > { %v1618_v11 = vsub.f32 %v8311_v10, %v4495_v9  ;;  %5069 = vmatmul.mubr.msk.f32.gmra.mrb[6].mxu1 %vm1629_vm3, %v4495_v9  ;;  %v5600_v9 = vpack.c.bf16 %v2453_v8, %v2452_v7 }
 0x49a   : > { %v1496_v12 = vpop.permute.xlu1 %1495  ;;  %v1432_v13 = vpop.permute.xlu0 %1431 }
 0x49b   : > { %vm1526_vm2 = vcmp.eq.s32.totalorder %v8242_v34, %v1496_v12  ;;  %vm1462_vm4 = vcmp.eq.s32.totalorder %v8242_v34, %v1432_v13  ;;  %5041 = vmatmul.mubr.msk.f32.gmra.mrb[6].mxu0 %vm1629_vm3, %v1618_v11  ;;  %5601 = vmatprep.subr.bf16.mxu0 %v5600_v9  ;;  %v2454_v11 = vld [vmem:[#allocation24 + $0x10] sm:$0xff]  ;;  %v2455_v12 = vld [vmem:[#allocation24 + $0x18] sm:$0xff] }
 0x49c   : > { %v4496_v14 = vsel %vm1526_vm2, 1.0, %v7420_v39  ;;  %v8320_v15 = vsel %vm1462_vm4, 1.0, %v7420_v39  ;;  %vm1839_vm4 = vcmask 64512   ;;  %5603 = vmatpush3.bf16.msra.mxu0 %v5600_v9 }
 0x49d   : > { %v1619_v16 = vsub.f32 %v8320_v15, %v4496_v14  ;;  %5071 = vmatprep.mubr.msk.f32.mxu1 %vm1629_vm3, %v4496_v14 }
 0x49e   : > { %v1499_v17 = vpop.permute.xlu1 %1498  ;;  %v1435_v18 = vpop.permute.xlu0 %1434 }
 0x49f   : > { %vm1527_vm5 = vcmp.eq.s32.totalorder %v8242_v34, %v1499_v17  ;;  %vm1463_vm6 = vcmp.eq.s32.totalorder %v8242_v34, %v1435_v18  ;;  %5043 = vmatprep.mubr.msk.f32.mxu0 %vm1629_vm3, %v1619_v16 }
 0x4a0   : > { %v4497_v19 = vsel %vm1527_vm5, 1.0, %v7420_v39  ;;  %v8329_v20 = vsel %vm1463_vm6, 1.0, %v7420_v39 }
 0x4a1   : > { %v1620_v21 = vsub.f32 %v8329_v20, %v4497_v19  ;;  %5072 = vmatmul.mubr.msk.f32.gmra.mrb[8].mxu1 %vm1629_vm3, %v4497_v19  ;;  %v2456_v19 = vld [vmem:[#allocation24 + $0x20] sm:$0xff] }
 0x4a2   : > { %v1502_v22 = vpop.permute.xlu1 %1501  ;;  %v1438_v23 = vpop.permute.xlu0 %1437 }
 0x4a3   : > { %vm1528_vm7 = vcmp.eq.s32.totalorder %v8242_v34, %v1502_v22  ;;  %vm1464_vm8 = vcmp.eq.s32.totalorder %v8242_v34, %v1438_v23  ;;  %5044 = vmatmul.mubr.msk.f32.gmra.mrb[8].mxu0 %vm1629_vm3, %v1620_v21 }
 0x4a4   : > { %v4498_v24 = vsel %vm1528_vm7, 1.0, %v7420_v39  ;;  %v4482_v25 = vsel %vm1464_vm8, 1.0, %v7420_v39 }
 0x4a5   : > { %v1621_v26 = vsub.f32 %v4482_v25, %v4498_v24  ;;  %5074 = vmatprep.mubr.msk.f32.mxu1 %vm1629_vm3, %v4498_v24 }
 0x4a6   : > { %v1505_v27 = vpop.permute.xlu1 %1504  ;;  %v1441_v28 = vpop.permute.xlu0 %1440 }
 0x4a7   : > { %vm1529_vm9 = vcmp.eq.s32.totalorder %v8242_v34, %v1505_v27  ;;  %vm1465_vm10 = vcmp.eq.s32.totalorder %v8242_v34, %v1441_v28  ;;  %5046 = vmatprep.mubr.msk.f32.mxu0 %vm1629_vm3, %v1621_v26  ;;  %v2459_v26 = vld [vmem:[#allocation24 + $0x38] sm:$0xff] }
 0x4a8   : > { %v4499_v29 = vsel %vm1529_vm9, 1.0, %v7420_v39  ;;  %v4483_v30 = vsel %vm1465_vm10, 1.0, %v7420_v39 }
 0x4a9   : > { %v1622_v31 = vsub.f32 %v4483_v30, %v4499_v29  ;;  %5075 = vmatmul.mubr.msk.f32.gmra.mrb[10].mxu1 %vm1629_vm3, %v4499_v29 }
 0x4aa   : > { %v1508_v32 = vpop.permute.xlu1 %1507  ;;  %v1444_v35 = vpop.permute.xlu0 %1443 }
 0x4ab   : > { %vm1530_vm11 = vcmp.eq.s32.totalorder %v8242_v34, %v1508_v32  ;;  %vm1466_vm12 = vcmp.eq.s32.totalorder %v8242_v34, %v1444_v35  ;;  %5047 = vmatmul.mubr.msk.f32.gmra.mrb[10].mxu0 %vm1629_vm3, %v1622_v31  ;;  %v2460_v31 = vld [vmem:[#allocation24 + $0x40] sm:$0xff]  ;;  %v2461_v32 = vld [vmem:[#allocation24 + $0x48] sm:$0xff] }
 0x4ac   : > { %v4500_v36 = vsel %vm1530_vm11, 1.0, %v7420_v39  ;;  %v4484_v37 = vsel %vm1466_vm12, 1.0, %v7420_v39  ;;  %v5616_v35 = vpack.c.bf16 %v2461_v32, %v2460_v31 }
 0x4ad   : > { %v1623_v38 = vsub.f32 %v4484_v37, %v4500_v36  ;;  %5077 = vmatprep.mubr.msk.f32.mxu1 %vm1629_vm3, %v4500_v36 }
 0x4ae   : > { %v1511_v42 = vpop.permute.xlu1 %1510  ;;  %v1447_v43 = vpop.permute.xlu0 %1446 }
 0x4af   : > { %vm1531_vm13 = vcmp.eq.s32.totalorder %v8242_v34, %v1511_v42  ;;  %vm1467_vm14 = vcmp.eq.s32.totalorder %v8242_v34, %v1447_v43  ;;  %5049 = vmatprep.mubr.msk.f32.mxu0 %vm1629_vm3, %v1623_v38  ;;  %v2462_v42 = vld [vmem:[#allocation24 + $0x50] sm:$0xff]  ;;  %v2463_v43 = vld [vmem:[#allocation24 + $0x58] sm:$0xff] }
 0x4b0   : > { %v4501_v44 = vsel %vm1531_vm13, 1.0, %v7420_v39  ;;  %v4485_v45 = vsel %vm1467_vm14, 1.0, %v7420_v39 }
 0x4b1   : > { %v1624_v46 = vsub.f32 %v4485_v45, %v4501_v44  ;;  %5078 = vmatmul.mubr.msk.f32.gmra.mrb[12].mxu1 %vm1629_vm3, %v4501_v44 }
 0x4b2   : > { %v1514_v47 = vpop.permute.xlu1 %1513  ;;  %v1450_v48 = vpop.permute.xlu0 %1449 }
 0x4b3   : > { %vm1532_vm15 = vcmp.eq.s32.totalorder %v8242_v34, %v1514_v47  ;;  %vm1468_vm0 = vcmp.eq.s32.totalorder %v8242_v34, %v1450_v48  ;;  %5050 = vmatmul.mubr.msk.f32.gmra.mrb[12].mxu0 %vm1629_vm3, %v1624_v46  ;;  %v2464_v48 = vld [vmem:[#allocation24 + $0x60] sm:$0xff] }
 0x4b4   : > { %v4502_v50 = vsel %vm1532_vm15, 1.0, %v7420_v39  ;;  %v4486_v51 = vsel %vm1468_vm0, 1.0, %v7420_v39 }
 0x4b5   : > { %v1625_v52 = vsub.f32 %v4486_v51, %v4502_v50  ;;  %5080 = vmatprep.mubr.msk.f32.mxu1 %vm1629_vm3, %v4502_v50  ;;  %v2465_v50 = vld [vmem:[#allocation24 + $0x68] sm:$0xff] }
 0x4b6   : > { %v1517_v53 = vpop.permute.xlu1 %1516  ;;  %v1453_v55 = vpop.permute.xlu0 %1452 }
 0x4b7   : > { %vm1533_vm1 = vcmp.eq.s32.totalorder %v8242_v34, %v1517_v53  ;;  %vm1469_vm2 = vcmp.eq.s32.totalorder %v8242_v34, %v1453_v55  ;;  %5052 = vmatprep.mubr.msk.f32.mxu0 %vm1629_vm3, %v1625_v52 }
 0x4b8   : > { %v4503_v56 = vsel %vm1533_vm1, 1.0, %v7420_v39  ;;  %v4487_v57 = vsel %vm1469_vm2, 1.0, %v7420_v39 }
 0x4b9   : > { %v1626_v58 = vsub.f32 %v4487_v57, %v4503_v56  ;;  %5081 = vmatmul.mubr.msk.f32.gmra.mrb[14].mxu1 %vm1629_vm3, %v4503_v56  ;;  %v2466_v56 = vld [vmem:[#allocation24 + $0x70] sm:$0xff] }
 0x4ba   : > { %5087 = vmatprep.mubr.msk.f32.mxu1 %vm1629_vm3, %v8252_v41 }
 0x4bb   : > { %5053 = vmatmul.mubr.msk.f32.gmra.mrb[14].mxu0 %vm1629_vm3, %v1626_v58 }
 0x4bd   : > { %5088 = vmatmul.mubr.msk.f32.vlgmr.msra.gmra.mrb[0].mxu1 %vm1629_vm3, %v8249_v40 }
 0x4be   : > { %5090 = vmatprep.mubr.msk.f32.mxu1 %vm1629_vm3, %v8265_v49 }
 0x4c1   : > { %5091 = vmatmul.mubr.msk.f32.gmra.mrb[2].mxu1 %vm1629_vm3, %v8275_v54 }
 0x4c2   : > { %5093 = vmatprep.mubr.msk.f32.mxu1 %vm1629_vm3, %v8284_v59 }
 0x4c5   : > { %5094 = vmatmul.mubr.msk.f32.gmra.mrb[4].mxu1 %vm1629_vm3, %v8293_v0 }
 0x4c6   : > { %5096 = vmatprep.mubr.msk.f32.mxu1 %vm1629_vm3, %v8302_v5 }
 0x4c9   : > { %5097 = vmatmul.mubr.msk.f32.gmra.mrb[6].mxu1 %vm1629_vm3, %v8311_v10 }
 0x4ca   : > { %5099 = vmatprep.mubr.msk.f32.mxu1 %vm1629_vm3, %v8320_v15  ;;  %v5604_v15 = vpack.c.bf16 %v2455_v12, %v2454_v11 }
 0x4cc   : > { %5605 = vmatprep.subr.bf16.mxu0 %v5604_v15 }
 0x4cd   : > { %5100 = vmatmul.mubr.msk.f32.gmra.mrb[8].mxu1 %vm1629_vm3, %v8329_v20  ;;  %5607 = vmatpush3.bf16.msra.mxu0 %v5604_v15  ;;  %v2457_v20 = vld [vmem:[#allocation24 + $0x28] sm:$0xff] }
 0x4ce   : > { %5102 = vmatprep.mubr.msk.f32.mxu1 %vm1629_vm3, %v4482_v25  ;;  %v5608_v21 = vpack.c.bf16 %v2457_v20, %v2456_v19  ;;  %v2458_v25 = vld [vmem:[#allocation24 + $0x30] sm:$0xff] }
 0x4cf   : > { %v5612_v28 = vpack.c.bf16 %v2459_v26, %v2458_v25 }
 0x4d0   : > { %5609 = vmatprep.subr.bf16.mxu0 %v5608_v21 }
 0x4d1   : > { %5103 = vmatmul.mubr.msk.f32.gmra.mrb[10].mxu1 %vm1629_vm3, %v4483_v30  ;;  %5611 = vmatpush3.bf16.msra.mxu0 %v5608_v21 }
 0x4d2   : > { %5105 = vmatprep.mubr.msk.f32.mxu1 %vm1629_vm3, %v4484_v37  ;;  %5613 = vmatprep.subr.bf16.mxu0 %v5612_v28 }
 0x4d5   : > { %5106 = vmatmul.mubr.msk.f32.gmra.mrb[12].mxu1 %vm1629_vm3, %v4485_v45  ;;  %5615 = vmatpush3.bf16.msra.mxu0 %v5612_v28  ;;  %v5620_v45 = vpack.c.bf16 %v2463_v43, %v2462_v42  ;;  %v8495_v28 = vld [vmem:[#allocation22] ss:$0 sm:$0xff] }
 0x4d6   : > { %5108 = vmatprep.mubr.msk.f32.mxu1 %vm1629_vm3, %v4486_v51  ;;  %5617 = vmatprep.subr.bf16.mxu0 %v5616_v35  ;;  %v5624_v51 = vpack.c.bf16 %v2465_v50, %v2464_v48 }
 0x4d9   : > { %5109 = vmatmul.mubr.msk.f32.gmra.mrb[14].mxu1 %vm1629_vm3, %v4487_v57  ;;  %5619 = vmatpush3.bf16.msra.mxu0 %v5616_v35  ;;  %v2467_v57 = vld [vmem:[#allocation24 + $0x78] sm:$0xff] }
 0x4da   : > { %5621 = vmatprep.subr.bf16.mxu0 %v5620_v45 }
 0x4dd   : > { %5623 = vmatpush3.bf16.msra.mxu0 %v5620_v45 }
 0x4de   : > { %5625 = vmatprep.subr.bf16.mxu0 %v5624_v51 }
 0x4e1   : > { %5627 = vmatpush3.bf16.msra.mxu0 %v5624_v51 }
 0x557   : > { %v8396_v34 = vpop.f32.mrb[0].mxu0 }
 0x558   : > { %v1824_v39 = vmul.f32 %v8396_v34, %v8396_v34  ;;  %v8400_v40 = vpop.f32.mrb[1].mxu0 }
 0x559   : > { %v1823_v41 = vmul.f32 %v8400_v40, %v8400_v40 }
 0x55a   : > { %v1843_v49 = vsel %vm1839_vm4, %v1824_v39, 0.0  ;;  %v5628_v39 = vpack.c.bf16 %v2467_v57, %v2466_v56 }
 0x55b   : > { %1844 = vadd.xlane.f32.xlu1 %v1843_v49  ;;  %v1840_v54 = vsel %vm1839_vm4, %v1823_v41, 0.0 }
 0x55c   : > { %1841 = vadd.xlane.f32.xlu0 %v1840_v54  ;;  %5629 = vmatprep.subr.bf16.mxu0 %v5628_v39 }
 0x55d   : > { %5631 = vmatpush3.bf16.msra.mxu0 %v5628_v39 }
 0x55e   : > { %v8406_v59 = vpop.f32.mrb[2].mxu0 }
 0x55f   : > { %v8408_v60 = vpop.f32.mrb[3].mxu0  ;;  %v1826_v62 = vmul.f32 %v8406_v59, %v8406_v59 }
 0x560   : > { %v1825_v61 = vmul.f32 %v8408_v60, %v8408_v60 }
 0x561   : > { %v1849_v1 = vsel %vm1839_vm4, %v1826_v62, 0.0 }
 0x562   : > { %v1846_v63 = vsel %vm1839_vm4, %v1825_v61, 0.0 }
 0x563   : > { %1847 = vadd.xlane.f32.xlu0 %v1846_v63 }
 0x566   : > { %v8415_v0 = vpop.f32.mrb[4].mxu0 }
 0x567   : > { %v1828_v2 = vmul.f32 %v8415_v0, %v8415_v0  ;;  %1850 = vadd.xlane.f32.xlu0 %v1849_v1  ;;  %v8420_v3 = vpop.f32.mrb[5].mxu0 }
 0x568   : > { %v1827_v4 = vmul.f32 %v8420_v3, %v8420_v3 }
 0x569   : > { %v1855_v5 = vsel %vm1839_vm4, %v1828_v2, 0.0 }
 0x56a   : > { %v1852_v6 = vsel %vm1839_vm4, %v1827_v4, 0.0 }
 0x56b   : > { %1856 = vadd.xlane.f32.xlu0 %v1855_v5  ;;  %1853 = vadd.xlane.f32.xlu1 %v1852_v6 }
 0x56e   : > { %v8426_v10 = vpop.f32.mrb[6].mxu0 }
 0x56f   : > { %v1830_v13 = vmul.f32 %v8426_v10, %v8426_v10  ;;  %v8430_v14 = vpop.f32.mrb[7].mxu0 }
 0x570   : > { %v1829_v16 = vmul.f32 %v8430_v14, %v8430_v14 }
 0x571   : > { %v1861_v17 = vsel %vm1839_vm4, %v1830_v13, 0.0 }
 0x572   : > { %1862 = vadd.xlane.f32.xlu0 %v1861_v17  ;;  %v1858_v18 = vsel %vm1839_vm4, %v1829_v16, 0.0 }
 0x573   : > { %1859 = vadd.xlane.f32.xlu1 %v1858_v18 }
 0x576   : > { %v8436_v22 = vpop.f32.mrb[8].mxu0 }
 0x577   : > { %v1832_v23 = vmul.f32 %v8436_v22, %v8436_v22  ;;  %v8440_v24 = vpop.f32.mrb[9].mxu0 }
 0x578   : > { %v1831_v27 = vmul.f32 %v8440_v24, %v8440_v24 }
 0x579   : > { %v1867_v29 = vsel %vm1839_vm4, %v1832_v23, 0.0  ;;  %v8492_v23 = vld [vmem:[#allocation21] ss:$0 sm:$0xff] }
 0x57a   : > { %1868 = vadd.xlane.f32.xlu0 %v1867_v29  ;;  %v1864_v30 = vsel %vm1839_vm4, %v1831_v27, 0.0 }
 0x57b   : > { %1865 = vadd.xlane.f32.xlu1 %v1864_v30 }
 0x57e   : > { %v8446_v36 = vpop.f32.mrb[10].mxu0 }
 0x57f   : > { %v1834_v37 = vmul.f32 %v8446_v36, %v8446_v36  ;;  %v8450_v38 = vpop.f32.mrb[11].mxu0 }
 0x580   : > { %v1833_v44 = vmul.f32 %v8450_v38, %v8450_v38 }
 0x581   : > { %v1873_v46 = vsel %vm1839_vm4, %v1834_v37, 0.0 }
 0x582   : > { %1874 = vadd.xlane.f32.xlu0 %v1873_v46  ;;  %v1870_v47 = vsel %vm1839_vm4, %v1833_v44, 0.0 }
 0x583   : > { %1871 = vadd.xlane.f32.xlu1 %v1870_v47 }
 0x586   : > { %v8456_v52 = vpop.f32.mrb[12].mxu0 }
 0x587   : > { %v1836_v53 = vmul.f32 %v8456_v52, %v8456_v52  ;;  %v8460_v55 = vpop.f32.mrb[13].mxu0 }
 0x588   : > { %v1835_v58 = vmul.f32 %v8460_v55, %v8460_v55 }
 0x589   : > { %v1879_v41 = vsel %vm1839_vm4, %v1836_v53, 0.0 }
 0x58a   : > { %1880 = vadd.xlane.f32.xlu0 %v1879_v41  ;;  %v1876_v49 = vsel %vm1839_vm4, %v1835_v58, 0.0 }
 0x58b   : > { %1877 = vadd.xlane.f32.xlu1 %v1876_v49 }
 0x58e   : > { %v8466_v54 = vpop.f32.mrb[14].mxu0 }
 0x58f   : > { %v1838_v61 = vmul.f32 %v8466_v54, %v8466_v54  ;;  %v8470_v62 = vpop.f32.mrb[15].mxu0 }
 0x590   : > { %v1837_v63 = vmul.f32 %v8470_v62, %v8470_v62  ;;  %v5089_v1 = vpop.f32.mrb[0].mxu1 }
 0x591   : > { %v2199_v2 = vpop.f32.mrb[1].mxu1  ;;  %v1885_v4 = vsel %vm1839_vm4, %v1838_v61, 0.0 }
 0x592   : > { %1886 = vadd.xlane.f32.xlu0 %v1885_v4  ;;  %v1882_v5 = vsel %vm1839_vm4, %v1837_v63, 0.0 }
 0x593   : > { %1883 = vadd.xlane.f32.xlu1 %v1882_v5 }
 0x594   : > { %v5092_v6 = vpop.f32.mrb[2].mxu1 }
 0x595   : > { %v2209_v7 = vpop.f32.mrb[3].mxu1 }
 0x598   : > { %v5095_v8 = vpop.f32.mrb[4].mxu1 }
 0x599   : > { %v2219_v9 = vpop.f32.mrb[5].mxu1 }
 0x59c   : > { %v5098_v11 = vpop.f32.mrb[6].mxu1 }
 0x59d   : > { %v2229_v12 = vpop.f32.mrb[7].mxu1 }
 0x5a0   : > { %v8476_v13 = vpop.f32.mrb[8].mxu1 }
 0x5a1   : > { %v8478_v15 = vpop.f32.mrb[9].mxu1 }
 0x5a4   : > { %v8480_v16 = vpop.f32.mrb[10].mxu1 }
 0x5a5   : > { %v8482_v17 = vpop.f32.mrb[11].mxu1 }
 0x5a8   : > { %v8484_v18 = vpop.f32.mrb[12].mxu1 }
 0x5a9   : > { %v8486_v19 = vpop.f32.mrb[13].mxu1 }
 0x5ac   : > { %v8488_v20 = vpop.f32.mrb[14].mxu1 }
 0x5ad   : > { %v8490_v21 = vpop.f32.mrb[15].mxu1 }
 0x5e8   : > { %v1845_v25 = vpop.xlane.xlu1 %1844 }
 0x5e9   : > { %v2286_v26 = vmul.f32 %v8492_v23, %v1845_v25  ;;  %v1842_v27 = vpop.xlane.xlu0 %1841 }
 0x5ea   : > { %v2285_v29 = vmul.f32 %v8492_v23, %v1842_v27 }
 0x5eb   : > { %v2302_v30 = vadd.f32 %v5089_v1, %v2286_v26 }
 0x5ec   : > { %v2301_v31 = vadd.f32 %v2285_v29, %v2199_v2 }
 0x5ed   : > { %v8499_v32 = vadd.f32 %v8495_v28, %v2302_v30 }
 0x5ee   : > { %v2324_v35 = vadd.f32 %v8495_v28, %v2301_v31 }
 0x5ef   : > { %v4557_v37 = vmul.f32 -1.442695, %v8499_v32 }
 0x5f0   : > { %v4556_v42 = vmul.f32 -1.442695, %v2324_v35  ;;  %v1848_v43 = vpop.xlane.xlu0 %1847 }
 0x5f1   : > { %6239 = vpow2.f32 %v4557_v37  ;;  %v2287_v44 = vmul.f32 %v8492_v23, %v1848_v43 }
 0x5f2   : > { %6241 = vpow2.f32 %v4556_v42 }
 0x5f3   : > { %v2303_v45 = vadd.f32 %v2287_v44, %v2209_v7 }
 0x5f4   : > { %v1851_v46 = vpop.xlane.xlu0 %1850 }
 0x5f5   : > { %v8505_v47 = vadd.f32 %v8495_v28, %v2303_v45  ;;  %v2288_v48 = vmul.f32 %v8492_v23, %v1851_v46 }
 0x5f7   : > { %v4558_v50 = vmul.f32 -1.442695, %v8505_v47  ;;  %v2304_v51 = vadd.f32 %v5092_v6, %v2288_v48 }
 0x5f8   : > { %v1854_v53 = vpop.xlane.xlu1 %1853  ;;  %v1857_v56 = vpop.xlane.xlu0 %1856 }
 0x5f9   : > { %6243 = vpow2.f32 %v4558_v50  ;;  %v8510_v57 = vadd.f32 %v8495_v28, %v2304_v51  ;;  %v2289_v58 = vmul.f32 %v8492_v23, %v1854_v53  ;;  %v2290_v39 = vmul.f32 %v8492_v23, %v1857_v56 }
 0x5fb   : > { %v6240_v41 = vpop.eup %6239  ;;  %v4559_v49 = vmul.f32 -1.442695, %v8510_v57  ;;  %v2305_v61 = vadd.f32 %v2289_v58, %v2219_v9  ;;  %v2306_v63 = vadd.f32 %v5095_v8, %v2290_v39 }
 0x5fc   : > { %v6242_v1 = vpop.eup %6241  ;;  %v2389_v2 = vadd.f32 1.0, %v6240_v41 }
 0x5fd   : > { %v2388_v4 = vadd.f32 1.0, %v6242_v1  ;;  %6245 = vpow2.f32 %v4559_v49  ;;  %v8516_v5 = vadd.f32 %v8495_v28, %v2305_v61  ;;  %v8519_v6 = vadd.f32 %v8495_v28, %v2306_v63 }
 0x5fe   : > { %6247 = vrcp.f32 %v2389_v2 }
 0x5ff   : > { %6249 = vrcp.f32 %v2388_v4  ;;  %v4560_v7 = vmul.f32 -1.442695, %v8516_v5  ;;  %v4561_v25 = vmul.f32 -1.442695, %v8519_v6  ;;  %v1863_v26 = vpop.xlane.xlu0 %1862 }
 0x600   : > { %v2292_v9 = vmul.f32 %v8492_v23, %v1863_v26  ;;  %v1860_v8 = vpop.xlane.xlu1 %1859 }
 0x601   : > { %6251 = vpow2.f32 %v4560_v7  ;;  %v2291_v27 = vmul.f32 %v8492_v23, %v1860_v8 }
 0x602   : > { %6253 = vpow2.f32 %v4561_v25  ;;  %v2308_v29 = vadd.f32 %v5098_v11, %v2292_v9 }
 0x603   : > { %v6244_v30 = vpop.eup %6243  ;;  %v2307_v31 = vadd.f32 %v2291_v27, %v2229_v12 }
 0x604   : > { %v2390_v37 = vadd.f32 1.0, %v6244_v30  ;;  %v8526_v42 = vadd.f32 %v8495_v28, %v2308_v29 }
 0x605   : > { %v8529_v43 = vadd.f32 %v8495_v28, %v2307_v31 }
 0x606   : > { %6255 = vrcp.f32 %v2390_v37  ;;  %v4563_v44 = vmul.f32 -1.442695, %v8526_v42 }
 0x607   : > { %v6246_v45 = vpop.eup %6245  ;;  %v4562_v46 = vmul.f32 -1.442695, %v8529_v43  ;;  %v1869_v48 = vpop.xlane.xlu0 %1868 }
 0x608   : > { %v6248_v50 = vpop.eup %6247  ;;  %v2391_v51 = vadd.f32 1.0, %v6246_v45  ;;  %6257 = vpow2.f32 %v4563_v44  ;;  %v2294_v11 = vmul.f32 %v8492_v23, %v1869_v48  ;;  %v1866_v12 = vpop.xlane.xlu1 %1865 }
 0x609   : > { %v6250_v53 = vpop.eup %6249  ;;  %6259 = vpow2.f32 %v4562_v46  ;;  %v2293_v56 = vmul.f32 %v8492_v23, %v1866_v12  ;;  %v2437_v49 = vmul.f32 %v6248_v50, %v8499_v32 }
 0x60a   : > { %6261 = vrcp.f32 %v2391_v51  ;;  %v2310_v58 = vadd.f32 %v8476_v13, %v2294_v11  ;;  %v2436_v39 = vmul.f32 %v6250_v53, %v2324_v35 }
 0x60b   : > { %v6252_v41 = vpop.eup %6251  ;;  %v2309_v61 = vadd.f32 %v2293_v56, %v8478_v15 }
 0x60c   : > { %v6254_v63 = vpop.eup %6253  ;;  %v2392_v1 = vadd.f32 1.0, %v6252_v41  ;;  %v8539_v2 = vadd.f32 %v8495_v28, %v2310_v58  ;;  %5143 = vmatprep.mubr.f32.mxu0 %v2436_v39 }
 0x60d   : > { %v2393_v4 = vadd.f32 1.0, %v6254_v63  ;;  %v8542_v7 = vadd.f32 %v8495_v28, %v2309_v61  ;;  %5144 = vmatmul.mubr.f32.vlgmr.msra.gmra.mrb[16].mxu0 %v2437_v49 }
 0x60e   : > { %6263 = vrcp.f32 %v2392_v1  ;;  %v4565_v13 = vmul.f32 -1.442695, %v8539_v2 }
 0x60f   : > { %6265 = vrcp.f32 %v2393_v4  ;;  %v4564_v35 = vmul.f32 -1.442695, %v8542_v7  ;;  %v1875_v32 = vpop.xlane.xlu0 %1874 }
 0x610   : > { %v6256_v25 = vpop.eup %6255  ;;  %6267 = vpow2.f32 %v4565_v13  ;;  %v2296_v15 = vmul.f32 %v8492_v23, %v1875_v32  ;;  %v1872_v26 = vpop.xlane.xlu1 %1871 }
 0x611   : > { %6269 = vpow2.f32 %v4564_v35  ;;  %v2295_v9 = vmul.f32 %v8492_v23, %v1872_v26  ;;  %v2438_v8 = vmul.f32 %v6256_v25, %v8505_v47 }
 0x612   : > { %v6258_v27 = vpop.eup %6257  ;;  %v2312_v29 = vadd.f32 %v8480_v16, %v2296_v15 }
 0x613   : > { %v6260_v30 = vpop.eup %6259  ;;  %v2395_v31 = vadd.f32 1.0, %v6258_v27  ;;  %v2311_v37 = vadd.f32 %v2295_v9, %v8482_v17  ;;  %5146 = vmatprep.mubr.f32.mxu0 %v2438_v8 }
 0x614   : > { %v6262_v44 = vpop.eup %6261  ;;  %v2394_v45 = vadd.f32 1.0, %v6260_v30  ;;  %v8552_v46 = vadd.f32 %v8495_v28, %v2312_v29 }
 0x615   : > { %6271 = vrcp.f32 %v2395_v31  ;;  %v8555_v48 = vadd.f32 %v8495_v28, %v2311_v37  ;;  %v2439_v50 = vmul.f32 %v6262_v44, %v8510_v57 }
 0x616   : > { %6273 = vrcp.f32 %v2394_v45  ;;  %v4567_v47 = vmul.f32 -1.442695, %v8552_v46 }
 0x617   : > { %v4566_v16 = vmul.f32 -1.442695, %v8555_v48  ;;  %5147 = vmatmul.mubr.f32.gmra.mrb[18].mxu0 %v2439_v50  ;;  %v1881_v51 = vpop.xlane.xlu0 %1880 }
 0x618   : > { %v6264_v17 = vpop.eup %6263  ;;  %6275 = vpow2.f32 %v4567_v47  ;;  %v2298_v11 = vmul.f32 %v8492_v23, %v1881_v51  ;;  %v1878_v12 = vpop.xlane.xlu1 %1877 }
 0x619   : > { %v6266_v53 = vpop.eup %6265  ;;  %6277 = vpow2.f32 %v4566_v16  ;;  %v2297_v56 = vmul.f32 %v8492_v23, %v1878_v12  ;;  %v2440_v58 = vmul.f32 %v6264_v17, %v8516_v5 }
 0x61a   : > { %v6268_v39 = vpop.eup %6267  ;;  %v2314_v57 = vadd.f32 %v8484_v18, %v2298_v11  ;;  %v2441_v41 = vmul.f32 %v6266_v53, %v8519_v6 }
 0x61b   : > { %v6270_v49 = vpop.eup %6269  ;;  %v2397_v61 = vadd.f32 1.0, %v6268_v39  ;;  %v2313_v63 = vadd.f32 %v2297_v56, %v8486_v19  ;;  %5149 = vmatprep.mubr.f32.mxu0 %v2440_v58 }
 0x61c   : > { %v2396_v1 = vadd.f32 1.0, %v6270_v49  ;;  %v2337_v4 = vadd.f32 %v8495_v28, %v2314_v57  ;;  %5150 = vmatmul.mubr.f32.gmra.mrb[20].mxu0 %v2441_v41 }
 0x61d   : > { %6279 = vrcp.f32 %v2397_v61  ;;  %v2336_v13 = vadd.f32 %v8495_v28, %v2313_v63 }
 0x61e   : > { %6281 = vrcp.f32 %v2396_v1  ;;  %v4569_v35 = vmul.f32 -1.442695, %v2337_v4 }
 0x61f   : > { %v6272_v5 = vpop.eup %6271  ;;  %v4568_v32 = vmul.f32 -1.442695, %v2336_v13  ;;  %v1887_v25 = vpop.xlane.xlu0 %1886 }
 0x620   : > { %v6274_v18 = vpop.eup %6273  ;;  %6283 = vpow2.f32 %v4569_v35  ;;  %v2300_v6 = vmul.f32 %v8492_v23, %v1887_v25  ;;  %v1884_v15 = vpop.xlane.xlu1 %1883  ;;  %v2443_v27 = vmul.f32 %v6272_v5, %v8526_v42  ;;  %v2733_v35 = vld [vmem:[#allocation27 + $0x8] sm:$0xff] }
 0x621   : > { %6285 = vpow2.f32 %v4568_v32  ;;  %v2299_v19 = vmul.f32 %v8492_v23, %v1884_v15  ;;  %v2442_v26 = vmul.f32 %v6274_v18, %v8529_v43  ;;  %v3012_v32 = vld [vmem:[#allocation30] sm:$0xff]  ;;  %v3013_v25 = vld [vmem:[#allocation30 + $0x8] sm:$0xff]  ;;  %v2735_v15 = vld [vmem:[#allocation27 + $0x18] sm:$0xff] }
 0x622   : > { %v6276_v9 = vpop.eup %6275  ;;  %v2316_v8 = vadd.f32 %v8488_v20, %v2300_v6  ;;  %v5664_v18 = vpack.c.bf16 %v3013_v25, %v3012_v32  ;;  %v2734_v6 = vld [vmem:[#allocation27 + $0x10] sm:$0xff] }
 0x623   : > { %v6278_v29 = vpop.eup %6277  ;;  %v2399_v30 = vadd.f32 1.0, %v6276_v9  ;;  %v2315_v31 = vadd.f32 %v2299_v19, %v8490_v21  ;;  %5152 = vmatprep.mubr.f32.mxu0 %v2442_v26  ;;  %v3015_v19 = vld [vmem:[#allocation30 + $0x18] sm:$0xff] }
 0x624   : > { %v2398_v37 = vadd.f32 1.0, %v6278_v29  ;;  %v2339_v44 = vadd.f32 %v8495_v28, %v2316_v8  ;;  %5153 = vmatmul.mubr.f32.gmra.mrb[22].mxu0 %v2443_v27  ;;  %5665 = vmatprep.subr.bf16.mxu1 %v5664_v18  ;;  %v2736_v9 = vld [vmem:[#allocation27 + $0x20] sm:$0xff]  ;;  %v2737_v8 = vld [vmem:[#allocation27 + $0x28] sm:$0xff] }
 0x625   : > { %6287 = vrcp.f32 %v2399_v30  ;;  %v2338_v45 = vadd.f32 %v8495_v28, %v2315_v31  ;;  %5667 = vmatpush3.bf16.msra.mxu1 %v5664_v18  ;;  %v5640_v27 = vpack.c.bf16 %v2737_v8, %v2736_v9  ;;  %v3016_v29 = vld [vmem:[#allocation30 + $0x20] sm:$0xff]  ;;  %v3017_v30 = vld [vmem:[#allocation30 + $0x28] sm:$0xff] }
 0x626   : > { %6289 = vrcp.f32 %v2398_v37  ;;  %v4571_v23 = vmul.f32 -1.442695, %v2339_v44  ;;  %v5672_v31 = vpack.c.bf16 %v3017_v30, %v3016_v29  ;;  %v2738_v37 = vld [vmem:[#allocation27 + $0x30] sm:$0xff] }
 0x627   : > { %v6280_v43 = vpop.eup %6279  ;;  %v4570_v50 = vmul.f32 -1.442695, %v2338_v45 }
 0x628   : > { %v6282_v47 = vpop.eup %6281  ;;  %6291 = vpow2.f32 %v4571_v23  ;;  %v2445_v21 = vmul.f32 %v6280_v43, %v8539_v2  ;;  %v3018_v23 = vld [vmem:[#allocation30 + $0x30] sm:$0xff]  ;;  %v3019_v43 = vld [vmem:[#allocation30 + $0x38] sm:$0xff] }
 0x629   : > { %6293 = vpow2.f32 %v4570_v50  ;;  %v2444_v20 = vmul.f32 %v6282_v47, %v8542_v7  ;;  %v5676_v50 = vpack.c.bf16 %v3019_v43, %v3018_v23  ;;  %v2740_v47 = vld [vmem:[#allocation27 + $0x40] sm:$0xff] }
 0x62a   : > { %v6284_v42 = vpop.eup %6283 }
 0x62b   : > { %v6286_v16 = vpop.eup %6285  ;;  %v2401_v51 = vadd.f32 1.0, %v6284_v42  ;;  %5155 = vmatprep.mubr.f32.mxu0 %v2444_v20  ;;  %v2741_v20 = vld [vmem:[#allocation27 + $0x48] sm:$0xff] }
 0x62c   : > { %v2400_v17 = vadd.f32 1.0, %v6286_v16  ;;  %5156 = vmatmul.mubr.f32.gmra.mrb[24].mxu0 %v2445_v21  ;;  %v5648_v42 = vpack.c.bf16 %v2741_v20, %v2740_v47  ;;  %v3020_v21 = vld [vmem:[#allocation30 + $0x40] sm:$0xff]  ;;  %v3021_v16 = vld [vmem:[#allocation30 + $0x48] sm:$0xff] }
 0x62d   : > { %6295 = vrcp.f32 %v2401_v51  ;;  %v5680_v51 = vpack.c.bf16 %v3021_v16, %v3020_v21 }
 0x62e   : > { %6297 = vrcp.f32 %v2400_v17  ;;  %v2742_v17 = vld [vmem:[#allocation27 + $0x50] sm:$0xff] }
 0x62f   : > { %v6288_v28 = vpop.eup %6287 }
 0x630   : > { %v6290_v11 = vpop.eup %6289  ;;  %v2447_v56 = vmul.f32 %v6288_v28, %v8552_v46  ;;  %v2732_v46 = vld [vmem:[#allocation27] sm:$0xff]  ;;  %v2743_v28 = vld [vmem:[#allocation27 + $0x58] sm:$0xff] }
 0x631   : > { %v2446_v12 = vmul.f32 %v6290_v11, %v8555_v48  ;;  %v5632_v5 = vpack.c.bf16 %v2733_v35, %v2732_v46  ;;  %v5652_v11 = vpack.c.bf16 %v2743_v28, %v2742_v17  ;;  %v8580_v35 = vld [vmem:[#allocation25] ss:$0 sm:$0xff] }
 0x632   : > { %v6292_v53 = vpop.eup %6291 }
 0x633   : > { %v6294_v58 = vpop.eup %6293  ;;  %v2403_v39 = vadd.f32 1.0, %v6292_v53  ;;  %5158 = vmatprep.mubr.f32.mxu0 %v2446_v12  ;;  %5633 = vmatprep.subr.bf16.mxu0 %v5632_v5  ;;  %v3022_v12 = vld [vmem:[#allocation30 + $0x50] sm:$0xff]  ;;  %v3023_v53 = vld [vmem:[#allocation30 + $0x58] sm:$0xff] }
 0x634   : > { %v2402_v7 = vadd.f32 1.0, %v6294_v58  ;;  %5159 = vmatmul.mubr.f32.gmra.mrb[26].mxu0 %v2447_v56  ;;  %v5684_v56 = vpack.c.bf16 %v3023_v53, %v3022_v12  ;;  %v2744_v58 = vld [vmem:[#allocation27 + $0x60] sm:$0xff] }
 0x635   : > { %6299 = vrcp.f32 %v2403_v39  ;;  %5635 = vmatpush3.bf16.msra.mxu0 %v5632_v5  ;;  %v2745_v39 = vld [vmem:[#allocation27 + $0x68] sm:$0xff] }
 0x636   : > { %6301 = vrcp.f32 %v2402_v7  ;;  %v5656_v7 = vpack.c.bf16 %v2745_v39, %v2744_v58 }
 0x637   : > { %v6296_v2 = vpop.eup %6295 }
 0x638   : > { %v6298_v57 = vpop.eup %6297  ;;  %v2449_v49 = vmul.f32 %v6296_v2, %v2337_v4  ;;  %v3014_v4 = vld [vmem:[#allocation30 + $0x10] sm:$0xff]  ;;  %v3024_v2 = vld [vmem:[#allocation30 + $0x60] sm:$0xff] }
 0x639   : > { %v2448_v41 = vmul.f32 %v6298_v57, %v2336_v13  ;;  %v5636_v13 = vpack.c.bf16 %v2735_v15, %v2734_v6  ;;  %v5668_v26 = vpack.c.bf16 %v3015_v19, %v3014_v4  ;;  %v3025_v57 = vld [vmem:[#allocation30 + $0x68] sm:$0xff] }
 0x63b   : > { %5161 = vmatprep.mubr.f32.mxu0 %v2448_v41  ;;  %5637 = vmatprep.subr.bf16.mxu0 %v5636_v13  ;;  %v5688_v41 = vpack.c.bf16 %v3025_v57, %v3024_v2 }
 0x63c   : > { %5162 = vmatmul.mubr.f32.gmra.mrb[28].mxu0 %v2449_v49  ;;  %5669 = vmatprep.subr.bf16.mxu1 %v5668_v26  ;;  %v2746_v49 = vld [vmem:[#allocation27 + $0x70] sm:$0xff] }
 0x63d   : > { %5639 = vmatpush3.bf16.msra.mxu0 %v5636_v13  ;;  %5671 = vmatpush3.bf16.msra.mxu1 %v5668_v26 }
 0x63e   : > { %5641 = vmatprep.subr.bf16.mxu0 %v5640_v27  ;;  %5673 = vmatprep.subr.bf16.mxu1 %v5672_v31 }
 0x63f   : > { %v6300_v61 = vpop.eup %6299 }
 0x640   : > { %v6302_v63 = vpop.eup %6301  ;;  %v2451_v48 = vmul.f32 %v6300_v61, %v2339_v44  ;;  %v2739_v44 = vld [vmem:[#allocation27 + $0x38] sm:$0xff] }
 0x641   : > { %v2450_v1 = vmul.f32 %v6302_v63, %v2338_v45  ;;  %5643 = vmatpush3.bf16.msra.mxu0 %v5640_v27  ;;  %v5644_v45 = vpack.c.bf16 %v2739_v44, %v2738_v37  ;;  %5675 = vmatpush3.bf16.msra.mxu1 %v5672_v31  ;;  %v2747_v61 = vld [vmem:[#allocation27 + $0x78] sm:$0xff] }
 0x642   : > { %5677 = vmatprep.subr.bf16.mxu1 %v5676_v50  ;;  %v5660_v63 = vpack.c.bf16 %v2747_v61, %v2746_v49 }
 0x643   : > { %5164 = vmatprep.mubr.f32.mxu0 %v2450_v1  ;;  %5645 = vmatprep.subr.bf16.mxu0 %v5644_v45  ;;  %v3026_v1 = vld [vmem:[#allocation30 + $0x70] sm:$0xff] }
 0x644   : > { %5165 = vmatmul.mubr.f32.gmra.mrb[30].mxu0 %v2451_v48  ;;  %v3027_v48 = vld [vmem:[#allocation30 + $0x78] sm:$0xff] }
 0x645   : > { %5647 = vmatpush3.bf16.msra.mxu0 %v5644_v45  ;;  %5679 = vmatpush3.bf16.msra.mxu1 %v5676_v50  ;;  %v5692_v46 = vpack.c.bf16 %v3027_v48, %v3026_v1 }
 0x646   : > { %5649 = vmatprep.subr.bf16.mxu0 %v5648_v42  ;;  %5681 = vmatprep.subr.bf16.mxu1 %v5680_v51 }
 0x649   : > { %5651 = vmatpush3.bf16.msra.mxu0 %v5648_v42  ;;  %5683 = vmatpush3.bf16.msra.mxu1 %v5680_v51 }
 0x64a   : > { %5653 = vmatprep.subr.bf16.mxu0 %v5652_v11  ;;  %5685 = vmatprep.subr.bf16.mxu1 %v5684_v56 }
 0x64d   : > { %5655 = vmatpush3.bf16.msra.mxu0 %v5652_v11  ;;  %5687 = vmatpush3.bf16.msra.mxu1 %v5684_v56 }
 0x64e   : > { %5657 = vmatprep.subr.bf16.mxu0 %v5656_v7  ;;  %5689 = vmatprep.subr.bf16.mxu1 %v5688_v41 }
 0x651   : > { %5659 = vmatpush3.bf16.msra.mxu0 %v5656_v7  ;;  %5691 = vmatpush3.bf16.msra.mxu1 %v5688_v41 }
 0x652   : > { %5661 = vmatprep.subr.bf16.mxu0 %v5660_v63  ;;  %5693 = vmatprep.subr.bf16.mxu1 %v5692_v46 }
 0x655   : > { %5663 = vmatpush3.bf16.msra.mxu0 %v5660_v63  ;;  %5695 = vmatpush3.bf16.msra.mxu1 %v5692_v46 }
 0x6e0   : > { %v5145_v5 = vpop.f32.mrb[16].mxu0 }
 0x6e1   : > { %v2547_v32 = vadd.f32 %v5145_v5, %v8580_v35  ;;  %v2541_v25 = vpop.f32.mrb[17].mxu0 }
 0x6e2   : > { %v2542_v18 = vadd.f32 %v8580_v35, %v2541_v25 }
 0x6e3   : > { %v4574_v6 = vmul.f32 -1.442695, %v2547_v32 }
 0x6e4   : > { %v4573_v15 = vmul.f32 -1.442695, %v2542_v18 }
 0x6e5   : > { %6303 = vpow2.f32 %v4574_v6 }
 0x6e6   : > { %6305 = vpow2.f32 %v4573_v15 }
 0x6ea   : > { %v5148_v13 = vpop.f32.mrb[18].mxu0 }
 0x6eb   : > { %v2557_v4 = vadd.f32 %v5148_v13, %v8580_v35  ;;  %v2551_v19 = vpop.f32.mrb[19].mxu0 }
 0x6ec   : > { %v2552_v26 = vadd.f32 %v8580_v35, %v2551_v19 }
 0x6ed   : > { %v4576_v9 = vmul.f32 -1.442695, %v2557_v4 }
 0x6ee   : > { %v4575_v8 = vmul.f32 -1.442695, %v2552_v26 }
 0x6ef   : > { %v6304_v27 = vpop.eup %6303  ;;  %6307 = vpow2.f32 %v4576_v9  ;;  %v5151_v29 = vpop.f32.mrb[20].mxu0 }
 0x6f0   : > { %v6306_v30 = vpop.eup %6305  ;;  %v2669_v31 = vadd.f32 1.0, %v6304_v27  ;;  %6309 = vpow2.f32 %v4575_v8  ;;  %v8587_v37 = vadd.f32 %v5151_v29, %v8580_v35  ;;  %v2561_v44 = vpop.f32.mrb[21].mxu0 }
 0x6f1   : > { %v2668_v45 = vadd.f32 1.0, %v6306_v30  ;;  %v8590_v23 = vadd.f32 %v8580_v35, %v2561_v44 }
 0x6f2   : > { %6311 = vrcp.f32 %v2669_v31  ;;  %v4578_v43 = vmul.f32 -1.442695, %v8587_v37 }
 0x6f3   : > { %6313 = vrcp.f32 %v2668_v45  ;;  %v4577_v50 = vmul.f32 -1.442695, %v8590_v23 }
 0x6f4   : > { %6315 = vpow2.f32 %v4578_v43 }
 0x6f5   : > { %6317 = vpow2.f32 %v4577_v50 }
 0x6f7   : > { %v5154_v47 = vpop.f32.mrb[22].mxu0 }
 0x6f8   : > { %v8595_v20 = vadd.f32 %v5154_v47, %v8580_v35  ;;  %v2571_v42 = vpop.f32.mrb[23].mxu0 }
 0x6f9   : > { %v6308_v21 = vpop.eup %6307  ;;  %v8598_v16 = vadd.f32 %v8580_v35, %v2571_v42 }
 0x6fa   : > { %v6310_v51 = vpop.eup %6309  ;;  %v2671_v17 = vadd.f32 1.0, %v6308_v21  ;;  %v4580_v28 = vmul.f32 -1.442695, %v8595_v20 }
 0x6fb   : > { %v2670_v11 = vadd.f32 1.0, %v6310_v51  ;;  %v4579_v12 = vmul.f32 -1.442695, %v8598_v16 }
 0x6fc   : > { %v6312_v53 = vpop.eup %6311  ;;  %6319 = vrcp.f32 %v2671_v17 }
 0x6fd   : > { %v6314_v56 = vpop.eup %6313  ;;  %v2717_v58 = vmul.f32 %v6312_v53, %v2547_v32  ;;  %6321 = vrcp.f32 %v2670_v11 }
 0x6fe   : > { %v6316_v39 = vpop.eup %6315  ;;  %v2716_v7 = vmul.f32 %v6314_v56, %v2542_v18  ;;  %6323 = vpow2.f32 %v4580_v28 }
 0x6ff   : > { %v6318_v2 = vpop.eup %6317  ;;  %v2673_v57 = vadd.f32 1.0, %v6316_v39  ;;  %6325 = vpow2.f32 %v4579_v12  ;;  %v5157_v41 = vpop.f32.mrb[24].mxu0 }
 0x700   : > { %v2672_v49 = vadd.f32 1.0, %v6318_v2  ;;  %v8603_v61 = vadd.f32 %v5157_v41, %v8580_v35  ;;  %v2581_v63 = vpop.f32.mrb[25].mxu0  ;;  %5199 = vmatprep.mubr.f32.mxu0 %v2716_v7  ;;  %v8605_v1 = vpack.c.bf16 %v2717_v58, %v2716_v7 }
 0x701   : > { %6327 = vrcp.f32 %v2673_v57  ;;  %v8608_v48 = vadd.f32 %v8580_v35, %v2581_v63  ;;  %5200 = vmatmul.mubr.f32.vlgmr.msra.gmra.mrb[32].mxu0 %v2717_v58 }
 0x702   : > { %6329 = vrcp.f32 %v2672_v49  ;;  %v4582_v46 = vmul.f32 -1.442695, %v8603_v61  ;;  %5729 = vmatprep.subr.bf16.mxu1 %v8605_v1 }
 0x703   : > { %v4581_v5 = vmul.f32 -1.442695, %v8608_v48 }
 0x704   : > { %6331 = vpow2.f32 %v4582_v46 }
 0x705   : > { %6333 = vpow2.f32 %v4581_v5 }
 0x706   : > { %v6320_v32 = vpop.eup %6319 }
 0x707   : > { %v6322_v25 = vpop.eup %6321  ;;  %v2719_v18 = vmul.f32 %v6320_v32, %v2557_v4  ;;  %v5160_v6 = vpop.f32.mrb[26].mxu0 }
 0x708   : > { %v6324_v15 = vpop.eup %6323  ;;  %v2718_v13 = vmul.f32 %v6322_v25, %v2552_v26  ;;  %v8614_v19 = vadd.f32 %v5160_v6, %v8580_v35  ;;  %v2591_v9 = vpop.f32.mrb[27].mxu0 }
 0x709   : > { %v6326_v8 = vpop.eup %6325  ;;  %v2675_v27 = vadd.f32 1.0, %v6324_v15  ;;  %v8617_v29 = vadd.f32 %v8580_v35, %v2591_v9 }
 0x70a   : > { %v2674_v30 = vadd.f32 1.0, %v6326_v8  ;;  %v4584_v31 = vmul.f32 -1.442695, %v8614_v19  ;;  %5202 = vmatprep.mubr.f32.mxu0 %v2718_v13  ;;  %v8620_v44 = vpack.c.bf16 %v2719_v18, %v2718_v13 }
 0x70b   : > { %v6328_v45 = vpop.eup %6327  ;;  %6335 = vrcp.f32 %v2675_v27  ;;  %v4583_v4 = vmul.f32 -1.442695, %v8617_v29  ;;  %5203 = vmatmul.mubr.f32.gmra.mrb[34].mxu0 %v2719_v18 }
 0x70c   : > { %v6330_v26 = vpop.eup %6329  ;;  %v2721_v43 = vmul.f32 %v6328_v45, %v8587_v37  ;;  %6337 = vrcp.f32 %v2674_v30 }
 0x70d   : > { %v2720_v50 = vmul.f32 %v6330_v26, %v8590_v23  ;;  %6339 = vpow2.f32 %v4584_v31 }
 0x70e   : > { %v6332_v47 = vpop.eup %6331  ;;  %6341 = vpow2.f32 %v4583_v4 }
 0x70f   : > { %v6334_v42 = vpop.eup %6333  ;;  %v2677_v21 = vadd.f32 1.0, %v6332_v47  ;;  %v5163_v51 = vpop.f32.mrb[28].mxu0  ;;  %5205 = vmatprep.mubr.f32.mxu0 %v2720_v50  ;;  %v8625_v17 = vpack.c.bf16 %v2721_v43, %v2720_v50 }
 0x710   : > { %v2676_v28 = vadd.f32 1.0, %v6334_v42  ;;  %v2607_v11 = vadd.f32 %v5163_v51, %v8580_v35  ;;  %v2601_v12 = vpop.f32.mrb[29].mxu0  ;;  %5206 = vmatmul.mubr.f32.gmra.mrb[36].mxu0 %v2721_v43 }
 0x711   : > { %6343 = vrcp.f32 %v2677_v21  ;;  %v2602_v37 = vadd.f32 %v8580_v35, %v2601_v12 }
 0x712   : > { %6345 = vrcp.f32 %v2676_v28  ;;  %v4586_v53 = vmul.f32 -1.442695, %v2607_v11 }
 0x713   : > { %v4585_v23 = vmul.f32 -1.442695, %v2602_v37 }
 0x714   : > { %6347 = vpow2.f32 %v4586_v53 }
 0x715   : > { %v6336_v56 = vpop.eup %6335  ;;  %6349 = vpow2.f32 %v4585_v23 }
 0x716   : > { %v6338_v58 = vpop.eup %6337  ;;  %v2723_v39 = vmul.f32 %v6336_v56, %v8595_v20 }
 0x717   : > { %v6340_v7 = vpop.eup %6339  ;;  %v2722_v2 = vmul.f32 %v6338_v58, %v8598_v16  ;;  %v5166_v57 = vpop.f32.mrb[30].mxu0  ;;  %v8647_v58 = vld [vmem:[#allocation28] ss:$0 sm:$0xff] }
 0x718   : > { %v6342_v41 = vpop.eup %6341  ;;  %v2679_v49 = vadd.f32 1.0, %v6340_v7  ;;  %v2617_v63 = vadd.f32 %v5166_v57, %v8580_v35  ;;  %v2611_v46 = vpop.f32.mrb[31].mxu0 }
 0x719   : > { %v2678_v5 = vadd.f32 1.0, %v6342_v41  ;;  %5208 = vmatprep.mubr.f32.mxu0 %v2722_v2  ;;  %v2612_v32 = vadd.f32 %v8580_v35, %v2611_v46  ;;  %v8633_v25 = vpack.c.bf16 %v2723_v39, %v2722_v2 }
 0x71a   : > { %6351 = vrcp.f32 %v2679_v49  ;;  %v4588_v18 = vmul.f32 -1.442695, %v2617_v63  ;;  %5209 = vmatmul.mubr.f32.gmra.mrb[38].mxu0 %v2723_v39 }
 0x71b   : > { %v6344_v6 = vpop.eup %6343  ;;  %6353 = vrcp.f32 %v2678_v5  ;;  %v4587_v20 = vmul.f32 -1.442695, %v2612_v32 }
 0x71c   : > { %v6346_v15 = vpop.eup %6345  ;;  %v2725_v16 = vmul.f32 %v6344_v6, %v8603_v61  ;;  %6355 = vpow2.f32 %v4588_v18 }
 0x71d   : > { %v2724_v13 = vmul.f32 %v6346_v15, %v8608_v48  ;;  %6357 = vpow2.f32 %v4587_v20 }
 0x71e   : > { %v6348_v9 = vpop.eup %6347 }
 0x71f   : > { %v6350_v8 = vpop.eup %6349  ;;  %v2681_v27 = vadd.f32 1.0, %v6348_v9  ;;  %5211 = vmatprep.mubr.f32.mxu0 %v2724_v13  ;;  %v8637_v35 = vpack.c.bf16 %v2725_v16, %v2724_v13 }
 0x720   : > { %v2680_v30 = vadd.f32 1.0, %v6350_v8  ;;  %5212 = vmatmul.mubr.f32.gmra.mrb[40].mxu0 %v2725_v16 }
 0x721   : > { %6359 = vrcp.f32 %v2681_v27 }
 0x722   : > { %6361 = vrcp.f32 %v2680_v30 }
 0x724   : > { %v6352_v31 = vpop.eup %6351 }
 0x725   : > { %v6354_v45 = vpop.eup %6353  ;;  %v2727_v4 = vmul.f32 %v6352_v31, %v8614_v19 }
 0x726   : > { %v6356_v26 = vpop.eup %6355  ;;  %v2726_v61 = vmul.f32 %v6354_v45, %v8617_v29 }
 0x727   : > { %v6358_v43 = vpop.eup %6357  ;;  %v2683_v48 = vadd.f32 1.0, %v6356_v26 }
 0x728   : > { %v2682_v50 = vadd.f32 1.0, %v6358_v43  ;;  %5214 = vmatprep.mubr.f32.mxu0 %v2726_v61  ;;  %v8641_v47 = vpack.c.bf16 %v2727_v4, %v2726_v61 }
 0x729   : > { %6363 = vrcp.f32 %v2683_v48  ;;  %5215 = vmatmul.mubr.f32.gmra.mrb[42].mxu0 %v2727_v4 }
 0x72a   : > { %6365 = vrcp.f32 %v2682_v50 }
 0x72b   : > { %v6360_v42 = vpop.eup %6359 }
 0x72c   : > { %v6362_v21 = vpop.eup %6361  ;;  %v2729_v51 = vmul.f32 %v6360_v42, %v2607_v11 }
 0x72d   : > { %v2728_v28 = vmul.f32 %v6362_v21, %v2602_v37 }
 0x72f   : > { %5217 = vmatprep.mubr.f32.mxu0 %v2728_v28  ;;  %v8643_v12 = vpack.c.bf16 %v2729_v51, %v2728_v28 }
 0x730   : > { %5218 = vmatmul.mubr.f32.gmra.mrb[44].mxu0 %v2729_v51 }
 0x733   : > { %v6364_v19 = vpop.eup %6363 }
 0x734   : > { %v6366_v53 = vpop.eup %6365  ;;  %v2731_v29 = vmul.f32 %v6364_v19, %v2617_v63 }
 0x735   : > { %v2730_v23 = vmul.f32 %v6366_v53, %v2612_v32 }
 0x737   : > { %5220 = vmatprep.mubr.f32.mxu0 %v2730_v23  ;;  %v8645_v56 = vpack.c.bf16 %v2731_v29, %v2730_v23 }
 0x738   : > { %5221 = vmatmul.mubr.f32.gmra.mrb[46].mxu0 %v2731_v29 }
 0x7d4   : > { %v5201_v39 = vpop.f32.mrb[32].mxu0 }
 0x7d5   : > { %v2827_v7 = vadd.f32 %v5201_v39, %v8647_v58  ;;  %v2821_v2 = vpop.f32.mrb[33].mxu0 }
 0x7d6   : > { %v2822_v11 = vadd.f32 %v8647_v58, %v2821_v2 }
 0x7d7   : > { %v4591_v37 = vmul.f32 -1.442695, %v2827_v7 }
 0x7d8   : > { %v4590_v57 = vmul.f32 -1.442695, %v2822_v11 }
 0x7d9   : > { %6367 = vpow2.f32 %v4591_v37 }
 0x7da   : > { %6369 = vpow2.f32 %v4590_v57 }
 0x7de   : > { %v5204_v41 = vpop.f32.mrb[34].mxu0 }
 0x7df   : > { %v8652_v49 = vadd.f32 %v5204_v41, %v8647_v58  ;;  %v2831_v63 = vpop.f32.mrb[35].mxu0 }
 0x7e0   : > { %v2832_v46 = vadd.f32 %v8647_v58, %v2831_v63 }
 0x7e1   : > { %v4593_v5 = vmul.f32 -1.442695, %v8652_v49 }
 0x7e2   : > { %v4592_v32 = vmul.f32 -1.442695, %v2832_v46 }
 0x7e3   : > { %v6368_v18 = vpop.eup %6367  ;;  %6371 = vpow2.f32 %v4593_v5  ;;  %v5207_v6 = vpop.f32.mrb[36].mxu0 }
 0x7e4   : > { %v6370_v20 = vpop.eup %6369  ;;  %v2949_v15 = vadd.f32 1.0, %v6368_v18  ;;  %6373 = vpow2.f32 %v4592_v32  ;;  %v8657_v16 = vadd.f32 %v5207_v6, %v8647_v58  ;;  %v2841_v13 = vpop.f32.mrb[37].mxu0 }
 0x7e5   : > { %v2948_v9 = vadd.f32 1.0, %v6370_v20  ;;  %v8660_v8 = vadd.f32 %v8647_v58, %v2841_v13 }
 0x7e6   : > { %6375 = vrcp.f32 %v2949_v15  ;;  %v4595_v27 = vmul.f32 -1.442695, %v8657_v16 }
 0x7e7   : > { %6377 = vrcp.f32 %v2948_v9  ;;  %v4594_v30 = vmul.f32 -1.442695, %v8660_v8 }
 0x7e8   : > { %6379 = vpow2.f32 %v4595_v27 }
 0x7e9   : > { %6381 = vpow2.f32 %v4594_v30 }
 0x7ed   : > { %v6372_v31 = vpop.eup %6371  ;;  %v5210_v45 = vpop.f32.mrb[38].mxu0 }
 0x7ee   : > { %v6374_v4 = vpop.eup %6373  ;;  %v2951_v26 = vadd.f32 1.0, %v6372_v31  ;;  %v8665_v61 = vadd.f32 %v5210_v45, %v8647_v58  ;;  %v2851_v43 = vpop.f32.mrb[39].mxu0 }
 0x7ef   : > { %v2950_v48 = vadd.f32 1.0, %v6374_v4  ;;  %v8668_v50 = vadd.f32 %v8647_v58, %v2851_v43 }
 0x7f0   : > { %v6376_v42 = vpop.eup %6375  ;;  %6383 = vrcp.f32 %v2951_v26  ;;  %v4597_v21 = vmul.f32 -1.442695, %v8665_v61 }
 0x7f1   : > { %v6378_v51 = vpop.eup %6377  ;;  %6385 = vrcp.f32 %v2950_v48  ;;  %v4596_v28 = vmul.f32 -1.442695, %v8668_v50  ;;  %v2997_v23 = vmul.f32 %v6376_v42, %v2827_v7 }
 0x7f2   : > { %v6380_v19 = vpop.eup %6379  ;;  %v2996_v53 = vmul.f32 %v6378_v51, %v2822_v11  ;;  %6387 = vpow2.f32 %v4597_v21 }
 0x7f3   : > { %v6382_v29 = vpop.eup %6381  ;;  %v2953_v39 = vadd.f32 1.0, %v6380_v19  ;;  %6389 = vpow2.f32 %v4596_v28  ;;  %v5213_v2 = vpop.f32.mrb[40].mxu0 }
 0x7f4   : > { %v2952_v37 = vadd.f32 1.0, %v6382_v29  ;;  %v8673_v57 = vadd.f32 %v5213_v2, %v8647_v58  ;;  %v2861_v41 = vpop.f32.mrb[41].mxu0  ;;  %5255 = vmatprep.mubr.f32.mxu1 %v2996_v53 }
 0x7f5   : > { %6391 = vrcp.f32 %v2953_v39  ;;  %v8676_v63 = vadd.f32 %v8647_v58, %v2861_v41  ;;  %5256 = vmatmul.mubr.f32.vlgmr.msra.gmra.mrb[16].mxu1 %v2997_v23 }
 0x7f6   : > { %6393 = vrcp.f32 %v2952_v37  ;;  %v4599_v11 = vmul.f32 -1.442695, %v8673_v57  ;;  %5731 = vmatpush3.bf16.msra.mxu1 %v8605_v1 }
 0x7f7   : > { %v4598_v7 = vmul.f32 -1.442695, %v8676_v63  ;;  %5733 = vmatprep.subr.bf16.mxu1 %v8620_v44 }
 0x7f8   : > { %6395 = vpow2.f32 %v4599_v11 }
 0x7f9   : > { %6397 = vpow2.f32 %v4598_v7 }
 0x7fa   : > { %v6384_v5 = vpop.eup %6383  ;;  %5735 = vmatpush3.bf16.msra.mxu1 %v8620_v44 }
 0x7fb   : > { %v6386_v32 = vpop.eup %6385  ;;  %5737 = vmatprep.subr.bf16.mxu1 %v8625_v17  ;;  %v2999_v13 = vmul.f32 %v6384_v5, %v8652_v49 }
 0x7fc   : > { %v6388_v18 = vpop.eup %6387  ;;  %v2998_v6 = vmul.f32 %v6386_v32, %v2832_v46  ;;  %v5216_v20 = vpop.f32.mrb[42].mxu0 }
 0x7fd   : > { %v6390_v15 = vpop.eup %6389  ;;  %v2955_v9 = vadd.f32 1.0, %v6388_v18  ;;  %v8686_v1 = vadd.f32 %v5216_v20, %v8647_v58  ;;  %v2871_v27 = vpop.f32.mrb[43].mxu0 }
 0x7fe   : > { %v2954_v30 = vadd.f32 1.0, %v6390_v15  ;;  %v8689_v31 = vadd.f32 %v8647_v58, %v2871_v27  ;;  %5739 = vmatpush3.bf16.msra.mxu1 %v8625_v17  ;;  %5258 = vmatprep.mubr.f32.mxu1 %v2998_v6 }
 0x7ff   : > { %v6392_v44 = vpop.eup %6391  ;;  %6399 = vrcp.f32 %v2955_v9  ;;  %v4601_v46 = vmul.f32 -1.442695, %v8686_v1  ;;  %5741 = vmatprep.subr.bf16.mxu1 %v8633_v25  ;;  %5259 = vmatmul.mubr.f32.gmra.mrb[18].mxu1 %v2999_v13 }
 0x800   : > { %v6394_v49 = vpop.eup %6393  ;;  %6401 = vrcp.f32 %v2954_v30  ;;  %v4600_v45 = vmul.f32 -1.442695, %v8689_v31  ;;  %v3001_v43 = vmul.f32 %v6392_v44, %v8657_v16 }
 0x801   : > { %v3000_v4 = vmul.f32 %v6394_v49, %v8660_v8  ;;  %6403 = vpow2.f32 %v4601_v46 }
 0x802   : > { %v6396_v26 = vpop.eup %6395  ;;  %6405 = vpow2.f32 %v4600_v45  ;;  %5743 = vmatpush3.bf16.msra.mxu1 %v8633_v25 }
 0x803   : > { %v6398_v17 = vpop.eup %6397  ;;  %v2957_v48 = vadd.f32 1.0, %v6396_v26  ;;  %5745 = vmatprep.subr.bf16.mxu1 %v8637_v35  ;;  %v5219_v42 = vpop.f32.mrb[44].mxu0  ;;  %5261 = vmatprep.mubr.f32.mxu1 %v3000_v4 }
 0x804   : > { %v2956_v21 = vadd.f32 1.0, %v6398_v17  ;;  %v8700_v51 = vadd.f32 %v5219_v42, %v8647_v58  ;;  %v2881_v28 = vpop.f32.mrb[45].mxu0  ;;  %5262 = vmatmul.mubr.f32.gmra.mrb[20].mxu1 %v3001_v43 }
 0x805   : > { %6407 = vrcp.f32 %v2957_v48  ;;  %v2882_v8 = vadd.f32 %v8647_v58, %v2881_v28 }
 0x806   : > { %6409 = vrcp.f32 %v2956_v21  ;;  %v4603_v16 = vmul.f32 -1.442695, %v8700_v51  ;;  %5747 = vmatpush3.bf16.msra.mxu1 %v8637_v35 }
 0x807   : > { %v4602_v25 = vmul.f32 -1.442695, %v2882_v8  ;;  %5749 = vmatprep.subr.bf16.mxu1 %v8641_v47 }
 0x808   : > { %6411 = vpow2.f32 %v4603_v16 }
 0x809   : > { %v6400_v19 = vpop.eup %6399  ;;  %6413 = vpow2.f32 %v4602_v25 }
 0x80a   : > { %v6402_v53 = vpop.eup %6401  ;;  %5751 = vmatpush3.bf16.msra.mxu1 %v8641_v47  ;;  %v3003_v37 = vmul.f32 %v6400_v19, %v8665_v61 }
 0x80b   : > { %v6404_v29 = vpop.eup %6403  ;;  %v3002_v23 = vmul.f32 %v6402_v53, %v8668_v50  ;;  %5753 = vmatprep.subr.bf16.mxu1 %v8643_v12  ;;  %v5222_v39 = vpop.f32.mrb[46].mxu0 }
 0x80c   : > { %v6406_v2 = vpop.eup %6405  ;;  %v2959_v41 = vadd.f32 1.0, %v6404_v29  ;;  %v2897_v35 = vadd.f32 %v5222_v39, %v8647_v58  ;;  %v2891_v11 = vpop.f32.mrb[47].mxu0 }
 0x80d   : > { %v2958_v7 = vadd.f32 1.0, %v6406_v2  ;;  %5264 = vmatprep.mubr.f32.mxu1 %v3002_v23  ;;  %v2892_v5 = vadd.f32 %v8647_v58, %v2891_v11 }
 0x80e   : > { %6415 = vrcp.f32 %v2959_v41  ;;  %v4605_v32 = vmul.f32 -1.442695, %v2897_v35  ;;  %5265 = vmatmul.mubr.f32.gmra.mrb[22].mxu1 %v3003_v37 }
 0x80f   : > { %v6408_v47 = vpop.eup %6407  ;;  %6417 = vrcp.f32 %v2958_v7  ;;  %v4604_v50 = vmul.f32 -1.442695, %v2892_v5  ;;  %5755 = vmatpush3.bf16.msra.mxu1 %v8643_v12 }
 0x810   : > { %v6410_v18 = vpop.eup %6409  ;;  %6419 = vpow2.f32 %v4605_v32  ;;  %5757 = vmatprep.subr.bf16.mxu1 %v8645_v56  ;;  %v3005_v20 = vmul.f32 %v6408_v47, %v8673_v57 }
 0x811   : > { %v3004_v61 = vmul.f32 %v6410_v18, %v8676_v63  ;;  %6421 = vpow2.f32 %v4604_v50 }
 0x812   : > { %v6412_v6 = vpop.eup %6411 }
 0x813   : > { %v6414_v15 = vpop.eup %6413  ;;  %v2961_v58 = vadd.f32 1.0, %v6412_v6  ;;  %5759 = vmatpush3.bf16.msra.mxu1 %v8645_v56  ;;  %5267 = vmatprep.mubr.f32.mxu1 %v3004_v61 }
 0x814   : > { %v2960_v13 = vadd.f32 1.0, %v6414_v15  ;;  %5268 = vmatmul.mubr.f32.gmra.mrb[24].mxu1 %v3005_v20 }
 0x815   : > { %6423 = vrcp.f32 %v2961_v58 }
 0x816   : > { %6425 = vrcp.f32 %v2960_v13 }
 0x818   : > { %v6416_v12 = vpop.eup %6415 }
 0x819   : > { %v6418_v9 = vpop.eup %6417  ;;  %v3007_v63 = vmul.f32 %v6416_v12, %v8686_v1  ;;  %v8720_v1 = vld [vmem:[#allocation31] ss:$0 sm:$0xff] }
 0x81a   : > { %v6420_v27 = vpop.eup %6419  ;;  %v3006_v30 = vmul.f32 %v6418_v9, %v8689_v31 }
 0x81b   : > { %v6422_v44 = vpop.eup %6421  ;;  %v2963_v46 = vadd.f32 1.0, %v6420_v27  ;;  %v8741_v27 = vld [vmem:[#allocation33] ss:$0 sm:$0xff] }
 0x81c   : > { %v2962_v49 = vadd.f32 1.0, %v6422_v44  ;;  %5270 = vmatprep.mubr.f32.mxu1 %v3006_v30 }
 0x81d   : > { %6427 = vrcp.f32 %v2963_v46  ;;  %5271 = vmatmul.mubr.f32.gmra.mrb[26].mxu1 %v3007_v63 }
 0x81e   : > { %6429 = vrcp.f32 %v2962_v49 }
 0x81f   : > { %v6424_v56 = vpop.eup %6423 }
 0x820   : > { %v6426_v57 = vpop.eup %6425  ;;  %v3009_v4 = vmul.f32 %v6424_v56, %v8700_v51 }
 0x821   : > { %v3008_v45 = vmul.f32 %v6426_v57, %v2882_v8 }
 0x823   : > { %5273 = vmatprep.mubr.f32.mxu1 %v3008_v45 }
 0x824   : > { %5274 = vmatmul.mubr.f32.gmra.mrb[28].mxu1 %v3009_v4 }
 0x827   : > { %v6428_v26 = vpop.eup %6427 }
 0x828   : > { %v6430_v43 = vpop.eup %6429  ;;  %v3011_v31 = vmul.f32 %v6428_v26, %v2897_v35 }
 0x829   : > { %v3010_v17 = vmul.f32 %v6430_v43, %v2892_v5 }
 0x82b   : > { %5276 = vmatprep.mubr.f32.mxu1 %v3010_v17 }
 0x82c   : > { %5277 = vmatmul.mubr.f32.gmra.mrb[30].mxu1 %v3011_v31 }
 0x8c8   : > { %v5257_v48 = vpop.f32.mrb[16].mxu1 }
 0x8c9   : > { %v3107_v42 = vadd.f32 %v5257_v48, %v8720_v1  ;;  %v3101_v21 = vpop.f32.mrb[17].mxu1 }
 0x8ca   : > { %v3102_v28 = vadd.f32 %v8720_v1, %v3101_v21 }
 0x8cb   : > { %v4608_v16 = vmul.f32 -1.442695, %v3107_v42 }
 0x8cc   : > { %v4607_v8 = vmul.f32 -1.442695, %v3102_v28 }
 0x8cd   : > { %6431 = vpow2.f32 %v4608_v16 }
 0x8ce   : > { %6433 = vpow2.f32 %v4607_v8 }
 0x8d2   : > { %v5260_v51 = vpop.f32.mrb[18].mxu1 }
 0x8d3   : > { %v3117_v25 = vadd.f32 %v5260_v51, %v8720_v1  ;;  %v3111_v19 = vpop.f32.mrb[19].mxu1 }
 0x8d4   : > { %v3112_v53 = vadd.f32 %v8720_v1, %v3111_v19 }
 0x8d5   : > { %v4610_v29 = vmul.f32 -1.442695, %v3117_v25 }
 0x8d6   : > { %v4609_v23 = vmul.f32 -1.442695, %v3112_v53 }
 0x8d7   : > { %v6432_v39 = vpop.eup %6431  ;;  %6435 = vpow2.f32 %v4610_v29  ;;  %v5263_v2 = vpop.f32.mrb[20].mxu1 }
 0x8d8   : > { %v6434_v37 = vpop.eup %6433  ;;  %v3229_v41 = vadd.f32 1.0, %v6432_v39  ;;  %6437 = vpow2.f32 %v4609_v23  ;;  %v8727_v35 = vadd.f32 %v5263_v2, %v8720_v1  ;;  %v3121_v11 = vpop.f32.mrb[21].mxu1 }
 0x8d9   : > { %v3228_v7 = vadd.f32 1.0, %v6434_v37  ;;  %v8730_v5 = vadd.f32 %v8720_v1, %v3121_v11 }
 0x8da   : > { %6439 = vrcp.f32 %v3229_v41  ;;  %v4612_v32 = vmul.f32 -1.442695, %v8727_v35 }
 0x8db   : > { %6441 = vrcp.f32 %v3228_v7  ;;  %v4611_v47 = vmul.f32 -1.442695, %v8730_v5 }
 0x8dc   : > { %6443 = vpow2.f32 %v4612_v32 }
 0x8dd   : > { %6445 = vpow2.f32 %v4611_v47 }
 0x8e1   : > { %v6436_v50 = vpop.eup %6435  ;;  %v5266_v18 = vpop.f32.mrb[22].mxu1 }
 0x8e2   : > { %v6438_v61 = vpop.eup %6437  ;;  %v3231_v6 = vadd.f32 1.0, %v6436_v50  ;;  %v8735_v20 = vadd.f32 %v5266_v18, %v8720_v1  ;;  %v3131_v15 = vpop.f32.mrb[23].mxu1 }
 0x8e3   : > { %v3230_v58 = vadd.f32 1.0, %v6438_v61  ;;  %v8738_v13 = vadd.f32 %v8720_v1, %v3131_v15 }
 0x8e4   : > { %v6440_v12 = vpop.eup %6439  ;;  %6447 = vrcp.f32 %v3231_v6  ;;  %v4614_v9 = vmul.f32 -1.442695, %v8735_v20 }
 0x8e5   : > { %v6442_v30 = vpop.eup %6441  ;;  %v3277_v44 = vmul.f32 %v6440_v12, %v3107_v42  ;;  %6449 = vrcp.f32 %v3230_v58  ;;  %v4613_v63 = vmul.f32 -1.442695, %v8738_v13 }
 0x8e6   : > { %v6444_v46 = vpop.eup %6443  ;;  %v3276_v49 = vmul.f32 %v6442_v30, %v3102_v28  ;;  %6451 = vpow2.f32 %v4614_v9 }
 0x8e7   : > { %v6446_v56 = vpop.eup %6445  ;;  %v3233_v57 = vadd.f32 1.0, %v6444_v46  ;;  %6453 = vpow2.f32 %v4613_v63  ;;  %v5269_v45 = vpop.f32.mrb[24].mxu1  ;;  %v3300_v4 = vmul.f32 %v8741_v27, %v3277_v44 }
 0x8e8   : > { %v3232_v26 = vadd.f32 1.0, %v6446_v56  ;;  %v8746_v43 = vadd.f32 %v5269_v45, %v8720_v1  ;;  %v3141_v17 = vpop.f32.mrb[25].mxu1  ;;  %v3299_v31 = vmul.f32 %v8741_v27, %v3276_v49 }
 0x8e9   : > { %6455 = vrcp.f32 %v3233_v57  ;;  %v8750_v48 = vadd.f32 %v8720_v1, %v3141_v17  ;;  %3317 = vadd.xlane.f32.xlu0 %v3300_v4 }
 0x8ea   : > { %6457 = vrcp.f32 %v3232_v26  ;;  %v4616_v42 = vmul.f32 -1.442695, %v8746_v43  ;;  %3315 = vadd.xlane.f32.xlu1 %v3299_v31 }
 0x8eb   : > { %v4615_v21 = vmul.f32 -1.442695, %v8750_v48 }
 0x8ec   : > { %6459 = vpow2.f32 %v4616_v42 }
 0x8ed   : > { %6461 = vpow2.f32 %v4615_v21 }
 0x8ee   : > { %v6448_v28 = vpop.eup %6447 }
 0x8ef   : > { %v6450_v16 = vpop.eup %6449  ;;  %v3279_v8 = vmul.f32 %v6448_v28, %v3117_v25 }
 0x8f0   : > { %v6452_v51 = vpop.eup %6451  ;;  %v3278_v19 = vmul.f32 %v6450_v16, %v3112_v53  ;;  %v5272_v29 = vpop.f32.mrb[26].mxu1 }
 0x8f1   : > { %v6454_v23 = vpop.eup %6453  ;;  %v3235_v39 = vadd.f32 1.0, %v6452_v51  ;;  %v8755_v2 = vadd.f32 %v5272_v29, %v8720_v1  ;;  %v3151_v37 = vpop.f32.mrb[27].mxu1  ;;  %v3302_v41 = vmul.f32 %v8741_v27, %v3279_v8 }
 0x8f2   : > { %v3234_v11 = vadd.f32 1.0, %v6454_v23  ;;  %v8759_v7 = vadd.f32 %v8720_v1, %v3151_v37  ;;  %v3301_v32 = vmul.f32 %v8741_v27, %v3278_v19 }
 0x8f3   : > { %v6456_v47 = vpop.eup %6455  ;;  %6463 = vrcp.f32 %v3235_v39  ;;  %v4618_v25 = vmul.f32 -1.442695, %v8755_v2  ;;  %3321 = vadd.xlane.f32.xlu0 %v3302_v41 }
 0x8f4   : > { %v6458_v53 = vpop.eup %6457  ;;  %v3281_v50 = vmul.f32 %v6456_v47, %v8727_v35  ;;  %6465 = vrcp.f32 %v3234_v11  ;;  %v4617_v18 = vmul.f32 -1.442695, %v8759_v7  ;;  %3319 = vadd.xlane.f32.xlu1 %v3301_v32 }
 0x8f5   : > { %v3280_v61 = vmul.f32 %v6458_v53, %v8730_v5  ;;  %6467 = vpow2.f32 %v4618_v25 }
 0x8f6   : > { %v6460_v6 = vpop.eup %6459  ;;  %6469 = vpow2.f32 %v4617_v18  ;;  %v3304_v15 = vmul.f32 %v8741_v27, %v3281_v50 }
 0x8f7   : > { %v6462_v58 = vpop.eup %6461  ;;  %v3237_v12 = vadd.f32 1.0, %v6460_v6  ;;  %v5275_v9 = vpop.f32.mrb[28].mxu1  ;;  %v3303_v30 = vmul.f32 %v8741_v27, %v3280_v61 }
 0x8f8   : > { %v3236_v44 = vadd.f32 1.0, %v6462_v58  ;;  %v8769_v63 = vadd.f32 %v5275_v9, %v8720_v1  ;;  %3325 = vadd.xlane.f32.xlu0 %v3304_v15  ;;  %v3161_v35 = vpop.f32.mrb[29].mxu1 }
 0x8f9   : > { %6471 = vrcp.f32 %v3237_v12  ;;  %v3162_v46 = vadd.f32 %v8720_v1, %v3161_v35  ;;  %3323 = vadd.xlane.f32.xlu1 %v3303_v30 }
 0x8fa   : > { %6473 = vrcp.f32 %v3236_v44  ;;  %v4620_v5 = vmul.f32 -1.442695, %v8769_v63 }
 0x8fb   : > { %v4619_v49 = vmul.f32 -1.442695, %v3162_v46 }
 0x8fc   : > { %6475 = vpow2.f32 %v4620_v5 }
 0x8fd   : > { %v6464_v56 = vpop.eup %6463  ;;  %6477 = vpow2.f32 %v4619_v49 }
 0x8fe   : > { %v6466_v57 = vpop.eup %6465  ;;  %v3283_v45 = vmul.f32 %v6464_v56, %v8735_v20 }
 0x8ff   : > { %v6468_v4 = vpop.eup %6467  ;;  %v3282_v26 = vmul.f32 %v6466_v57, %v8738_v13  ;;  %v5278_v17 = vpop.f32.mrb[30].mxu1 }
 0x900   : > { %v6470_v31 = vpop.eup %6469  ;;  %v3239_v42 = vadd.f32 1.0, %v6468_v4  ;;  %v3177_v21 = vadd.f32 %v5278_v17, %v8720_v1  ;;  %v3306_v28 = vmul.f32 %v8741_v27, %v3283_v45  ;;  %v3171_v16 = vpop.f32.mrb[31].mxu1  ;;  %v7421_v17 = vmov 1.0  }
 0x901   : > { %v3238_v8 = vadd.f32 1.0, %v6470_v31  ;;  %v3172_v51 = vadd.f32 %v8720_v1, %v3171_v16  ;;  %v3305_v19 = vmul.f32 %v8741_v27, %v3282_v26 }
 0x902   : > { %6479 = vrcp.f32 %v3239_v42  ;;  %v4622_v29 = vmul.f32 -1.442695, %v3177_v21  ;;  %3329 = vadd.xlane.f32.xlu0 %v3306_v28 }
 0x903   : > { %v6472_v20 = vpop.eup %6471  ;;  %6481 = vrcp.f32 %v3238_v8  ;;  %v4621_v23 = vmul.f32 -1.442695, %v3172_v51  ;;  %3327 = vadd.xlane.f32.xlu1 %v3305_v19 }
 0x904   : > { %v6474_v13 = vpop.eup %6473  ;;  %v3285_v39 = vmul.f32 %v6472_v20, %v8746_v43  ;;  %6483 = vpow2.f32 %v4622_v29 }
 0x905   : > { %v3284_v37 = vmul.f32 %v6474_v13, %v8750_v48  ;;  %6485 = vpow2.f32 %v4621_v23 }
 0x906   : > { %v6476_v41 = vpop.eup %6475  ;;  %v3308_v11 = vmul.f32 %v8741_v27, %v3285_v39 }
 0x907   : > { %v6478_v1 = vpop.eup %6477  ;;  %v3241_v32 = vadd.f32 1.0, %v6476_v41  ;;  %v3307_v47 = vmul.f32 %v8741_v27, %v3284_v37 }
 0x908   : > { %v3240_v25 = vadd.f32 1.0, %v6478_v1  ;;  %3333 = vadd.xlane.f32.xlu0 %v3308_v11 }
 0x909   : > { %6487 = vrcp.f32 %v3241_v32  ;;  %3331 = vadd.xlane.f32.xlu1 %v3307_v47 }
 0x90a   : > { %6489 = vrcp.f32 %v3240_v25 }
 0x90c   : > { %v6480_v53 = vpop.eup %6479 }
 0x90d   : > { %v6482_v50 = vpop.eup %6481  ;;  %v3287_v43 = vmul.f32 %v6480_v53, %v8755_v2 }
 0x90e   : > { %v6484_v18 = vpop.eup %6483  ;;  %v3286_v48 = vmul.f32 %v6482_v50, %v8759_v7 }
 0x90f   : > { %v6486_v61 = vpop.eup %6485  ;;  %v3243_v6 = vadd.f32 1.0, %v6484_v18  ;;  %v3310_v15 = vmul.f32 %v8741_v27, %v3287_v43 }
 0x910   : > { %v3242_v58 = vadd.f32 1.0, %v6486_v61  ;;  %v3309_v12 = vmul.f32 %v8741_v27, %v3286_v48 }
 0x911   : > { %6491 = vrcp.f32 %v3243_v6  ;;  %3337 = vadd.xlane.f32.xlu0 %v3310_v15  ;;  %v3444_v15 = vld [vmem:[#allocation5] sm:$0xff] }
 0x912   : > { %6493 = vrcp.f32 %v3242_v58  ;;  %3335 = vadd.xlane.f32.xlu1 %v3309_v12 }
 0x913   : > { %v6488_v9 = vpop.eup %6487 }
 0x914   : > { %v6490_v30 = vpop.eup %6489  ;;  %v3289_v44 = vmul.f32 %v6488_v9, %v8769_v63  ;;  %v1535_v63 = vshrl.u32 %v1404_v33, 7  ;;  %v3364_v9 = vld [vmem:[#allocation6 + $0x8] sm:$0xff] }
 0x915   : > { %v3288_v2 = vmul.f32 %v6490_v30, %v3162_v46  ;;  %v8794_v46 = vld [vmem:[%s1402_s12] ss:$0 sm:$0xff] }
 0x916   : > { %v3312_v35 = vmul.f32 %v8741_v27, %v3289_v44  ;;  %v8796_v26 = vadd.s32 8, %v1535_v63  ;;  %vm1541_vm3 = vcmp.eq.s32.totalorder %v1535_v63, %v8794_v46  ;;  %v3530_v63 = vld [vmem:[#allocation16 + $0x8] sm:$0xff] (!%p4628_p8) }
 0x917   : > { %v3311_v7 = vmul.f32 %v8741_v27, %v3288_v2  ;;  %5311 = vmatprep.mubr.msk.f32.mxu0 %vm1541_vm3, %v7421_v17  ;;  %5346 = vmatprep.mubr.msk.f32.mxu1 %vm1541_vm3, %v7421_v17 }
 0x918   : > { %3341 = vadd.xlane.f32.xlu0 %v3312_v35  ;;  %vm1542_vm5 = vcmp.eq.s32.totalorder %v8796_v26, %v8794_v46  ;;  %v3529_v35 = vld [vmem:[#allocation16] sm:$0xff] (!%p4628_p8) }
 0x919   : > { %3339 = vadd.xlane.f32.xlu1 %v3311_v7  ;;  %5347 = vmatmul.mubr.msk.f32.vlgmr.msra.gmra.mrb[32].mxu1 %vm1542_vm5, %v7421_v17  ;;  %v3563_v7 = vld [vmem:[#allocation36] sm:$0xff] (!%p4628_p8)  ;;  %v3568_v26 = vld [vmem:[#allocation36 + $0x28] sm:$0xff] (!%p4628_p8) }
 0x91a   : > { %v3567_v46 = vld [vmem:[#allocation36 + $0x20] sm:$0xff] (!%p4628_p8) }
 0x91b   : > { %v6492_v5 = vpop.eup %6491 }
 0x91c   : > { %v6494_v49 = vpop.eup %6493  ;;  %v3291_v56 = vmul.f32 %v6492_v5, %v3177_v21  ;;  %v7422_v5 = vmov (!%p4628_p8), 0  }
 0x91d   : > { %v3290_v57 = vmul.f32 %v6494_v49, %v3172_v51  ;;  %6495 = vset.pattern.permute.xlu0 (!%p4628_p8), %v7422_v5  ;;  %v3564_v49 = vld [vmem:[#allocation36 + $0x8] sm:$0xff] (!%p4628_p8)  ;;  %v8831_v5 = vld [vmem:[#allocation2 + $0x8] sm:$0xff] (!%p4628_p8) }
 0x91e   : > { %v3314_v45 = vmul.f32 %v8741_v27, %v3291_v56  ;;  %v3565_v56 = vld [vmem:[#allocation36 + $0x10] sm:$0xff] (!%p4628_p8) }
 0x91f   : > { %v3313_v4 = vmul.f32 %v8741_v27, %v3290_v57  ;;  %v3566_v57 = vld [vmem:[#allocation36 + $0x18] sm:$0xff] (!%p4628_p8) }
 0x920   : > { %3345 = vadd.xlane.f32.xlu0 %v3314_v45  ;;  %v5760_v45 = vpack.c.bf16 (!%p4628_p8), %v3564_v49, %v3563_v7  ;;  %v3752_v49 = vld [vmem:[#allocation39] sm:$0xff] (!%p4628_p8) }
 0x921   : > { %3343 = vadd.xlane.f32.xlu1 %v3313_v4  ;;  %v5764_v4 = vpack.c.bf16 (!%p4628_p8), %v3566_v57, %v3565_v56  ;;  %v3753_v56 = vld [vmem:[#allocation39 + $0x8] sm:$0xff] (!%p4628_p8) }
 0x922   : > { %v5824_v57 = vpack.c.bf16 (!%p4628_p8), %v3753_v56, %v3752_v49  ;;  %v3976_v56 = vld [vmem:[#allocation45] sm:$0xff] (!%p4628_p8) }
 0x924   : > { %5825 = vmatprep.subr.bf16.mxu1 (!%p4628_p8), %v5824_v57 }
 0x925   : > { %5827 = vmatpush3.bf16.msra.mxu1 (!%p4628_p8), %v5824_v57  ;;  %v3977_v57 = vld [vmem:[#allocation45 + $0x8] sm:$0xff] (!%p4628_p8) }
 0x936   : > { %3537 = vperm.xlu0 (!%p4628_p8), %6495, %v3529_v35   ;;  %v3562_v35 = vld [vmem:[#allocation34 + $0x78] sm:$0xff] (!%p4628_p8) }
 0x93a   : > { %3542 = vperm.xlu0 (!%p4628_p8), %6495, %v3530_v63  }
 0x976   : > { %v3318_v27 = vpop.xlane.xlu0 %3317 }
 0x977   : > { %v3348_v33 = vmul.f32 %v8396_v34, %v3318_v27  ;;  %v3316_v31 = vpop.xlane.xlu1 %3315  ;;  %v3569_v27 = vld [vmem:[#allocation36 + $0x30] sm:$0xff] (!%p4628_p8) }
 0x978   : > { %v3347_v42 = vmul.f32 %v3316_v31, %v8400_v40 }
 0x97a   : > { %v5696_v21 = vpack.c.bf16 %v3348_v33, %v3347_v42  ;;  %v3570_v33 = vld [vmem:[#allocation36 + $0x38] sm:$0xff] (!%p4628_p8)  ;;  %v3571_v42 = vld [vmem:[#allocation36 + $0x40] sm:$0xff] (!%p4628_p8) }
 0x97b   : > { %v5772_v31 = vpack.c.bf16 (!%p4628_p8), %v3570_v33, %v3569_v27  ;;  %v3758_v27 = vld [vmem:[#allocation39 + $0x30] sm:$0xff] (!%p4628_p8)  ;;  %v3759_v33 = vld [vmem:[#allocation39 + $0x38] sm:$0xff] (!%p4628_p8) }
 0x97c   : > { %5697 = vmatprep.subr.bf16.mxu0 %v5696_v21 }
 0x97d   : > { %5699 = vmatpush3.bf16.msra.mxu0 %v5696_v21  ;;  %v3572_v21 = vld [vmem:[#allocation36 + $0x48] sm:$0xff] (!%p4628_p8) }
 0x980   : > { %v3322_v28 = vpop.xlane.xlu0 %3321 }
 0x981   : > { %v3350_v16 = vmul.f32 %v8406_v59, %v3322_v28  ;;  %v3320_v8 = vpop.xlane.xlu1 %3319  ;;  %v5776_v28 = vpack.c.bf16 (!%p4628_p8), %v3572_v21, %v3571_v42  ;;  %v3760_v42 = vld [vmem:[#allocation39 + $0x40] sm:$0xff] (!%p4628_p8)  ;;  %v3761_v21 = vld [vmem:[#allocation39 + $0x48] sm:$0xff] (!%p4628_p8) }
 0x982   : > { %v3349_v51 = vmul.f32 %v3320_v8, %v8408_v60  ;;  %v3574_v8 = vld [vmem:[#allocation36 + $0x58] sm:$0xff] (!%p4628_p8) }
 0x984   : > { %v5700_v19 = vpack.c.bf16 %v3350_v16, %v3349_v51  ;;  %v3573_v16 = vld [vmem:[#allocation36 + $0x50] sm:$0xff] (!%p4628_p8) }
 0x985   : > { %v3326_v29 = vpop.xlane.xlu0 %3325  ;;  %v5780_v51 = vpack.c.bf16 (!%p4628_p8), %v3574_v8, %v3573_v16  ;;  %v3762_v16 = vld [vmem:[#allocation39 + $0x50] sm:$0xff] (!%p4628_p8)  ;;  %v3763_v8 = vld [vmem:[#allocation39 + $0x58] sm:$0xff] (!%p4628_p8) }
 0x986   : > { %v3352_v20 = vmul.f32 %v8415_v0, %v3326_v29  ;;  %5701 = vmatprep.subr.bf16.mxu0 %v5700_v19  ;;  %v3324_v23 = vpop.xlane.xlu1 %3323  ;;  %v3576_v29 = vld [vmem:[#allocation36 + $0x68] sm:$0xff] (!%p4628_p8) }
 0x987   : > { %v3351_v34 = vmul.f32 %v3324_v23, %v8420_v3  ;;  %5703 = vmatpush3.bf16.msra.mxu0 %v5700_v19  ;;  %v3575_v19 = vld [vmem:[#allocation36 + $0x60] sm:$0xff] (!%p4628_p8)  ;;  %v3577_v23 = vld [vmem:[#allocation36 + $0x70] sm:$0xff] (!%p4628_p8) }
 0x989   : > { %v5704_v13 = vpack.c.bf16 %v3352_v20, %v3351_v34  ;;  %v5784_v20 = vpack.c.bf16 (!%p4628_p8), %v3576_v29, %v3575_v19  ;;  %v3578_v34 = vld [vmem:[#allocation36 + $0x78] sm:$0xff] (!%p4628_p8)  ;;  %v3764_v19 = vld [vmem:[#allocation39 + $0x60] sm:$0xff] (!%p4628_p8)  ;;  %v3765_v29 = vld [vmem:[#allocation39 + $0x68] sm:$0xff] (!%p4628_p8) }
 0x98b   : > { %5705 = vmatprep.subr.bf16.mxu0 %v5704_v13 }
 0x98c   : > { %5707 = vmatpush3.bf16.msra.mxu0 %v5704_v13  ;;  %v5788_v13 = vpack.c.bf16 (!%p4628_p8), %v3578_v34, %v3577_v23  ;;  %v3766_v23 = vld [vmem:[#allocation39 + $0x70] sm:$0xff] (!%p4628_p8)  ;;  %v3767_v34 = vld [vmem:[#allocation39 + $0x78] sm:$0xff] (!%p4628_p8) }
 0x98f   : > { %v3330_v40 = vpop.xlane.xlu0 %3329 }
 0x990   : > { %v3354_v39 = vmul.f32 %v8426_v10, %v3330_v40  ;;  %v3328_v37 = vpop.xlane.xlu1 %3327  ;;  %v3547_v40 = vld [vmem:[#allocation34] sm:$0xff] (!%p4628_p8) }
 0x991   : > { %v3353_v59 = vmul.f32 %v3328_v37, %v8430_v14 }
 0x993   : > { %v5708_v41 = vpack.c.bf16 %v3354_v39, %v3353_v59  ;;  %v3548_v39 = vld [vmem:[#allocation34 + $0x8] sm:$0xff] (!%p4628_p8) }
 0x994   : > { %v5792_v37 = vpack.c.bf16 (!%p4628_p8), %v3548_v39, %v3547_v40  ;;  %v4629_v40 = vld [vmem:[#allocation37] ss:$0 sm:$0xff] (!%p4628_p8) }
 0x995   : > { %5709 = vmatprep.subr.bf16.mxu0 %v5708_v41  ;;  %v3334_v60 = vpop.xlane.xlu0 %3333 }
 0x996   : > { %5711 = vmatpush3.bf16.msra.mxu0 %v5708_v41  ;;  %v3356_v0 = vmul.f32 %v8436_v22, %v3334_v60  ;;  %v3332_v11 = vpop.xlane.xlu1 %3331  ;;  %v3966_v60 = vld [vmem:[#allocation15] sm:$0xff] (!%p4628_p8) }
 0x997   : > { %v3355_v1 = vmul.f32 %v3332_v11, %v8440_v24 }
 0x999   : > { %v5712_v3 = vpack.c.bf16 %v3356_v0, %v3355_v1 }
 0x99b   : > { %5713 = vmatprep.subr.bf16.mxu0 %v5712_v3 }
 0x99c   : > { %5715 = vmatpush3.bf16.msra.mxu0 %v5712_v3 }
 0x99e   : > { %v3338_v32 = vpop.xlane.xlu0 %3337 }
 0x99f   : > { %v3358_v47 = vmul.f32 %v8446_v36, %v3338_v32  ;;  %v3336_v25 = vpop.xlane.xlu1 %3335 }
 0x9a0   : > { %v3357_v10 = vmul.f32 %v3336_v25, %v8450_v38  ;;  %v3550_v25 = vld [vmem:[#allocation34 + $0x18] sm:$0xff] (!%p4628_p8) }
 0x9a2   : > { %v5716_v53 = vpack.c.bf16 %v3358_v47, %v3357_v10  ;;  %v3549_v47 = vld [vmem:[#allocation34 + $0x10] sm:$0xff] (!%p4628_p8) }
 0x9a4   : > { %5717 = vmatprep.subr.bf16.mxu0 %v5716_v53 }
 0x9a5   : > { %5719 = vmatpush3.bf16.msra.mxu0 %v5716_v53  ;;  %v3342_v14 = vpop.xlane.xlu0 %3341  ;;  %v3967_v53 = vld [vmem:[#allocation15 + $0x8] sm:$0xff] (!%p4628_p8) }
 0x9a6   : > { %v3360_v50 = vmul.f32 %v8456_v52, %v3342_v14  ;;  %v3340_v43 = vpop.xlane.xlu1 %3339  ;;  %v3445_v52 = vld [vmem:[#allocation5 + $0x8] sm:$0xff] }
 0x9a7   : > { %v3359_v22 = vmul.f32 %v3340_v43, %v8460_v55 }
 0x9a9   : > { %v5720_v18 = vpack.c.bf16 %v3360_v50, %v3359_v22  ;;  %v5796_v22 = vpack.c.bf16 (!%p4628_p8), %v3550_v25, %v3549_v47 }
 0x9ab   : > { %5721 = vmatprep.subr.bf16.mxu0 %v5720_v18 }
 0x9ac   : > { %5723 = vmatpush3.bf16.msra.mxu0 %v5720_v18  ;;  %v8827_v18 = vld [vmem:[#allocation2] sm:$0xff] (!%p4628_p8) }
 0x9ad   : > { %v3346_v24 = vpop.xlane.xlu0 %3345 }
 0x9ae   : > { %v3362_v48 = vmul.f32 %v8466_v54, %v3346_v24  ;;  %v3344_v61 = vpop.xlane.xlu1 %3343  ;;  %v3363_v54 = vld [vmem:[#allocation6] sm:$0xff]  ;;  %v3551_v24 = vld [vmem:[#allocation34 + $0x20] sm:$0xff] (!%p4628_p8) }
 0x9af   : > { %v3361_v36 = vmul.f32 %v3344_v61, %v8470_v62 }
 0x9b1   : > { %v5724_v6 = vpack.c.bf16 %v3362_v48, %v3361_v36  ;;  %v3552_v48 = vld [vmem:[#allocation34 + $0x28] sm:$0xff] (!%p4628_p8) }
 0x9b2   : > { %v5800_v36 = vpack.c.bf16 (!%p4628_p8), %v3552_v48, %v3551_v24  ;;  %v3867_v24 = vld [vmem:[#allocation42 + $0x18] sm:$0xff] (!%p4628_p8) }
 0x9b3   : > { %5725 = vmatprep.subr.bf16.mxu0 %v5724_v6 }
 0x9b4   : > { %5727 = vmatpush3.bf16.msra.mxu0 %v5724_v6  ;;  %v3553_v6 = vld [vmem:[#allocation34 + $0x30] sm:$0xff] (!%p4628_p8) }
 0x9b5   : > { %5761 = vmatprep.subr.bf16.mxu0 (!%p4628_p8), %v5760_v45  ;;  %v3538_v0 = vpop.permute.xlu0 (!%p4628_p8), %3537 }
 0x9b7   : > { %5312 = vmatmul.mubr.msk.f32.vlgmr.msra.gmra.mrb[48].mxu0 %vm1542_vm5, %v7421_v17  ;;  %v5768_v17 = vpack.c.bf16 (!%p4628_p8), %v3568_v26, %v3567_v46  ;;  %v3756_v46 = vld [vmem:[#allocation39 + $0x20] sm:$0xff] (!%p4628_p8)  ;;  %v3757_v26 = vld [vmem:[#allocation39 + $0x28] sm:$0xff] (!%p4628_p8) }
 0x9b8   : > { %5763 = vmatpush3.bf16.msra.mxu0 (!%p4628_p8), %v5760_v45  ;;  %v3754_v45 = vld [vmem:[#allocation39 + $0x10] sm:$0xff] (!%p4628_p8) }
 0x9b9   : > { %5765 = vmatprep.subr.bf16.mxu0 (!%p4628_p8), %v5764_v4  ;;  %v3543_v14 = vpop.permute.xlu0 (!%p4628_p8), %3542 }
 0x9bc   : > { %5767 = vmatpush3.bf16.msra.mxu0 (!%p4628_p8), %v5764_v4  ;;  %v3755_v4 = vld [vmem:[#allocation39 + $0x18] sm:$0xff] (!%p4628_p8) }
 0x9bd   : > { %5769 = vmatprep.subr.bf16.mxu0 (!%p4628_p8), %v5768_v17  ;;  %v5828_v63 = vpack.c.bf16 (!%p4628_p8), %v3755_v4, %v3754_v45  ;;  %v3978_v45 = vld [vmem:[#allocation45 + $0x10] sm:$0xff] (!%p4628_p8)  ;;  %v5888_v4 = vpack.c.bf16 (!%p4628_p8), %v3977_v57, %v3976_v56 }
 0x9bf   : > { %5829 = vmatprep.subr.bf16.mxu1 (!%p4628_p8), %v5828_v63 }
 0x9c0   : > { %5771 = vmatpush3.bf16.msra.mxu0 (!%p4628_p8), %v5768_v17  ;;  %5831 = vmatpush3.bf16.msra.mxu1 (!%p4628_p8), %v5828_v63  ;;  %v5832_v17 = vpack.c.bf16 (!%p4628_p8), %v3757_v26, %v3756_v46  ;;  %v3979_v63 = vld [vmem:[#allocation45 + $0x18] sm:$0xff] (!%p4628_p8)  ;;  %v3980_v26 = vld [vmem:[#allocation45 + $0x20] sm:$0xff] (!%p4628_p8) }
 0x9c1   : > { %5773 = vmatprep.subr.bf16.mxu0 (!%p4628_p8), %v5772_v31  ;;  %v5892_v46 = vpack.c.bf16 (!%p4628_p8), %v3979_v63, %v3978_v45 }
 0x9c2   : > { %5833 = vmatprep.subr.bf16.mxu1 (!%p4628_p8), %v5832_v17 }
 0x9c4   : > { %5775 = vmatpush3.bf16.msra.mxu0 (!%p4628_p8), %v5772_v31  ;;  %5835 = vmatpush3.bf16.msra.mxu1 (!%p4628_p8), %v5832_v17  ;;  %v5836_v31 = vpack.c.bf16 (!%p4628_p8), %v3759_v33, %v3758_v27  ;;  %v3981_v17 = vld [vmem:[#allocation45 + $0x28] sm:$0xff] (!%p4628_p8)  ;;  %v3982_v33 = vld [vmem:[#allocation45 + $0x30] sm:$0xff] (!%p4628_p8) }
 0x9c5   : > { %5777 = vmatprep.subr.bf16.mxu0 (!%p4628_p8), %v5776_v28  ;;  %v5896_v27 = vpack.c.bf16 (!%p4628_p8), %v3981_v17, %v3980_v26 }
 0x9c6   : > { %5837 = vmatprep.subr.bf16.mxu1 (!%p4628_p8), %v5836_v31 }
 0x9c8   : > { %5779 = vmatpush3.bf16.msra.mxu0 (!%p4628_p8), %v5776_v28  ;;  %5839 = vmatpush3.bf16.msra.mxu1 (!%p4628_p8), %v5836_v31  ;;  %v5840_v28 = vpack.c.bf16 (!%p4628_p8), %v3761_v21, %v3760_v42  ;;  %v3983_v31 = vld [vmem:[#allocation45 + $0x38] sm:$0xff] (!%p4628_p8)  ;;  %v3984_v21 = vld [vmem:[#allocation45 + $0x40] sm:$0xff] (!%p4628_p8) }
 0x9c9   : > { %5781 = vmatprep.subr.bf16.mxu0 (!%p4628_p8), %v5780_v51  ;;  %v5900_v42 = vpack.c.bf16 (!%p4628_p8), %v3983_v31, %v3982_v33 }
 0x9ca   : > { %5841 = vmatprep.subr.bf16.mxu1 (!%p4628_p8), %v5840_v28 }
 0x9cc   : > { %5783 = vmatpush3.bf16.msra.mxu0 (!%p4628_p8), %v5780_v51  ;;  %5843 = vmatpush3.bf16.msra.mxu1 (!%p4628_p8), %v5840_v28  ;;  %v5844_v51 = vpack.c.bf16 (!%p4628_p8), %v3763_v8, %v3762_v16  ;;  %v3985_v28 = vld [vmem:[#allocation45 + $0x48] sm:$0xff] (!%p4628_p8)  ;;  %v3986_v8 = vld [vmem:[#allocation45 + $0x50] sm:$0xff] (!%p4628_p8) }
 0x9cd   : > { %5785 = vmatprep.subr.bf16.mxu0 (!%p4628_p8), %v5784_v20  ;;  %v5904_v16 = vpack.c.bf16 (!%p4628_p8), %v3985_v28, %v3984_v21 }
 0x9ce   : > { %5845 = vmatprep.subr.bf16.mxu1 (!%p4628_p8), %v5844_v51 }
 0x9d0   : > { %5787 = vmatpush3.bf16.msra.mxu0 (!%p4628_p8), %v5784_v20  ;;  %5847 = vmatpush3.bf16.msra.mxu1 (!%p4628_p8), %v5844_v51  ;;  %v5848_v20 = vpack.c.bf16 (!%p4628_p8), %v3765_v29, %v3764_v19  ;;  %v3987_v51 = vld [vmem:[#allocation45 + $0x58] sm:$0xff] (!%p4628_p8)  ;;  %v3988_v29 = vld [vmem:[#allocation45 + $0x60] sm:$0xff] (!%p4628_p8) }
 0x9d1   : > { %5789 = vmatprep.subr.bf16.mxu0 (!%p4628_p8), %v5788_v13  ;;  %v5908_v19 = vpack.c.bf16 (!%p4628_p8), %v3987_v51, %v3986_v8 }
 0x9d2   : > { %5849 = vmatprep.subr.bf16.mxu1 (!%p4628_p8), %v5848_v20 }
 0x9d4   : > { %5791 = vmatpush3.bf16.msra.mxu0 (!%p4628_p8), %v5788_v13  ;;  %5851 = vmatpush3.bf16.msra.mxu1 (!%p4628_p8), %v5848_v20  ;;  %v5852_v13 = vpack.c.bf16 (!%p4628_p8), %v3767_v34, %v3766_v23  ;;  %v3989_v20 = vld [vmem:[#allocation45 + $0x68] sm:$0xff] (!%p4628_p8)  ;;  %v4632_v34 = vld [vmem:[#allocation40] ss:$0 sm:$0xff] (!%p4628_p8) }
 0x9d5   : > { %5793 = vmatprep.subr.bf16.mxu0 (!%p4628_p8), %v5792_v37  ;;  %v5912_v23 = vpack.c.bf16 (!%p4628_p8), %v3989_v20, %v3988_v29 }
 0x9d6   : > { %5853 = vmatprep.subr.bf16.mxu1 (!%p4628_p8), %v5852_v13 }
 0x9d8   : > { %5855 = vmatpush3.bf16.msra.mxu1 (!%p4628_p8), %v5852_v13 }
 0x9ec   : > { %v5348_v38 = vpop.f32.mrb[32].mxu1 }
 0x9ed   : > { %v3512_v55 = vpop.f32.mrb[33].mxu1  ;;  %v3522_v58 = vadd.f32 %v5348_v38, %v3445_v52  ;;  %v3554_v38 = vld [vmem:[#allocation34 + $0x38] sm:$0xff] (!%p4628_p8) }
 0x9ee   : > { %v3521_v12 = vadd.f32 %v3512_v55, %v3444_v15  ;;  %v5804_v52 = vpack.c.bf16 (!%p4628_p8), %v3554_v38, %v3553_v6  ;;  %v3555_v15 = vld [vmem:[#allocation34 + $0x40] sm:$0xff] (!%p4628_p8)  ;;  %v3556_v55 = vld [vmem:[#allocation34 + $0x48] sm:$0xff] (!%p4628_p8)  ;;  %v3870_v38 = vld [vmem:[#allocation42 + $0x30] sm:$0xff] (!%p4628_p8) }
 0x9ef   : > { %3524 = vst [vmem:[#allocation5 + $0x8] sm:$0xff] %v3522_v58  ;;  %v5808_v58 = vpack.c.bf16 (!%p4628_p8), %v3556_v55, %v3555_v15  ;;  %v3872_v55 = vld [vmem:[#allocation42 + $0x40] sm:$0xff] (!%p4628_p8) }
 0x9f0   : > { %3523 = vst [vmem:[#allocation5] sm:$0xff] %v3521_v12  ;;  %v3557_v12 = vld [vmem:[#allocation34 + $0x50] sm:$0xff] (!%p4628_p8) }
 0x9f6   : > { %v3534_v3 = vld [vmem:[#allocation5 + $0x8] sm:$0xff] (!%p4628_p8) }
 0x9f7   : > { %v3533_v41 = vld [vmem:[#allocation5] sm:$0xff] (!%p4628_p8)  ;;  %v3546_v50 = vmul.f32 (!%p4628_p8), %v3543_v14, %v3534_v3 }
 0x9f8   : > { %v3545_v1 = vmul.f32 (!%p4628_p8), %v3538_v0, %v3533_v41 }
 0x9fa   : > { %5381 = vmatprep.mubr.f32.mxu0 (!%p4628_p8), %v3545_v1 }
 0x9fb   : > { %5382 = vmatmul.mubr.f32.vlgmr.msra.gmra.mrb[0].mxu0 (!%p4628_p8), %v3546_v50  ;;  %v3865_v50 = vld [vmem:[#allocation42 + $0x8] sm:$0xff] (!%p4628_p8) }
 0x9fc   : > { %5795 = vmatpush3.bf16.msra.mxu0 (!%p4628_p8), %v5792_v37  ;;  %5416 = vmatprep.mubr.f32.mxu0 (!%p4628_p8), %v8827_v18 }
 0x9fd   : > { %5797 = vmatprep.subr.bf16.mxu0 (!%p4628_p8), %v5796_v22 }
 0xa00   : > { %5799 = vmatpush3.bf16.msra.mxu0 (!%p4628_p8), %v5796_v22  ;;  %v3866_v22 = vld [vmem:[#allocation42 + $0x10] sm:$0xff] (!%p4628_p8) }
 0xa01   : > { %5801 = vmatprep.subr.bf16.mxu0 (!%p4628_p8), %v5800_v36  ;;  %v5860_v48 = vpack.c.bf16 (!%p4628_p8), %v3867_v24, %v3866_v22 }
 0xa04   : > { %5803 = vmatpush3.bf16.msra.mxu0 (!%p4628_p8), %v5800_v36  ;;  %v3869_v36 = vld [vmem:[#allocation42 + $0x28] sm:$0xff] (!%p4628_p8) }
 0xa05   : > { %5805 = vmatprep.subr.bf16.mxu0 (!%p4628_p8), %v5804_v52 }
 0xa08   : > { %5807 = vmatpush3.bf16.msra.mxu0 (!%p4628_p8), %v5804_v52  ;;  %v3871_v52 = vld [vmem:[#allocation42 + $0x38] sm:$0xff] (!%p4628_p8) }
 0xa09   : > { %5809 = vmatprep.subr.bf16.mxu0 (!%p4628_p8), %v5808_v58  ;;  %v5868_v15 = vpack.c.bf16 (!%p4628_p8), %v3871_v52, %v3870_v38 }
 0xa0c   : > { %5811 = vmatpush3.bf16.msra.mxu0 (!%p4628_p8), %v5808_v58  ;;  %v3873_v58 = vld [vmem:[#allocation42 + $0x48] sm:$0xff] (!%p4628_p8) }
 0xa88   : > { %3528 = sbr.rel (%p4628_p8) target bundleno = 3636 (0xe34), region = 236 }
 0xa8a   : > { %v5313_v30 = vpop.f32.mrb[48].mxu0 }
 0xa8b   : > { %v3441_v44 = vadd.f32 %v5313_v30, %v3364_v9  ;;  %v3431_v62 = vpop.f32.mrb[49].mxu0  ;;  %v3558_v9 = vld [vmem:[#allocation34 + $0x58] sm:$0xff] (!%p4628_p8)  ;;  %v3559_v30 = vld [vmem:[#allocation34 + $0x60] sm:$0xff] (!%p4628_p8) }
 0xa8c   : > { %v3440_v2 = vadd.f32 %v3431_v62, %v3363_v54  ;;  %v5812_v54 = vpack.c.bf16 (!%p4628_p8), %v3558_v9, %v3557_v12  ;;  %v5872_v12 = vpack.c.bf16 (!%p4628_p8), %v3873_v58, %v3872_v55  ;;  %v3874_v9 = vld [vmem:[#allocation42 + $0x50] sm:$0xff] (!%p4628_p8) }
 0xa8d   : > { %3443 = vst.msk [vmem:[#allocation6 + $0x8] sm:$0xff] %vm1839_vm4, %v3441_v44  ;;  %v3560_v44 = vld [vmem:[#allocation34 + $0x68] sm:$0xff] (!%p4628_p8) }
 0xa8e   : > { %3442 = vst.msk [vmem:[#allocation6] sm:$0xff] %vm1839_vm4, %v3440_v2  ;;  %5813 = vmatprep.subr.bf16.mxu0 (!%p4628_p8), %v5812_v54  ;;  %v5816_v62 = vpack.c.bf16 (!%p4628_p8), %v3560_v44, %v3559_v30  ;;  %v3561_v2 = vld [vmem:[#allocation34 + $0x70] sm:$0xff] (!%p4628_p8)  ;;  %v3876_v44 = vld [vmem:[#allocation42 + $0x60] sm:$0xff] (!%p4628_p8) }
 0xa8f   : > { %5815 = vmatpush3.bf16.msra.mxu0 %v5812_v54  ;;  %v5820_v7 = vpack.c.bf16 %v3562_v35, %v3561_v2  ;;  %v3875_v54 = vld [vmem:[#allocation42 + $0x58] sm:$0xff]  ;;  %v3878_v35 = vld [vmem:[#allocation42 + $0x70] sm:$0xff] }
 0xa90   : > { %5817 = vmatprep.subr.bf16.mxu0 %v5816_v62  ;;  %v5876_v30 = vpack.c.bf16 %v3875_v54, %v3874_v9 }
 0xa93   : > { %5819 = vmatpush3.bf16.msra.mxu0 %v5816_v62  ;;  %v3877_v62 = vld [vmem:[#allocation42 + $0x68] sm:$0xff] }
 0xa94   : > { %v3969_v32 = vld [vmem:[#allocation6 + $0x8] sm:$0xff]  ;;  %5821 = vmatprep.subr.bf16.mxu0 %v5820_v7  ;;  %v5880_v2 = vpack.c.bf16 %v3877_v62, %v3876_v44 }
 0xa95   : > { %v3968_v59 = vld [vmem:[#allocation6] sm:$0xff]  ;;  %v3971_v43 = vmul.f32 %v3969_v32, %v3543_v14  ;;  %v3864_v14 = vld [vmem:[#allocation42] sm:$0xff] }
 0xa96   : > { %v3970_v11 = vmul.f32 %v3968_v59, %v3538_v0 }
 0xa97   : > { %v3973_v61 = vadd.f32 %v3971_v43, %v3967_v53  ;;  %5823 = vmatpush3.bf16.msra.mxu0 %v5820_v7  ;;  %v5856_v43 = vpack.c.bf16 %v3865_v50, %v3864_v14  ;;  %v3879_v7 = vld [vmem:[#allocation42 + $0x78] sm:$0xff]  ;;  %v4635_v50 = vld [vmem:[#allocation43] ss:$0 sm:$0xff] }
 0xa98   : > { %v3972_v10 = vadd.f32 %v3970_v11, %v3966_v60  ;;  %v5884_v49 = vpack.c.bf16 %v3879_v7, %v3878_v35  ;;  %5889 = vmatprep.subr.bf16.mxu0 %v5888_v4 }
 0xa99   : > { %3975 = vst.msk [vmem:[#allocation49 + $0x8] sm:$0xff] %vm1839_vm4, %v3973_v61  ;;  %5857 = vmatprep.subr.bf16.mxu1 %v5856_v43  ;;  %v3868_v61 = vld [vmem:[#allocation42 + $0x20] sm:$0xff] }
 0xa9a   : > { %3974 = vst.msk [vmem:[#allocation49] sm:$0xff] %vm1839_vm4, %v3972_v10  ;;  %5417 = vmatmul.mubr.f32.vlgmr.msra.gmra.mrb[0].mxu0 %v8831_v5  ;;  %v5864_v6 = vpack.c.bf16 %v3869_v36, %v3868_v61 }
 0xa9b   : > { %5891 = vmatpush3.bf16.msra.mxu0 %v5888_v4 }
 0xa9c   : > { %5893 = vmatprep.subr.bf16.mxu0 %v5892_v46 }
 0xa9f   : > { %5895 = vmatpush3.bf16.msra.mxu0 %v5892_v46 }
 0xaa0   : > { %5897 = vmatprep.subr.bf16.mxu0 %v5896_v27 }
 0xaa3   : > { %5899 = vmatpush3.bf16.msra.mxu0 %v5896_v27 }
 0xaa4   : > { %5901 = vmatprep.subr.bf16.mxu0 %v5900_v42 }
 0xaa7   : > { %5903 = vmatpush3.bf16.msra.mxu0 %v5900_v42 }
 0xaa8   : > { %5905 = vmatprep.subr.bf16.mxu0 %v5904_v16 }
 0xaab   : > { %5907 = vmatpush3.bf16.msra.mxu0 %v5904_v16 }
 0xaac   : > { %5909 = vmatprep.subr.bf16.mxu0 %v5908_v19 }
 0xaaf   : > { %5911 = vmatpush3.bf16.msra.mxu0 %v5908_v19 }
 0xab0   : > { %5913 = vmatprep.subr.bf16.mxu0 %v5912_v23 }
 0xab3   : > { %5915 = vmatpush3.bf16.msra.mxu0 %v5912_v23 }
 0xb6d   : > { %v5418_v39 = vpop.f32.mrb[0].mxu0 }
 0xb6e   : > { %v3737_v37 = vadd.f32 %v5418_v39, %v4629_v40  ;;  %v3720_v59 = vpop.f32.mrb[1].mxu0 }
 0xb6f   : > { %v3736_v41 = vadd.f32 %v4629_v40, %v3720_v59 }
 0xb70   : > { %v4631_v60 = vmul.f32 -1.442695, %v3737_v37 }
 0xb71   : > { %v4630_v0 = vmul.f32 -1.442695, %v3736_v41 }
 0xb72   : > { %6496 = vpow2.f32 %v4631_v60 }
 0xb73   : > { %6498 = vpow2.f32 %v4630_v0 }
 0xb7c   : > { %v6497_v11 = vpop.eup %6496 }
 0xb7d   : > { %v6499_v1 = vpop.eup %6498  ;;  %v3745_v3 = vadd.f32 1.0, %v6497_v11 }
 0xb7e   : > { %v3744_v32 = vadd.f32 1.0, %v6499_v1 }
 0xb7f   : > { %6500 = vrcp.f32 %v3745_v3 }
 0xb80   : > { %6502 = vrcp.f32 %v3744_v32 }
 0xb89   : > { %v6501_v47 = vpop.eup %6500 }
 0xb8a   : > { %v6503_v25 = vpop.eup %6502  ;;  %v3751_v53 = vmul.f32 %v6501_v47, %v3737_v37 }
 0xb8b   : > { %v3750_v10 = vmul.f32 %v6503_v25, %v3736_v41 }
 0xb8d   : > { %5451 = vmatprep.mubr.f32.mxu1 %v3750_v10  ;;  %v3990_v10 = vld [vmem:[#allocation45 + $0x70] sm:$0xff] }
 0xb8e   : > { %5452 = vmatmul.mubr.f32.vlgmr.msra.gmra.mrb[0].mxu1 %v3751_v53  ;;  %v3991_v53 = vld [vmem:[#allocation45 + $0x78] sm:$0xff] }
 0xb8f   : > { %5859 = vmatpush3.bf16.msra.mxu1 %v5856_v43  ;;  %v5916_v14 = vpack.c.bf16 %v3991_v53, %v3990_v10 }
 0xb90   : > { %5861 = vmatprep.subr.bf16.mxu1 %v5860_v48 }
 0xb91   : > { %5917 = vmatprep.subr.bf16.mxu0 %v5916_v14 }
 0xb92   : > { %5919 = vmatpush3.bf16.msra.mxu0 %v5916_v14 }
 0xb93   : > { %5863 = vmatpush3.bf16.msra.mxu1 %v5860_v48 }
 0xb94   : > { %5865 = vmatprep.subr.bf16.mxu1 %v5864_v6 }
 0xb97   : > { %5867 = vmatpush3.bf16.msra.mxu1 %v5864_v6  ;;  %v4636_v6 = vld [vmem:[#allocation46] ss:$0 sm:$0xff] }
 0xb98   : > { %5869 = vmatprep.subr.bf16.mxu1 %v5868_v15 }
 0xb9b   : > { %5871 = vmatpush3.bf16.msra.mxu1 %v5868_v15 }
 0xb9c   : > { %5873 = vmatprep.subr.bf16.mxu1 %v5872_v12 }
 0xb9f   : > { %5875 = vmatpush3.bf16.msra.mxu1 %v5872_v12 }
 0xba0   : > { %5877 = vmatprep.subr.bf16.mxu1 %v5876_v30 }
 0xba3   : > { %5879 = vmatpush3.bf16.msra.mxu1 %v5876_v30 }
 0xba4   : > { %5881 = vmatprep.subr.bf16.mxu1 %v5880_v2 }
 0xba7   : > { %5883 = vmatpush3.bf16.msra.mxu1 %v5880_v2 }
 0xba8   : > { %5885 = vmatprep.subr.bf16.mxu1 %v5884_v49 }
 0xbab   : > { %5887 = vmatpush3.bf16.msra.mxu1 %v5884_v49 }
 0xc61   : > { %v5453_v13 = vpop.f32.mrb[0].mxu1 }
 0xc62   : > { %v3847_v40 = vadd.f32 %v5453_v13, %v4632_v34  ;;  %v3841_v39 = vpop.f32.mrb[1].mxu1 }
 0xc63   : > { %v3842_v37 = vadd.f32 %v4632_v34, %v3841_v39 }
 0xc64   : > { %v4634_v59 = vmul.f32 -1.442695, %v3847_v40 }
 0xc65   : > { %v4633_v41 = vmul.f32 -1.442695, %v3842_v37 }
 0xc66   : > { %6504 = vpow2.f32 %v4634_v59 }
 0xc67   : > { %6506 = vpow2.f32 %v4633_v41 }
 0xc70   : > { %v6505_v60 = vpop.eup %6504 }
 0xc71   : > { %v6507_v0 = vpop.eup %6506  ;;  %v3857_v11 = vadd.f32 1.0, %v6505_v60 }
 0xc72   : > { %v3856_v1 = vadd.f32 1.0, %v6507_v0 }
 0xc73   : > { %6508 = vrcp.f32 %v3857_v11 }
 0xc74   : > { %6510 = vrcp.f32 %v3856_v1 }
 0xc7d   : > { %v6509_v3 = vpop.eup %6508 }
 0xc7e   : > { %v6511_v32 = vpop.eup %6510  ;;  %v3863_v25 = vmul.f32 %v6509_v3, %v3847_v40 }
 0xc7f   : > { %v3862_v47 = vmul.f32 %v6511_v32, %v3842_v37 }
 0xc81   : > { %5486 = vmatprep.mubr.f32.mxu1 %v3862_v47 }
 0xc82   : > { %5487 = vmatmul.mubr.f32.vlgmr.msra.gmra.mrb[2].mxu1 %v3863_v25 }
 0xd55   : > { %v5488_v43 = vpop.f32.mrb[2].mxu1 }
 0xd56   : > { %v3959_v22 = vadd.f32 %v5488_v43, %v4635_v50  ;;  %v3953_v24 = vpop.f32.mrb[3].mxu1 }
 0xd57   : > { %v3954_v48 = vadd.f32 %v4635_v50, %v3953_v24 }
 0xd58   : > { %v3963_v61 = vadd.f32 %v3959_v22, %v8831_v5 }
 0xd59   : > { %v3962_v36 = vadd.f32 %v3954_v48, %v8827_v18 }
 0xd5a   : > { %3965 = vst [vmem:[#allocation48 + $0x8] sm:$0xff] %v3963_v61 }
 0xd5b   : > { %3964 = vst [vmem:[#allocation48] sm:$0xff] %v3962_v36  ;;  %5521 = vmatprep.mubr.f32.mxu0 %v3962_v36 }
 0xd5c   : > { %5522 = vmatmul.mubr.f32.vlgmr.msra.gmra.mrb[2].mxu0 %v3963_v61 }
 0xe2f   : > { %v5523_v38 = vpop.f32.mrb[2].mxu0 }
 0xe30   : > { %v4071_v52 = vadd.f32 %v5523_v38, %v4636_v6  ;;  %v4065_v15 = vpop.f32.mrb[3].mxu0 }
 0xe31   : > { %v4066_v55 = vadd.f32 %v4636_v6, %v4065_v15 }
 0xe32   : > { %4075 = vst [vmem:[#allocation51 + $0x8] sm:$0xff] %v4071_v52 }
 0xe33   : > { %4074 = vst [vmem:[#allocation51] sm:$0xff] %v4066_v55 }
 0xe34 PF: > { %s9052_s13 = sld [smem:[#allocation69_spill]]  ;;  %s7423_s25 = smov [#allocation49]  }
 0xe35   : > { %s4095_s6 = sshll.u32 %s7423_s25, 4  ;;  %s7424_s3 = smov [#allocation48]   ;;  %s4096_s6 = int_to_ptr.vmem [resolvable:$true] %s4095_s6 }
 0xe36   : > { %s4082_s1 = sshll.u32 %s7424_s3, 4  ;;  %s7240_s30 = scalar_lea.vmem %s4096_s6, 256  ;;  %s4083_s1 = int_to_ptr.vmem [resolvable:$true] %s4082_s1 }
 0xe37   : > { %p7241_p0 = scmp.ne.s32.totalorder %s4096_s6, %s7240_s30  ;;  %p7247_p5 = scmp.lt.s32.totalorder %s4096_s6, %s4096_s6 }
 0xe38   : > { %p7248_p7 = scmp.lt.s32.totalorder %s7240_s30, %s7240_s30 }
 0xe3a   : > { %p6185_p13 = scmp.eq.s32.totalorder %s9052_s13, 1  ;;  %p7249_p9 = por %p7248_p7, %p7247_p5 }
 0xe3c   : > { %p7242_p1 = pnand %p7241_p0, %p6185_p13 }
 0xe3e   : > { %p7243_p6 = pneg %p7242_p1 }
 0xe40   : > { %p7250_p2 = pnand %p7249_p9, %p7243_p6 }
 0xe42   : > { %7253 = shalt.err (!%p7250_p2)
}
 0xe43   : > { %s9053_s10 = sld [smem:[#allocation87_spill]] }
 0xe49   : > { %s7254_s8 = scalar_lea.hbm %s9053_s10, 256 }
 0xe4a   : > { %p7255_p10 = scmp.ne.s32.totalorder %s9053_s10, %s7254_s8  ;;  %p7260_p3 = scmp.lt.u32.totalorder %s7254_s8, %s9053_s10 }
 0xe4c   : > { %p7256_p11 = pnand %p7255_p10, %p6185_p13 }
 0xe4e   : > { %p7257_p12 = pneg %p7256_p11 }
 0xe50   : > { %p7262_p4 = pnand %p7260_p3, %p7257_p12 }
 0xe52   : > { %7265 = shalt.err (!%p7262_p4)
}
 0xe53   : > { %s7425_s29 = smov 128   ;;  %s7426_s12 = smov 8  }
 0xe54   : > { %6045 = dma.vmem_to_hbm [thread:$0]  (%p6185_p13), %s4096_s6, 256, %s9053_s10, [#allocation50], %s7425_s29, %s7425_s29, %s7426_s12  }
 0xe55   : > { %s7266_s30 = scalar_lea.vmem %s4083_s1, 256  ;;  %p7273_p6 = scmp.lt.s32.totalorder %s4083_s1, %s4083_s1 }
 0xe56   : > { %p7267_p8 = scmp.ne.s32.totalorder %s4083_s1, %s7266_s30  ;;  %p7274_p5 = scmp.lt.s32.totalorder %s7266_s30, %s7266_s30 }
 0xe58   : > { %p7268_p0 = pnand %p7267_p8, %p6185_p13  ;;  %p7275_p7 = por %p7274_p5, %p7273_p6 }
 0xe5a   : > { %p7269_p1 = pneg %p7268_p0 }
 0xe5c   : > { %p7276_p9 = pnand %p7275_p7, %p7269_p1 }
 0xe5e   : > { %7279 = shalt.err (!%p7276_p9)
}
 0xe5f   : > { %s9054_s8 = sld [smem:[#allocation86_spill]] }
 0xe65   : > { %s9055_s28 = smov %s9054_s8  ;;  %s7280_s0 = scalar_lea.hbm %s9054_s8, 256 }
 0xe66   : > { %p7281_p2 = scmp.ne.s32.totalorder %s9055_s28, %s7280_s0  ;;  %p7286_p12 = scmp.lt.u32.totalorder %s7280_s0, %s9055_s28 }
 0xe68   : > { %p7282_p10 = pnand %p7281_p2, %p6185_p13 }
 0xe6a   : > { %p7283_p11 = pneg %p7282_p10 }
 0xe6c   : > { %p7288_p3 = pnand %p7286_p12, %p7283_p11 }
 0xe6e   : > { %7291 = shalt.err (!%p7288_p3)
}
 0xe6f   : > { %6043 = dma.vmem_to_hbm [thread:$0]  (%p6185_p13), %s4083_s1, 256, %s9055_s28, [#allocation9], %s7425_s29, %s7425_s29, %s7426_s12  }
 0xe70   : > { %s7427_s7 = smov [#allocation51]  }
 0xe71   : > { %s4108_s2 = sshll.u32 %s7427_s7, 4  ;;  %s4109_s2 = int_to_ptr.vmem [resolvable:$true] %s4108_s2 }
 0xe72   : > { %s7292_s8 = scalar_lea.vmem %s4109_s2, 256  ;;  %p7299_p1 = scmp.lt.s32.totalorder %s4109_s2, %s4109_s2 }
 0xe73   : > { %p7293_p4 = scmp.ne.s32.totalorder %s4109_s2, %s7292_s8  ;;  %p7300_p6 = scmp.lt.s32.totalorder %s7292_s8, %s7292_s8 }
 0xe75   : > { %p7294_p8 = pnand %p7293_p4, %p6185_p13  ;;  %p7301_p5 = por %p7300_p6, %p7299_p1 }
 0xe77   : > { %p7295_p0 = pneg %p7294_p8 }
 0xe79   : > { %p7302_p7 = pnand %p7301_p5, %p7295_p0 }
 0xe7b   : > { %7305 = shalt.err (!%p7302_p7)
}
 0xe7c   : > { %s9056_s9 = sld [smem:[#allocation88_spill]] }
 0xe82   : > { %s7306_s6 = scalar_lea.hbm %s9056_s9, 256 }
 0xe83   : > { %p7307_p9 = scmp.ne.s32.totalorder %s9056_s9, %s7306_s6  ;;  %p7312_p11 = scmp.lt.u32.totalorder %s7306_s6, %s9056_s9 }
 0xe85   : > { %p7308_p2 = pnand %p7307_p9, %p6185_p13 }
 0xe87   : > { %p7309_p10 = pneg %p7308_p2 }
 0xe89   : > { %p7314_p12 = pnand %p7312_p11, %p7309_p10 }
 0xe8b   : > { %7317 = shalt.err (!%p7314_p12)
}
 0xe8c   : > { %6047 = dma.vmem_to_hbm [thread:$0]  (%p6185_p13), %s4109_s2, 256, %s9056_s9, [#allocation50], %s7425_s29, %s7425_s29, %s7426_s12  }
 0xe8d   : > { %7379 = dma.done.wait (%p6185_p13), [#allocation9], 256  }
 0xe8e   : > { %7381 = vsyncadd (%p6185_p13), [#allocation9], 4294967040 }
 0xe8f   : > { %7383 = dma.done.wait (%p6185_p13), [#allocation50], 512  }
 0xe90   : > { %7385 = vsyncadd (%p6185_p13), [#allocation50], 4294966784 }
 0xe91 PF: > { %s9057_s0 = sld [smem:[#allocation68_spill]] }
 0xe97   : > { %s55_s8 = sadd.s32 1, %s9057_s0  }
 0xe98   : > { %p52_p3 = scmp.ge.s32.totalorder %s55_s8, 4  }
 0xe9a   :  { %54 = sbr.rel (!%p52_p3) target bundleno = 35 (0x23), region = 280 }
 0xea1   :  { %4132 = vsyncpa [#allocation8], 1 }
 0xea2   :  { %4134 = vsyncpa [#allocation8 + $0x1], 1 }
 0xea3   :  { %4135 = vsyncpa [#allocation11], 1 }
 0xea4   :  { %4136 = vsyncpa [#allocation14], 1 }
 0xea5   :  { %4137 = vsyncpa [#allocation17], 1 }
 0xea6   :  { %4138 = vsyncpa [#allocation20], 1 }
 0xea7   :  { %4139 = vsyncpa [#allocation23], 1 }
 0xea8   :  { %4140 = vsyncpa [#allocation26], 1 }
 0xea9   :  { %4141 = vsyncpa [#allocation29], 1 }
 0xeaa   :  { %4142 = vsyncpa [#allocation32], 1 }
 0xeab   :  { %4143 = vsyncpa [#allocation35], 1 }
 0xeac   :  { %4144 = vsyncpa [#allocation38], 1 }
 0xead   :  { %4145 = vsyncpa [#allocation41], 1 }
 0xeae   :  { %4146 = vsyncpa [#allocation44], 1 }
 0xeaf   :  { %4147 = vsyncpa [#allocation47], 1 }
 0xeb0   :  { %4148 = vsyncpa [#allocation9], 1 }
 0xeb1   :  { %4150 = vsyncpa [#allocation9 + $0x1], 1 }
 0xeb2   :  { %4151 = vsyncpa [#allocation50], 1 }

</bundles_post_ra>
